<compile_context>
chip_gen: v7x
topology: tpu7x:2x2x1
jax: 0.10.0
libtpu: 0.0.40
codegen_flags: <defaults>
</compile_context>

<pallas_src>
import functools

import jax
import jax.numpy as jnp
from jax import lax
from jax.experimental import pallas as pl
from jax.experimental.pallas import tpu as pltpu

IN_FEATURES = 196608
OUT_FEATURES = 10


def linear_kernel(x_ref, w_ref, o_ref):
    """One K-tile of out = x @ W.T.

    Grid: (nk,), axis 0 is the K reduction ("arbitrary"). The output block
    index is constant along it, so o_ref stays VMEM-resident and acts as the
    f32 accumulator (init at k==0, written back to HBM once at the end).

    x_ref: (B, tk) f32   -> cast to bf16 on the VPU (hidden under DMA)
    w_ref: (N, tk) bf16  -> lane-dense PyTorch (out, in) layout
    o_ref: (B, N)  f32
    """
    k = pl.program_id(0)

    @pl.when(k == 0)
    def _():
        o_ref[...] = jnp.zeros_like(o_ref)

    # Contract the shared K (lane) dim of both operands; f32 MXU accumulation.
    o_ref[...] += lax.dot_general(
        x_ref[...].astype(jnp.bfloat16),
        w_ref[...],
        dimension_numbers=(((1,), (1,)), ((), ())),
        preferred_element_type=jnp.float32,
    )


@functools.partial(jax.jit, static_argnames=("tk",))
def linear_pallas(x, w_bf16, b, *, tk=65536):
    """x: (B, K) f32, w_bf16: (N, K) bf16 (PyTorch layout), b: (1, N) f32 -> (B, N) f32."""
    B, K = x.shape
    N, Kw = w_bf16.shape
    assert Kw == K
    assert K % tk == 0, "K must be divisible by the K-tile size"
    nk = K // tk

    out = pl.pallas_call(
        linear_kernel,
        out_shape=jax.ShapeDtypeStruct((B, N), jnp.float32),
        grid_spec=pltpu.PrefetchScalarGridSpec(
            num_scalar_prefetch=0,
            grid=(nk,),
            in_specs=[
                # x tile: (B, tk) sliding along K.
                pl.BlockSpec((B, tk), lambda k: (0, k)),
                # W tile: (N, tk) lane-dense bf16, sliding along K.
                pl.BlockSpec((N, tk), lambda k: (0, k)),
            ],
            # Single resident (B, N) accumulator block across the whole grid.
            out_specs=pl.BlockSpec((B, N), lambda k: (0, 0)),
        ),
        compiler_params=pltpu.CompilerParams(
            dimension_semantics=("arbitrary",),
        ),
    )(x, w_bf16)

    # Bias applied once in the wrapper (80 bytes of work, fuses trivially).
    return out + b


def init_params(key):
    """Deterministic init matching torch.nn.Linear's default:
    U(-1/sqrt(in_features), 1/sqrt(in_features)) for weight and bias.
    Weight kept in PyTorch's (out_features, in_features) layout."""
    kw, kb = jax.random.split(key)
    bound = 1.0 / jnp.sqrt(jnp.float32(IN_FEATURES))
    w = jax.random.uniform(
        kw, (OUT_FEATURES, IN_FEATURES), jnp.float32, -bound, bound
    )
    b = jax.random.uniform(kb, (1, OUT_FEATURES), jnp.float32, -bound, bound)
    return w, b


if __name__ == "__main__":
    key = jax.random.PRNGKey(0)
    k_x, k_p = jax.random.split(key)

    # Small batch; the feature dim is fixed at 196608 by the module definition.
    B = 2
    x = jax.random.normal(k_x, (B, IN_FEATURES), jnp.float32)
    w, b = init_params(k_p)

    # Weights live in HBM as bf16 (f32 accumulation on the MXU).
    w_bf16 = w.astype(jnp.bfloat16)

    out = linear_pallas(x, w_bf16, b)
    out = jax.block_until_ready(out)
    assert out.shape == (B, OUT_FEATURES), out.shape

    # Tight check against a JAX reference using the same bf16 operands
    # (f32 accumulation) -- only summation-order differences remain.
    ref_bf16 = (
        jnp.dot(
            x.astype(jnp.bfloat16), w_bf16.T, preferred_element_type=jnp.float32
        )
        + b
    )
    assert jnp.allclose(out, ref_bf16, atol=2e-3, rtol=2e-3), float(
        jnp.max(jnp.abs(out - ref_bf16))
    )

    # Sanity check vs. the exact f32 nn.Linear semantics (bf16 quantization noise).
    ref_f32 = jnp.einsum("bk,nk->bn", x, w) + b
    assert jnp.allclose(out, ref_f32, atol=5e-2, rtol=5e-2), float(
        jnp.max(jnp.abs(out - ref_f32))
    )

    print("KERNEL_OK")
</pallas_src>

<mosaic_0001>
module attributes {stable_mosaic.version = 11 : i64} {
  func.func @linear_kernel(%arg0: i32, %arg1: memref<2x65536xf32, #tpu.memory_space<vmem>>, %arg2: memref<10x65536xbf16, #tpu.memory_space<vmem>>, %arg3: memref<2x10xf32, #tpu.memory_space<vmem>>) attributes {dimension_semantics = [#tpu.dimension_semantics<arbitrary>], iteration_bounds = array<i64: 3>, scalar_prefetch = 0 : i64, scratch_operands = 0 : i64, tpu.core_type = #tpu.core_type<tc>, window_params = [{transform_indices = @transform_0, window_bounds = array<i64: 2, 65536>}, {transform_indices = @transform_1, window_bounds = array<i64: 10, 65536>}, {pipeline_mode = #tpu.pipeline_mode<synchronous>, transform_indices = @transform_2, window_bounds = array<i64: 2, 10>}]} {
    %c0_i32 = arith.constant 0 : i32
    %0 = arith.cmpi eq, %arg0, %c0_i32 : i32
    %1 = arith.extui %0 : i1 to i32
    %c0_i32_0 = arith.constant 0 : i32
    %2 = arith.cmpi ne, %1, %c0_i32_0 : i32
    scf.if %2 {
      %cst_8 = arith.constant 0.000000e+00 : f32
      %10 = vector.broadcast %cst_8 : f32 to vector<2x10xf32>
      %c0_9 = arith.constant 0 : index
      %c0_10 = arith.constant 0 : index
      %11 = vector.load %arg3[%c0_9, %c0_10] : memref<2x10xf32, #tpu.memory_space<vmem>>, vector<2x10xf32>
      tpu.vector_store %arg3[%c0_9, %c0_10], %10 {strides = array<i32>} : memref<2x10xf32, #tpu.memory_space<vmem>>, vector<2x10xf32>,
    } else {
    }
    %c0 = arith.constant 0 : index
    %c0_1 = arith.constant 0 : index
    %3 = vector.load %arg3[%c0, %c0_1] : memref<2x10xf32, #tpu.memory_space<vmem>>, vector<2x10xf32>
    %c0_2 = arith.constant 0 : index
    %c0_3 = arith.constant 0 : index
    %4 = vector.load %arg1[%c0_2, %c0_3] : memref<2x65536xf32, #tpu.memory_space<vmem>>, vector<2x65536xf32>
    %5 = arith.truncf %4 : vector<2x65536xf32> to vector<2x65536xbf16>
    %c0_4 = arith.constant 0 : index
    %c0_5 = arith.constant 0 : index
    %6 = vector.load %arg2[%c0_4, %c0_5] : memref<10x65536xbf16, #tpu.memory_space<vmem>>, vector<10x65536xbf16>
    %cst = arith.constant dense<0.000000e+00> : vector<2x10xf32>
    %7 = tpu.matmul %5, %6, %cst {dimension_numbers = #tpu.dot_dimension_numbers<[1], [1], [0], [0], [0, 0, 1, 0], [], []>} : vector<2x65536xbf16>, vector<10x65536xbf16>, vector<2x10xf32> -> vector<2x10xf32>
    %8 = arith.addf %3, %7 : vector<2x10xf32>
    %c0_6 = arith.constant 0 : index
    %c0_7 = arith.constant 0 : index
    %9 = vector.load %arg3[%c0_6, %c0_7] : memref<2x10xf32, #tpu.memory_space<vmem>>, vector<2x10xf32>
    tpu.vector_store %arg3[%c0_6, %c0_7], %8 {strides = array<i32>} : memref<2x10xf32, #tpu.memory_space<vmem>>, vector<2x10xf32>,
    return
  }
  func.func @transform_0(%arg0: i32) -> (i32, i32) {
    %c0_i32 = arith.constant 0 : i32
    %c0_i32_0 = arith.constant 0 : i32
    return %c0_i32, %arg0 : i32, i32
  }
  func.func @transform_1(%arg0: i32) -> (i32, i32) {
    %c0_i32 = arith.constant 0 : i32
    %c0_i32_0 = arith.constant 0 : i32
    return %c0_i32, %arg0 : i32, i32
  }
  func.func @transform_2(%arg0: i32) -> (i32, i32) {
    %c0_i32 = arith.constant 0 : i32
    %c0_i32_0 = arith.constant 0 : i32
    %c0_i32_1 = arith.constant 0 : i32
    return %c0_i32, %c0_i32_0 : i32, i32
  }
}

</mosaic_0001>

<bundles_post_ra>
// kernel: linear_pallas.1
= control target key start
LH: loop header
LB: loop body
LE: loop exit
PB: predicated region body
PF: predicated region fallthrough
CT: control target
= control target key end

     0   :  { %7 = vsyncpa [#allocation3], 0  ;;  %s20119_s0 = inlined_call_operand.hbm [shape: f32[2,196608], index: 0, kind: input, shape index: {}]   ;;  %s20120_s1 = inlined_call_operand.hbm [shape: bf16[10,196608], index: 1, kind: input, shape index: {}]   ;;  %s20121_s2 = inlined_call_operand.vmem [shape: f32[2,10], index: 2, kind: output, shape index: {}]  }
   0x1   :  { %9 = vsyncpa [#allocation3 + $0x1], 0 }
   0x2   :  { %10 = vsyncpa [#allocation5], 0 }
   0x3   :  { %12 = vsyncpa [#allocation5 + $0x1], 0  ;;  %s17858_s9 = smov 0   ;;  %s17860_s10 = smov 0  }
   0x4   :  { %s17862_s11 = smov 0   ;;  %s17864_s12 = smov 0  }
   0x5 LB: > { %s17030_s13 = sadd.s32 4294967295, %s17834_s12   ;;  %s17878_s14 = sadd.s32 1, %s17834_s12   ;;  %s17834_s12 = sphi %s17864_s12, %s20130_s12   ;;  %s17830_s11 = sphi %s17862_s11, %s20129_s11   ;;  %s17826_s10 = sphi %s17860_s10, %s20128_s10   ;;  %s17822_s9 = sphi %s17858_s9, %s20127_s9  }
   0x6   : > { %s22_s15 = ssub.s32 %s17834_s12, %s17878_s14  ;;  %s25_s16 = sadd.s32 1, %s17830_s11 }
   0x7   : > { %p23_p0 = scmp.eq.s32.totalorder %s22_s15, 0  ;;  %p32_p1 = scmp.ne.s32.totalorder %s17830_s11, %s17826_s10 }
   0x8   : > { %p33_p2 = scmp.eq.s32.totalorder %s17834_s12, 0  ;;  %p38_p3 = scmp.ne.s32.totalorder %s17826_s10, %s17822_s9 }
   0x9   : > { %s17888_s17 = scalar_select %p23_p0, %s17830_s11, %s25_s16  }
   0xa   : > { %p34_p4 = por %p33_p2, %p32_p1  ;;  %p39_p5 = scmp.eq.s32.totalorder %s17030_s13, 0 }
   0xb   : > { %p17570_p6 = scmp.lt.s32.totalorder %s17834_s12, 3  ;;  %s17898_s19 = sand.u32 1, %s17830_s11  }
   0xc   : > { %p17893_p7 = por %p39_p5, %p38_p3  ;;  %s17033_s20 = sshll.u32 %s17898_s19, 10 }
   0xd   : > { %s17557_s21 = sshll.u32 %s17834_s12, 14  ;;  %s113_s25 = scalar_lea.vmem [#allocation2], %s17033_s20 }
   0xe   : > { %s20123_s18 = scalar_select %p17893_p7, 1, 0 }
   0xf   : > { %s17905_s24 = scalar_lea.hbm %s20119_s0, %s17557_s21  ;;  %s121_s26 = sshll.u32 %s113_s25, 4  ;;  %s17907_s26 = int_to_ptr.vmem [resolvable:$true] %s121_s26 }
  0x10   : > { %p17909_p8 = pnand %p17570_p6, %p34_p4  ;;  %s17036_s28 = sshll.u32 %s17898_s19, 12 }
  0x11   : > { %s110_s29 = scalar_lea.sflag [#allocation3], %s17898_s19  ;;  %s17736_s30 = scalar_lea.hbm %s17905_s24, 16384 }
  0x12   : > { %p17737_p9 = scmp.ne.s32.totalorder %s17905_s24, %s17736_s30  ;;  %p17738_p10 = pneg %p17909_p8 }
  0x13   : > { %s17741_s5 = scalar_lea.hbm %s20119_s0, 49152  ;;  %p17742_p13 = scmp.lt.u32.totalorder %s17905_s24, %s20119_s0 }
  0x14   : > { %p17739_p11 = pnand %p17738_p10, %p17737_p9  ;;  %p17743_p0 = scmp.lt.u32.totalorder %s17741_s5, %s17736_s30 }
  0x15   : > { %p17745_p2 = scmp.lt.u32.totalorder %s17736_s30, %s17905_s24 }
  0x16   : > { %p17740_p12 = pneg %p17739_p11  ;;  %p17744_p1 = por %p17743_p0, %p17742_p13 }
  0x18   : > { %p17746_p3 = por %p17745_p2, %p17744_p1 }
  0x1a   : > { %p17747_p4 = pnand %p17746_p3, %p17740_p12 }
  0x1c   : > { %17750 = shalt.err (!%p17747_p4)
}
  0x1d   : > { %s17751_s8 = scalar_lea.vmem %s17907_s26, 16384  ;;  %s17836_s9 = smov [#allocation2]  }
  0x1e   : > { %p17752_p5 = scmp.ne.s32.totalorder %s17907_s26, %s17751_s8  ;;  %s17756_s15 = sshll.u32 %s17836_s9, 4  ;;  %s17757_s15 = int_to_ptr.vmem [resolvable:$false] %s17756_s15 }
  0x1f   : > { %s17758_s16 = scalar_lea.vmem %s17757_s15, 32768  ;;  %p17759_p11 = scmp.lt.s32.totalorder %s17907_s26, %s17757_s15 }
  0x20   : > { %p17754_p6 = pnand %p17752_p5, %p17738_p10  ;;  %p17760_p13 = scmp.lt.s32.totalorder %s17758_s16, %s17751_s8 }
  0x22   : > { %p17755_p9 = pneg %p17754_p6  ;;  %p17761_p0 = por %p17760_p13, %p17759_p11 }
  0x24   : > { %p17762_p1 = pnand %p17761_p0, %p17755_p9 }
  0x26   : > { %17765 = shalt.err (!%p17762_p1)
}
  0x27   : > { %17566 = dma.hbm_to_vmem [thread:$0]  (!%p17909_p8), %s17905_s24, 16384, %s17907_s26, %s110_s29  }
  0x28   : > { %p17039_p12 = scmp.ge.s32.totalorder %s17834_s12, 1  ;;  %p147_p2 = scmp.lt.s32.totalorder %s17834_s12, 4 }
  0x29   : > { %s17558_s20 = sshll.u32 %s17834_s12, 15  ;;  %s132_s21 = scalar_lea.vmem [#allocation4], %s17036_s28 }
  0x2a   : > { %s139_s22 = sshll.u32 %s132_s21, 4  ;;  %p17945_p3 = pnand %p17039_p12, %p147_p2  ;;  %s17954_s22 = int_to_ptr.vmem [resolvable:$true] %s139_s22 }
  0x2b   : > { %s17952_s3 = scalar_lea.hbm %s20120_s1, %s17558_s20  ;;  %s129_s24 = scalar_lea.sflag [#allocation5], %s17898_s19 }
  0x2c   : > { %s17766_s26 = scalar_lea.hbm %s17952_s3, 65536  ;;  %s17771_s4 = scalar_lea.hbm %s20120_s1, 196608 }
  0x2d   : > { %p17767_p4 = scmp.ne.s32.totalorder %s17952_s3, %s17766_s26  ;;  %p17772_p9 = scmp.lt.u32.totalorder %s17952_s3, %s20120_s1 }
  0x2e   : > { %p17773_p11 = scmp.lt.u32.totalorder %s17771_s4, %s17766_s26  ;;  %p17775_p0 = scmp.lt.u32.totalorder %s17766_s26, %s17952_s3 }
  0x2f   : > { %p17769_p5 = pnand %p17767_p4, %p17738_p10 }
  0x30   : > { %p17774_p13 = por %p17773_p11, %p17772_p9 }
  0x31   : > { %p17770_p6 = pneg %p17769_p5 }
  0x32   : > { %p17776_p1 = por %p17775_p0, %p17774_p13 }
  0x34   : > { %p17777_p12 = pnand %p17776_p1, %p17770_p6 }
  0x36   : > { %17780 = shalt.err (!%p17777_p12)
}
  0x37   : > { %s17781_s7 = scalar_lea.vmem %s17954_s22, 65536  ;;  %s17837_s8 = smov [#allocation4]  }
  0x38   : > { %p17782_p2 = scmp.ne.s32.totalorder %s17954_s22, %s17781_s7  ;;  %s17786_s9 = sshll.u32 %s17837_s8, 4  ;;  %s17787_s9 = int_to_ptr.vmem [resolvable:$false] %s17786_s9 }
  0x39   : > { %s17788_s15 = scalar_lea.vmem %s17787_s9, 131072  ;;  %p17789_p7 = scmp.lt.s32.totalorder %s17954_s22, %s17787_s9 }
  0x3a   : > { %p17784_p4 = pnand %p17782_p2, %p17738_p10  ;;  %p17790_p9 = scmp.lt.s32.totalorder %s17788_s15, %s17781_s7 }
  0x3c   : > { %p17785_p5 = pneg %p17784_p4  ;;  %p17791_p11 = por %p17790_p9, %p17789_p7 }
  0x3e   : > { %p17792_p13 = pnand %p17791_p11, %p17785_p5 }
  0x40   : > { %17795 = shalt.err (!%p17792_p13)
}
  0x41   : > { %s17838_s16 = smov 98304   ;;  %s17839_s20 = smov 32768  }
  0x42   : > { %s17840_s21 = smov 2048   ;;  %151 = sbr.rel (%p17945_p3) target bundleno = 1335 (0x537), region = 28 }
  0x43   : > { %17569 = dma.hbm_to_vmem [thread:$0]  (!%p17909_p8), %s17952_s3, 65536, %s17954_s22, %s129_s24, %s17838_s16, %s17839_s20, %s17840_s21  }
  0x44   : > { %s153_s25 = sand.u32 (!%p17945_p3), 1, %s17826_s10   ;;  %p20126_p7 = scmp.ne.s32.totalorder (!%p17945_p3), %s20123_s18, 0 }
  0x45   : > { %s17040_s30 = sshll.u32 (!%p17945_p3), %s153_s25, 10  ;;  %s154_s26 = scalar_lea.sflag (!%p17945_p3), [#allocation3], %s153_s25 }
  0x46   : > { %s17985_s28 = scalar_lea.vmem (!%p17945_p3), [#allocation2], %s17040_s30 }
  0x49   : > { %17813 = dma.done.wait (%p20126_p7), %s154_s26, 16384  }
  0x4a   : > { %17815 = vsyncadd (%p20126_p7), %s154_s26, 4294950912  ;;  %s17041_s29 = sshll.u32 %s153_s25, 12  ;;  %s163_s27 = scalar_lea.sflag [#allocation5], %s153_s25 }
  0x4b   : > { %s17991_s19 = scalar_lea.vmem [#allocation4], %s17041_s29 }
  0x4c   : > { %17817 = dma.done.wait (%p20126_p7), %s163_s27, 65536  }
  0x4d   : > { %17819 = vsyncadd (%p20126_p7), %s163_s27, 4294901760  ;;  %p17042_p8 = scmp.ne.s32.totalorder %s17030_s13, 0 }
  0x4e   : > { %vm194_vm0 = vcmask (!%p17042_p8), 74752   ;;  %v17841_v0 = vmov (!%p17042_p8), 0.0  }
  0x4f   : > { %193 = sbr.rel (%p17042_p8) target bundleno = 86 (0x56), region = 40  ;;  %195 = vst.msk [vmem:[%s20121_s2] sm:$0x3] (!%p17042_p8), %vm194_vm0, %v17841_v0 }
  0x56 PF: > { %v3653_v1 = vld [vmem:[%s17991_s19] sm:$0xff]  ;;  %v3654_v3 = vld [vmem:[%s17991_s19 + $0x8] sm:$0xff]  ;;  %v457_v4 = vlaneseq  ;;  %v17842_v9 = vmov 1983009808   ;;  %v3655_v11 = vld [vmem:[%s17991_s19 + $0x10] sm:$0xff]  ;;  %vm16966_vm1 = vcmask 74752  }
  0x57   : > { %v3909_v2 = vld [vmem:[%s17991_s19 + $0x800] sm:$0x11]  ;;  %v3910_v7 = vld [vmem:[%s17991_s19 + $0x808] sm:$0x11]  ;;  %v455_v10 = vunpack.c.l.s4 %v17842_v9  ;;  %v3911_v15 = vld [vmem:[%s17991_s19 + $0x810] sm:$0x11] }
  0x58   : > { %v17044_v5 = vcombine.high %v3653_v1, %v3909_v2  ;;  %v17043_v6 = vcombine.low %v3653_v1, %v3909_v2  ;;  %v197_v8 = vld [vmem:[%s17985_s28] sm:$0xff]  ;;  %v17046_v12 = vcombine.high %v3654_v3, %v3910_v7  ;;  %v17045_v13 = vcombine.low %v3654_v3, %v3910_v7  ;;  %v3656_v16 = vld [vmem:[%s17991_s19 + $0x18] sm:$0xff]  ;;  %v198_v21 = vld [vmem:[%s17985_s28 + $0x8] sm:$0xff] }
  0x59   : > { %v458_v14 = vshrl.u32 %v457_v4, 7  ;;  %v3912_v17 = vld [vmem:[%s17991_s19 + $0x818] sm:$0x11]  ;;  %v456_v18 = vunpack.c.0.s8 %v455_v10  ;;  %v453_v19 = vcombine.high %v197_v8, %v197_v8  ;;  %v17048_v20 = vcombine.high %v3655_v11, %v3911_v15  ;;  %v199_v25 = vld [vmem:[%s17985_s28 + $0x10] sm:$0xff]  ;;  %v3657_v33 = vld [vmem:[%s17991_s19 + $0x20] sm:$0xff] }
  0x5a   : > { %6725 = vmatprep.subr.bf16.mxu0 %v17044_v5  ;;  %6765 = vmatprep.subr.bf16.mxu1 %v17046_v12  ;;  %v17050_v22 = vcombine.high %v3656_v16, %v3912_v17  ;;  %v470_v23 = vcombine.high %v198_v21, %v198_v21  ;;  %v487_v30 = vcombine.high %v199_v25, %v199_v25  ;;  %v3913_v38 = vld [vmem:[%s17991_s19 + $0x820] sm:$0x11]  ;;  %v3658_v39 = vld [vmem:[%s17991_s19 + $0x28] sm:$0xff]  ;;  %v200_v51 = vld [vmem:[%s17985_s28 + $0x18] sm:$0xff] }
  0x5b   : > { %6726 = vmatpush1.bf16.xpose.msra.mxu0 %v17043_v6  ;;  %6766 = vmatpush1.bf16.xpose.msra.mxu1 %v17045_v13  ;;  %v18012_v24 = vsub.s32 %v456_v18, %v458_v14  ;;  %v3914_v40 = vld [vmem:[%s17991_s19 + $0x828] sm:$0x11]  ;;  %v17047_v43 = vcombine.low %v3655_v11, %v3911_v15  ;;  %v17049_v44 = vcombine.low %v3656_v16, %v3912_v17  ;;  %v3659_v55 = vld [vmem:[%s17991_s19 + $0x30] sm:$0xff]  ;;  %v3660_v59 = vld [vmem:[%s17991_s19 + $0x38] sm:$0xff] }
  0x5c   : > { %6805 = vmatprep.subr.bf16.mxu0 %v17048_v20  ;;  %6845 = vmatprep.subr.bf16.mxu1 %v17050_v22  ;;  %v17052_v49 = vcombine.high %v3657_v33, %v3913_v38  ;;  %v17054_v50 = vcombine.high %v3658_v39, %v3914_v40  ;;  %v504_v54 = vcombine.high %v200_v51, %v200_v51  ;;  %v3915_v58 = vld [vmem:[%s17991_s19 + $0x830] sm:$0x11]  ;;  %v3916_v60 = vld [vmem:[%s17991_s19 + $0x838] sm:$0x11]  ;;  %v201_v5 = vld [vmem:[%s17985_s28 + $0x20] sm:$0xff] }
  0x5d   : > { %v460_v26 = vrot.slane %v197_v8, %v18012_v24  ;;  %v467_v27 = vrot.slane %v453_v19, %v18012_v24  ;;  %v477_v28 = vrot.slane %v198_v21, %v18012_v24  ;;  %v484_v29 = vrot.slane %v470_v23, %v18012_v24  ;;  %v3661_v9 = vld [vmem:[%s17991_s19 + $0x40] sm:$0xff]  ;;  %v3662_v13 = vld [vmem:[%s17991_s19 + $0x48] sm:$0xff] }
  0x5e   : > { %v494_v47 = vrot.slane %v199_v25, %v18012_v24  ;;  %v501_v48 = vrot.slane %v487_v30, %v18012_v24  ;;  %v17051_v61 = vcombine.low %v3657_v33, %v3913_v38  ;;  %v17053_v62 = vcombine.low %v3658_v39, %v3914_v40  ;;  %v3917_v12 = vld [vmem:[%s17991_s19 + $0x840] sm:$0x11]  ;;  %v3918_v14 = vld [vmem:[%s17991_s19 + $0x848] sm:$0x11]  ;;  %v3920_v33 = vld [vmem:[%s17991_s19 + $0x858] sm:$0x11] }
  0x5f   : > { %v468_v31 = vcombine.high %v460_v26, %v460_v26  ;;  %v469_v32 = vcombine.high %v467_v27, %v467_v27  ;;  %v3141_v34 = vpack.c.bf16 %v460_v26, %v460_v26  ;;  %v3143_v35 = vpack.c.bf16 %v467_v27, %v467_v27  ;;  %v202_v23 = vld [vmem:[%s17985_s28 + $0x28] sm:$0xff] }
  0x60   : > { %v485_v36 = vcombine.high %v477_v28, %v477_v28  ;;  %v486_v37 = vcombine.high %v484_v29, %v484_v29  ;;  %v502_v52 = vcombine.high %v494_v47, %v494_v47  ;;  %v503_v53 = vcombine.high %v501_v48, %v501_v48 }
  0x61   : > { %v3142_v41 = vpack.c.bf16 %v468_v31, %v468_v31  ;;  %v3144_v42 = vpack.c.bf16 %v469_v32, %v469_v32  ;;  %v3145_v56 = vpack.c.bf16 %v477_v28, %v477_v28  ;;  %v3147_v57 = vpack.c.bf16 %v484_v29, %v484_v29  ;;  %v3663_v28 = vld [vmem:[%s17991_s19 + $0x50] sm:$0xff]  ;;  %v3664_v32 = vld [vmem:[%s17991_s19 + $0x58] sm:$0xff] }
  0x62   : > { %v3146_v45 = vpack.c.bf16 %v485_v36, %v485_v36  ;;  %v3148_v46 = vpack.c.bf16 %v486_v37, %v486_v37  ;;  %v3150_v63 = vpack.c.bf16 %v502_v52, %v502_v52  ;;  %v3152_v0 = vpack.c.bf16 %v503_v53, %v503_v53  ;;  %v3919_v31 = vld [vmem:[%s17991_s19 + $0x850] sm:$0x11] }
  0x63   : > { %6757 = vmatprep.mubr.bf16.mxu0 %v3142_v41  ;;  %6797 = vmatprep.mubr.bf16.mxu1 %v3144_v42  ;;  %v511_v1 = vrot.slane %v200_v51, %v18012_v24  ;;  %v518_v2 = vrot.slane %v504_v54, %v18012_v24  ;;  %v17056_v3 = vcombine.high %v3659_v55, %v3915_v58  ;;  %v203_v42 = vld [vmem:[%s17985_s28 + $0x30] sm:$0xff]  ;;  %v3922_v51 = vld [vmem:[%s17991_s19 + $0x868] sm:$0x11] }
  0x64   : > { %6758 = vmatmul.mubr.bf16.vlgmr.msra.gmra.mrb[0].mxu0 %v3141_v34  ;;  %6798 = vmatmul.mubr.bf16.vlgmr.msra.gmra.mrb[0].mxu1 %v3143_v35  ;;  %v17058_v4 = vcombine.high %v3660_v59, %v3916_v60  ;;  %v521_v8 = vcombine.high %v201_v5, %v201_v5  ;;  %v3149_v10 = vpack.c.bf16 %v494_v47, %v494_v47 }
  0x65   : > { %6806 = vmatpush1.bf16.xpose.msra.mxu0 %v17047_v43  ;;  %6846 = vmatpush1.bf16.xpose.msra.mxu1 %v17049_v44  ;;  %v519_v6 = vcombine.high %v511_v1, %v511_v1  ;;  %v520_v7 = vcombine.high %v518_v2, %v518_v2  ;;  %v3151_v11 = vpack.c.bf16 %v501_v48, %v501_v48 }
  0x66   : > { %6837 = vmatprep.mubr.bf16.mxu0 %v3146_v45  ;;  %6877 = vmatprep.mubr.bf16.mxu1 %v3148_v46  ;;  %v17055_v15 = vcombine.low %v3659_v55, %v3915_v58  ;;  %v17057_v16 = vcombine.low %v3660_v59, %v3916_v60  ;;  %v528_v19 = vrot.slane %v201_v5, %v18012_v24  ;;  %v3665_v46 = vld [vmem:[%s17991_s19 + $0x60] sm:$0xff]  ;;  %v204_v60 = vld [vmem:[%s17985_s28 + $0x38] sm:$0xff] }
  0x67   : > { %6885 = vmatprep.subr.bf16.mxu0 %v17052_v49  ;;  %6925 = vmatprep.subr.bf16.mxu1 %v17054_v50  ;;  %v3154_v17 = vpack.c.bf16 %v519_v6, %v519_v6  ;;  %v3156_v18 = vpack.c.bf16 %v520_v7, %v520_v7  ;;  %v535_v20 = vrot.slane %v521_v8, %v18012_v24  ;;  %v3921_v49 = vld [vmem:[%s17991_s19 + $0x860] sm:$0x11]  ;;  %v3666_v50 = vld [vmem:[%s17991_s19 + $0x68] sm:$0xff]  ;;  %v3924_v5 = vld [vmem:[%s17991_s19 + $0x878] sm:$0x11] }
  0x68   : > { %v17060_v21 = vcombine.high %v3661_v9, %v3917_v12  ;;  %v17062_v22 = vcombine.high %v3662_v13, %v3918_v14  ;;  %v536_v25 = vcombine.high %v528_v19, %v528_v19  ;;  %v538_v27 = vcombine.high %v202_v23, %v202_v23 }
  0x69   : > { %v537_v26 = vcombine.high %v535_v20, %v535_v20  ;;  %v3153_v29 = vpack.c.bf16 %v511_v1, %v511_v1  ;;  %v3155_v30 = vpack.c.bf16 %v518_v2, %v518_v2  ;;  %v17059_v34 = vcombine.low %v3661_v9, %v3917_v12 }
  0x6a   : > { %v17061_v35 = vcombine.low %v3662_v13, %v3918_v14  ;;  %v3158_v36 = vpack.c.bf16 %v536_v25, %v536_v25  ;;  %v545_v38 = vrot.slane %v202_v23, %v18012_v24  ;;  %v552_v39 = vrot.slane %v538_v27, %v18012_v24  ;;  %v205_v14 = vld [vmem:[%s17985_s28 + $0x40] sm:$0xff]  ;;  %v3926_v23 = vld [vmem:[%s17991_s19 + $0x888] sm:$0x11] }
  0x6b   : > { %v3160_v37 = vpack.c.bf16 %v537_v26, %v537_v26  ;;  %v17064_v40 = vcombine.high %v3663_v28, %v3919_v31  ;;  %v17066_v41 = vcombine.high %v3664_v32, %v3920_v33  ;;  %v555_v45 = vcombine.high %v203_v42, %v203_v42 }
  0x6c   : > { %6838 = vmatmul.mubr.bf16.vlgmr.msra.gmra.mrb[4].mxu0 %v3145_v56  ;;  %6878 = vmatmul.mubr.bf16.vlgmr.msra.gmra.mrb[4].mxu1 %v3147_v57  ;;  %v553_v43 = vcombine.high %v545_v38, %v545_v38  ;;  %v554_v44 = vcombine.high %v552_v39, %v552_v39  ;;  %v3157_v47 = vpack.c.bf16 %v528_v19, %v528_v19 }
  0x6d   : > { %6886 = vmatpush1.bf16.xpose.msra.mxu0 %v17051_v61  ;;  %6926 = vmatpush1.bf16.xpose.msra.mxu1 %v17053_v62  ;;  %v3159_v48 = vpack.c.bf16 %v535_v20, %v535_v20  ;;  %v17063_v52 = vcombine.low %v3663_v28, %v3919_v31  ;;  %v17065_v53 = vcombine.low %v3664_v32, %v3920_v33  ;;  %v206_v33 = vld [vmem:[%s17985_s28 + $0x48] sm:$0xff] }
  0x6e   : > { %6917 = vmatprep.mubr.bf16.mxu0 %v3150_v63  ;;  %6957 = vmatprep.mubr.bf16.mxu1 %v3152_v0  ;;  %v3162_v54 = vpack.c.bf16 %v553_v43, %v553_v43  ;;  %v3164_v55 = vpack.c.bf16 %v554_v44, %v554_v44  ;;  %v562_v56 = vrot.slane %v203_v42, %v18012_v24  ;;  %v3667_v0 = vld [vmem:[%s17991_s19 + $0x70] sm:$0xff]  ;;  %v3928_v42 = vld [vmem:[%s17991_s19 + $0x898] sm:$0x11] }
  0x6f   : > { %6965 = vmatprep.subr.bf16.mxu0 %v17056_v3  ;;  %7005 = vmatprep.subr.bf16.mxu1 %v17058_v4  ;;  %v569_v57 = vrot.slane %v555_v45, %v18012_v24  ;;  %v17068_v58 = vcombine.high %v3665_v46, %v3921_v49  ;;  %v17070_v59 = vcombine.high %v3666_v50, %v3922_v51  ;;  %v3923_v3 = vld [vmem:[%s17991_s19 + $0x870] sm:$0x11]  ;;  %v3668_v4 = vld [vmem:[%s17991_s19 + $0x78] sm:$0xff] }
  0x70   : > { %v570_v61 = vcombine.high %v562_v56, %v562_v56  ;;  %v572_v63 = vcombine.high %v204_v60, %v204_v60  ;;  %v3161_v1 = vpack.c.bf16 %v545_v38, %v545_v38  ;;  %v3163_v2 = vpack.c.bf16 %v552_v39, %v552_v39 }
  0x71   : > { %v571_v62 = vcombine.high %v569_v57, %v569_v57  ;;  %v17067_v6 = vcombine.low %v3665_v46, %v3921_v49  ;;  %v17069_v7 = vcombine.low %v3666_v50, %v3922_v51  ;;  %v17072_v12 = vcombine.high %v3667_v0, %v3923_v3  ;;  %v207_v51 = vld [vmem:[%s17985_s28 + $0x50] sm:$0xff] }
  0x72   : > { %v3166_v8 = vpack.c.bf16 %v570_v61, %v570_v61  ;;  %v17074_v13 = vcombine.high %v3668_v4, %v3924_v5  ;;  %v3165_v19 = vpack.c.bf16 %v562_v56, %v562_v56  ;;  %v3167_v20 = vpack.c.bf16 %v569_v57, %v569_v57 }
  0x73   : > { %v3168_v9 = vpack.c.bf16 %v571_v62, %v571_v62  ;;  %v17071_v25 = vcombine.low %v3667_v0, %v3923_v3  ;;  %v17073_v26 = vcombine.low %v3668_v4, %v3924_v5  ;;  %v208_v5 = vld [vmem:[%s17985_s28 + $0x58] sm:$0xff] }
  0x74   : > { %6918 = vmatmul.mubr.bf16.vlgmr.msra.gmra.mrb[8].mxu0 %v3149_v10  ;;  %6958 = vmatmul.mubr.bf16.vlgmr.msra.gmra.mrb[8].mxu1 %v3151_v11  ;;  %v579_v10 = vrot.slane %v204_v60, %v18012_v24  ;;  %v586_v11 = vrot.slane %v572_v63, %v18012_v24  ;;  %v3930_v60 = vld [vmem:[%s17991_s19 + $0x8a8] sm:$0x11] }
  0x75   : > { %6966 = vmatpush1.bf16.xpose.msra.mxu0 %v17055_v15  ;;  %7006 = vmatpush1.bf16.xpose.msra.mxu1 %v17057_v16 }
  0x76   : > { %6997 = vmatprep.mubr.bf16.mxu0 %v3154_v17  ;;  %7037 = vmatprep.mubr.bf16.mxu1 %v3156_v18  ;;  %v587_v15 = vcombine.high %v579_v10, %v579_v10  ;;  %v588_v16 = vcombine.high %v586_v11, %v586_v11  ;;  %v589_v17 = vcombine.high %v205_v14, %v205_v14  ;;  %v3669_v18 = vld [vmem:[%s17991_s19 + $0x80] sm:$0xff] }
  0x77   : > { %7045 = vmatprep.subr.bf16.mxu0 %v17060_v21  ;;  %7085 = vmatprep.subr.bf16.mxu1 %v17062_v22  ;;  %v3925_v21 = vld [vmem:[%s17991_s19 + $0x880] sm:$0x11]  ;;  %v3670_v22 = vld [vmem:[%s17991_s19 + $0x88] sm:$0xff]  ;;  %v3169_v38 = vpack.c.bf16 %v579_v10, %v579_v10  ;;  %v3171_v39 = vpack.c.bf16 %v586_v11, %v586_v11 }
  0x78   : > { %v3170_v27 = vpack.c.bf16 %v587_v15, %v587_v15  ;;  %v3172_v28 = vpack.c.bf16 %v588_v16, %v588_v16  ;;  %v17076_v31 = vcombine.high %v3669_v18, %v3925_v21  ;;  %v17078_v32 = vcombine.high %v3670_v22, %v3926_v23 }
  0x79   : > { %v17075_v43 = vcombine.low %v3669_v18, %v3925_v21  ;;  %v17077_v44 = vcombine.low %v3670_v22, %v3926_v23  ;;  %v209_v23 = vld [vmem:[%s17985_s28 + $0x60] sm:$0xff] }
  0x7c   : > { %6998 = vmatmul.mubr.bf16.vlgmr.msra.gmra.mrb[12].mxu0 %v3153_v29  ;;  %7038 = vmatmul.mubr.bf16.vlgmr.msra.gmra.mrb[12].mxu1 %v3155_v30  ;;  %v596_v29 = vrot.slane %v205_v14, %v18012_v24  ;;  %v603_v30 = vrot.slane %v589_v17, %v18012_v24  ;;  %v3932_v14 = vld [vmem:[%s17991_s19 + $0x8b8] sm:$0x11] }
  0x7d   : > { %7046 = vmatpush1.bf16.xpose.msra.mxu0 %v17059_v34  ;;  %7086 = vmatpush1.bf16.xpose.msra.mxu1 %v17061_v35 }
  0x7e   : > { %7077 = vmatprep.mubr.bf16.mxu0 %v3158_v36  ;;  %7117 = vmatprep.mubr.bf16.mxu1 %v3160_v37  ;;  %v604_v34 = vcombine.high %v596_v29, %v596_v29  ;;  %v605_v35 = vcombine.high %v603_v30, %v603_v30  ;;  %v606_v36 = vcombine.high %v206_v33, %v206_v33  ;;  %v3671_v37 = vld [vmem:[%s17991_s19 + $0x90] sm:$0xff] }
  0x7f   : > { %7125 = vmatprep.subr.bf16.mxu0 %v17064_v40  ;;  %7165 = vmatprep.subr.bf16.mxu1 %v17066_v41  ;;  %v3927_v40 = vld [vmem:[%s17991_s19 + $0x890] sm:$0x11]  ;;  %v3672_v41 = vld [vmem:[%s17991_s19 + $0x98] sm:$0xff]  ;;  %v3173_v56 = vpack.c.bf16 %v596_v29, %v596_v29  ;;  %v3175_v57 = vpack.c.bf16 %v603_v30, %v603_v30 }
  0x80   : > { %v3174_v45 = vpack.c.bf16 %v604_v34, %v604_v34  ;;  %v3176_v46 = vpack.c.bf16 %v605_v35, %v605_v35  ;;  %v17080_v49 = vcombine.high %v3671_v37, %v3927_v40  ;;  %v17082_v50 = vcombine.high %v3672_v41, %v3928_v42 }
  0x81   : > { %v17079_v61 = vcombine.low %v3671_v37, %v3927_v40  ;;  %v17081_v62 = vcombine.low %v3672_v41, %v3928_v42  ;;  %v210_v42 = vld [vmem:[%s17985_s28 + $0x68] sm:$0xff] }
  0x84   : > { %7078 = vmatmul.mubr.bf16.vlgmr.msra.gmra.mrb[16].mxu0 %v3157_v47  ;;  %7118 = vmatmul.mubr.bf16.vlgmr.msra.gmra.mrb[16].mxu1 %v3159_v48  ;;  %v613_v47 = vrot.slane %v206_v33, %v18012_v24  ;;  %v620_v48 = vrot.slane %v606_v36, %v18012_v24  ;;  %v3934_v33 = vld [vmem:[%s17991_s19 + $0x8c8] sm:$0x11] }
  0x85   : > { %7126 = vmatpush1.bf16.xpose.msra.mxu0 %v17063_v52  ;;  %7166 = vmatpush1.bf16.xpose.msra.mxu1 %v17065_v53 }
  0x86   : > { %7157 = vmatprep.mubr.bf16.mxu0 %v3162_v54  ;;  %7197 = vmatprep.mubr.bf16.mxu1 %v3164_v55  ;;  %v621_v52 = vcombine.high %v613_v47, %v613_v47  ;;  %v622_v53 = vcombine.high %v620_v48, %v620_v48  ;;  %v623_v54 = vcombine.high %v207_v51, %v207_v51  ;;  %v3673_v55 = vld [vmem:[%s17991_s19 + $0xa0] sm:$0xff] }
  0x87   : > { %7205 = vmatprep.subr.bf16.mxu0 %v17068_v58  ;;  %7245 = vmatprep.subr.bf16.mxu1 %v17070_v59  ;;  %v3929_v58 = vld [vmem:[%s17991_s19 + $0x8a0] sm:$0x11]  ;;  %v3674_v59 = vld [vmem:[%s17991_s19 + $0xa8] sm:$0xff]  ;;  %v3177_v10 = vpack.c.bf16 %v613_v47, %v613_v47  ;;  %v3179_v11 = vpack.c.bf16 %v620_v48, %v620_v48 }
  0x88   : > { %v3178_v63 = vpack.c.bf16 %v621_v52, %v621_v52  ;;  %v3180_v0 = vpack.c.bf16 %v622_v53, %v622_v53  ;;  %v17084_v3 = vcombine.high %v3673_v55, %v3929_v58  ;;  %v17086_v4 = vcombine.high %v3674_v59, %v3930_v60 }
  0x89   : > { %v17083_v15 = vcombine.low %v3673_v55, %v3929_v58  ;;  %v17085_v16 = vcombine.low %v3674_v59, %v3930_v60  ;;  %v211_v60 = vld [vmem:[%s17985_s28 + $0x70] sm:$0xff] }
  0x8c   : > { %7158 = vmatmul.mubr.bf16.vlgmr.msra.gmra.mrb[20].mxu0 %v3161_v1  ;;  %7198 = vmatmul.mubr.bf16.vlgmr.msra.gmra.mrb[20].mxu1 %v3163_v2  ;;  %v630_v1 = vrot.slane %v207_v51, %v18012_v24  ;;  %v637_v2 = vrot.slane %v623_v54, %v18012_v24  ;;  %v3936_v51 = vld [vmem:[%s17991_s19 + $0x8d8] sm:$0x11] }
  0x8d   : > { %7206 = vmatpush1.bf16.xpose.msra.mxu0 %v17067_v6  ;;  %7246 = vmatpush1.bf16.xpose.msra.mxu1 %v17069_v7 }
  0x8e   : > { %7237 = vmatprep.mubr.bf16.mxu0 %v3166_v8  ;;  %7277 = vmatprep.mubr.bf16.mxu1 %v3168_v9  ;;  %v638_v6 = vcombine.high %v630_v1, %v630_v1  ;;  %v639_v7 = vcombine.high %v637_v2, %v637_v2  ;;  %v640_v8 = vcombine.high %v208_v5, %v208_v5  ;;  %v3675_v9 = vld [vmem:[%s17991_s19 + $0xb0] sm:$0xff] }
  0x8f   : > { %7285 = vmatprep.subr.bf16.mxu0 %v17072_v12  ;;  %7325 = vmatprep.subr.bf16.mxu1 %v17074_v13  ;;  %v3931_v12 = vld [vmem:[%s17991_s19 + $0x8b0] sm:$0x11]  ;;  %v3676_v13 = vld [vmem:[%s17991_s19 + $0xb8] sm:$0xff]  ;;  %v3181_v29 = vpack.c.bf16 %v630_v1, %v630_v1  ;;  %v3183_v30 = vpack.c.bf16 %v637_v2, %v637_v2 }
  0x90   : > { %v3182_v17 = vpack.c.bf16 %v638_v6, %v638_v6  ;;  %v3184_v18 = vpack.c.bf16 %v639_v7, %v639_v7  ;;  %v17088_v21 = vcombine.high %v3675_v9, %v3931_v12  ;;  %v17090_v22 = vcombine.high %v3676_v13, %v3932_v14 }
  0x91   : > { %v17087_v34 = vcombine.low %v3675_v9, %v3931_v12  ;;  %v17089_v35 = vcombine.low %v3676_v13, %v3932_v14  ;;  %v212_v14 = vld [vmem:[%s17985_s28 + $0x78] sm:$0xff] }
  0x94   : > { %7238 = vmatmul.mubr.bf16.vlgmr.msra.gmra.mrb[24].mxu0 %v3165_v19  ;;  %7278 = vmatmul.mubr.bf16.vlgmr.msra.gmra.mrb[24].mxu1 %v3167_v20  ;;  %v647_v19 = vrot.slane %v208_v5, %v18012_v24  ;;  %v654_v20 = vrot.slane %v640_v8, %v18012_v24  ;;  %v3938_v5 = vld [vmem:[%s17991_s19 + $0x8e8] sm:$0x11] }
  0x95   : > { %7286 = vmatpush1.bf16.xpose.msra.mxu0 %v17071_v25  ;;  %7326 = vmatpush1.bf16.xpose.msra.mxu1 %v17073_v26 }
  0x96   : > { %7317 = vmatprep.mubr.bf16.mxu0 %v3170_v27  ;;  %7357 = vmatprep.mubr.bf16.mxu1 %v3172_v28  ;;  %v655_v25 = vcombine.high %v647_v19, %v647_v19  ;;  %v656_v26 = vcombine.high %v654_v20, %v654_v20  ;;  %v657_v27 = vcombine.high %v209_v23, %v209_v23  ;;  %v3677_v28 = vld [vmem:[%s17991_s19 + $0xc0] sm:$0xff] }
  0x97   : > { %7365 = vmatprep.subr.bf16.mxu0 %v17076_v31  ;;  %7405 = vmatprep.subr.bf16.mxu1 %v17078_v32  ;;  %v3933_v31 = vld [vmem:[%s17991_s19 + $0x8c0] sm:$0x11]  ;;  %v3678_v32 = vld [vmem:[%s17991_s19 + $0xc8] sm:$0xff]  ;;  %v3185_v47 = vpack.c.bf16 %v647_v19, %v647_v19  ;;  %v3187_v48 = vpack.c.bf16 %v654_v20, %v654_v20 }
  0x98   : > { %v3186_v36 = vpack.c.bf16 %v655_v25, %v655_v25  ;;  %v3188_v37 = vpack.c.bf16 %v656_v26, %v656_v26  ;;  %v17092_v40 = vcombine.high %v3677_v28, %v3933_v31  ;;  %v17094_v41 = vcombine.high %v3678_v32, %v3934_v33 }
  0x99   : > { %v17091_v52 = vcombine.low %v3677_v28, %v3933_v31  ;;  %v17093_v53 = vcombine.low %v3678_v32, %v3934_v33  ;;  %v213_v33 = vld [vmem:[%s17985_s28 + $0x80] sm:$0xff] }
  0x9c   : > { %7318 = vmatmul.mubr.bf16.vlgmr.msra.gmra.mrb[28].mxu0 %v3169_v38  ;;  %7358 = vmatmul.mubr.bf16.vlgmr.msra.gmra.mrb[28].mxu1 %v3171_v39  ;;  %v664_v38 = vrot.slane %v209_v23, %v18012_v24  ;;  %v671_v39 = vrot.slane %v657_v27, %v18012_v24  ;;  %v3940_v23 = vld [vmem:[%s17991_s19 + $0x8f8] sm:$0x11] }
  0x9d   : > { %7366 = vmatpush1.bf16.xpose.msra.mxu0 %v17075_v43  ;;  %7406 = vmatpush1.bf16.xpose.msra.mxu1 %v17077_v44 }
  0x9e   : > { %7397 = vmatprep.mubr.bf16.mxu0 %v3174_v45  ;;  %7437 = vmatprep.mubr.bf16.mxu1 %v3176_v46  ;;  %v672_v43 = vcombine.high %v664_v38, %v664_v38  ;;  %v673_v44 = vcombine.high %v671_v39, %v671_v39  ;;  %v674_v45 = vcombine.high %v210_v42, %v210_v42  ;;  %v3679_v46 = vld [vmem:[%s17991_s19 + $0xd0] sm:$0xff] }
  0x9f   : > { %7445 = vmatprep.subr.bf16.mxu0 %v17080_v49  ;;  %7485 = vmatprep.subr.bf16.mxu1 %v17082_v50  ;;  %v3935_v49 = vld [vmem:[%s17991_s19 + $0x8d0] sm:$0x11]  ;;  %v3680_v50 = vld [vmem:[%s17991_s19 + $0xd8] sm:$0xff]  ;;  %v3189_v1 = vpack.c.bf16 %v664_v38, %v664_v38  ;;  %v3191_v2 = vpack.c.bf16 %v671_v39, %v671_v39 }
  0xa0   : > { %v3190_v54 = vpack.c.bf16 %v672_v43, %v672_v43  ;;  %v3192_v55 = vpack.c.bf16 %v673_v44, %v673_v44  ;;  %v17096_v58 = vcombine.high %v3679_v46, %v3935_v49  ;;  %v17098_v59 = vcombine.high %v3680_v50, %v3936_v51 }
  0xa1   : > { %v17095_v6 = vcombine.low %v3679_v46, %v3935_v49  ;;  %v17097_v7 = vcombine.low %v3680_v50, %v3936_v51  ;;  %v214_v51 = vld [vmem:[%s17985_s28 + $0x88] sm:$0xff] }
  0xa4   : > { %7398 = vmatmul.mubr.bf16.vlgmr.msra.gmra.mrb[32].mxu0 %v3173_v56  ;;  %7438 = vmatmul.mubr.bf16.vlgmr.msra.gmra.mrb[32].mxu1 %v3175_v57  ;;  %v681_v56 = vrot.slane %v210_v42, %v18012_v24  ;;  %v688_v57 = vrot.slane %v674_v45, %v18012_v24  ;;  %v3942_v42 = vld [vmem:[%s17991_s19 + $0x908] sm:$0x11] }
  0xa5   : > { %7446 = vmatpush1.bf16.xpose.msra.mxu0 %v17079_v61  ;;  %7486 = vmatpush1.bf16.xpose.msra.mxu1 %v17081_v62 }
  0xa6   : > { %7477 = vmatprep.mubr.bf16.mxu0 %v3178_v63  ;;  %7517 = vmatprep.mubr.bf16.mxu1 %v3180_v0  ;;  %v689_v61 = vcombine.high %v681_v56, %v681_v56  ;;  %v690_v62 = vcombine.high %v688_v57, %v688_v57  ;;  %v691_v63 = vcombine.high %v211_v60, %v211_v60  ;;  %v3681_v0 = vld [vmem:[%s17991_s19 + $0xe0] sm:$0xff] }
  0xa7   : > { %7525 = vmatprep.subr.bf16.mxu0 %v17084_v3  ;;  %7565 = vmatprep.subr.bf16.mxu1 %v17086_v4  ;;  %v3937_v3 = vld [vmem:[%s17991_s19 + $0x8e0] sm:$0x11]  ;;  %v3682_v4 = vld [vmem:[%s17991_s19 + $0xe8] sm:$0xff]  ;;  %v3193_v19 = vpack.c.bf16 %v681_v56, %v681_v56  ;;  %v3195_v20 = vpack.c.bf16 %v688_v57, %v688_v57 }
  0xa8   : > { %v3194_v8 = vpack.c.bf16 %v689_v61, %v689_v61  ;;  %v3196_v9 = vpack.c.bf16 %v690_v62, %v690_v62  ;;  %v17100_v12 = vcombine.high %v3681_v0, %v3937_v3  ;;  %v17102_v13 = vcombine.high %v3682_v4, %v3938_v5 }
  0xa9   : > { %v17099_v25 = vcombine.low %v3681_v0, %v3937_v3  ;;  %v17101_v26 = vcombine.low %v3682_v4, %v3938_v5  ;;  %v215_v5 = vld [vmem:[%s17985_s28 + $0x90] sm:$0xff] }
  0xac   : > { %7478 = vmatmul.mubr.bf16.vlgmr.msra.gmra.mrb[36].mxu0 %v3177_v10  ;;  %7518 = vmatmul.mubr.bf16.vlgmr.msra.gmra.mrb[36].mxu1 %v3179_v11  ;;  %v698_v10 = vrot.slane %v211_v60, %v18012_v24  ;;  %v705_v11 = vrot.slane %v691_v63, %v18012_v24  ;;  %v3944_v60 = vld [vmem:[%s17991_s19 + $0x918] sm:$0x11] }
  0xad   : > { %7526 = vmatpush1.bf16.xpose.msra.mxu0 %v17083_v15  ;;  %7566 = vmatpush1.bf16.xpose.msra.mxu1 %v17085_v16 }
  0xae   : > { %7557 = vmatprep.mubr.bf16.mxu0 %v3182_v17  ;;  %7597 = vmatprep.mubr.bf16.mxu1 %v3184_v18  ;;  %v706_v15 = vcombine.high %v698_v10, %v698_v10  ;;  %v707_v16 = vcombine.high %v705_v11, %v705_v11  ;;  %v708_v17 = vcombine.high %v212_v14, %v212_v14  ;;  %v3683_v18 = vld [vmem:[%s17991_s19 + $0xf0] sm:$0xff] }
  0xaf   : > { %7605 = vmatprep.subr.bf16.mxu0 %v17088_v21  ;;  %7645 = vmatprep.subr.bf16.mxu1 %v17090_v22  ;;  %v3939_v21 = vld [vmem:[%s17991_s19 + $0x8f0] sm:$0x11]  ;;  %v3684_v22 = vld [vmem:[%s17991_s19 + $0xf8] sm:$0xff]  ;;  %v3197_v38 = vpack.c.bf16 %v698_v10, %v698_v10  ;;  %v3199_v39 = vpack.c.bf16 %v705_v11, %v705_v11 }
  0xb0   : > { %v3198_v27 = vpack.c.bf16 %v706_v15, %v706_v15  ;;  %v3200_v28 = vpack.c.bf16 %v707_v16, %v707_v16  ;;  %v17104_v31 = vcombine.high %v3683_v18, %v3939_v21  ;;  %v17106_v32 = vcombine.high %v3684_v22, %v3940_v23 }
  0xb1   : > { %v17103_v43 = vcombine.low %v3683_v18, %v3939_v21  ;;  %v17105_v44 = vcombine.low %v3684_v22, %v3940_v23  ;;  %v216_v23 = vld [vmem:[%s17985_s28 + $0x98] sm:$0xff] }
  0xb4   : > { %7558 = vmatmul.mubr.bf16.vlgmr.msra.gmra.mrb[40].mxu0 %v3181_v29  ;;  %7598 = vmatmul.mubr.bf16.vlgmr.msra.gmra.mrb[40].mxu1 %v3183_v30  ;;  %v715_v29 = vrot.slane %v212_v14, %v18012_v24  ;;  %v722_v30 = vrot.slane %v708_v17, %v18012_v24  ;;  %v3946_v14 = vld [vmem:[%s17991_s19 + $0x928] sm:$0x11] }
  0xb5   : > { %7606 = vmatpush1.bf16.xpose.msra.mxu0 %v17087_v34  ;;  %7646 = vmatpush1.bf16.xpose.msra.mxu1 %v17089_v35 }
  0xb6   : > { %7637 = vmatprep.mubr.bf16.mxu0 %v3186_v36  ;;  %7677 = vmatprep.mubr.bf16.mxu1 %v3188_v37  ;;  %v723_v34 = vcombine.high %v715_v29, %v715_v29  ;;  %v724_v35 = vcombine.high %v722_v30, %v722_v30  ;;  %v725_v36 = vcombine.high %v213_v33, %v213_v33  ;;  %v3685_v37 = vld [vmem:[%s17991_s19 + $0x100] sm:$0xff] }
  0xb7   : > { %7685 = vmatprep.subr.bf16.mxu0 %v17092_v40  ;;  %7725 = vmatprep.subr.bf16.mxu1 %v17094_v41  ;;  %v3941_v40 = vld [vmem:[%s17991_s19 + $0x900] sm:$0x11]  ;;  %v3686_v41 = vld [vmem:[%s17991_s19 + $0x108] sm:$0xff]  ;;  %v3201_v56 = vpack.c.bf16 %v715_v29, %v715_v29  ;;  %v3203_v57 = vpack.c.bf16 %v722_v30, %v722_v30 }
  0xb8   : > { %v3202_v45 = vpack.c.bf16 %v723_v34, %v723_v34  ;;  %v3204_v46 = vpack.c.bf16 %v724_v35, %v724_v35  ;;  %v17108_v49 = vcombine.high %v3685_v37, %v3941_v40  ;;  %v17110_v50 = vcombine.high %v3686_v41, %v3942_v42 }
  0xb9   : > { %v17107_v61 = vcombine.low %v3685_v37, %v3941_v40  ;;  %v17109_v62 = vcombine.low %v3686_v41, %v3942_v42  ;;  %v217_v42 = vld [vmem:[%s17985_s28 + $0xa0] sm:$0xff] }
  0xbc   : > { %7638 = vmatmul.mubr.bf16.vlgmr.msra.gmra.mrb[44].mxu0 %v3185_v47  ;;  %7678 = vmatmul.mubr.bf16.vlgmr.msra.gmra.mrb[44].mxu1 %v3187_v48  ;;  %v732_v47 = vrot.slane %v213_v33, %v18012_v24  ;;  %v739_v48 = vrot.slane %v725_v36, %v18012_v24  ;;  %v3948_v33 = vld [vmem:[%s17991_s19 + $0x938] sm:$0x11] }
  0xbd   : > { %7686 = vmatpush1.bf16.xpose.msra.mxu0 %v17091_v52  ;;  %7726 = vmatpush1.bf16.xpose.msra.mxu1 %v17093_v53 }
  0xbe   : > { %7717 = vmatprep.mubr.bf16.mxu0 %v3190_v54  ;;  %7757 = vmatprep.mubr.bf16.mxu1 %v3192_v55  ;;  %v740_v52 = vcombine.high %v732_v47, %v732_v47  ;;  %v741_v53 = vcombine.high %v739_v48, %v739_v48  ;;  %v742_v54 = vcombine.high %v214_v51, %v214_v51  ;;  %v3687_v55 = vld [vmem:[%s17991_s19 + $0x110] sm:$0xff] }
  0xbf   : > { %7765 = vmatprep.subr.bf16.mxu0 %v17096_v58  ;;  %7805 = vmatprep.subr.bf16.mxu1 %v17098_v59  ;;  %v3943_v58 = vld [vmem:[%s17991_s19 + $0x910] sm:$0x11]  ;;  %v3688_v59 = vld [vmem:[%s17991_s19 + $0x118] sm:$0xff]  ;;  %v3205_v10 = vpack.c.bf16 %v732_v47, %v732_v47  ;;  %v3207_v11 = vpack.c.bf16 %v739_v48, %v739_v48 }
  0xc0   : > { %v3206_v63 = vpack.c.bf16 %v740_v52, %v740_v52  ;;  %v3208_v0 = vpack.c.bf16 %v741_v53, %v741_v53  ;;  %v17112_v3 = vcombine.high %v3687_v55, %v3943_v58  ;;  %v17114_v4 = vcombine.high %v3688_v59, %v3944_v60 }
  0xc1   : > { %v17111_v15 = vcombine.low %v3687_v55, %v3943_v58  ;;  %v17113_v16 = vcombine.low %v3688_v59, %v3944_v60  ;;  %v218_v60 = vld [vmem:[%s17985_s28 + $0xa8] sm:$0xff] }
  0xc4   : > { %7718 = vmatmul.mubr.bf16.vlgmr.msra.gmra.mrb[48].mxu0 %v3189_v1  ;;  %7758 = vmatmul.mubr.bf16.vlgmr.msra.gmra.mrb[48].mxu1 %v3191_v2  ;;  %v749_v1 = vrot.slane %v214_v51, %v18012_v24  ;;  %v756_v2 = vrot.slane %v742_v54, %v18012_v24  ;;  %v3950_v51 = vld [vmem:[%s17991_s19 + $0x948] sm:$0x11] }
  0xc5   : > { %7766 = vmatpush1.bf16.xpose.msra.mxu0 %v17095_v6  ;;  %7806 = vmatpush1.bf16.xpose.msra.mxu1 %v17097_v7 }
  0xc6   : > { %7797 = vmatprep.mubr.bf16.mxu0 %v3194_v8  ;;  %7837 = vmatprep.mubr.bf16.mxu1 %v3196_v9  ;;  %v757_v6 = vcombine.high %v749_v1, %v749_v1  ;;  %v758_v7 = vcombine.high %v756_v2, %v756_v2  ;;  %v759_v8 = vcombine.high %v215_v5, %v215_v5  ;;  %v3689_v9 = vld [vmem:[%s17991_s19 + $0x120] sm:$0xff] }
  0xc7   : > { %7845 = vmatprep.subr.bf16.mxu0 %v17100_v12  ;;  %7885 = vmatprep.subr.bf16.mxu1 %v17102_v13  ;;  %v3945_v12 = vld [vmem:[%s17991_s19 + $0x920] sm:$0x11]  ;;  %v3690_v13 = vld [vmem:[%s17991_s19 + $0x128] sm:$0xff]  ;;  %v3209_v29 = vpack.c.bf16 %v749_v1, %v749_v1  ;;  %v3211_v30 = vpack.c.bf16 %v756_v2, %v756_v2 }
  0xc8   : > { %v3210_v17 = vpack.c.bf16 %v757_v6, %v757_v6  ;;  %v3212_v18 = vpack.c.bf16 %v758_v7, %v758_v7  ;;  %v17116_v21 = vcombine.high %v3689_v9, %v3945_v12  ;;  %v17118_v22 = vcombine.high %v3690_v13, %v3946_v14 }
  0xc9   : > { %v17115_v34 = vcombine.low %v3689_v9, %v3945_v12  ;;  %v17117_v35 = vcombine.low %v3690_v13, %v3946_v14  ;;  %v219_v14 = vld [vmem:[%s17985_s28 + $0xb0] sm:$0xff] }
  0xcc   : > { %7798 = vmatmul.mubr.bf16.vlgmr.msra.gmra.mrb[52].mxu0 %v3193_v19  ;;  %7838 = vmatmul.mubr.bf16.vlgmr.msra.gmra.mrb[52].mxu1 %v3195_v20  ;;  %v766_v19 = vrot.slane %v215_v5, %v18012_v24  ;;  %v773_v20 = vrot.slane %v759_v8, %v18012_v24  ;;  %v3952_v5 = vld [vmem:[%s17991_s19 + $0x958] sm:$0x11] }
  0xcd   : > { %7846 = vmatpush1.bf16.xpose.msra.mxu0 %v17099_v25  ;;  %7886 = vmatpush1.bf16.xpose.msra.mxu1 %v17101_v26 }
  0xce   : > { %7877 = vmatprep.mubr.bf16.mxu0 %v3198_v27  ;;  %7917 = vmatprep.mubr.bf16.mxu1 %v3200_v28  ;;  %v774_v25 = vcombine.high %v766_v19, %v766_v19  ;;  %v775_v26 = vcombine.high %v773_v20, %v773_v20  ;;  %v776_v27 = vcombine.high %v216_v23, %v216_v23  ;;  %v3691_v28 = vld [vmem:[%s17991_s19 + $0x130] sm:$0xff] }
  0xcf   : > { %7925 = vmatprep.subr.bf16.mxu0 %v17104_v31  ;;  %7965 = vmatprep.subr.bf16.mxu1 %v17106_v32  ;;  %v3947_v31 = vld [vmem:[%s17991_s19 + $0x930] sm:$0x11]  ;;  %v3692_v32 = vld [vmem:[%s17991_s19 + $0x138] sm:$0xff]  ;;  %v3213_v47 = vpack.c.bf16 %v766_v19, %v766_v19  ;;  %v3215_v48 = vpack.c.bf16 %v773_v20, %v773_v20 }
  0xd0   : > { %v3214_v36 = vpack.c.bf16 %v774_v25, %v774_v25  ;;  %v3216_v37 = vpack.c.bf16 %v775_v26, %v775_v26  ;;  %v17120_v40 = vcombine.high %v3691_v28, %v3947_v31  ;;  %v17122_v41 = vcombine.high %v3692_v32, %v3948_v33 }
  0xd1   : > { %v17119_v52 = vcombine.low %v3691_v28, %v3947_v31  ;;  %v17121_v53 = vcombine.low %v3692_v32, %v3948_v33  ;;  %v220_v33 = vld [vmem:[%s17985_s28 + $0xb8] sm:$0xff] }
  0xd4   : > { %7878 = vmatmul.mubr.bf16.vlgmr.msra.gmra.mrb[56].mxu0 %v3197_v38  ;;  %7918 = vmatmul.mubr.bf16.vlgmr.msra.gmra.mrb[56].mxu1 %v3199_v39  ;;  %v783_v38 = vrot.slane %v216_v23, %v18012_v24  ;;  %v790_v39 = vrot.slane %v776_v27, %v18012_v24  ;;  %v3954_v23 = vld [vmem:[%s17991_s19 + $0x968] sm:$0x11] }
  0xd5   : > { %7926 = vmatpush1.bf16.xpose.msra.mxu0 %v17103_v43  ;;  %7966 = vmatpush1.bf16.xpose.msra.mxu1 %v17105_v44 }
  0xd6   : > { %7957 = vmatprep.mubr.bf16.mxu0 %v3202_v45  ;;  %7997 = vmatprep.mubr.bf16.mxu1 %v3204_v46  ;;  %v791_v43 = vcombine.high %v783_v38, %v783_v38  ;;  %v792_v44 = vcombine.high %v790_v39, %v790_v39  ;;  %v793_v45 = vcombine.high %v217_v42, %v217_v42  ;;  %v3693_v46 = vld [vmem:[%s17991_s19 + $0x140] sm:$0xff] }
  0xd7   : > { %8005 = vmatprep.subr.bf16.mxu0 %v17108_v49  ;;  %8045 = vmatprep.subr.bf16.mxu1 %v17110_v50  ;;  %v3949_v49 = vld [vmem:[%s17991_s19 + $0x940] sm:$0x11]  ;;  %v3694_v50 = vld [vmem:[%s17991_s19 + $0x148] sm:$0xff]  ;;  %v3217_v1 = vpack.c.bf16 %v783_v38, %v783_v38  ;;  %v3219_v2 = vpack.c.bf16 %v790_v39, %v790_v39 }
  0xd8   : > { %v3218_v54 = vpack.c.bf16 %v791_v43, %v791_v43  ;;  %v3220_v55 = vpack.c.bf16 %v792_v44, %v792_v44  ;;  %v17124_v58 = vcombine.high %v3693_v46, %v3949_v49  ;;  %v17126_v59 = vcombine.high %v3694_v50, %v3950_v51 }
  0xd9   : > { %v17123_v6 = vcombine.low %v3693_v46, %v3949_v49  ;;  %v17125_v7 = vcombine.low %v3694_v50, %v3950_v51  ;;  %v221_v51 = vld [vmem:[%s17985_s28 + $0xc0] sm:$0xff] }
  0xdc   : > { %7958 = vmatmul.mubr.bf16.vlgmr.msra.gmra.mrb[60].mxu0 %v3201_v56  ;;  %7998 = vmatmul.mubr.bf16.vlgmr.msra.gmra.mrb[60].mxu1 %v3203_v57  ;;  %v800_v56 = vrot.slane %v217_v42, %v18012_v24  ;;  %v807_v57 = vrot.slane %v793_v45, %v18012_v24  ;;  %v3956_v42 = vld [vmem:[%s17991_s19 + $0x978] sm:$0x11] }
  0xdd   : > { %8006 = vmatpush1.bf16.xpose.msra.mxu0 %v17107_v61  ;;  %8046 = vmatpush1.bf16.xpose.msra.mxu1 %v17109_v62 }
  0xde   : > { %8037 = vmatprep.mubr.bf16.mxu0 %v3206_v63  ;;  %8077 = vmatprep.mubr.bf16.mxu1 %v3208_v0  ;;  %v808_v61 = vcombine.high %v800_v56, %v800_v56  ;;  %v809_v62 = vcombine.high %v807_v57, %v807_v57  ;;  %v810_v63 = vcombine.high %v218_v60, %v218_v60  ;;  %v3695_v0 = vld [vmem:[%s17991_s19 + $0x150] sm:$0xff] }
  0xdf   : > { %8085 = vmatprep.subr.bf16.mxu0 %v17112_v3  ;;  %8125 = vmatprep.subr.bf16.mxu1 %v17114_v4  ;;  %v3951_v3 = vld [vmem:[%s17991_s19 + $0x950] sm:$0x11]  ;;  %v3696_v4 = vld [vmem:[%s17991_s19 + $0x158] sm:$0xff]  ;;  %v3221_v19 = vpack.c.bf16 %v800_v56, %v800_v56  ;;  %v3223_v20 = vpack.c.bf16 %v807_v57, %v807_v57 }
  0xe0   : > { %v3222_v8 = vpack.c.bf16 %v808_v61, %v808_v61  ;;  %v3224_v9 = vpack.c.bf16 %v809_v62, %v809_v62  ;;  %v17128_v12 = vcombine.high %v3695_v0, %v3951_v3  ;;  %v17130_v13 = vcombine.high %v3696_v4, %v3952_v5 }
  0xe1   : > { %v17127_v25 = vcombine.low %v3695_v0, %v3951_v3  ;;  %v17129_v26 = vcombine.low %v3696_v4, %v3952_v5  ;;  %v222_v5 = vld [vmem:[%s17985_s28 + $0xc8] sm:$0xff] }
  0xe4   : > { %8038 = vmatmul.mubr.bf16.vlgmr.msra.gmra.mrb[64].mxu0 %v3205_v10  ;;  %8078 = vmatmul.mubr.bf16.vlgmr.msra.gmra.mrb[64].mxu1 %v3207_v11  ;;  %v817_v10 = vrot.slane %v218_v60, %v18012_v24  ;;  %v824_v11 = vrot.slane %v810_v63, %v18012_v24  ;;  %v3958_v60 = vld [vmem:[%s17991_s19 + $0x988] sm:$0x11] }
  0xe5   : > { %8086 = vmatpush1.bf16.xpose.msra.mxu0 %v17111_v15  ;;  %8126 = vmatpush1.bf16.xpose.msra.mxu1 %v17113_v16 }
  0xe6   : > { %8117 = vmatprep.mubr.bf16.mxu0 %v3210_v17  ;;  %8157 = vmatprep.mubr.bf16.mxu1 %v3212_v18  ;;  %v825_v15 = vcombine.high %v817_v10, %v817_v10  ;;  %v826_v16 = vcombine.high %v824_v11, %v824_v11  ;;  %v827_v17 = vcombine.high %v219_v14, %v219_v14  ;;  %v3697_v18 = vld [vmem:[%s17991_s19 + $0x160] sm:$0xff] }
  0xe7   : > { %8165 = vmatprep.subr.bf16.mxu0 %v17116_v21  ;;  %8205 = vmatprep.subr.bf16.mxu1 %v17118_v22  ;;  %v3953_v21 = vld [vmem:[%s17991_s19 + $0x960] sm:$0x11]  ;;  %v3698_v22 = vld [vmem:[%s17991_s19 + $0x168] sm:$0xff]  ;;  %v3225_v38 = vpack.c.bf16 %v817_v10, %v817_v10  ;;  %v3227_v39 = vpack.c.bf16 %v824_v11, %v824_v11 }
  0xe8   : > { %v3226_v27 = vpack.c.bf16 %v825_v15, %v825_v15  ;;  %v3228_v28 = vpack.c.bf16 %v826_v16, %v826_v16  ;;  %v17132_v31 = vcombine.high %v3697_v18, %v3953_v21  ;;  %v17134_v32 = vcombine.high %v3698_v22, %v3954_v23 }
  0xe9   : > { %v17131_v43 = vcombine.low %v3697_v18, %v3953_v21  ;;  %v17133_v44 = vcombine.low %v3698_v22, %v3954_v23  ;;  %v223_v23 = vld [vmem:[%s17985_s28 + $0xd0] sm:$0xff] }
  0xec   : > { %8118 = vmatmul.mubr.bf16.vlgmr.msra.gmra.mrb[68].mxu0 %v3209_v29  ;;  %8158 = vmatmul.mubr.bf16.vlgmr.msra.gmra.mrb[68].mxu1 %v3211_v30  ;;  %v834_v29 = vrot.slane %v219_v14, %v18012_v24  ;;  %v841_v30 = vrot.slane %v827_v17, %v18012_v24  ;;  %v3960_v14 = vld [vmem:[%s17991_s19 + $0x998] sm:$0x11] }
  0xed   : > { %8166 = vmatpush1.bf16.xpose.msra.mxu0 %v17115_v34  ;;  %8206 = vmatpush1.bf16.xpose.msra.mxu1 %v17117_v35 }
  0xee   : > { %8197 = vmatprep.mubr.bf16.mxu0 %v3214_v36  ;;  %8237 = vmatprep.mubr.bf16.mxu1 %v3216_v37  ;;  %v842_v34 = vcombine.high %v834_v29, %v834_v29  ;;  %v843_v35 = vcombine.high %v841_v30, %v841_v30  ;;  %v844_v36 = vcombine.high %v220_v33, %v220_v33  ;;  %v3699_v37 = vld [vmem:[%s17991_s19 + $0x170] sm:$0xff] }
  0xef   : > { %8245 = vmatprep.subr.bf16.mxu0 %v17120_v40  ;;  %8285 = vmatprep.subr.bf16.mxu1 %v17122_v41  ;;  %v3955_v40 = vld [vmem:[%s17991_s19 + $0x970] sm:$0x11]  ;;  %v3700_v41 = vld [vmem:[%s17991_s19 + $0x178] sm:$0xff]  ;;  %v3229_v56 = vpack.c.bf16 %v834_v29, %v834_v29  ;;  %v3231_v57 = vpack.c.bf16 %v841_v30, %v841_v30 }
  0xf0   : > { %v3230_v45 = vpack.c.bf16 %v842_v34, %v842_v34  ;;  %v3232_v46 = vpack.c.bf16 %v843_v35, %v843_v35  ;;  %v17136_v49 = vcombine.high %v3699_v37, %v3955_v40  ;;  %v17138_v50 = vcombine.high %v3700_v41, %v3956_v42 }
  0xf1   : > { %v17135_v61 = vcombine.low %v3699_v37, %v3955_v40  ;;  %v17137_v62 = vcombine.low %v3700_v41, %v3956_v42  ;;  %v224_v42 = vld [vmem:[%s17985_s28 + $0xd8] sm:$0xff] }
  0xf4   : > { %8198 = vmatmul.mubr.bf16.vlgmr.msra.gmra.mrb[72].mxu0 %v3213_v47  ;;  %8238 = vmatmul.mubr.bf16.vlgmr.msra.gmra.mrb[72].mxu1 %v3215_v48  ;;  %v851_v47 = vrot.slane %v220_v33, %v18012_v24  ;;  %v858_v48 = vrot.slane %v844_v36, %v18012_v24  ;;  %v3962_v33 = vld [vmem:[%s17991_s19 + $0x9a8] sm:$0x11] }
  0xf5   : > { %8246 = vmatpush1.bf16.xpose.msra.mxu0 %v17119_v52  ;;  %8286 = vmatpush1.bf16.xpose.msra.mxu1 %v17121_v53 }
  0xf6   : > { %8277 = vmatprep.mubr.bf16.mxu0 %v3218_v54  ;;  %8317 = vmatprep.mubr.bf16.mxu1 %v3220_v55  ;;  %v859_v52 = vcombine.high %v851_v47, %v851_v47  ;;  %v860_v53 = vcombine.high %v858_v48, %v858_v48  ;;  %v861_v54 = vcombine.high %v221_v51, %v221_v51  ;;  %v3701_v55 = vld [vmem:[%s17991_s19 + $0x180] sm:$0xff] }
  0xf7   : > { %8325 = vmatprep.subr.bf16.mxu0 %v17124_v58  ;;  %8365 = vmatprep.subr.bf16.mxu1 %v17126_v59  ;;  %v3957_v58 = vld [vmem:[%s17991_s19 + $0x980] sm:$0x11]  ;;  %v3702_v59 = vld [vmem:[%s17991_s19 + $0x188] sm:$0xff]  ;;  %v3233_v10 = vpack.c.bf16 %v851_v47, %v851_v47  ;;  %v3235_v11 = vpack.c.bf16 %v858_v48, %v858_v48 }
  0xf8   : > { %v3234_v63 = vpack.c.bf16 %v859_v52, %v859_v52  ;;  %v3236_v0 = vpack.c.bf16 %v860_v53, %v860_v53  ;;  %v17140_v3 = vcombine.high %v3701_v55, %v3957_v58  ;;  %v17142_v4 = vcombine.high %v3702_v59, %v3958_v60 }
  0xf9   : > { %v17139_v15 = vcombine.low %v3701_v55, %v3957_v58  ;;  %v17141_v16 = vcombine.low %v3702_v59, %v3958_v60  ;;  %v225_v60 = vld [vmem:[%s17985_s28 + $0xe0] sm:$0xff] }
  0xfc   : > { %8278 = vmatmul.mubr.bf16.vlgmr.msra.gmra.mrb[76].mxu0 %v3217_v1  ;;  %8318 = vmatmul.mubr.bf16.vlgmr.msra.gmra.mrb[76].mxu1 %v3219_v2  ;;  %v868_v1 = vrot.slane %v221_v51, %v18012_v24  ;;  %v875_v2 = vrot.slane %v861_v54, %v18012_v24  ;;  %v3964_v51 = vld [vmem:[%s17991_s19 + $0x9b8] sm:$0x11] }
  0xfd   : > { %8326 = vmatpush1.bf16.xpose.msra.mxu0 %v17123_v6  ;;  %8366 = vmatpush1.bf16.xpose.msra.mxu1 %v17125_v7 }
  0xfe   : > { %8357 = vmatprep.mubr.bf16.mxu0 %v3222_v8  ;;  %8397 = vmatprep.mubr.bf16.mxu1 %v3224_v9  ;;  %v876_v6 = vcombine.high %v868_v1, %v868_v1  ;;  %v877_v7 = vcombine.high %v875_v2, %v875_v2  ;;  %v878_v8 = vcombine.high %v222_v5, %v222_v5  ;;  %v3703_v9 = vld [vmem:[%s17991_s19 + $0x190] sm:$0xff] }
  0xff   : > { %8405 = vmatprep.subr.bf16.mxu0 %v17128_v12  ;;  %8445 = vmatprep.subr.bf16.mxu1 %v17130_v13  ;;  %v3959_v12 = vld [vmem:[%s17991_s19 + $0x990] sm:$0x11]  ;;  %v3704_v13 = vld [vmem:[%s17991_s19 + $0x198] sm:$0xff]  ;;  %v3237_v29 = vpack.c.bf16 %v868_v1, %v868_v1  ;;  %v3239_v30 = vpack.c.bf16 %v875_v2, %v875_v2 }
 0x100   : > { %v3238_v17 = vpack.c.bf16 %v876_v6, %v876_v6  ;;  %v3240_v18 = vpack.c.bf16 %v877_v7, %v877_v7  ;;  %v17144_v21 = vcombine.high %v3703_v9, %v3959_v12  ;;  %v17146_v22 = vcombine.high %v3704_v13, %v3960_v14 }
 0x101   : > { %v17143_v34 = vcombine.low %v3703_v9, %v3959_v12  ;;  %v17145_v35 = vcombine.low %v3704_v13, %v3960_v14  ;;  %v226_v14 = vld [vmem:[%s17985_s28 + $0xe8] sm:$0xff] }
 0x104   : > { %8358 = vmatmul.mubr.bf16.vlgmr.msra.gmra.mrb[80].mxu0 %v3221_v19  ;;  %8398 = vmatmul.mubr.bf16.vlgmr.msra.gmra.mrb[80].mxu1 %v3223_v20  ;;  %v885_v19 = vrot.slane %v222_v5, %v18012_v24  ;;  %v892_v20 = vrot.slane %v878_v8, %v18012_v24  ;;  %v3966_v5 = vld [vmem:[%s17991_s19 + $0x9c8] sm:$0x11] }
 0x105   : > { %8406 = vmatpush1.bf16.xpose.msra.mxu0 %v17127_v25  ;;  %8446 = vmatpush1.bf16.xpose.msra.mxu1 %v17129_v26 }
 0x106   : > { %8437 = vmatprep.mubr.bf16.mxu0 %v3226_v27  ;;  %8477 = vmatprep.mubr.bf16.mxu1 %v3228_v28  ;;  %v893_v25 = vcombine.high %v885_v19, %v885_v19  ;;  %v894_v26 = vcombine.high %v892_v20, %v892_v20  ;;  %v895_v27 = vcombine.high %v223_v23, %v223_v23  ;;  %v3705_v28 = vld [vmem:[%s17991_s19 + $0x1a0] sm:$0xff] }
 0x107   : > { %8485 = vmatprep.subr.bf16.mxu0 %v17132_v31  ;;  %8525 = vmatprep.subr.bf16.mxu1 %v17134_v32  ;;  %v3961_v31 = vld [vmem:[%s17991_s19 + $0x9a0] sm:$0x11]  ;;  %v3706_v32 = vld [vmem:[%s17991_s19 + $0x1a8] sm:$0xff]  ;;  %v3241_v47 = vpack.c.bf16 %v885_v19, %v885_v19  ;;  %v3243_v48 = vpack.c.bf16 %v892_v20, %v892_v20  ;;  %v3967_v20 = vld [vmem:[%s17991_s19 + $0x9d0] sm:$0x11] }
 0x108   : > { %v3242_v36 = vpack.c.bf16 %v893_v25, %v893_v25  ;;  %v3244_v37 = vpack.c.bf16 %v894_v26, %v894_v26  ;;  %v17148_v40 = vcombine.high %v3705_v28, %v3961_v31  ;;  %v17150_v41 = vcombine.high %v3706_v32, %v3962_v33 }
 0x109   : > { %v17147_v52 = vcombine.low %v3705_v28, %v3961_v31  ;;  %v17149_v53 = vcombine.low %v3706_v32, %v3962_v33  ;;  %v3712_v28 = vld [vmem:[%s17991_s19 + $0x1d8] sm:$0xff] }
 0x10c   : > { %8438 = vmatmul.mubr.bf16.vlgmr.msra.gmra.mrb[84].mxu0 %v3225_v38  ;;  %8478 = vmatmul.mubr.bf16.vlgmr.msra.gmra.mrb[84].mxu1 %v3227_v39  ;;  %v902_v38 = vrot.slane %v223_v23, %v18012_v24  ;;  %v909_v39 = vrot.slane %v895_v27, %v18012_v24  ;;  %v3711_v27 = vld [vmem:[%s17991_s19 + $0x1d0] sm:$0xff] }
 0x10d   : > { %8486 = vmatpush1.bf16.xpose.msra.mxu0 %v17131_v43  ;;  %8526 = vmatpush1.bf16.xpose.msra.mxu1 %v17133_v44 }
 0x10e   : > { %8517 = vmatprep.mubr.bf16.mxu0 %v3230_v45  ;;  %8557 = vmatprep.mubr.bf16.mxu1 %v3232_v46  ;;  %v910_v43 = vcombine.high %v902_v38, %v902_v38  ;;  %v911_v44 = vcombine.high %v909_v39, %v909_v39  ;;  %v912_v45 = vcombine.high %v224_v42, %v224_v42  ;;  %v3707_v46 = vld [vmem:[%s17991_s19 + $0x1b0] sm:$0xff] }
 0x10f   : > { %8565 = vmatprep.subr.bf16.mxu0 %v17136_v49  ;;  %8605 = vmatprep.subr.bf16.mxu1 %v17138_v50  ;;  %v3963_v49 = vld [vmem:[%s17991_s19 + $0x9b0] sm:$0x11]  ;;  %v3708_v50 = vld [vmem:[%s17991_s19 + $0x1b8] sm:$0xff]  ;;  %v3245_v1 = vpack.c.bf16 %v902_v38, %v902_v38  ;;  %v3247_v2 = vpack.c.bf16 %v909_v39, %v909_v39  ;;  %v18233_v38 = vrot.slane %v226_v14, %v18012_v24 }
 0x110   : > { %v3246_v54 = vpack.c.bf16 %v910_v43, %v910_v43  ;;  %v3248_v55 = vpack.c.bf16 %v911_v44, %v911_v44  ;;  %v17152_v58 = vcombine.high %v3707_v46, %v3963_v49  ;;  %v17154_v59 = vcombine.high %v3708_v50, %v3964_v51 }
 0x111   : > { %v17151_v6 = vcombine.low %v3707_v46, %v3963_v49  ;;  %v17153_v7 = vcombine.low %v3708_v50, %v3964_v51  ;;  %v961_v43 = vcombine.high %v18233_v38, %v18233_v38 }
 0x114   : > { %8518 = vmatmul.mubr.bf16.vlgmr.msra.gmra.mrb[88].mxu0 %v3229_v56  ;;  %8558 = vmatmul.mubr.bf16.vlgmr.msra.gmra.mrb[88].mxu1 %v3231_v57  ;;  %v18199_v56 = vrot.slane %v224_v42, %v18012_v24  ;;  %v18202_v57 = vrot.slane %v912_v45, %v18012_v24  ;;  %v227_v42 = vld [vmem:[%s17985_s28 + $0xf0] sm:$0xff] }
 0x115   : > { %8566 = vmatpush1.bf16.xpose.msra.mxu0 %v17135_v61  ;;  %8606 = vmatpush1.bf16.xpose.msra.mxu1 %v17137_v62  ;;  %v963_v45 = vcombine.high %v227_v42, %v227_v42 }
 0x116   : > { %8597 = vmatprep.mubr.bf16.mxu0 %v3234_v63  ;;  %8637 = vmatprep.mubr.bf16.mxu1 %v3236_v0  ;;  %v927_v61 = vcombine.high %v18199_v56, %v18199_v56  ;;  %v928_v62 = vcombine.high %v18202_v57, %v18202_v57  ;;  %v929_v63 = vcombine.high %v225_v60, %v225_v60  ;;  %v3709_v0 = vld [vmem:[%s17991_s19 + $0x1c0] sm:$0xff] }
 0x117   : > { %8645 = vmatprep.subr.bf16.mxu0 %v17140_v3  ;;  %8685 = vmatprep.subr.bf16.mxu1 %v17142_v4  ;;  %v3965_v3 = vld [vmem:[%s17991_s19 + $0x9c0] sm:$0x11]  ;;  %v3710_v4 = vld [vmem:[%s17991_s19 + $0x1c8] sm:$0xff]  ;;  %v3249_v25 = vpack.c.bf16 %v18199_v56, %v18199_v56  ;;  %v3251_v26 = vpack.c.bf16 %v18202_v57, %v18202_v57 }
 0x118   : > { %v3250_v8 = vpack.c.bf16 %v927_v61, %v927_v61  ;;  %v3252_v9 = vpack.c.bf16 %v928_v62, %v928_v62  ;;  %v17156_v12 = vcombine.high %v3709_v0, %v3965_v3  ;;  %v17158_v13 = vcombine.high %v3710_v4, %v3966_v5  ;;  %v3970_v56 = vld [vmem:[%s17991_s19 + $0x9e8] sm:$0x11] }
 0x119   : > { %v17155_v32 = vcombine.low %v3709_v0, %v3965_v3  ;;  %v17157_v33 = vcombine.low %v3710_v4, %v3966_v5  ;;  %v18252_v61 = vrot.slane %v227_v42, %v18012_v24  ;;  %v18255_v3 = vrot.slane %v963_v45, %v18012_v24 }
 0x11b   : > { %v3261_v45 = vpack.c.bf16 %v18252_v61, %v18252_v61 }
 0x11c   : > { %8598 = vmatmul.mubr.bf16.vlgmr.msra.gmra.mrb[92].mxu0 %v3233_v10  ;;  %8638 = vmatmul.mubr.bf16.vlgmr.msra.gmra.mrb[92].mxu1 %v3235_v11  ;;  %v18214_v10 = vrot.slane %v225_v60, %v18012_v24  ;;  %v18217_v11 = vrot.slane %v929_v63, %v18012_v24 }
 0x11d   : > { %8646 = vmatpush1.bf16.xpose.msra.mxu0 %v17139_v15  ;;  %8686 = vmatpush1.bf16.xpose.msra.mxu1 %v17141_v16 }
 0x11e   : > { %8677 = vmatprep.mubr.bf16.mxu0 %v3238_v17  ;;  %8717 = vmatprep.mubr.bf16.mxu1 %v3240_v18  ;;  %v944_v15 = vcombine.high %v18214_v10, %v18214_v10  ;;  %v945_v16 = vcombine.high %v18217_v11, %v18217_v11  ;;  %v946_v17 = vcombine.high %v226_v14, %v226_v14 }
 0x11f   : > { %8725 = vmatprep.subr.bf16.mxu0 %v17144_v21  ;;  %8765 = vmatprep.subr.bf16.mxu1 %v17146_v22 }
 0x120   : > { %v18236_v39 = vrot.slane %v946_v17, %v18012_v24 }
 0x122   : > { %v962_v44 = vcombine.high %v18236_v39, %v18236_v39  ;;  %v3259_v17 = vpack.c.bf16 %v18236_v39, %v18236_v39 }
 0x124   : > { %8678 = vmatmul.mubr.bf16.vlgmr.msra.gmra.mrb[96].mxu0 %v3237_v29  ;;  %8718 = vmatmul.mubr.bf16.vlgmr.msra.gmra.mrb[96].mxu1 %v3239_v30  ;;  %v3968_v29 = vld [vmem:[%s17991_s19 + $0x9d8] sm:$0x11] }
 0x125   : > { %8726 = vmatpush1.bf16.xpose.msra.mxu0 %v17143_v34  ;;  %8766 = vmatpush1.bf16.xpose.msra.mxu1 %v17145_v35  ;;  %v17161_v60 = vcombine.low %v3712_v28, %v3968_v29 }
 0x126   : > { %8757 = vmatprep.mubr.bf16.mxu0 %v3242_v36  ;;  %8797 = vmatprep.mubr.bf16.mxu1 %v3244_v37  ;;  %v3254_v36 = vpack.c.bf16 %v944_v15, %v944_v15  ;;  %v3256_v37 = vpack.c.bf16 %v945_v16, %v945_v16  ;;  %v3257_v16 = vpack.c.bf16 %v18233_v38, %v18233_v38 }
 0x127   : > { %8805 = vmatprep.subr.bf16.mxu0 %v17148_v40  ;;  %8845 = vmatprep.subr.bf16.mxu1 %v17150_v41  ;;  %v17160_v40 = vcombine.high %v3711_v27, %v3967_v20  ;;  %v17162_v41 = vcombine.high %v3712_v28, %v3968_v29 }
 0x12c   : > { %8758 = vmatmul.mubr.bf16.vlgmr.msra.gmra.mrb[100].mxu0 %v3241_v47  ;;  %8798 = vmatmul.mubr.bf16.vlgmr.msra.gmra.mrb[100].mxu1 %v3243_v48  ;;  %v3969_v48 = vld [vmem:[%s17991_s19 + $0x9e0] sm:$0x11] }
 0x12d   : > { %8806 = vmatpush1.bf16.xpose.msra.mxu0 %v17147_v52  ;;  %8846 = vmatpush1.bf16.xpose.msra.mxu1 %v17149_v53  ;;  %v3253_v52 = vpack.c.bf16 %v18214_v10, %v18214_v10  ;;  %v3255_v53 = vpack.c.bf16 %v18217_v11, %v18217_v11 }
 0x12e   : > { %8837 = vmatprep.mubr.bf16.mxu0 %v3246_v54  ;;  %8877 = vmatprep.mubr.bf16.mxu1 %v3248_v55  ;;  %v3713_v54 = vld [vmem:[%s17991_s19 + $0x1e0] sm:$0xff]  ;;  %v3714_v55 = vld [vmem:[%s17991_s19 + $0x1e8] sm:$0xff] }
 0x12f   : > { %8885 = vmatprep.subr.bf16.mxu0 %v17152_v58  ;;  %8925 = vmatprep.subr.bf16.mxu1 %v17154_v59  ;;  %v17159_v59 = vcombine.low %v3711_v27, %v3967_v20  ;;  %v17164_v4 = vcombine.high %v3713_v54, %v3969_v48  ;;  %v17166_v5 = vcombine.high %v3714_v55, %v3970_v56  ;;  %v3972_v20 = vld [vmem:[%s17991_s19 + $0x9f8] sm:$0x11] }
 0x134   : > { %8838 = vmatmul.mubr.bf16.vlgmr.msra.gmra.mrb[104].mxu0 %v3245_v1  ;;  %8878 = vmatmul.mubr.bf16.vlgmr.msra.gmra.mrb[104].mxu1 %v3247_v2  ;;  %v3258_v1 = vpack.c.bf16 %v961_v43, %v961_v43  ;;  %v3260_v2 = vpack.c.bf16 %v962_v44, %v962_v44 }
 0x135   : > { %8886 = vmatpush1.bf16.xpose.msra.mxu0 %v17151_v6  ;;  %8926 = vmatpush1.bf16.xpose.msra.mxu1 %v17153_v7  ;;  %v228_v6 = vld [vmem:[%s17985_s28 + $0xf8] sm:$0xff]  ;;  %v978_v7 = vcombine.high %v18252_v61, %v18252_v61 }
 0x136   : > { %8917 = vmatprep.mubr.bf16.mxu0 %v3250_v8  ;;  %8957 = vmatprep.mubr.bf16.mxu1 %v3252_v9  ;;  %v979_v8 = vcombine.high %v18255_v3, %v18255_v3  ;;  %v980_v9 = vcombine.high %v228_v6, %v228_v6 }
 0x137   : > { %v6759_v18 = vpop.f32.mrb[0].mxu0  ;;  %v6799_v19 = vpop.f32.mrb[0].mxu1  ;;  %8965 = vmatprep.subr.bf16.mxu0 %v17156_v12  ;;  %9005 = vmatprep.subr.bf16.mxu1 %v17158_v13  ;;  %v3971_v12 = vld [vmem:[%s17991_s19 + $0x9f0] sm:$0x11] }
 0x138   : > { %v6800_v21 = vadd.f32 %v6799_v19, %v6759_v18  ;;  %v6761_v22 = vpop.f32.mrb[1].mxu0  ;;  %v6801_v23 = vpop.f32.mrb[1].mxu1  ;;  %v3715_v18 = vld [vmem:[%s17991_s19 + $0x1f0] sm:$0xff]  ;;  %v3716_v19 = vld [vmem:[%s17991_s19 + $0x1f8] sm:$0xff] }
 0x139   : > { %v6762_v30 = vpop.f32.mrb[2].mxu0  ;;  %v6802_v31 = vpop.f32.mrb[2].mxu1  ;;  %v17163_v23 = vcombine.low %v3713_v54, %v3969_v48  ;;  %v3718_v48 = vld [vmem:[%s17991_s19 + $0x208] sm:$0xff] }
 0x13a   : > { %v6763_v34 = vpop.f32.mrb[3].mxu0  ;;  %v6803_v35 = vpop.f32.mrb[3].mxu1  ;;  %v3264_v30 = vpack.c.bf16 %v979_v8, %v979_v8  ;;  %v18271_v31 = vrot.slane %v228_v6, %v18012_v24 }
 0x13b   : > { %v17170_v34 = vcombine.high %v3716_v19, %v3972_v20  ;;  %v229_v35 = vld [vmem:[%s17985_s28 + $0x100] sm:$0xff] }
 0x13c   : > { %8918 = vmatmul.mubr.bf16.vlgmr.msra.gmra.mrb[108].mxu0 %v3249_v25  ;;  %8958 = vmatmul.mubr.bf16.vlgmr.msra.gmra.mrb[108].mxu1 %v3251_v26  ;;  %v17165_v25 = vcombine.low %v3714_v55, %v3970_v56  ;;  %v3262_v26 = vpack.c.bf16 %v978_v7, %v978_v7  ;;  %v997_v38 = vcombine.high %v229_v35, %v229_v35 }
 0x13d   : > { %8966 = vmatpush1.bf16.xpose.msra.mxu0 %v17155_v32  ;;  %9006 = vmatpush1.bf16.xpose.msra.mxu1 %v17157_v33  ;;  %v18274_v32 = vrot.slane %v980_v9, %v18012_v24  ;;  %v17168_v33 = vcombine.high %v3715_v18, %v3971_v12  ;;  %v18290_v54 = vrot.slane %v229_v35, %v18012_v24 }
 0x13e   : > { %8997 = vmatprep.mubr.bf16.mxu0 %v3254_v36  ;;  %9037 = vmatprep.mubr.bf16.mxu1 %v3256_v37  ;;  %v995_v36 = vcombine.high %v18271_v31, %v18271_v31  ;;  %v3265_v9 = vpack.c.bf16 %v18271_v31, %v18271_v31 }
 0x13f   : > { %v6839_v46 = vpop.f32.mrb[4].mxu0  ;;  %v6879_v47 = vpop.f32.mrb[4].mxu1  ;;  %9045 = vmatprep.subr.bf16.mxu0 %v17160_v40  ;;  %9085 = vmatprep.subr.bf16.mxu1 %v17162_v41  ;;  %v996_v37 = vcombine.high %v18274_v32, %v18274_v32  ;;  %v3973_v41 = vld [vmem:[%s17991_s19 + $0xa00] sm:$0x11] }
 0x140   : > { %v6840_v49 = vadd.f32 %v6839_v46, %v6800_v21  ;;  %v6841_v50 = vpop.f32.mrb[5].mxu0  ;;  %v6881_v51 = vpop.f32.mrb[5].mxu1  ;;  %v3263_v46 = vpack.c.bf16 %v18255_v3, %v18255_v3 }
 0x141   : > { %v6842_v57 = vpop.f32.mrb[6].mxu0  ;;  %v6882_v58 = vpop.f32.mrb[6].mxu1 }
 0x142   : > { %v6880_v62 = vadd.f32 %v6879_v47, %v6840_v49  ;;  %v6843_v63 = vpop.f32.mrb[7].mxu0  ;;  %v6883_v0 = vpop.f32.mrb[7].mxu1  ;;  %v3717_v47 = vld [vmem:[%s17991_s19 + $0x200] sm:$0xff]  ;;  %v3974_v49 = vld [vmem:[%s17991_s19 + $0xa08] sm:$0x11]  ;;  %v3266_v58 = vpack.c.bf16 %v995_v36, %v995_v36 }
 0x143   : > { %v17172_v61 = vcombine.high %v3717_v47, %v3973_v41  ;;  %v230_v63 = vld [vmem:[%s17985_s28 + $0x108] sm:$0xff]  ;;  %v1012_v0 = vcombine.high %v18290_v54, %v18290_v54 }
 0x144   : > { %8998 = vmatmul.mubr.bf16.vlgmr.msra.gmra.mrb[112].mxu0 %v3253_v52  ;;  %9038 = vmatmul.mubr.bf16.vlgmr.msra.gmra.mrb[112].mxu1 %v3255_v53  ;;  %v17167_v52 = vcombine.low %v3715_v18, %v3971_v12  ;;  %v17169_v53 = vcombine.low %v3716_v19, %v3972_v20  ;;  %v3720_v12 = vld [vmem:[%s17991_s19 + $0x218] sm:$0xff] }
 0x145   : > { %9046 = vmatpush1.bf16.xpose.msra.mxu0 %v17159_v59  ;;  %9086 = vmatpush1.bf16.xpose.msra.mxu1 %v17161_v60  ;;  %v3268_v59 = vpack.c.bf16 %v996_v37, %v996_v37  ;;  %v18293_v60 = vrot.slane %v997_v38, %v18012_v24  ;;  %v3270_v18 = vpack.c.bf16 %v1012_v0, %v1012_v0 }
 0x146   : > { %9077 = vmatprep.mubr.bf16.mxu0 %v3258_v1  ;;  %9117 = vmatprep.mubr.bf16.mxu1 %v3260_v2  ;;  %v1014_v2 = vcombine.high %v230_v63, %v230_v63  ;;  %v3269_v38 = vpack.c.bf16 %v18290_v54, %v18290_v54 }
 0x147   : > { %v6919_v10 = vpop.f32.mrb[8].mxu0  ;;  %v6959_v11 = vpop.f32.mrb[8].mxu1  ;;  %9125 = vmatprep.subr.bf16.mxu0 %v17164_v4  ;;  %9165 = vmatprep.subr.bf16.mxu1 %v17166_v5  ;;  %v1013_v1 = vcombine.high %v18293_v60, %v18293_v60  ;;  %v3975_v5 = vld [vmem:[%s17991_s19 + $0xa10] sm:$0x11] }
 0x148   : > { %v6920_v13 = vadd.f32 %v6919_v10, %v6880_v62  ;;  %v6921_v14 = vpop.f32.mrb[9].mxu0  ;;  %v6961_v15 = vpop.f32.mrb[9].mxu1  ;;  %v17174_v62 = vcombine.high %v3718_v48, %v3974_v49  ;;  %v3267_v10 = vpack.c.bf16 %v18274_v32, %v18274_v32 }
 0x149   : > { %v6922_v21 = vpop.f32.mrb[10].mxu0  ;;  %v6962_v22 = vpop.f32.mrb[10].mxu1 }
 0x14a   : > { %v6960_v27 = vadd.f32 %v6959_v11, %v6920_v13  ;;  %v6923_v28 = vpop.f32.mrb[11].mxu0  ;;  %v6963_v29 = vpop.f32.mrb[11].mxu1  ;;  %v3719_v11 = vld [vmem:[%s17991_s19 + $0x210] sm:$0xff]  ;;  %v3976_v13 = vld [vmem:[%s17991_s19 + $0xa18] sm:$0x11]  ;;  %v3272_v22 = vpack.c.bf16 %v1013_v1, %v1013_v1 }
 0x14b   : > { %v231_v28 = vld [vmem:[%s17985_s28 + $0x110] sm:$0xff] }
 0x14c   : > { %9078 = vmatmul.mubr.bf16.vlgmr.msra.gmra.mrb[116].mxu0 %v3257_v16  ;;  %9118 = vmatmul.mubr.bf16.vlgmr.msra.gmra.mrb[116].mxu1 %v3259_v17  ;;  %v17171_v16 = vcombine.low %v3717_v47, %v3973_v41  ;;  %v17173_v17 = vcombine.low %v3718_v48, %v3974_v49  ;;  %v1031_v31 = vcombine.high %v231_v28, %v231_v28  ;;  %v3722_v41 = vld [vmem:[%s17991_s19 + $0x228] sm:$0xff] }
 0x14d   : > { %9126 = vmatpush1.bf16.xpose.msra.mxu0 %v17163_v23  ;;  %9166 = vmatpush1.bf16.xpose.msra.mxu1 %v17165_v25  ;;  %v18309_v23 = vrot.slane %v230_v63, %v18012_v24  ;;  %v18312_v25 = vrot.slane %v1014_v2, %v18012_v24  ;;  %v18328_v47 = vrot.slane %v231_v28, %v18012_v24 }
 0x14e   : > { %9157 = vmatprep.mubr.bf16.mxu0 %v3262_v26  ;;  %9197 = vmatprep.mubr.bf16.mxu1 %v3264_v30  ;;  %v17176_v26 = vcombine.high %v3719_v11, %v3975_v5 }
 0x14f   : > { %v6999_v39 = vpop.f32.mrb[12].mxu0  ;;  %v7039_v40 = vpop.f32.mrb[12].mxu1  ;;  %9205 = vmatprep.subr.bf16.mxu0 %v17168_v33  ;;  %9245 = vmatprep.subr.bf16.mxu1 %v17170_v34  ;;  %v1029_v29 = vcombine.high %v18309_v23, %v18309_v23  ;;  %v1030_v30 = vcombine.high %v18312_v25, %v18312_v25  ;;  %v3977_v34 = vld [vmem:[%s17991_s19 + $0xa20] sm:$0x11]  ;;  %v3273_v2 = vpack.c.bf16 %v18309_v23, %v18309_v23 }
 0x150   : > { %v7000_v42 = vadd.f32 %v6999_v39, %v6960_v27  ;;  %v7001_v43 = vpop.f32.mrb[13].mxu0  ;;  %v7041_v44 = vpop.f32.mrb[13].mxu1  ;;  %v17178_v27 = vcombine.high %v3720_v12, %v3976_v13  ;;  %v3271_v39 = vpack.c.bf16 %v18293_v60, %v18293_v60 }
 0x151   : > { %v7002_v50 = vpop.f32.mrb[14].mxu0  ;;  %v7042_v51 = vpop.f32.mrb[14].mxu1 }
 0x152   : > { %v7040_v55 = vadd.f32 %v7039_v40, %v7000_v42  ;;  %v7003_v56 = vpop.f32.mrb[15].mxu0  ;;  %v7043_v57 = vpop.f32.mrb[15].mxu1  ;;  %v3721_v40 = vld [vmem:[%s17991_s19 + $0x220] sm:$0xff]  ;;  %v3978_v42 = vld [vmem:[%s17991_s19 + $0xa28] sm:$0x11]  ;;  %v3274_v51 = vpack.c.bf16 %v1029_v29, %v1029_v29 }
 0x153   : > { %v17180_v54 = vcombine.high %v3721_v40, %v3977_v34  ;;  %v232_v56 = vld [vmem:[%s17985_s28 + $0x118] sm:$0xff]  ;;  %v1046_v57 = vcombine.high %v18328_v47, %v18328_v47 }
 0x154   : > { %9158 = vmatmul.mubr.bf16.vlgmr.msra.gmra.mrb[120].mxu0 %v3261_v45  ;;  %9198 = vmatmul.mubr.bf16.vlgmr.msra.gmra.mrb[120].mxu1 %v3263_v46  ;;  %v17175_v45 = vcombine.low %v3719_v11, %v3975_v5  ;;  %v17177_v46 = vcombine.low %v3720_v12, %v3976_v13  ;;  %v3724_v5 = vld [vmem:[%s17991_s19 + $0x238] sm:$0xff] }
 0x155   : > { %9206 = vmatpush1.bf16.xpose.msra.mxu0 %v17167_v52  ;;  %9246 = vmatpush1.bf16.xpose.msra.mxu1 %v17169_v53  ;;  %v3276_v52 = vpack.c.bf16 %v1030_v30, %v1030_v30  ;;  %v18331_v53 = vrot.slane %v1031_v31, %v18012_v24  ;;  %v3278_v11 = vpack.c.bf16 %v1046_v57, %v1046_v57 }
 0x156   : > { %9237 = vmatprep.mubr.bf16.mxu0 %v3266_v58  ;;  %9277 = vmatprep.mubr.bf16.mxu1 %v3268_v59  ;;  %v1048_v59 = vcombine.high %v232_v56, %v232_v56  ;;  %v3277_v31 = vpack.c.bf16 %v18328_v47, %v18328_v47 }
 0x157   : > { %v7079_v3 = vpop.f32.mrb[16].mxu0  ;;  %v7119_v4 = vpop.f32.mrb[16].mxu1  ;;  %9285 = vmatprep.subr.bf16.mxu0 %v17172_v61  ;;  %9325 = vmatprep.subr.bf16.mxu1 %v17174_v62  ;;  %v1047_v58 = vcombine.high %v18331_v53, %v18331_v53  ;;  %v3979_v62 = vld [vmem:[%s17991_s19 + $0xa30] sm:$0x11] }
 0x158   : > { %v7080_v6 = vadd.f32 %v7079_v3, %v7040_v55  ;;  %v7081_v7 = vpop.f32.mrb[17].mxu0  ;;  %v7121_v8 = vpop.f32.mrb[17].mxu1  ;;  %v17182_v55 = vcombine.high %v3722_v41, %v3978_v42  ;;  %v3275_v3 = vpack.c.bf16 %v18312_v25, %v18312_v25 }
 0x159   : > { %v7082_v14 = vpop.f32.mrb[18].mxu0  ;;  %v7122_v15 = vpop.f32.mrb[18].mxu1 }
 0x15a   : > { %v7120_v19 = vadd.f32 %v7119_v4, %v7080_v6  ;;  %v7083_v20 = vpop.f32.mrb[19].mxu0  ;;  %v7123_v21 = vpop.f32.mrb[19].mxu1  ;;  %v3723_v4 = vld [vmem:[%s17991_s19 + $0x230] sm:$0xff]  ;;  %v3980_v6 = vld [vmem:[%s17991_s19 + $0xa38] sm:$0x11]  ;;  %v3280_v15 = vpack.c.bf16 %v1047_v58, %v1047_v58 }
 0x15b   : > { %v233_v20 = vld [vmem:[%s17985_s28 + $0x120] sm:$0xff] }
 0x15c   : > { %9238 = vmatmul.mubr.bf16.vlgmr.msra.gmra.mrb[124].mxu0 %v3265_v9  ;;  %9278 = vmatmul.mubr.bf16.vlgmr.msra.gmra.mrb[124].mxu1 %v3267_v10  ;;  %v17179_v9 = vcombine.low %v3721_v40, %v3977_v34  ;;  %v17181_v10 = vcombine.low %v3722_v41, %v3978_v42  ;;  %v1065_v23 = vcombine.high %v233_v20, %v233_v20  ;;  %v3726_v34 = vld [vmem:[%s17991_s19 + $0x248] sm:$0xff] }
 0x15d   : > { %9286 = vmatpush1.bf16.xpose.msra.mxu0 %v17171_v16  ;;  %9326 = vmatpush1.bf16.xpose.msra.mxu1 %v17173_v17  ;;  %v18347_v16 = vrot.slane %v232_v56, %v18012_v24  ;;  %v18350_v17 = vrot.slane %v1048_v59, %v18012_v24  ;;  %v18366_v40 = vrot.slane %v233_v20, %v18012_v24 }
 0x15e   : > { %9317 = vmatprep.mubr.bf16.mxu0 %v3270_v18  ;;  %9357 = vmatprep.mubr.bf16.mxu1 %v3272_v22  ;;  %v17184_v18 = vcombine.high %v3723_v4, %v3979_v62 }
 0x15f   : > { %v7159_v32 = vpop.f32.mrb[20].mxu0  ;;  %v7199_v33 = vpop.f32.mrb[20].mxu1  ;;  %9365 = vmatprep.subr.bf16.mxu0 %v17176_v26  ;;  %9405 = vmatprep.subr.bf16.mxu1 %v17178_v27  ;;  %v1063_v21 = vcombine.high %v18347_v16, %v18347_v16  ;;  %v1064_v22 = vcombine.high %v18350_v17, %v18350_v17  ;;  %v3981_v27 = vld [vmem:[%s17991_s19 + $0xa40] sm:$0x11]  ;;  %v3281_v59 = vpack.c.bf16 %v18347_v16, %v18347_v16 }
 0x160   : > { %v7160_v35 = vadd.f32 %v7159_v32, %v7120_v19  ;;  %v7161_v36 = vpop.f32.mrb[21].mxu0  ;;  %v7201_v37 = vpop.f32.mrb[21].mxu1  ;;  %v17186_v19 = vcombine.high %v3724_v5, %v3980_v6  ;;  %v3279_v32 = vpack.c.bf16 %v18331_v53, %v18331_v53 }
 0x161   : > { %v7162_v43 = vpop.f32.mrb[22].mxu0  ;;  %v7202_v44 = vpop.f32.mrb[22].mxu1 }
 0x162   : > { %v7200_v48 = vadd.f32 %v7199_v33, %v7160_v35  ;;  %v7163_v49 = vpop.f32.mrb[23].mxu0  ;;  %v7203_v50 = vpop.f32.mrb[23].mxu1  ;;  %v3725_v33 = vld [vmem:[%s17991_s19 + $0x240] sm:$0xff]  ;;  %v3982_v35 = vld [vmem:[%s17991_s19 + $0xa48] sm:$0x11]  ;;  %v3282_v44 = vpack.c.bf16 %v1063_v21, %v1063_v21 }
 0x163   : > { %v17188_v47 = vcombine.high %v3725_v33, %v3981_v27  ;;  %v234_v49 = vld [vmem:[%s17985_s28 + $0x128] sm:$0xff]  ;;  %v1080_v50 = vcombine.high %v18366_v40, %v18366_v40 }
 0x164   : > { %9318 = vmatmul.mubr.bf16.vlgmr.msra.gmra.mrb[128].mxu0 %v3269_v38  ;;  %9358 = vmatmul.mubr.bf16.vlgmr.msra.gmra.mrb[128].mxu1 %v3271_v39  ;;  %v17183_v38 = vcombine.low %v3723_v4, %v3979_v62  ;;  %v17185_v39 = vcombine.low %v3724_v5, %v3980_v6  ;;  %v3728_v62 = vld [vmem:[%s17991_s19 + $0x258] sm:$0xff] }
 0x165   : > { %9366 = vmatpush1.bf16.xpose.msra.mxu0 %v17175_v45  ;;  %9406 = vmatpush1.bf16.xpose.msra.mxu1 %v17177_v46  ;;  %v3284_v45 = vpack.c.bf16 %v1064_v22, %v1064_v22  ;;  %v18369_v46 = vrot.slane %v1065_v23, %v18012_v24  ;;  %v3286_v4 = vpack.c.bf16 %v1080_v50, %v1080_v50 }
 0x166   : > { %9397 = vmatprep.mubr.bf16.mxu0 %v3274_v51  ;;  %9437 = vmatprep.mubr.bf16.mxu1 %v3276_v52  ;;  %v1082_v52 = vcombine.high %v234_v49, %v234_v49  ;;  %v3285_v23 = vpack.c.bf16 %v18366_v40, %v18366_v40 }
 0x167   : > { %v7239_v60 = vpop.f32.mrb[24].mxu0  ;;  %v7279_v61 = vpop.f32.mrb[24].mxu1  ;;  %9445 = vmatprep.subr.bf16.mxu0 %v17180_v54  ;;  %9485 = vmatprep.subr.bf16.mxu1 %v17182_v55  ;;  %v1081_v51 = vcombine.high %v18369_v46, %v18369_v46  ;;  %v3983_v55 = vld [vmem:[%s17991_s19 + $0xa50] sm:$0x11] }
 0x168   : > { %v7240_v63 = vadd.f32 %v7239_v60, %v7200_v48  ;;  %v7241_v0 = vpop.f32.mrb[25].mxu0  ;;  %v7281_v1 = vpop.f32.mrb[25].mxu1  ;;  %v17190_v48 = vcombine.high %v3726_v34, %v3982_v35  ;;  %v3283_v60 = vpack.c.bf16 %v18350_v17, %v18350_v17 }
 0x169   : > { %v7242_v7 = vpop.f32.mrb[26].mxu0  ;;  %v7282_v8 = vpop.f32.mrb[26].mxu1 }
 0x16a   : > { %v7280_v12 = vadd.f32 %v7279_v61, %v7240_v63  ;;  %v7243_v13 = vpop.f32.mrb[27].mxu0  ;;  %v7283_v14 = vpop.f32.mrb[27].mxu1  ;;  %v3727_v61 = vld [vmem:[%s17991_s19 + $0x250] sm:$0xff]  ;;  %v3984_v63 = vld [vmem:[%s17991_s19 + $0xa58] sm:$0x11]  ;;  %v3288_v8 = vpack.c.bf16 %v1081_v51, %v1081_v51 }
 0x16b   : > { %v235_v13 = vld [vmem:[%s17985_s28 + $0x130] sm:$0xff] }
 0x16c   : > { %9398 = vmatmul.mubr.bf16.vlgmr.msra.gmra.mrb[132].mxu0 %v3273_v2  ;;  %9438 = vmatmul.mubr.bf16.vlgmr.msra.gmra.mrb[132].mxu1 %v3275_v3  ;;  %v17187_v2 = vcombine.low %v3725_v33, %v3981_v27  ;;  %v17189_v3 = vcombine.low %v3726_v34, %v3982_v35  ;;  %v1099_v16 = vcombine.high %v235_v13, %v235_v13  ;;  %v3730_v27 = vld [vmem:[%s17991_s19 + $0x268] sm:$0xff] }
 0x16d   : > { %9446 = vmatpush1.bf16.xpose.msra.mxu0 %v17179_v9  ;;  %9486 = vmatpush1.bf16.xpose.msra.mxu1 %v17181_v10  ;;  %v18385_v9 = vrot.slane %v234_v49, %v18012_v24  ;;  %v18388_v10 = vrot.slane %v1082_v52, %v18012_v24  ;;  %v18404_v33 = vrot.slane %v235_v13, %v18012_v24 }
 0x16e   : > { %9477 = vmatprep.mubr.bf16.mxu0 %v3278_v11  ;;  %9517 = vmatprep.mubr.bf16.mxu1 %v3280_v15  ;;  %v17192_v11 = vcombine.high %v3727_v61, %v3983_v55 }
 0x16f   : > { %v7319_v25 = vpop.f32.mrb[28].mxu0  ;;  %v7359_v26 = vpop.f32.mrb[28].mxu1  ;;  %9525 = vmatprep.subr.bf16.mxu0 %v17184_v18  ;;  %9565 = vmatprep.subr.bf16.mxu1 %v17186_v19  ;;  %v1097_v14 = vcombine.high %v18385_v9, %v18385_v9  ;;  %v1098_v15 = vcombine.high %v18388_v10, %v18388_v10  ;;  %v3985_v19 = vld [vmem:[%s17991_s19 + $0xa60] sm:$0x11]  ;;  %v3289_v52 = vpack.c.bf16 %v18385_v9, %v18385_v9 }
 0x170   : > { %v7320_v28 = vadd.f32 %v7319_v25, %v7280_v12  ;;  %v7321_v29 = vpop.f32.mrb[29].mxu0  ;;  %v7361_v30 = vpop.f32.mrb[29].mxu1  ;;  %v17194_v12 = vcombine.high %v3728_v62, %v3984_v63  ;;  %v3287_v25 = vpack.c.bf16 %v18369_v46, %v18369_v46 }
 0x171   : > { %v7322_v36 = vpop.f32.mrb[30].mxu0  ;;  %v7362_v37 = vpop.f32.mrb[30].mxu1 }
 0x172   : > { %v7360_v41 = vadd.f32 %v7359_v26, %v7320_v28  ;;  %v7323_v42 = vpop.f32.mrb[31].mxu0  ;;  %v7363_v43 = vpop.f32.mrb[31].mxu1  ;;  %v3729_v26 = vld [vmem:[%s17991_s19 + $0x260] sm:$0xff]  ;;  %v3986_v28 = vld [vmem:[%s17991_s19 + $0xa68] sm:$0x11]  ;;  %v3290_v37 = vpack.c.bf16 %v1097_v14, %v1097_v14 }
 0x173   : > { %v17196_v40 = vcombine.high %v3729_v26, %v3985_v19  ;;  %v236_v42 = vld [vmem:[%s17985_s28 + $0x138] sm:$0xff]  ;;  %v1114_v43 = vcombine.high %v18404_v33, %v18404_v33 }
 0x174   : > { %9478 = vmatmul.mubr.bf16.vlgmr.msra.gmra.mrb[136].mxu0 %v3277_v31  ;;  %9518 = vmatmul.mubr.bf16.vlgmr.msra.gmra.mrb[136].mxu1 %v3279_v32  ;;  %v17191_v31 = vcombine.low %v3727_v61, %v3983_v55  ;;  %v17193_v32 = vcombine.low %v3728_v62, %v3984_v63  ;;  %v3732_v55 = vld [vmem:[%s17991_s19 + $0x278] sm:$0xff] }
 0x175   : > { %9526 = vmatpush1.bf16.xpose.msra.mxu0 %v17183_v38  ;;  %9566 = vmatpush1.bf16.xpose.msra.mxu1 %v17185_v39  ;;  %v3292_v38 = vpack.c.bf16 %v1098_v15, %v1098_v15  ;;  %v18407_v39 = vrot.slane %v1099_v16, %v18012_v24  ;;  %v3294_v61 = vpack.c.bf16 %v1114_v43, %v1114_v43 }
 0x176   : > { %9557 = vmatprep.mubr.bf16.mxu0 %v3282_v44  ;;  %9597 = vmatprep.mubr.bf16.mxu1 %v3284_v45  ;;  %v1116_v45 = vcombine.high %v236_v42, %v236_v42  ;;  %v3293_v16 = vpack.c.bf16 %v18404_v33, %v18404_v33 }
 0x177   : > { %v7399_v53 = vpop.f32.mrb[32].mxu0  ;;  %v7439_v54 = vpop.f32.mrb[32].mxu1  ;;  %9605 = vmatprep.subr.bf16.mxu0 %v17188_v47  ;;  %9645 = vmatprep.subr.bf16.mxu1 %v17190_v48  ;;  %v1115_v44 = vcombine.high %v18407_v39, %v18407_v39  ;;  %v3987_v48 = vld [vmem:[%s17991_s19 + $0xa70] sm:$0x11] }
 0x178   : > { %v7400_v56 = vadd.f32 %v7399_v53, %v7360_v41  ;;  %v7401_v57 = vpop.f32.mrb[33].mxu0  ;;  %v7441_v58 = vpop.f32.mrb[33].mxu1  ;;  %v17198_v41 = vcombine.high %v3730_v27, %v3986_v28  ;;  %v3291_v53 = vpack.c.bf16 %v18388_v10, %v18388_v10 }
 0x179   : > { %v7402_v0 = vpop.f32.mrb[34].mxu0  ;;  %v7442_v1 = vpop.f32.mrb[34].mxu1 }
 0x17a   : > { %v7440_v5 = vadd.f32 %v7439_v54, %v7400_v56  ;;  %v7403_v6 = vpop.f32.mrb[35].mxu0  ;;  %v7443_v7 = vpop.f32.mrb[35].mxu1  ;;  %v3731_v54 = vld [vmem:[%s17991_s19 + $0x270] sm:$0xff]  ;;  %v3988_v56 = vld [vmem:[%s17991_s19 + $0xa78] sm:$0x11]  ;;  %v3296_v1 = vpack.c.bf16 %v1115_v44, %v1115_v44 }
 0x17b   : > { %v237_v6 = vld [vmem:[%s17985_s28 + $0x140] sm:$0xff] }
 0x17c   : > { %9558 = vmatmul.mubr.bf16.vlgmr.msra.gmra.mrb[140].mxu0 %v3281_v59  ;;  %9598 = vmatmul.mubr.bf16.vlgmr.msra.gmra.mrb[140].mxu1 %v3283_v60  ;;  %v17195_v59 = vcombine.low %v3729_v26, %v3985_v19  ;;  %v17197_v60 = vcombine.low %v3730_v27, %v3986_v28  ;;  %v1133_v9 = vcombine.high %v237_v6, %v237_v6  ;;  %v3734_v19 = vld [vmem:[%s17991_s19 + $0x288] sm:$0xff] }
 0x17d   : > { %9606 = vmatpush1.bf16.xpose.msra.mxu0 %v17187_v2  ;;  %9646 = vmatpush1.bf16.xpose.msra.mxu1 %v17189_v3  ;;  %v18423_v2 = vrot.slane %v236_v42, %v18012_v24  ;;  %v18426_v3 = vrot.slane %v1116_v45, %v18012_v24  ;;  %v18442_v26 = vrot.slane %v237_v6, %v18012_v24 }
 0x17e   : > { %9637 = vmatprep.mubr.bf16.mxu0 %v3286_v4  ;;  %9677 = vmatprep.mubr.bf16.mxu1 %v3288_v8  ;;  %v17200_v4 = vcombine.high %v3731_v54, %v3987_v48 }
 0x17f   : > { %v7479_v17 = vpop.f32.mrb[36].mxu0  ;;  %v7519_v18 = vpop.f32.mrb[36].mxu1  ;;  %9685 = vmatprep.subr.bf16.mxu0 %v17192_v11  ;;  %9725 = vmatprep.subr.bf16.mxu1 %v17194_v12  ;;  %v1131_v7 = vcombine.high %v18423_v2, %v18423_v2  ;;  %v1132_v8 = vcombine.high %v18426_v3, %v18426_v3  ;;  %v3989_v12 = vld [vmem:[%s17991_s19 + $0xa80] sm:$0x11]  ;;  %v3297_v45 = vpack.c.bf16 %v18423_v2, %v18423_v2 }
 0x180   : > { %v7480_v20 = vadd.f32 %v7479_v17, %v7440_v5  ;;  %v7481_v21 = vpop.f32.mrb[37].mxu0  ;;  %v7521_v22 = vpop.f32.mrb[37].mxu1  ;;  %v17202_v5 = vcombine.high %v3732_v55, %v3988_v56  ;;  %v3295_v17 = vpack.c.bf16 %v18407_v39, %v18407_v39 }
 0x181   : > { %v7482_v29 = vpop.f32.mrb[38].mxu0  ;;  %v7522_v30 = vpop.f32.mrb[38].mxu1 }
 0x182   : > { %v7520_v34 = vadd.f32 %v7519_v18, %v7480_v20  ;;  %v7483_v35 = vpop.f32.mrb[39].mxu0  ;;  %v7523_v36 = vpop.f32.mrb[39].mxu1  ;;  %v3733_v18 = vld [vmem:[%s17991_s19 + $0x280] sm:$0xff]  ;;  %v3990_v20 = vld [vmem:[%s17991_s19 + $0xa88] sm:$0x11]  ;;  %v3298_v30 = vpack.c.bf16 %v1131_v7, %v1131_v7 }
 0x183   : > { %v17204_v33 = vcombine.high %v3733_v18, %v3989_v12  ;;  %v238_v35 = vld [vmem:[%s17985_s28 + $0x148] sm:$0xff]  ;;  %v1148_v36 = vcombine.high %v18442_v26, %v18442_v26 }
 0x184   : > { %9638 = vmatmul.mubr.bf16.vlgmr.msra.gmra.mrb[144].mxu0 %v3285_v23  ;;  %9678 = vmatmul.mubr.bf16.vlgmr.msra.gmra.mrb[144].mxu1 %v3287_v25  ;;  %v17199_v23 = vcombine.low %v3731_v54, %v3987_v48  ;;  %v17201_v25 = vcombine.low %v3732_v55, %v3988_v56  ;;  %v3736_v48 = vld [vmem:[%s17991_s19 + $0x298] sm:$0xff] }
 0x185   : > { %9686 = vmatpush1.bf16.xpose.msra.mxu0 %v17191_v31  ;;  %9726 = vmatpush1.bf16.xpose.msra.mxu1 %v17193_v32  ;;  %v3300_v31 = vpack.c.bf16 %v1132_v8, %v1132_v8  ;;  %v18445_v32 = vrot.slane %v1133_v9, %v18012_v24  ;;  %v3302_v54 = vpack.c.bf16 %v1148_v36, %v1148_v36 }
 0x186   : > { %9717 = vmatprep.mubr.bf16.mxu0 %v3290_v37  ;;  %9757 = vmatprep.mubr.bf16.mxu1 %v3292_v38  ;;  %v1150_v38 = vcombine.high %v238_v35, %v238_v35  ;;  %v3301_v9 = vpack.c.bf16 %v18442_v26, %v18442_v26 }
 0x187   : > { %v7559_v46 = vpop.f32.mrb[40].mxu0  ;;  %v7599_v47 = vpop.f32.mrb[40].mxu1  ;;  %9765 = vmatprep.subr.bf16.mxu0 %v17196_v40  ;;  %9805 = vmatprep.subr.bf16.mxu1 %v17198_v41  ;;  %v1149_v37 = vcombine.high %v18445_v32, %v18445_v32  ;;  %v3991_v41 = vld [vmem:[%s17991_s19 + $0xa90] sm:$0x11] }
 0x188   : > { %v7560_v49 = vadd.f32 %v7559_v46, %v7520_v34  ;;  %v7561_v50 = vpop.f32.mrb[41].mxu0  ;;  %v7601_v51 = vpop.f32.mrb[41].mxu1  ;;  %v17206_v34 = vcombine.high %v3734_v19, %v3990_v20  ;;  %v3299_v46 = vpack.c.bf16 %v18426_v3, %v18426_v3 }
 0x189   : > { %v7562_v57 = vpop.f32.mrb[42].mxu0  ;;  %v7602_v58 = vpop.f32.mrb[42].mxu1 }
 0x18a   : > { %v7600_v62 = vadd.f32 %v7599_v47, %v7560_v49  ;;  %v7563_v63 = vpop.f32.mrb[43].mxu0  ;;  %v7603_v0 = vpop.f32.mrb[43].mxu1  ;;  %v3735_v47 = vld [vmem:[%s17991_s19 + $0x290] sm:$0xff]  ;;  %v3992_v49 = vld [vmem:[%s17991_s19 + $0xa98] sm:$0x11]  ;;  %v3304_v58 = vpack.c.bf16 %v1149_v37, %v1149_v37 }
 0x18b   : > { %v239_v63 = vld [vmem:[%s17985_s28 + $0x150] sm:$0xff] }
 0x18c   : > { %9718 = vmatmul.mubr.bf16.vlgmr.msra.gmra.mrb[148].mxu0 %v3289_v52  ;;  %9758 = vmatmul.mubr.bf16.vlgmr.msra.gmra.mrb[148].mxu1 %v3291_v53  ;;  %v17203_v52 = vcombine.low %v3733_v18, %v3989_v12  ;;  %v17205_v53 = vcombine.low %v3734_v19, %v3990_v20  ;;  %v1167_v2 = vcombine.high %v239_v63, %v239_v63  ;;  %v3738_v12 = vld [vmem:[%s17991_s19 + $0x2a8] sm:$0xff] }
 0x18d   : > { %9766 = vmatpush1.bf16.xpose.msra.mxu0 %v17195_v59  ;;  %9806 = vmatpush1.bf16.xpose.msra.mxu1 %v17197_v60  ;;  %v18461_v59 = vrot.slane %v238_v35, %v18012_v24  ;;  %v18464_v60 = vrot.slane %v1150_v38, %v18012_v24  ;;  %v18480_v18 = vrot.slane %v239_v63, %v18012_v24 }
 0x18e   : > { %9797 = vmatprep.mubr.bf16.mxu0 %v3294_v61  ;;  %9837 = vmatprep.mubr.bf16.mxu1 %v3296_v1  ;;  %v17208_v61 = vcombine.high %v3735_v47, %v3991_v41 }
 0x18f   : > { %v7639_v10 = vpop.f32.mrb[44].mxu0  ;;  %v7679_v11 = vpop.f32.mrb[44].mxu1  ;;  %9845 = vmatprep.subr.bf16.mxu0 %v17200_v4  ;;  %9885 = vmatprep.subr.bf16.mxu1 %v17202_v5  ;;  %v1165_v0 = vcombine.high %v18461_v59, %v18461_v59  ;;  %v1166_v1 = vcombine.high %v18464_v60, %v18464_v60  ;;  %v3993_v5 = vld [vmem:[%s17991_s19 + $0xaa0] sm:$0x11]  ;;  %v3305_v38 = vpack.c.bf16 %v18461_v59, %v18461_v59 }
 0x190   : > { %v7640_v13 = vadd.f32 %v7639_v10, %v7600_v62  ;;  %v7641_v14 = vpop.f32.mrb[45].mxu0  ;;  %v7681_v15 = vpop.f32.mrb[45].mxu1  ;;  %v17210_v62 = vcombine.high %v3736_v48, %v3992_v49  ;;  %v3303_v10 = vpack.c.bf16 %v18445_v32, %v18445_v32 }
 0x191   : > { %v7642_v21 = vpop.f32.mrb[46].mxu0  ;;  %v7682_v22 = vpop.f32.mrb[46].mxu1 }
 0x192   : > { %v7680_v27 = vadd.f32 %v7679_v11, %v7640_v13  ;;  %v7643_v28 = vpop.f32.mrb[47].mxu0  ;;  %v7683_v29 = vpop.f32.mrb[47].mxu1  ;;  %v3737_v11 = vld [vmem:[%s17991_s19 + $0x2a0] sm:$0xff]  ;;  %v3994_v13 = vld [vmem:[%s17991_s19 + $0xaa8] sm:$0x11]  ;;  %v3306_v22 = vpack.c.bf16 %v1165_v0, %v1165_v0 }
 0x193   : > { %v17212_v26 = vcombine.high %v3737_v11, %v3993_v5  ;;  %v240_v28 = vld [vmem:[%s17985_s28 + $0x158] sm:$0xff]  ;;  %v1182_v29 = vcombine.high %v18480_v18, %v18480_v18 }
 0x194   : > { %9798 = vmatmul.mubr.bf16.vlgmr.msra.gmra.mrb[152].mxu0 %v3293_v16  ;;  %9838 = vmatmul.mubr.bf16.vlgmr.msra.gmra.mrb[152].mxu1 %v3295_v17  ;;  %v17207_v16 = vcombine.low %v3735_v47, %v3991_v41  ;;  %v17209_v17 = vcombine.low %v3736_v48, %v3992_v49  ;;  %v3740_v41 = vld [vmem:[%s17991_s19 + $0x2b8] sm:$0xff] }
 0x195   : > { %9846 = vmatpush1.bf16.xpose.msra.mxu0 %v17199_v23  ;;  %9886 = vmatpush1.bf16.xpose.msra.mxu1 %v17201_v25  ;;  %v3308_v23 = vpack.c.bf16 %v1166_v1, %v1166_v1  ;;  %v18483_v25 = vrot.slane %v1167_v2, %v18012_v24  ;;  %v3310_v47 = vpack.c.bf16 %v1182_v29, %v1182_v29 }
 0x196   : > { %9877 = vmatprep.mubr.bf16.mxu0 %v3298_v30  ;;  %9917 = vmatprep.mubr.bf16.mxu1 %v3300_v31  ;;  %v1184_v31 = vcombine.high %v240_v28, %v240_v28  ;;  %v3309_v2 = vpack.c.bf16 %v18480_v18, %v18480_v18 }
 0x197   : > { %v7719_v39 = vpop.f32.mrb[48].mxu0  ;;  %v7759_v40 = vpop.f32.mrb[48].mxu1  ;;  %9925 = vmatprep.subr.bf16.mxu0 %v17204_v33  ;;  %9965 = vmatprep.subr.bf16.mxu1 %v17206_v34  ;;  %v1183_v30 = vcombine.high %v18483_v25, %v18483_v25  ;;  %v3995_v34 = vld [vmem:[%s17991_s19 + $0xab0] sm:$0x11] }
 0x198   : > { %v7720_v42 = vadd.f32 %v7719_v39, %v7680_v27  ;;  %v7721_v43 = vpop.f32.mrb[49].mxu0  ;;  %v7761_v44 = vpop.f32.mrb[49].mxu1  ;;  %v17214_v27 = vcombine.high %v3738_v12, %v3994_v13  ;;  %v3307_v39 = vpack.c.bf16 %v18464_v60, %v18464_v60 }
 0x199   : > { %v7722_v50 = vpop.f32.mrb[50].mxu0  ;;  %v7762_v51 = vpop.f32.mrb[50].mxu1 }
 0x19a   : > { %v7760_v55 = vadd.f32 %v7759_v40, %v7720_v42  ;;  %v7723_v56 = vpop.f32.mrb[51].mxu0  ;;  %v7763_v57 = vpop.f32.mrb[51].mxu1  ;;  %v3739_v40 = vld [vmem:[%s17991_s19 + $0x2b0] sm:$0xff]  ;;  %v3996_v42 = vld [vmem:[%s17991_s19 + $0xab8] sm:$0x11]  ;;  %v3312_v51 = vpack.c.bf16 %v1183_v30, %v1183_v30 }
 0x19b   : > { %v241_v56 = vld [vmem:[%s17985_s28 + $0x160] sm:$0xff] }
 0x19c   : > { %9878 = vmatmul.mubr.bf16.vlgmr.msra.gmra.mrb[156].mxu0 %v3297_v45  ;;  %9918 = vmatmul.mubr.bf16.vlgmr.msra.gmra.mrb[156].mxu1 %v3299_v46  ;;  %v17211_v45 = vcombine.low %v3737_v11, %v3993_v5  ;;  %v17213_v46 = vcombine.low %v3738_v12, %v3994_v13  ;;  %v1201_v59 = vcombine.high %v241_v56, %v241_v56  ;;  %v3742_v5 = vld [vmem:[%s17991_s19 + $0x2c8] sm:$0xff] }
 0x19d   : > { %9926 = vmatpush1.bf16.xpose.msra.mxu0 %v17203_v52  ;;  %9966 = vmatpush1.bf16.xpose.msra.mxu1 %v17205_v53  ;;  %v18499_v52 = vrot.slane %v240_v28, %v18012_v24  ;;  %v18502_v53 = vrot.slane %v1184_v31, %v18012_v24  ;;  %v18518_v11 = vrot.slane %v241_v56, %v18012_v24 }
 0x19e   : > { %9957 = vmatprep.mubr.bf16.mxu0 %v3302_v54  ;;  %9997 = vmatprep.mubr.bf16.mxu1 %v3304_v58  ;;  %v17216_v54 = vcombine.high %v3739_v40, %v3995_v34 }
 0x19f   : > { %v7799_v3 = vpop.f32.mrb[52].mxu0  ;;  %v7839_v4 = vpop.f32.mrb[52].mxu1  ;;  %10005 = vmatprep.subr.bf16.mxu0 %v17208_v61  ;;  %10045 = vmatprep.subr.bf16.mxu1 %v17210_v62  ;;  %v1199_v57 = vcombine.high %v18499_v52, %v18499_v52  ;;  %v1200_v58 = vcombine.high %v18502_v53, %v18502_v53  ;;  %v3997_v62 = vld [vmem:[%s17991_s19 + $0xac0] sm:$0x11]  ;;  %v3313_v31 = vpack.c.bf16 %v18499_v52, %v18499_v52 }
 0x1a0   : > { %v7800_v6 = vadd.f32 %v7799_v3, %v7760_v55  ;;  %v7801_v7 = vpop.f32.mrb[53].mxu0  ;;  %v7841_v8 = vpop.f32.mrb[53].mxu1  ;;  %v17218_v55 = vcombine.high %v3740_v41, %v3996_v42  ;;  %v3311_v3 = vpack.c.bf16 %v18483_v25, %v18483_v25 }
 0x1a1   : > { %v7802_v14 = vpop.f32.mrb[54].mxu0  ;;  %v7842_v15 = vpop.f32.mrb[54].mxu1 }
 0x1a2   : > { %v7840_v19 = vadd.f32 %v7839_v4, %v7800_v6  ;;  %v7803_v20 = vpop.f32.mrb[55].mxu0  ;;  %v7843_v21 = vpop.f32.mrb[55].mxu1  ;;  %v3741_v4 = vld [vmem:[%s17991_s19 + $0x2c0] sm:$0xff]  ;;  %v3998_v6 = vld [vmem:[%s17991_s19 + $0xac8] sm:$0x11]  ;;  %v3314_v15 = vpack.c.bf16 %v1199_v57, %v1199_v57 }
 0x1a3   : > { %v17220_v18 = vcombine.high %v3741_v4, %v3997_v62  ;;  %v242_v20 = vld [vmem:[%s17985_s28 + $0x168] sm:$0xff]  ;;  %v1216_v21 = vcombine.high %v18518_v11, %v18518_v11 }
 0x1a4   : > { %9958 = vmatmul.mubr.bf16.vlgmr.msra.gmra.mrb[160].mxu0 %v3301_v9  ;;  %9998 = vmatmul.mubr.bf16.vlgmr.msra.gmra.mrb[160].mxu1 %v3303_v10  ;;  %v17215_v9 = vcombine.low %v3739_v40, %v3995_v34  ;;  %v17217_v10 = vcombine.low %v3740_v41, %v3996_v42  ;;  %v3744_v34 = vld [vmem:[%s17991_s19 + $0x2d8] sm:$0xff] }
 0x1a5   : > { %10006 = vmatpush1.bf16.xpose.msra.mxu0 %v17207_v16  ;;  %10046 = vmatpush1.bf16.xpose.msra.mxu1 %v17209_v17  ;;  %v3316_v16 = vpack.c.bf16 %v1200_v58, %v1200_v58  ;;  %v18521_v17 = vrot.slane %v1201_v59, %v18012_v24  ;;  %v3318_v40 = vpack.c.bf16 %v1216_v21, %v1216_v21 }
 0x1a6   : > { %10037 = vmatprep.mubr.bf16.mxu0 %v3306_v22  ;;  %10077 = vmatprep.mubr.bf16.mxu1 %v3308_v23  ;;  %v1218_v23 = vcombine.high %v242_v20, %v242_v20  ;;  %v3317_v59 = vpack.c.bf16 %v18518_v11, %v18518_v11 }
 0x1a7   : > { %v7879_v32 = vpop.f32.mrb[56].mxu0  ;;  %v7919_v33 = vpop.f32.mrb[56].mxu1  ;;  %10085 = vmatprep.subr.bf16.mxu0 %v17212_v26  ;;  %10125 = vmatprep.subr.bf16.mxu1 %v17214_v27  ;;  %v1217_v22 = vcombine.high %v18521_v17, %v18521_v17  ;;  %v3999_v27 = vld [vmem:[%s17991_s19 + $0xad0] sm:$0x11] }
 0x1a8   : > { %v7880_v35 = vadd.f32 %v7879_v32, %v7840_v19  ;;  %v7881_v36 = vpop.f32.mrb[57].mxu0  ;;  %v7921_v37 = vpop.f32.mrb[57].mxu1  ;;  %v17222_v19 = vcombine.high %v3742_v5, %v3998_v6  ;;  %v3315_v32 = vpack.c.bf16 %v18502_v53, %v18502_v53 }
 0x1a9   : > { %v7882_v43 = vpop.f32.mrb[58].mxu0  ;;  %v7922_v44 = vpop.f32.mrb[58].mxu1 }
 0x1aa   : > { %v7920_v48 = vadd.f32 %v7919_v33, %v7880_v35  ;;  %v7883_v49 = vpop.f32.mrb[59].mxu0  ;;  %v7923_v50 = vpop.f32.mrb[59].mxu1  ;;  %v3743_v33 = vld [vmem:[%s17991_s19 + $0x2d0] sm:$0xff]  ;;  %v4000_v35 = vld [vmem:[%s17991_s19 + $0xad8] sm:$0x11]  ;;  %v3320_v44 = vpack.c.bf16 %v1217_v22, %v1217_v22 }
 0x1ab   : > { %v243_v49 = vld [vmem:[%s17985_s28 + $0x170] sm:$0xff] }
 0x1ac   : > { %10038 = vmatmul.mubr.bf16.vlgmr.msra.gmra.mrb[164].mxu0 %v3305_v38  ;;  %10078 = vmatmul.mubr.bf16.vlgmr.msra.gmra.mrb[164].mxu1 %v3307_v39  ;;  %v17219_v38 = vcombine.low %v3741_v4, %v3997_v62  ;;  %v17221_v39 = vcombine.low %v3742_v5, %v3998_v6  ;;  %v1235_v52 = vcombine.high %v243_v49, %v243_v49  ;;  %v3746_v62 = vld [vmem:[%s17991_s19 + $0x2e8] sm:$0xff] }
 0x1ad   : > { %10086 = vmatpush1.bf16.xpose.msra.mxu0 %v17211_v45  ;;  %10126 = vmatpush1.bf16.xpose.msra.mxu1 %v17213_v46  ;;  %v18537_v45 = vrot.slane %v242_v20, %v18012_v24  ;;  %v18540_v46 = vrot.slane %v1218_v23, %v18012_v24  ;;  %v18556_v4 = vrot.slane %v243_v49, %v18012_v24 }
 0x1ae   : > { %10117 = vmatprep.mubr.bf16.mxu0 %v3310_v47  ;;  %10157 = vmatprep.mubr.bf16.mxu1 %v3312_v51  ;;  %v17224_v47 = vcombine.high %v3743_v33, %v3999_v27 }
 0x1af   : > { %v7959_v60 = vpop.f32.mrb[60].mxu0  ;;  %v7999_v61 = vpop.f32.mrb[60].mxu1  ;;  %10165 = vmatprep.subr.bf16.mxu0 %v17216_v54  ;;  %10205 = vmatprep.subr.bf16.mxu1 %v17218_v55  ;;  %v1233_v50 = vcombine.high %v18537_v45, %v18537_v45  ;;  %v1234_v51 = vcombine.high %v18540_v46, %v18540_v46  ;;  %v4001_v55 = vld [vmem:[%s17991_s19 + $0xae0] sm:$0x11]  ;;  %v3321_v23 = vpack.c.bf16 %v18537_v45, %v18537_v45 }
 0x1b0   : > { %v7960_v63 = vadd.f32 %v7959_v60, %v7920_v48  ;;  %v7961_v0 = vpop.f32.mrb[61].mxu0  ;;  %v8001_v1 = vpop.f32.mrb[61].mxu1  ;;  %v17226_v48 = vcombine.high %v3744_v34, %v4000_v35  ;;  %v3319_v60 = vpack.c.bf16 %v18521_v17, %v18521_v17 }
 0x1b1   : > { %v7962_v7 = vpop.f32.mrb[62].mxu0  ;;  %v8002_v8 = vpop.f32.mrb[62].mxu1 }
 0x1b2   : > { %v8000_v12 = vadd.f32 %v7999_v61, %v7960_v63  ;;  %v7963_v13 = vpop.f32.mrb[63].mxu0  ;;  %v8003_v14 = vpop.f32.mrb[63].mxu1  ;;  %v3745_v61 = vld [vmem:[%s17991_s19 + $0x2e0] sm:$0xff]  ;;  %v4002_v63 = vld [vmem:[%s17991_s19 + $0xae8] sm:$0x11]  ;;  %v3322_v8 = vpack.c.bf16 %v1233_v50, %v1233_v50 }
 0x1b3   : > { %v17228_v11 = vcombine.high %v3745_v61, %v4001_v55  ;;  %v244_v13 = vld [vmem:[%s17985_s28 + $0x178] sm:$0xff]  ;;  %v1250_v14 = vcombine.high %v18556_v4, %v18556_v4 }
 0x1b4   : > { %10118 = vmatmul.mubr.bf16.vlgmr.msra.gmra.mrb[168].mxu0 %v3309_v2  ;;  %10158 = vmatmul.mubr.bf16.vlgmr.msra.gmra.mrb[168].mxu1 %v3311_v3  ;;  %v17223_v2 = vcombine.low %v3743_v33, %v3999_v27  ;;  %v17225_v3 = vcombine.low %v3744_v34, %v4000_v35  ;;  %v3748_v27 = vld [vmem:[%s17991_s19 + $0x2f8] sm:$0xff] }
 0x1b5   : > { %10166 = vmatpush1.bf16.xpose.msra.mxu0 %v17215_v9  ;;  %10206 = vmatpush1.bf16.xpose.msra.mxu1 %v17217_v10  ;;  %v3324_v9 = vpack.c.bf16 %v1234_v51, %v1234_v51  ;;  %v18559_v10 = vrot.slane %v1235_v52, %v18012_v24  ;;  %v3326_v33 = vpack.c.bf16 %v1250_v14, %v1250_v14 }
 0x1b6   : > { %10197 = vmatprep.mubr.bf16.mxu0 %v3314_v15  ;;  %10237 = vmatprep.mubr.bf16.mxu1 %v3316_v16  ;;  %v1252_v16 = vcombine.high %v244_v13, %v244_v13  ;;  %v3325_v52 = vpack.c.bf16 %v18556_v4, %v18556_v4 }
 0x1b7   : > { %v8039_v25 = vpop.f32.mrb[64].mxu0  ;;  %v8079_v26 = vpop.f32.mrb[64].mxu1  ;;  %10245 = vmatprep.subr.bf16.mxu0 %v17220_v18  ;;  %10285 = vmatprep.subr.bf16.mxu1 %v17222_v19  ;;  %v1251_v15 = vcombine.high %v18559_v10, %v18559_v10  ;;  %v4003_v19 = vld [vmem:[%s17991_s19 + $0xaf0] sm:$0x11] }
 0x1b8   : > { %v8040_v28 = vadd.f32 %v8039_v25, %v8000_v12  ;;  %v8041_v29 = vpop.f32.mrb[65].mxu0  ;;  %v8081_v30 = vpop.f32.mrb[65].mxu1  ;;  %v17230_v12 = vcombine.high %v3746_v62, %v4002_v63  ;;  %v3323_v25 = vpack.c.bf16 %v18540_v46, %v18540_v46 }
 0x1b9   : > { %v8042_v36 = vpop.f32.mrb[66].mxu0  ;;  %v8082_v37 = vpop.f32.mrb[66].mxu1 }
 0x1ba   : > { %v8080_v41 = vadd.f32 %v8079_v26, %v8040_v28  ;;  %v8043_v42 = vpop.f32.mrb[67].mxu0  ;;  %v8083_v43 = vpop.f32.mrb[67].mxu1  ;;  %v3747_v26 = vld [vmem:[%s17991_s19 + $0x2f0] sm:$0xff]  ;;  %v4004_v28 = vld [vmem:[%s17991_s19 + $0xaf8] sm:$0x11]  ;;  %v3328_v37 = vpack.c.bf16 %v1251_v15, %v1251_v15 }
 0x1bb   : > { %v245_v42 = vld [vmem:[%s17985_s28 + $0x180] sm:$0xff] }
 0x1bc   : > { %10198 = vmatmul.mubr.bf16.vlgmr.msra.gmra.mrb[172].mxu0 %v3313_v31  ;;  %10238 = vmatmul.mubr.bf16.vlgmr.msra.gmra.mrb[172].mxu1 %v3315_v32  ;;  %v17227_v31 = vcombine.low %v3745_v61, %v4001_v55  ;;  %v17229_v32 = vcombine.low %v3746_v62, %v4002_v63  ;;  %v1269_v45 = vcombine.high %v245_v42, %v245_v42  ;;  %v3750_v55 = vld [vmem:[%s17991_s19 + $0x308] sm:$0xff] }
 0x1bd   : > { %10246 = vmatpush1.bf16.xpose.msra.mxu0 %v17219_v38  ;;  %10286 = vmatpush1.bf16.xpose.msra.mxu1 %v17221_v39  ;;  %v18575_v38 = vrot.slane %v244_v13, %v18012_v24  ;;  %v18578_v39 = vrot.slane %v1252_v16, %v18012_v24  ;;  %v18594_v61 = vrot.slane %v245_v42, %v18012_v24 }
 0x1be   : > { %10277 = vmatprep.mubr.bf16.mxu0 %v3318_v40  ;;  %10317 = vmatprep.mubr.bf16.mxu1 %v3320_v44  ;;  %v17232_v40 = vcombine.high %v3747_v26, %v4003_v19 }
 0x1bf   : > { %v8119_v53 = vpop.f32.mrb[68].mxu0  ;;  %v8159_v54 = vpop.f32.mrb[68].mxu1  ;;  %10325 = vmatprep.subr.bf16.mxu0 %v17224_v47  ;;  %10365 = vmatprep.subr.bf16.mxu1 %v17226_v48  ;;  %v1267_v43 = vcombine.high %v18575_v38, %v18575_v38  ;;  %v1268_v44 = vcombine.high %v18578_v39, %v18578_v39  ;;  %v4005_v48 = vld [vmem:[%s17991_s19 + $0xb00] sm:$0x11]  ;;  %v3329_v16 = vpack.c.bf16 %v18575_v38, %v18575_v38 }
 0x1c0   : > { %v8120_v56 = vadd.f32 %v8119_v53, %v8080_v41  ;;  %v8121_v57 = vpop.f32.mrb[69].mxu0  ;;  %v8161_v58 = vpop.f32.mrb[69].mxu1  ;;  %v17234_v41 = vcombine.high %v3748_v27, %v4004_v28  ;;  %v3327_v53 = vpack.c.bf16 %v18559_v10, %v18559_v10 }
 0x1c1   : > { %v8122_v0 = vpop.f32.mrb[70].mxu0  ;;  %v8162_v1 = vpop.f32.mrb[70].mxu1 }
 0x1c2   : > { %v8160_v5 = vadd.f32 %v8159_v54, %v8120_v56  ;;  %v8123_v6 = vpop.f32.mrb[71].mxu0  ;;  %v8163_v7 = vpop.f32.mrb[71].mxu1  ;;  %v3749_v54 = vld [vmem:[%s17991_s19 + $0x300] sm:$0xff]  ;;  %v4006_v56 = vld [vmem:[%s17991_s19 + $0xb08] sm:$0x11]  ;;  %v3330_v1 = vpack.c.bf16 %v1267_v43, %v1267_v43 }
 0x1c3   : > { %v17236_v4 = vcombine.high %v3749_v54, %v4005_v48  ;;  %v246_v6 = vld [vmem:[%s17985_s28 + $0x188] sm:$0xff]  ;;  %v1284_v7 = vcombine.high %v18594_v61, %v18594_v61 }
 0x1c4   : > { %10278 = vmatmul.mubr.bf16.vlgmr.msra.gmra.mrb[176].mxu0 %v3317_v59  ;;  %10318 = vmatmul.mubr.bf16.vlgmr.msra.gmra.mrb[176].mxu1 %v3319_v60  ;;  %v17231_v59 = vcombine.low %v3747_v26, %v4003_v19  ;;  %v17233_v60 = vcombine.low %v3748_v27, %v4004_v28  ;;  %v3752_v19 = vld [vmem:[%s17991_s19 + $0x318] sm:$0xff] }
 0x1c5   : > { %10326 = vmatpush1.bf16.xpose.msra.mxu0 %v17223_v2  ;;  %10366 = vmatpush1.bf16.xpose.msra.mxu1 %v17225_v3  ;;  %v3332_v2 = vpack.c.bf16 %v1268_v44, %v1268_v44  ;;  %v18597_v3 = vrot.slane %v1269_v45, %v18012_v24  ;;  %v3334_v26 = vpack.c.bf16 %v1284_v7, %v1284_v7 }
 0x1c6   : > { %10357 = vmatprep.mubr.bf16.mxu0 %v3322_v8  ;;  %10397 = vmatprep.mubr.bf16.mxu1 %v3324_v9  ;;  %v1286_v9 = vcombine.high %v246_v6, %v246_v6  ;;  %v3333_v45 = vpack.c.bf16 %v18594_v61, %v18594_v61 }
 0x1c7   : > { %v8199_v17 = vpop.f32.mrb[72].mxu0  ;;  %v8239_v18 = vpop.f32.mrb[72].mxu1  ;;  %10405 = vmatprep.subr.bf16.mxu0 %v17228_v11  ;;  %10445 = vmatprep.subr.bf16.mxu1 %v17230_v12  ;;  %v1285_v8 = vcombine.high %v18597_v3, %v18597_v3  ;;  %v4007_v12 = vld [vmem:[%s17991_s19 + $0xb10] sm:$0x11] }
 0x1c8   : > { %v8200_v20 = vadd.f32 %v8199_v17, %v8160_v5  ;;  %v8201_v21 = vpop.f32.mrb[73].mxu0  ;;  %v8241_v22 = vpop.f32.mrb[73].mxu1  ;;  %v17238_v5 = vcombine.high %v3750_v55, %v4006_v56  ;;  %v3331_v17 = vpack.c.bf16 %v18578_v39, %v18578_v39 }
 0x1c9   : > { %v8202_v29 = vpop.f32.mrb[74].mxu0  ;;  %v8242_v30 = vpop.f32.mrb[74].mxu1 }
 0x1ca   : > { %v8240_v34 = vadd.f32 %v8239_v18, %v8200_v20  ;;  %v8203_v35 = vpop.f32.mrb[75].mxu0  ;;  %v8243_v36 = vpop.f32.mrb[75].mxu1  ;;  %v3751_v18 = vld [vmem:[%s17991_s19 + $0x310] sm:$0xff]  ;;  %v4008_v20 = vld [vmem:[%s17991_s19 + $0xb18] sm:$0x11]  ;;  %v3336_v30 = vpack.c.bf16 %v1285_v8, %v1285_v8 }
 0x1cb   : > { %v247_v35 = vld [vmem:[%s17985_s28 + $0x190] sm:$0xff] }
 0x1cc   : > { %10358 = vmatmul.mubr.bf16.vlgmr.msra.gmra.mrb[180].mxu0 %v3321_v23  ;;  %10398 = vmatmul.mubr.bf16.vlgmr.msra.gmra.mrb[180].mxu1 %v3323_v25  ;;  %v17235_v23 = vcombine.low %v3749_v54, %v4005_v48  ;;  %v17237_v25 = vcombine.low %v3750_v55, %v4006_v56  ;;  %v1303_v38 = vcombine.high %v247_v35, %v247_v35  ;;  %v3754_v48 = vld [vmem:[%s17991_s19 + $0x328] sm:$0xff] }
 0x1cd   : > { %10406 = vmatpush1.bf16.xpose.msra.mxu0 %v17227_v31  ;;  %10446 = vmatpush1.bf16.xpose.msra.mxu1 %v17229_v32  ;;  %v18613_v31 = vrot.slane %v246_v6, %v18012_v24  ;;  %v18616_v32 = vrot.slane %v1286_v9, %v18012_v24  ;;  %v18632_v54 = vrot.slane %v247_v35, %v18012_v24 }
 0x1ce   : > { %10437 = vmatprep.mubr.bf16.mxu0 %v3326_v33  ;;  %10477 = vmatprep.mubr.bf16.mxu1 %v3328_v37  ;;  %v17240_v33 = vcombine.high %v3751_v18, %v4007_v12 }
 0x1cf   : > { %v8279_v46 = vpop.f32.mrb[76].mxu0  ;;  %v8319_v47 = vpop.f32.mrb[76].mxu1  ;;  %10485 = vmatprep.subr.bf16.mxu0 %v17232_v40  ;;  %10525 = vmatprep.subr.bf16.mxu1 %v17234_v41  ;;  %v1301_v36 = vcombine.high %v18613_v31, %v18613_v31  ;;  %v1302_v37 = vcombine.high %v18616_v32, %v18616_v32  ;;  %v4009_v41 = vld [vmem:[%s17991_s19 + $0xb20] sm:$0x11]  ;;  %v3337_v9 = vpack.c.bf16 %v18613_v31, %v18613_v31 }
 0x1d0   : > { %v8280_v49 = vadd.f32 %v8279_v46, %v8240_v34  ;;  %v8281_v50 = vpop.f32.mrb[77].mxu0  ;;  %v8321_v51 = vpop.f32.mrb[77].mxu1  ;;  %v17242_v34 = vcombine.high %v3752_v19, %v4008_v20  ;;  %v3335_v46 = vpack.c.bf16 %v18597_v3, %v18597_v3 }
 0x1d1   : > { %v8282_v57 = vpop.f32.mrb[78].mxu0  ;;  %v8322_v58 = vpop.f32.mrb[78].mxu1 }
 0x1d2   : > { %v8320_v62 = vadd.f32 %v8319_v47, %v8280_v49  ;;  %v8283_v63 = vpop.f32.mrb[79].mxu0  ;;  %v8323_v0 = vpop.f32.mrb[79].mxu1  ;;  %v3753_v47 = vld [vmem:[%s17991_s19 + $0x320] sm:$0xff]  ;;  %v4010_v49 = vld [vmem:[%s17991_s19 + $0xb28] sm:$0x11]  ;;  %v3338_v58 = vpack.c.bf16 %v1301_v36, %v1301_v36 }
 0x1d3   : > { %v17244_v61 = vcombine.high %v3753_v47, %v4009_v41  ;;  %v248_v63 = vld [vmem:[%s17985_s28 + $0x198] sm:$0xff]  ;;  %v1318_v0 = vcombine.high %v18632_v54, %v18632_v54 }
 0x1d4   : > { %10438 = vmatmul.mubr.bf16.vlgmr.msra.gmra.mrb[184].mxu0 %v3325_v52  ;;  %10478 = vmatmul.mubr.bf16.vlgmr.msra.gmra.mrb[184].mxu1 %v3327_v53  ;;  %v17239_v52 = vcombine.low %v3751_v18, %v4007_v12  ;;  %v17241_v53 = vcombine.low %v3752_v19, %v4008_v20  ;;  %v3756_v12 = vld [vmem:[%s17991_s19 + $0x338] sm:$0xff] }
 0x1d5   : > { %10486 = vmatpush1.bf16.xpose.msra.mxu0 %v17231_v59  ;;  %10526 = vmatpush1.bf16.xpose.msra.mxu1 %v17233_v60  ;;  %v3340_v59 = vpack.c.bf16 %v1302_v37, %v1302_v37  ;;  %v18635_v60 = vrot.slane %v1303_v38, %v18012_v24  ;;  %v3342_v18 = vpack.c.bf16 %v1318_v0, %v1318_v0 }
 0x1d6   : > { %10517 = vmatprep.mubr.bf16.mxu0 %v3330_v1  ;;  %10557 = vmatprep.mubr.bf16.mxu1 %v3332_v2  ;;  %v1320_v2 = vcombine.high %v248_v63, %v248_v63  ;;  %v3341_v38 = vpack.c.bf16 %v18632_v54, %v18632_v54 }
 0x1d7   : > { %v8359_v10 = vpop.f32.mrb[80].mxu0  ;;  %v8399_v11 = vpop.f32.mrb[80].mxu1  ;;  %10565 = vmatprep.subr.bf16.mxu0 %v17236_v4  ;;  %10605 = vmatprep.subr.bf16.mxu1 %v17238_v5  ;;  %v1319_v1 = vcombine.high %v18635_v60, %v18635_v60  ;;  %v4011_v5 = vld [vmem:[%s17991_s19 + $0xb30] sm:$0x11] }
 0x1d8   : > { %v8360_v13 = vadd.f32 %v8359_v10, %v8320_v62  ;;  %v8361_v14 = vpop.f32.mrb[81].mxu0  ;;  %v8401_v15 = vpop.f32.mrb[81].mxu1  ;;  %v17246_v62 = vcombine.high %v3754_v48, %v4010_v49  ;;  %v3339_v10 = vpack.c.bf16 %v18616_v32, %v18616_v32 }
 0x1d9   : > { %v8362_v21 = vpop.f32.mrb[82].mxu0  ;;  %v8402_v22 = vpop.f32.mrb[82].mxu1 }
 0x1da   : > { %v8400_v27 = vadd.f32 %v8399_v11, %v8360_v13  ;;  %v8363_v28 = vpop.f32.mrb[83].mxu0  ;;  %v8403_v29 = vpop.f32.mrb[83].mxu1  ;;  %v3755_v11 = vld [vmem:[%s17991_s19 + $0x330] sm:$0xff]  ;;  %v4012_v13 = vld [vmem:[%s17991_s19 + $0xb38] sm:$0x11]  ;;  %v3344_v22 = vpack.c.bf16 %v1319_v1, %v1319_v1 }
 0x1db   : > { %v249_v28 = vld [vmem:[%s17985_s28 + $0x1a0] sm:$0xff] }
 0x1dc   : > { %10518 = vmatmul.mubr.bf16.vlgmr.msra.gmra.mrb[188].mxu0 %v3329_v16  ;;  %10558 = vmatmul.mubr.bf16.vlgmr.msra.gmra.mrb[188].mxu1 %v3331_v17  ;;  %v17243_v16 = vcombine.low %v3753_v47, %v4009_v41  ;;  %v17245_v17 = vcombine.low %v3754_v48, %v4010_v49  ;;  %v1337_v31 = vcombine.high %v249_v28, %v249_v28  ;;  %v3758_v41 = vld [vmem:[%s17991_s19 + $0x348] sm:$0xff] }
 0x1dd   : > { %10566 = vmatpush1.bf16.xpose.msra.mxu0 %v17235_v23  ;;  %10606 = vmatpush1.bf16.xpose.msra.mxu1 %v17237_v25  ;;  %v18651_v23 = vrot.slane %v248_v63, %v18012_v24  ;;  %v18654_v25 = vrot.slane %v1320_v2, %v18012_v24  ;;  %v18670_v47 = vrot.slane %v249_v28, %v18012_v24 }
 0x1de   : > { %10597 = vmatprep.mubr.bf16.mxu0 %v3334_v26  ;;  %10637 = vmatprep.mubr.bf16.mxu1 %v3336_v30  ;;  %v17248_v26 = vcombine.high %v3755_v11, %v4011_v5 }
 0x1df   : > { %v8439_v39 = vpop.f32.mrb[84].mxu0  ;;  %v8479_v40 = vpop.f32.mrb[84].mxu1  ;;  %10645 = vmatprep.subr.bf16.mxu0 %v17240_v33  ;;  %10685 = vmatprep.subr.bf16.mxu1 %v17242_v34  ;;  %v1335_v29 = vcombine.high %v18651_v23, %v18651_v23  ;;  %v1336_v30 = vcombine.high %v18654_v25, %v18654_v25  ;;  %v4013_v34 = vld [vmem:[%s17991_s19 + $0xb40] sm:$0x11]  ;;  %v3345_v2 = vpack.c.bf16 %v18651_v23, %v18651_v23 }
 0x1e0   : > { %v8440_v42 = vadd.f32 %v8439_v39, %v8400_v27  ;;  %v8441_v43 = vpop.f32.mrb[85].mxu0  ;;  %v8481_v44 = vpop.f32.mrb[85].mxu1  ;;  %v17250_v27 = vcombine.high %v3756_v12, %v4012_v13  ;;  %v3343_v39 = vpack.c.bf16 %v18635_v60, %v18635_v60 }
 0x1e1   : > { %v8442_v50 = vpop.f32.mrb[86].mxu0  ;;  %v8482_v51 = vpop.f32.mrb[86].mxu1 }
 0x1e2   : > { %v8480_v55 = vadd.f32 %v8479_v40, %v8440_v42  ;;  %v8443_v56 = vpop.f32.mrb[87].mxu0  ;;  %v8483_v57 = vpop.f32.mrb[87].mxu1  ;;  %v3757_v40 = vld [vmem:[%s17991_s19 + $0x340] sm:$0xff]  ;;  %v4014_v42 = vld [vmem:[%s17991_s19 + $0xb48] sm:$0x11]  ;;  %v3346_v51 = vpack.c.bf16 %v1335_v29, %v1335_v29 }
 0x1e3   : > { %v17252_v54 = vcombine.high %v3757_v40, %v4013_v34  ;;  %v250_v56 = vld [vmem:[%s17985_s28 + $0x1a8] sm:$0xff]  ;;  %v1352_v57 = vcombine.high %v18670_v47, %v18670_v47 }
 0x1e4   : > { %10598 = vmatmul.mubr.bf16.vlgmr.msra.gmra.mrb[192].mxu0 %v3333_v45  ;;  %10638 = vmatmul.mubr.bf16.vlgmr.msra.gmra.mrb[192].mxu1 %v3335_v46  ;;  %v17247_v45 = vcombine.low %v3755_v11, %v4011_v5  ;;  %v17249_v46 = vcombine.low %v3756_v12, %v4012_v13  ;;  %v3760_v5 = vld [vmem:[%s17991_s19 + $0x358] sm:$0xff] }
 0x1e5   : > { %10646 = vmatpush1.bf16.xpose.msra.mxu0 %v17239_v52  ;;  %10686 = vmatpush1.bf16.xpose.msra.mxu1 %v17241_v53  ;;  %v3348_v52 = vpack.c.bf16 %v1336_v30, %v1336_v30  ;;  %v18673_v53 = vrot.slane %v1337_v31, %v18012_v24  ;;  %v3350_v11 = vpack.c.bf16 %v1352_v57, %v1352_v57 }
 0x1e6   : > { %10677 = vmatprep.mubr.bf16.mxu0 %v3338_v58  ;;  %10717 = vmatprep.mubr.bf16.mxu1 %v3340_v59  ;;  %v1354_v59 = vcombine.high %v250_v56, %v250_v56  ;;  %v3349_v31 = vpack.c.bf16 %v18670_v47, %v18670_v47 }
 0x1e7   : > { %v8519_v3 = vpop.f32.mrb[88].mxu0  ;;  %v8559_v4 = vpop.f32.mrb[88].mxu1  ;;  %10725 = vmatprep.subr.bf16.mxu0 %v17244_v61  ;;  %10765 = vmatprep.subr.bf16.mxu1 %v17246_v62  ;;  %v1353_v58 = vcombine.high %v18673_v53, %v18673_v53  ;;  %v4015_v62 = vld [vmem:[%s17991_s19 + $0xb50] sm:$0x11] }
 0x1e8   : > { %v8520_v6 = vadd.f32 %v8519_v3, %v8480_v55  ;;  %v8521_v7 = vpop.f32.mrb[89].mxu0  ;;  %v8561_v8 = vpop.f32.mrb[89].mxu1  ;;  %v17254_v55 = vcombine.high %v3758_v41, %v4014_v42  ;;  %v3347_v3 = vpack.c.bf16 %v18654_v25, %v18654_v25 }
 0x1e9   : > { %v8522_v14 = vpop.f32.mrb[90].mxu0  ;;  %v8562_v15 = vpop.f32.mrb[90].mxu1 }
 0x1ea   : > { %v8560_v19 = vadd.f32 %v8559_v4, %v8520_v6  ;;  %v8523_v20 = vpop.f32.mrb[91].mxu0  ;;  %v8563_v21 = vpop.f32.mrb[91].mxu1  ;;  %v3759_v4 = vld [vmem:[%s17991_s19 + $0x350] sm:$0xff]  ;;  %v4016_v6 = vld [vmem:[%s17991_s19 + $0xb58] sm:$0x11]  ;;  %v3352_v15 = vpack.c.bf16 %v1353_v58, %v1353_v58 }
 0x1eb   : > { %v251_v20 = vld [vmem:[%s17985_s28 + $0x1b0] sm:$0xff] }
 0x1ec   : > { %10678 = vmatmul.mubr.bf16.vlgmr.msra.gmra.mrb[196].mxu0 %v3337_v9  ;;  %10718 = vmatmul.mubr.bf16.vlgmr.msra.gmra.mrb[196].mxu1 %v3339_v10  ;;  %v17251_v9 = vcombine.low %v3757_v40, %v4013_v34  ;;  %v17253_v10 = vcombine.low %v3758_v41, %v4014_v42  ;;  %v1371_v23 = vcombine.high %v251_v20, %v251_v20  ;;  %v3762_v34 = vld [vmem:[%s17991_s19 + $0x368] sm:$0xff] }
 0x1ed   : > { %10726 = vmatpush1.bf16.xpose.msra.mxu0 %v17243_v16  ;;  %10766 = vmatpush1.bf16.xpose.msra.mxu1 %v17245_v17  ;;  %v18689_v16 = vrot.slane %v250_v56, %v18012_v24  ;;  %v18692_v17 = vrot.slane %v1354_v59, %v18012_v24  ;;  %v18708_v40 = vrot.slane %v251_v20, %v18012_v24 }
 0x1ee   : > { %10757 = vmatprep.mubr.bf16.mxu0 %v3342_v18  ;;  %10797 = vmatprep.mubr.bf16.mxu1 %v3344_v22  ;;  %v17256_v18 = vcombine.high %v3759_v4, %v4015_v62 }
 0x1ef   : > { %v8599_v32 = vpop.f32.mrb[92].mxu0  ;;  %v8639_v33 = vpop.f32.mrb[92].mxu1  ;;  %10805 = vmatprep.subr.bf16.mxu0 %v17248_v26  ;;  %10845 = vmatprep.subr.bf16.mxu1 %v17250_v27  ;;  %v1369_v21 = vcombine.high %v18689_v16, %v18689_v16  ;;  %v1370_v22 = vcombine.high %v18692_v17, %v18692_v17  ;;  %v4017_v27 = vld [vmem:[%s17991_s19 + $0xb60] sm:$0x11]  ;;  %v3353_v59 = vpack.c.bf16 %v18689_v16, %v18689_v16 }
 0x1f0   : > { %v8600_v35 = vadd.f32 %v8599_v32, %v8560_v19  ;;  %v8601_v36 = vpop.f32.mrb[93].mxu0  ;;  %v8641_v37 = vpop.f32.mrb[93].mxu1  ;;  %v17258_v19 = vcombine.high %v3760_v5, %v4016_v6  ;;  %v3351_v32 = vpack.c.bf16 %v18673_v53, %v18673_v53 }
 0x1f1   : > { %v8602_v43 = vpop.f32.mrb[94].mxu0  ;;  %v8642_v44 = vpop.f32.mrb[94].mxu1 }
 0x1f2   : > { %v8640_v48 = vadd.f32 %v8639_v33, %v8600_v35  ;;  %v8603_v49 = vpop.f32.mrb[95].mxu0  ;;  %v8643_v50 = vpop.f32.mrb[95].mxu1  ;;  %v3761_v33 = vld [vmem:[%s17991_s19 + $0x360] sm:$0xff]  ;;  %v4018_v35 = vld [vmem:[%s17991_s19 + $0xb68] sm:$0x11]  ;;  %v3354_v44 = vpack.c.bf16 %v1369_v21, %v1369_v21 }
 0x1f3   : > { %v17260_v47 = vcombine.high %v3761_v33, %v4017_v27  ;;  %v252_v49 = vld [vmem:[%s17985_s28 + $0x1b8] sm:$0xff]  ;;  %v1386_v50 = vcombine.high %v18708_v40, %v18708_v40 }
 0x1f4   : > { %10758 = vmatmul.mubr.bf16.vlgmr.msra.gmra.mrb[200].mxu0 %v3341_v38  ;;  %10798 = vmatmul.mubr.bf16.vlgmr.msra.gmra.mrb[200].mxu1 %v3343_v39  ;;  %v17255_v38 = vcombine.low %v3759_v4, %v4015_v62  ;;  %v17257_v39 = vcombine.low %v3760_v5, %v4016_v6  ;;  %v3764_v62 = vld [vmem:[%s17991_s19 + $0x378] sm:$0xff] }
 0x1f5   : > { %10806 = vmatpush1.bf16.xpose.msra.mxu0 %v17247_v45  ;;  %10846 = vmatpush1.bf16.xpose.msra.mxu1 %v17249_v46  ;;  %v3356_v45 = vpack.c.bf16 %v1370_v22, %v1370_v22  ;;  %v18711_v46 = vrot.slane %v1371_v23, %v18012_v24  ;;  %v3358_v4 = vpack.c.bf16 %v1386_v50, %v1386_v50 }
 0x1f6   : > { %10837 = vmatprep.mubr.bf16.mxu0 %v3346_v51  ;;  %10877 = vmatprep.mubr.bf16.mxu1 %v3348_v52  ;;  %v1388_v52 = vcombine.high %v252_v49, %v252_v49  ;;  %v3357_v23 = vpack.c.bf16 %v18708_v40, %v18708_v40 }
 0x1f7   : > { %v8679_v60 = vpop.f32.mrb[96].mxu0  ;;  %v8719_v61 = vpop.f32.mrb[96].mxu1  ;;  %10885 = vmatprep.subr.bf16.mxu0 %v17252_v54  ;;  %10925 = vmatprep.subr.bf16.mxu1 %v17254_v55  ;;  %v1387_v51 = vcombine.high %v18711_v46, %v18711_v46  ;;  %v4019_v55 = vld [vmem:[%s17991_s19 + $0xb70] sm:$0x11] }
 0x1f8   : > { %v8680_v63 = vadd.f32 %v8679_v60, %v8640_v48  ;;  %v8681_v0 = vpop.f32.mrb[97].mxu0  ;;  %v8721_v1 = vpop.f32.mrb[97].mxu1  ;;  %v17262_v48 = vcombine.high %v3762_v34, %v4018_v35  ;;  %v3355_v60 = vpack.c.bf16 %v18692_v17, %v18692_v17 }
 0x1f9   : > { %v8682_v7 = vpop.f32.mrb[98].mxu0  ;;  %v8722_v8 = vpop.f32.mrb[98].mxu1 }
 0x1fa   : > { %v8720_v12 = vadd.f32 %v8719_v61, %v8680_v63  ;;  %v8683_v13 = vpop.f32.mrb[99].mxu0  ;;  %v8723_v14 = vpop.f32.mrb[99].mxu1  ;;  %v3763_v61 = vld [vmem:[%s17991_s19 + $0x370] sm:$0xff]  ;;  %v4020_v63 = vld [vmem:[%s17991_s19 + $0xb78] sm:$0x11]  ;;  %v3360_v8 = vpack.c.bf16 %v1387_v51, %v1387_v51 }
 0x1fb   : > { %v253_v13 = vld [vmem:[%s17985_s28 + $0x1c0] sm:$0xff] }
 0x1fc   : > { %10838 = vmatmul.mubr.bf16.vlgmr.msra.gmra.mrb[204].mxu0 %v3345_v2  ;;  %10878 = vmatmul.mubr.bf16.vlgmr.msra.gmra.mrb[204].mxu1 %v3347_v3  ;;  %v17259_v2 = vcombine.low %v3761_v33, %v4017_v27  ;;  %v17261_v3 = vcombine.low %v3762_v34, %v4018_v35  ;;  %v1405_v16 = vcombine.high %v253_v13, %v253_v13  ;;  %v3766_v27 = vld [vmem:[%s17991_s19 + $0x388] sm:$0xff] }
 0x1fd   : > { %10886 = vmatpush1.bf16.xpose.msra.mxu0 %v17251_v9  ;;  %10926 = vmatpush1.bf16.xpose.msra.mxu1 %v17253_v10  ;;  %v18727_v9 = vrot.slane %v252_v49, %v18012_v24  ;;  %v18730_v10 = vrot.slane %v1388_v52, %v18012_v24  ;;  %v18746_v33 = vrot.slane %v253_v13, %v18012_v24 }
 0x1fe   : > { %10917 = vmatprep.mubr.bf16.mxu0 %v3350_v11  ;;  %10957 = vmatprep.mubr.bf16.mxu1 %v3352_v15  ;;  %v17264_v11 = vcombine.high %v3763_v61, %v4019_v55 }
 0x1ff   : > { %v8759_v25 = vpop.f32.mrb[100].mxu0  ;;  %v8799_v26 = vpop.f32.mrb[100].mxu1  ;;  %10965 = vmatprep.subr.bf16.mxu0 %v17256_v18  ;;  %11005 = vmatprep.subr.bf16.mxu1 %v17258_v19  ;;  %v1403_v14 = vcombine.high %v18727_v9, %v18727_v9  ;;  %v1404_v15 = vcombine.high %v18730_v10, %v18730_v10  ;;  %v4021_v19 = vld [vmem:[%s17991_s19 + $0xb80] sm:$0x11]  ;;  %v3361_v52 = vpack.c.bf16 %v18727_v9, %v18727_v9 }
 0x200   : > { %v8760_v28 = vadd.f32 %v8759_v25, %v8720_v12  ;;  %v8761_v29 = vpop.f32.mrb[101].mxu0  ;;  %v8801_v30 = vpop.f32.mrb[101].mxu1  ;;  %v17266_v12 = vcombine.high %v3764_v62, %v4020_v63  ;;  %v3359_v25 = vpack.c.bf16 %v18711_v46, %v18711_v46 }
 0x201   : > { %v8762_v36 = vpop.f32.mrb[102].mxu0  ;;  %v8802_v37 = vpop.f32.mrb[102].mxu1 }
 0x202   : > { %v8800_v41 = vadd.f32 %v8799_v26, %v8760_v28  ;;  %v8763_v42 = vpop.f32.mrb[103].mxu0  ;;  %v8803_v43 = vpop.f32.mrb[103].mxu1  ;;  %v3765_v26 = vld [vmem:[%s17991_s19 + $0x380] sm:$0xff]  ;;  %v4022_v28 = vld [vmem:[%s17991_s19 + $0xb88] sm:$0x11]  ;;  %v3362_v37 = vpack.c.bf16 %v1403_v14, %v1403_v14 }
 0x203   : > { %v17268_v40 = vcombine.high %v3765_v26, %v4021_v19  ;;  %v254_v42 = vld [vmem:[%s17985_s28 + $0x1c8] sm:$0xff]  ;;  %v1420_v43 = vcombine.high %v18746_v33, %v18746_v33 }
 0x204   : > { %10918 = vmatmul.mubr.bf16.vlgmr.msra.gmra.mrb[208].mxu0 %v3349_v31  ;;  %10958 = vmatmul.mubr.bf16.vlgmr.msra.gmra.mrb[208].mxu1 %v3351_v32  ;;  %v17263_v31 = vcombine.low %v3763_v61, %v4019_v55  ;;  %v17265_v32 = vcombine.low %v3764_v62, %v4020_v63  ;;  %v3768_v55 = vld [vmem:[%s17991_s19 + $0x398] sm:$0xff] }
 0x205   : > { %10966 = vmatpush1.bf16.xpose.msra.mxu0 %v17255_v38  ;;  %11006 = vmatpush1.bf16.xpose.msra.mxu1 %v17257_v39  ;;  %v3364_v38 = vpack.c.bf16 %v1404_v15, %v1404_v15  ;;  %v18749_v39 = vrot.slane %v1405_v16, %v18012_v24  ;;  %v3366_v61 = vpack.c.bf16 %v1420_v43, %v1420_v43 }
 0x206   : > { %10997 = vmatprep.mubr.bf16.mxu0 %v3354_v44  ;;  %11037 = vmatprep.mubr.bf16.mxu1 %v3356_v45  ;;  %v1422_v45 = vcombine.high %v254_v42, %v254_v42  ;;  %v3365_v16 = vpack.c.bf16 %v18746_v33, %v18746_v33 }
 0x207   : > { %v8839_v53 = vpop.f32.mrb[104].mxu0  ;;  %v8879_v54 = vpop.f32.mrb[104].mxu1  ;;  %11045 = vmatprep.subr.bf16.mxu0 %v17260_v47  ;;  %11085 = vmatprep.subr.bf16.mxu1 %v17262_v48  ;;  %v1421_v44 = vcombine.high %v18749_v39, %v18749_v39  ;;  %v4023_v48 = vld [vmem:[%s17991_s19 + $0xb90] sm:$0x11] }
 0x208   : > { %v8840_v56 = vadd.f32 %v8839_v53, %v8800_v41  ;;  %v8841_v57 = vpop.f32.mrb[105].mxu0  ;;  %v8881_v58 = vpop.f32.mrb[105].mxu1  ;;  %v17270_v41 = vcombine.high %v3766_v27, %v4022_v28  ;;  %v3363_v53 = vpack.c.bf16 %v18730_v10, %v18730_v10 }
 0x209   : > { %v8842_v0 = vpop.f32.mrb[106].mxu0  ;;  %v8882_v1 = vpop.f32.mrb[106].mxu1 }
 0x20a   : > { %v8880_v5 = vadd.f32 %v8879_v54, %v8840_v56  ;;  %v8843_v6 = vpop.f32.mrb[107].mxu0  ;;  %v8883_v7 = vpop.f32.mrb[107].mxu1  ;;  %v3767_v54 = vld [vmem:[%s17991_s19 + $0x390] sm:$0xff]  ;;  %v4024_v56 = vld [vmem:[%s17991_s19 + $0xb98] sm:$0x11]  ;;  %v3368_v1 = vpack.c.bf16 %v1421_v44, %v1421_v44 }
 0x20b   : > { %v255_v6 = vld [vmem:[%s17985_s28 + $0x1d0] sm:$0xff] }
 0x20c   : > { %10998 = vmatmul.mubr.bf16.vlgmr.msra.gmra.mrb[212].mxu0 %v3353_v59  ;;  %11038 = vmatmul.mubr.bf16.vlgmr.msra.gmra.mrb[212].mxu1 %v3355_v60  ;;  %v17267_v59 = vcombine.low %v3765_v26, %v4021_v19  ;;  %v17269_v60 = vcombine.low %v3766_v27, %v4022_v28  ;;  %v1439_v9 = vcombine.high %v255_v6, %v255_v6  ;;  %v3770_v19 = vld [vmem:[%s17991_s19 + $0x3a8] sm:$0xff] }
 0x20d   : > { %11046 = vmatpush1.bf16.xpose.msra.mxu0 %v17259_v2  ;;  %11086 = vmatpush1.bf16.xpose.msra.mxu1 %v17261_v3  ;;  %v18765_v2 = vrot.slane %v254_v42, %v18012_v24  ;;  %v18768_v3 = vrot.slane %v1422_v45, %v18012_v24  ;;  %v18784_v26 = vrot.slane %v255_v6, %v18012_v24 }
 0x20e   : > { %11077 = vmatprep.mubr.bf16.mxu0 %v3358_v4  ;;  %11117 = vmatprep.mubr.bf16.mxu1 %v3360_v8  ;;  %v17272_v4 = vcombine.high %v3767_v54, %v4023_v48 }
 0x20f   : > { %v8919_v17 = vpop.f32.mrb[108].mxu0  ;;  %v8959_v18 = vpop.f32.mrb[108].mxu1  ;;  %11125 = vmatprep.subr.bf16.mxu0 %v17264_v11  ;;  %11165 = vmatprep.subr.bf16.mxu1 %v17266_v12  ;;  %v1437_v7 = vcombine.high %v18765_v2, %v18765_v2  ;;  %v1438_v8 = vcombine.high %v18768_v3, %v18768_v3  ;;  %v4025_v12 = vld [vmem:[%s17991_s19 + $0xba0] sm:$0x11]  ;;  %v3369_v45 = vpack.c.bf16 %v18765_v2, %v18765_v2 }
 0x210   : > { %v8920_v20 = vadd.f32 %v8919_v17, %v8880_v5  ;;  %v8921_v21 = vpop.f32.mrb[109].mxu0  ;;  %v8961_v22 = vpop.f32.mrb[109].mxu1  ;;  %v17274_v5 = vcombine.high %v3768_v55, %v4024_v56  ;;  %v3367_v17 = vpack.c.bf16 %v18749_v39, %v18749_v39 }
 0x211   : > { %v8922_v29 = vpop.f32.mrb[110].mxu0  ;;  %v8962_v30 = vpop.f32.mrb[110].mxu1 }
 0x212   : > { %v8960_v34 = vadd.f32 %v8959_v18, %v8920_v20  ;;  %v8923_v35 = vpop.f32.mrb[111].mxu0  ;;  %v8963_v36 = vpop.f32.mrb[111].mxu1  ;;  %v3769_v18 = vld [vmem:[%s17991_s19 + $0x3a0] sm:$0xff]  ;;  %v4026_v20 = vld [vmem:[%s17991_s19 + $0xba8] sm:$0x11]  ;;  %v3370_v30 = vpack.c.bf16 %v1437_v7, %v1437_v7 }
 0x213   : > { %v17276_v33 = vcombine.high %v3769_v18, %v4025_v12  ;;  %v256_v35 = vld [vmem:[%s17985_s28 + $0x1d8] sm:$0xff]  ;;  %v1454_v36 = vcombine.high %v18784_v26, %v18784_v26 }
 0x214   : > { %11078 = vmatmul.mubr.bf16.vlgmr.msra.gmra.mrb[216].mxu0 %v3357_v23  ;;  %11118 = vmatmul.mubr.bf16.vlgmr.msra.gmra.mrb[216].mxu1 %v3359_v25  ;;  %v17271_v23 = vcombine.low %v3767_v54, %v4023_v48  ;;  %v17273_v25 = vcombine.low %v3768_v55, %v4024_v56  ;;  %v3772_v48 = vld [vmem:[%s17991_s19 + $0x3b8] sm:$0xff] }
 0x215   : > { %11126 = vmatpush1.bf16.xpose.msra.mxu0 %v17263_v31  ;;  %11166 = vmatpush1.bf16.xpose.msra.mxu1 %v17265_v32  ;;  %v3372_v31 = vpack.c.bf16 %v1438_v8, %v1438_v8  ;;  %v18787_v32 = vrot.slane %v1439_v9, %v18012_v24  ;;  %v3374_v54 = vpack.c.bf16 %v1454_v36, %v1454_v36 }
 0x216   : > { %11157 = vmatprep.mubr.bf16.mxu0 %v3362_v37  ;;  %11197 = vmatprep.mubr.bf16.mxu1 %v3364_v38  ;;  %v1456_v38 = vcombine.high %v256_v35, %v256_v35  ;;  %v3373_v9 = vpack.c.bf16 %v18784_v26, %v18784_v26 }
 0x217   : > { %v8999_v46 = vpop.f32.mrb[112].mxu0  ;;  %v9039_v47 = vpop.f32.mrb[112].mxu1  ;;  %11205 = vmatprep.subr.bf16.mxu0 %v17268_v40  ;;  %11245 = vmatprep.subr.bf16.mxu1 %v17270_v41  ;;  %v1455_v37 = vcombine.high %v18787_v32, %v18787_v32  ;;  %v4027_v41 = vld [vmem:[%s17991_s19 + $0xbb0] sm:$0x11] }
 0x218   : > { %v9000_v49 = vadd.f32 %v8999_v46, %v8960_v34  ;;  %v9001_v50 = vpop.f32.mrb[113].mxu0  ;;  %v9041_v51 = vpop.f32.mrb[113].mxu1  ;;  %v17278_v34 = vcombine.high %v3770_v19, %v4026_v20  ;;  %v3371_v46 = vpack.c.bf16 %v18768_v3, %v18768_v3 }
 0x219   : > { %v9002_v57 = vpop.f32.mrb[114].mxu0  ;;  %v9042_v58 = vpop.f32.mrb[114].mxu1 }
 0x21a   : > { %v9040_v62 = vadd.f32 %v9039_v47, %v9000_v49  ;;  %v9003_v63 = vpop.f32.mrb[115].mxu0  ;;  %v9043_v0 = vpop.f32.mrb[115].mxu1  ;;  %v3771_v47 = vld [vmem:[%s17991_s19 + $0x3b0] sm:$0xff]  ;;  %v4028_v49 = vld [vmem:[%s17991_s19 + $0xbb8] sm:$0x11]  ;;  %v3376_v58 = vpack.c.bf16 %v1455_v37, %v1455_v37 }
 0x21b   : > { %v257_v63 = vld [vmem:[%s17985_s28 + $0x1e0] sm:$0xff] }
 0x21c   : > { %11158 = vmatmul.mubr.bf16.vlgmr.msra.gmra.mrb[220].mxu0 %v3361_v52  ;;  %11198 = vmatmul.mubr.bf16.vlgmr.msra.gmra.mrb[220].mxu1 %v3363_v53  ;;  %v17275_v52 = vcombine.low %v3769_v18, %v4025_v12  ;;  %v17277_v53 = vcombine.low %v3770_v19, %v4026_v20  ;;  %v1473_v2 = vcombine.high %v257_v63, %v257_v63  ;;  %v3774_v12 = vld [vmem:[%s17991_s19 + $0x3c8] sm:$0xff] }
 0x21d   : > { %11206 = vmatpush1.bf16.xpose.msra.mxu0 %v17267_v59  ;;  %11246 = vmatpush1.bf16.xpose.msra.mxu1 %v17269_v60  ;;  %v18803_v59 = vrot.slane %v256_v35, %v18012_v24  ;;  %v18806_v60 = vrot.slane %v1456_v38, %v18012_v24  ;;  %v18822_v18 = vrot.slane %v257_v63, %v18012_v24 }
 0x21e   : > { %11237 = vmatprep.mubr.bf16.mxu0 %v3366_v61  ;;  %11277 = vmatprep.mubr.bf16.mxu1 %v3368_v1  ;;  %v17280_v61 = vcombine.high %v3771_v47, %v4027_v41 }
 0x21f   : > { %v9079_v10 = vpop.f32.mrb[116].mxu0  ;;  %v9119_v11 = vpop.f32.mrb[116].mxu1  ;;  %11285 = vmatprep.subr.bf16.mxu0 %v17272_v4  ;;  %11325 = vmatprep.subr.bf16.mxu1 %v17274_v5  ;;  %v1471_v0 = vcombine.high %v18803_v59, %v18803_v59  ;;  %v1472_v1 = vcombine.high %v18806_v60, %v18806_v60  ;;  %v4029_v5 = vld [vmem:[%s17991_s19 + $0xbc0] sm:$0x11]  ;;  %v3377_v38 = vpack.c.bf16 %v18803_v59, %v18803_v59 }
 0x220   : > { %v9080_v13 = vadd.f32 %v9079_v10, %v9040_v62  ;;  %v9081_v14 = vpop.f32.mrb[117].mxu0  ;;  %v9121_v15 = vpop.f32.mrb[117].mxu1  ;;  %v17282_v62 = vcombine.high %v3772_v48, %v4028_v49  ;;  %v3375_v10 = vpack.c.bf16 %v18787_v32, %v18787_v32 }
 0x221   : > { %v9082_v21 = vpop.f32.mrb[118].mxu0  ;;  %v9122_v22 = vpop.f32.mrb[118].mxu1 }
 0x222   : > { %v9120_v27 = vadd.f32 %v9119_v11, %v9080_v13  ;;  %v9083_v28 = vpop.f32.mrb[119].mxu0  ;;  %v9123_v29 = vpop.f32.mrb[119].mxu1  ;;  %v3773_v11 = vld [vmem:[%s17991_s19 + $0x3c0] sm:$0xff]  ;;  %v4030_v13 = vld [vmem:[%s17991_s19 + $0xbc8] sm:$0x11]  ;;  %v3378_v22 = vpack.c.bf16 %v1471_v0, %v1471_v0 }
 0x223   : > { %v17284_v26 = vcombine.high %v3773_v11, %v4029_v5  ;;  %v258_v28 = vld [vmem:[%s17985_s28 + $0x1e8] sm:$0xff]  ;;  %v1488_v29 = vcombine.high %v18822_v18, %v18822_v18 }
 0x224   : > { %11238 = vmatmul.mubr.bf16.vlgmr.msra.gmra.mrb[224].mxu0 %v3365_v16  ;;  %11278 = vmatmul.mubr.bf16.vlgmr.msra.gmra.mrb[224].mxu1 %v3367_v17  ;;  %v17279_v16 = vcombine.low %v3771_v47, %v4027_v41  ;;  %v17281_v17 = vcombine.low %v3772_v48, %v4028_v49  ;;  %v3776_v41 = vld [vmem:[%s17991_s19 + $0x3d8] sm:$0xff] }
 0x225   : > { %11286 = vmatpush1.bf16.xpose.msra.mxu0 %v17271_v23  ;;  %11326 = vmatpush1.bf16.xpose.msra.mxu1 %v17273_v25  ;;  %v3380_v23 = vpack.c.bf16 %v1472_v1, %v1472_v1  ;;  %v18825_v25 = vrot.slane %v1473_v2, %v18012_v24  ;;  %v3382_v47 = vpack.c.bf16 %v1488_v29, %v1488_v29 }
 0x226   : > { %11317 = vmatprep.mubr.bf16.mxu0 %v3370_v30  ;;  %11357 = vmatprep.mubr.bf16.mxu1 %v3372_v31  ;;  %v1490_v31 = vcombine.high %v258_v28, %v258_v28  ;;  %v3381_v2 = vpack.c.bf16 %v18822_v18, %v18822_v18 }
 0x227   : > { %v9159_v39 = vpop.f32.mrb[120].mxu0  ;;  %v9199_v40 = vpop.f32.mrb[120].mxu1  ;;  %11365 = vmatprep.subr.bf16.mxu0 %v17276_v33  ;;  %11405 = vmatprep.subr.bf16.mxu1 %v17278_v34  ;;  %v1489_v30 = vcombine.high %v18825_v25, %v18825_v25  ;;  %v4031_v34 = vld [vmem:[%s17991_s19 + $0xbd0] sm:$0x11] }
 0x228   : > { %v9160_v42 = vadd.f32 %v9159_v39, %v9120_v27  ;;  %v9161_v43 = vpop.f32.mrb[121].mxu0  ;;  %v9201_v44 = vpop.f32.mrb[121].mxu1  ;;  %v17286_v27 = vcombine.high %v3774_v12, %v4030_v13  ;;  %v3379_v39 = vpack.c.bf16 %v18806_v60, %v18806_v60 }
 0x229   : > { %v9162_v50 = vpop.f32.mrb[122].mxu0  ;;  %v9202_v51 = vpop.f32.mrb[122].mxu1 }
 0x22a   : > { %v9200_v55 = vadd.f32 %v9199_v40, %v9160_v42  ;;  %v9163_v56 = vpop.f32.mrb[123].mxu0  ;;  %v9203_v57 = vpop.f32.mrb[123].mxu1  ;;  %v3775_v40 = vld [vmem:[%s17991_s19 + $0x3d0] sm:$0xff]  ;;  %v4032_v42 = vld [vmem:[%s17991_s19 + $0xbd8] sm:$0x11]  ;;  %v3384_v51 = vpack.c.bf16 %v1489_v30, %v1489_v30 }
 0x22b   : > { %v259_v56 = vld [vmem:[%s17985_s28 + $0x1f0] sm:$0xff] }
 0x22c   : > { %11318 = vmatmul.mubr.bf16.vlgmr.msra.gmra.mrb[228].mxu0 %v3369_v45  ;;  %11358 = vmatmul.mubr.bf16.vlgmr.msra.gmra.mrb[228].mxu1 %v3371_v46  ;;  %v17283_v45 = vcombine.low %v3773_v11, %v4029_v5  ;;  %v17285_v46 = vcombine.low %v3774_v12, %v4030_v13  ;;  %v1507_v59 = vcombine.high %v259_v56, %v259_v56  ;;  %v3778_v5 = vld [vmem:[%s17991_s19 + $0x3e8] sm:$0xff] }
 0x22d   : > { %11366 = vmatpush1.bf16.xpose.msra.mxu0 %v17275_v52  ;;  %11406 = vmatpush1.bf16.xpose.msra.mxu1 %v17277_v53  ;;  %v18841_v52 = vrot.slane %v258_v28, %v18012_v24  ;;  %v18844_v53 = vrot.slane %v1490_v31, %v18012_v24  ;;  %v18860_v11 = vrot.slane %v259_v56, %v18012_v24 }
 0x22e   : > { %11397 = vmatprep.mubr.bf16.mxu0 %v3374_v54  ;;  %11437 = vmatprep.mubr.bf16.mxu1 %v3376_v58  ;;  %v17288_v54 = vcombine.high %v3775_v40, %v4031_v34 }
 0x22f   : > { %v9239_v3 = vpop.f32.mrb[124].mxu0  ;;  %v9279_v4 = vpop.f32.mrb[124].mxu1  ;;  %11445 = vmatprep.subr.bf16.mxu0 %v17280_v61  ;;  %11485 = vmatprep.subr.bf16.mxu1 %v17282_v62  ;;  %v1505_v57 = vcombine.high %v18841_v52, %v18841_v52  ;;  %v1506_v58 = vcombine.high %v18844_v53, %v18844_v53  ;;  %v4033_v62 = vld [vmem:[%s17991_s19 + $0xbe0] sm:$0x11]  ;;  %v3385_v31 = vpack.c.bf16 %v18841_v52, %v18841_v52 }
 0x230   : > { %v9240_v6 = vadd.f32 %v9239_v3, %v9200_v55  ;;  %v9241_v7 = vpop.f32.mrb[125].mxu0  ;;  %v9281_v8 = vpop.f32.mrb[125].mxu1  ;;  %v17290_v55 = vcombine.high %v3776_v41, %v4032_v42  ;;  %v3383_v3 = vpack.c.bf16 %v18825_v25, %v18825_v25 }
 0x231   : > { %v9242_v14 = vpop.f32.mrb[126].mxu0  ;;  %v9282_v15 = vpop.f32.mrb[126].mxu1 }
 0x232   : > { %v9280_v19 = vadd.f32 %v9279_v4, %v9240_v6  ;;  %v9243_v20 = vpop.f32.mrb[127].mxu0  ;;  %v9283_v21 = vpop.f32.mrb[127].mxu1  ;;  %v3777_v4 = vld [vmem:[%s17991_s19 + $0x3e0] sm:$0xff]  ;;  %v4034_v6 = vld [vmem:[%s17991_s19 + $0xbe8] sm:$0x11]  ;;  %v3386_v15 = vpack.c.bf16 %v1505_v57, %v1505_v57 }
 0x233   : > { %v17292_v18 = vcombine.high %v3777_v4, %v4033_v62  ;;  %v260_v20 = vld [vmem:[%s17985_s28 + $0x1f8] sm:$0xff]  ;;  %v1522_v21 = vcombine.high %v18860_v11, %v18860_v11 }
 0x234   : > { %11398 = vmatmul.mubr.bf16.vlgmr.msra.gmra.mrb[232].mxu0 %v3373_v9  ;;  %11438 = vmatmul.mubr.bf16.vlgmr.msra.gmra.mrb[232].mxu1 %v3375_v10  ;;  %v17287_v9 = vcombine.low %v3775_v40, %v4031_v34  ;;  %v17289_v10 = vcombine.low %v3776_v41, %v4032_v42  ;;  %v3780_v34 = vld [vmem:[%s17991_s19 + $0x3f8] sm:$0xff] }
 0x235   : > { %11446 = vmatpush1.bf16.xpose.msra.mxu0 %v17279_v16  ;;  %11486 = vmatpush1.bf16.xpose.msra.mxu1 %v17281_v17  ;;  %v3388_v16 = vpack.c.bf16 %v1506_v58, %v1506_v58  ;;  %v18863_v17 = vrot.slane %v1507_v59, %v18012_v24  ;;  %v3390_v40 = vpack.c.bf16 %v1522_v21, %v1522_v21 }
 0x236   : > { %11477 = vmatprep.mubr.bf16.mxu0 %v3378_v22  ;;  %11517 = vmatprep.mubr.bf16.mxu1 %v3380_v23  ;;  %v1524_v23 = vcombine.high %v260_v20, %v260_v20  ;;  %v3389_v59 = vpack.c.bf16 %v18860_v11, %v18860_v11 }
 0x237   : > { %v9319_v32 = vpop.f32.mrb[128].mxu0  ;;  %v9359_v33 = vpop.f32.mrb[128].mxu1  ;;  %11525 = vmatprep.subr.bf16.mxu0 %v17284_v26  ;;  %11565 = vmatprep.subr.bf16.mxu1 %v17286_v27  ;;  %v1523_v22 = vcombine.high %v18863_v17, %v18863_v17  ;;  %v4035_v27 = vld [vmem:[%s17991_s19 + $0xbf0] sm:$0x11] }
 0x238   : > { %v9320_v35 = vadd.f32 %v9319_v32, %v9280_v19  ;;  %v9321_v36 = vpop.f32.mrb[129].mxu0  ;;  %v9361_v37 = vpop.f32.mrb[129].mxu1  ;;  %v17294_v19 = vcombine.high %v3778_v5, %v4034_v6  ;;  %v3387_v32 = vpack.c.bf16 %v18844_v53, %v18844_v53 }
 0x239   : > { %v9322_v43 = vpop.f32.mrb[130].mxu0  ;;  %v9362_v44 = vpop.f32.mrb[130].mxu1 }
 0x23a   : > { %v9360_v48 = vadd.f32 %v9359_v33, %v9320_v35  ;;  %v9323_v49 = vpop.f32.mrb[131].mxu0  ;;  %v9363_v50 = vpop.f32.mrb[131].mxu1  ;;  %v3779_v33 = vld [vmem:[%s17991_s19 + $0x3f0] sm:$0xff]  ;;  %v4036_v35 = vld [vmem:[%s17991_s19 + $0xbf8] sm:$0x11]  ;;  %v3392_v44 = vpack.c.bf16 %v1523_v22, %v1523_v22 }
 0x23b   : > { %v261_v49 = vld [vmem:[%s17985_s28 + $0x200] sm:$0xff] }
 0x23c   : > { %11478 = vmatmul.mubr.bf16.vlgmr.msra.gmra.mrb[236].mxu0 %v3377_v38  ;;  %11518 = vmatmul.mubr.bf16.vlgmr.msra.gmra.mrb[236].mxu1 %v3379_v39  ;;  %v17291_v38 = vcombine.low %v3777_v4, %v4033_v62  ;;  %v17293_v39 = vcombine.low %v3778_v5, %v4034_v6  ;;  %v1541_v52 = vcombine.high %v261_v49, %v261_v49  ;;  %v3782_v62 = vld [vmem:[%s17991_s19 + $0x408] sm:$0xff] }
 0x23d   : > { %11526 = vmatpush1.bf16.xpose.msra.mxu0 %v17283_v45  ;;  %11566 = vmatpush1.bf16.xpose.msra.mxu1 %v17285_v46  ;;  %v18879_v45 = vrot.slane %v260_v20, %v18012_v24  ;;  %v18882_v46 = vrot.slane %v1524_v23, %v18012_v24  ;;  %v18898_v4 = vrot.slane %v261_v49, %v18012_v24 }
 0x23e   : > { %11557 = vmatprep.mubr.bf16.mxu0 %v3382_v47  ;;  %11597 = vmatprep.mubr.bf16.mxu1 %v3384_v51  ;;  %v17296_v47 = vcombine.high %v3779_v33, %v4035_v27 }
 0x23f   : > { %v9399_v60 = vpop.f32.mrb[132].mxu0  ;;  %v9439_v61 = vpop.f32.mrb[132].mxu1  ;;  %11605 = vmatprep.subr.bf16.mxu0 %v17288_v54  ;;  %11645 = vmatprep.subr.bf16.mxu1 %v17290_v55  ;;  %v1539_v50 = vcombine.high %v18879_v45, %v18879_v45  ;;  %v1540_v51 = vcombine.high %v18882_v46, %v18882_v46  ;;  %v4037_v55 = vld [vmem:[%s17991_s19 + $0xc00] sm:$0x11]  ;;  %v3393_v23 = vpack.c.bf16 %v18879_v45, %v18879_v45 }
 0x240   : > { %v9400_v63 = vadd.f32 %v9399_v60, %v9360_v48  ;;  %v9401_v0 = vpop.f32.mrb[133].mxu0  ;;  %v9441_v1 = vpop.f32.mrb[133].mxu1  ;;  %v17298_v48 = vcombine.high %v3780_v34, %v4036_v35  ;;  %v3391_v60 = vpack.c.bf16 %v18863_v17, %v18863_v17 }
 0x241   : > { %v9402_v7 = vpop.f32.mrb[134].mxu0  ;;  %v9442_v8 = vpop.f32.mrb[134].mxu1 }
 0x242   : > { %v9440_v12 = vadd.f32 %v9439_v61, %v9400_v63  ;;  %v9403_v13 = vpop.f32.mrb[135].mxu0  ;;  %v9443_v14 = vpop.f32.mrb[135].mxu1  ;;  %v3781_v61 = vld [vmem:[%s17991_s19 + $0x400] sm:$0xff]  ;;  %v4038_v63 = vld [vmem:[%s17991_s19 + $0xc08] sm:$0x11]  ;;  %v3394_v8 = vpack.c.bf16 %v1539_v50, %v1539_v50 }
 0x243   : > { %v17300_v11 = vcombine.high %v3781_v61, %v4037_v55  ;;  %v262_v13 = vld [vmem:[%s17985_s28 + $0x208] sm:$0xff]  ;;  %v1556_v14 = vcombine.high %v18898_v4, %v18898_v4 }
 0x244   : > { %11558 = vmatmul.mubr.bf16.vlgmr.msra.gmra.mrb[240].mxu0 %v3381_v2  ;;  %11598 = vmatmul.mubr.bf16.vlgmr.msra.gmra.mrb[240].mxu1 %v3383_v3  ;;  %v17295_v2 = vcombine.low %v3779_v33, %v4035_v27  ;;  %v17297_v3 = vcombine.low %v3780_v34, %v4036_v35  ;;  %v3784_v27 = vld [vmem:[%s17991_s19 + $0x418] sm:$0xff] }
 0x245   : > { %11606 = vmatpush1.bf16.xpose.msra.mxu0 %v17287_v9  ;;  %11646 = vmatpush1.bf16.xpose.msra.mxu1 %v17289_v10  ;;  %v3396_v9 = vpack.c.bf16 %v1540_v51, %v1540_v51  ;;  %v18901_v10 = vrot.slane %v1541_v52, %v18012_v24  ;;  %v3398_v33 = vpack.c.bf16 %v1556_v14, %v1556_v14 }
 0x246   : > { %11637 = vmatprep.mubr.bf16.mxu0 %v3386_v15  ;;  %11677 = vmatprep.mubr.bf16.mxu1 %v3388_v16  ;;  %v1558_v16 = vcombine.high %v262_v13, %v262_v13  ;;  %v3397_v52 = vpack.c.bf16 %v18898_v4, %v18898_v4 }
 0x247   : > { %v9479_v25 = vpop.f32.mrb[136].mxu0  ;;  %v9519_v26 = vpop.f32.mrb[136].mxu1  ;;  %11685 = vmatprep.subr.bf16.mxu0 %v17292_v18  ;;  %11725 = vmatprep.subr.bf16.mxu1 %v17294_v19  ;;  %v1557_v15 = vcombine.high %v18901_v10, %v18901_v10  ;;  %v4039_v19 = vld [vmem:[%s17991_s19 + $0xc10] sm:$0x11] }
 0x248   : > { %v9480_v28 = vadd.f32 %v9479_v25, %v9440_v12  ;;  %v9481_v29 = vpop.f32.mrb[137].mxu0  ;;  %v9521_v30 = vpop.f32.mrb[137].mxu1  ;;  %v17302_v12 = vcombine.high %v3782_v62, %v4038_v63  ;;  %v3395_v25 = vpack.c.bf16 %v18882_v46, %v18882_v46 }
 0x249   : > { %v9482_v36 = vpop.f32.mrb[138].mxu0  ;;  %v9522_v37 = vpop.f32.mrb[138].mxu1 }
 0x24a   : > { %v9520_v41 = vadd.f32 %v9519_v26, %v9480_v28  ;;  %v9483_v42 = vpop.f32.mrb[139].mxu0  ;;  %v9523_v43 = vpop.f32.mrb[139].mxu1  ;;  %v3783_v26 = vld [vmem:[%s17991_s19 + $0x410] sm:$0xff]  ;;  %v4040_v28 = vld [vmem:[%s17991_s19 + $0xc18] sm:$0x11]  ;;  %v3400_v37 = vpack.c.bf16 %v1557_v15, %v1557_v15 }
 0x24b   : > { %v263_v42 = vld [vmem:[%s17985_s28 + $0x210] sm:$0xff] }
 0x24c   : > { %11638 = vmatmul.mubr.bf16.vlgmr.msra.gmra.mrb[244].mxu0 %v3385_v31  ;;  %11678 = vmatmul.mubr.bf16.vlgmr.msra.gmra.mrb[244].mxu1 %v3387_v32  ;;  %v17299_v31 = vcombine.low %v3781_v61, %v4037_v55  ;;  %v17301_v32 = vcombine.low %v3782_v62, %v4038_v63  ;;  %v1575_v45 = vcombine.high %v263_v42, %v263_v42  ;;  %v3786_v55 = vld [vmem:[%s17991_s19 + $0x428] sm:$0xff] }
 0x24d   : > { %11686 = vmatpush1.bf16.xpose.msra.mxu0 %v17291_v38  ;;  %11726 = vmatpush1.bf16.xpose.msra.mxu1 %v17293_v39  ;;  %v18917_v38 = vrot.slane %v262_v13, %v18012_v24  ;;  %v18920_v39 = vrot.slane %v1558_v16, %v18012_v24  ;;  %v18936_v61 = vrot.slane %v263_v42, %v18012_v24 }
 0x24e   : > { %11717 = vmatprep.mubr.bf16.mxu0 %v3390_v40  ;;  %11757 = vmatprep.mubr.bf16.mxu1 %v3392_v44  ;;  %v17304_v40 = vcombine.high %v3783_v26, %v4039_v19 }
 0x24f   : > { %v9559_v53 = vpop.f32.mrb[140].mxu0  ;;  %v9599_v54 = vpop.f32.mrb[140].mxu1  ;;  %11765 = vmatprep.subr.bf16.mxu0 %v17296_v47  ;;  %11805 = vmatprep.subr.bf16.mxu1 %v17298_v48  ;;  %v1573_v43 = vcombine.high %v18917_v38, %v18917_v38  ;;  %v1574_v44 = vcombine.high %v18920_v39, %v18920_v39  ;;  %v4041_v48 = vld [vmem:[%s17991_s19 + $0xc20] sm:$0x11]  ;;  %v3401_v16 = vpack.c.bf16 %v18917_v38, %v18917_v38 }
 0x250   : > { %v9560_v56 = vadd.f32 %v9559_v53, %v9520_v41  ;;  %v9561_v57 = vpop.f32.mrb[141].mxu0  ;;  %v9601_v58 = vpop.f32.mrb[141].mxu1  ;;  %v17306_v41 = vcombine.high %v3784_v27, %v4040_v28  ;;  %v3399_v53 = vpack.c.bf16 %v18901_v10, %v18901_v10 }
 0x251   : > { %v9562_v0 = vpop.f32.mrb[142].mxu0  ;;  %v9602_v1 = vpop.f32.mrb[142].mxu1 }
 0x252   : > { %v9600_v5 = vadd.f32 %v9599_v54, %v9560_v56  ;;  %v9563_v6 = vpop.f32.mrb[143].mxu0  ;;  %v9603_v7 = vpop.f32.mrb[143].mxu1  ;;  %v3785_v54 = vld [vmem:[%s17991_s19 + $0x420] sm:$0xff]  ;;  %v4042_v56 = vld [vmem:[%s17991_s19 + $0xc28] sm:$0x11]  ;;  %v3402_v1 = vpack.c.bf16 %v1573_v43, %v1573_v43 }
 0x253   : > { %v17308_v4 = vcombine.high %v3785_v54, %v4041_v48  ;;  %v264_v6 = vld [vmem:[%s17985_s28 + $0x218] sm:$0xff]  ;;  %v1590_v7 = vcombine.high %v18936_v61, %v18936_v61 }
 0x254   : > { %11718 = vmatmul.mubr.bf16.vlgmr.msra.gmra.mrb[248].mxu0 %v3389_v59  ;;  %11758 = vmatmul.mubr.bf16.vlgmr.msra.gmra.mrb[248].mxu1 %v3391_v60  ;;  %v17303_v59 = vcombine.low %v3783_v26, %v4039_v19  ;;  %v17305_v60 = vcombine.low %v3784_v27, %v4040_v28  ;;  %v3788_v19 = vld [vmem:[%s17991_s19 + $0x438] sm:$0xff] }
 0x255   : > { %11766 = vmatpush1.bf16.xpose.msra.mxu0 %v17295_v2  ;;  %11806 = vmatpush1.bf16.xpose.msra.mxu1 %v17297_v3  ;;  %v3404_v2 = vpack.c.bf16 %v1574_v44, %v1574_v44  ;;  %v18939_v3 = vrot.slane %v1575_v45, %v18012_v24  ;;  %v3406_v26 = vpack.c.bf16 %v1590_v7, %v1590_v7 }
 0x256   : > { %11797 = vmatprep.mubr.bf16.mxu0 %v3394_v8  ;;  %11837 = vmatprep.mubr.bf16.mxu1 %v3396_v9  ;;  %v1592_v9 = vcombine.high %v264_v6, %v264_v6  ;;  %v3405_v45 = vpack.c.bf16 %v18936_v61, %v18936_v61 }
 0x257   : > { %v9639_v17 = vpop.f32.mrb[144].mxu0  ;;  %v9679_v18 = vpop.f32.mrb[144].mxu1  ;;  %11845 = vmatprep.subr.bf16.mxu0 %v17300_v11  ;;  %11885 = vmatprep.subr.bf16.mxu1 %v17302_v12  ;;  %v1591_v8 = vcombine.high %v18939_v3, %v18939_v3  ;;  %v4043_v12 = vld [vmem:[%s17991_s19 + $0xc30] sm:$0x11] }
 0x258   : > { %v9640_v20 = vadd.f32 %v9639_v17, %v9600_v5  ;;  %v9641_v21 = vpop.f32.mrb[145].mxu0  ;;  %v9681_v22 = vpop.f32.mrb[145].mxu1  ;;  %v17310_v5 = vcombine.high %v3786_v55, %v4042_v56  ;;  %v3403_v17 = vpack.c.bf16 %v18920_v39, %v18920_v39 }
 0x259   : > { %v9642_v29 = vpop.f32.mrb[146].mxu0  ;;  %v9682_v30 = vpop.f32.mrb[146].mxu1 }
 0x25a   : > { %v9680_v34 = vadd.f32 %v9679_v18, %v9640_v20  ;;  %v9643_v35 = vpop.f32.mrb[147].mxu0  ;;  %v9683_v36 = vpop.f32.mrb[147].mxu1  ;;  %v3787_v18 = vld [vmem:[%s17991_s19 + $0x430] sm:$0xff]  ;;  %v4044_v20 = vld [vmem:[%s17991_s19 + $0xc38] sm:$0x11]  ;;  %v3408_v30 = vpack.c.bf16 %v1591_v8, %v1591_v8 }
 0x25b   : > { %v265_v35 = vld [vmem:[%s17985_s28 + $0x220] sm:$0xff] }
 0x25c   : > { %11798 = vmatmul.mubr.bf16.vlgmr.msra.gmra.mrb[252].mxu0 %v3393_v23  ;;  %11838 = vmatmul.mubr.bf16.vlgmr.msra.gmra.mrb[252].mxu1 %v3395_v25  ;;  %v17307_v23 = vcombine.low %v3785_v54, %v4041_v48  ;;  %v17309_v25 = vcombine.low %v3786_v55, %v4042_v56  ;;  %v1609_v38 = vcombine.high %v265_v35, %v265_v35  ;;  %v3790_v48 = vld [vmem:[%s17991_s19 + $0x448] sm:$0xff] }
 0x25d   : > { %11846 = vmatpush1.bf16.xpose.msra.mxu0 %v17299_v31  ;;  %11886 = vmatpush1.bf16.xpose.msra.mxu1 %v17301_v32  ;;  %v18955_v31 = vrot.slane %v264_v6, %v18012_v24  ;;  %v18958_v32 = vrot.slane %v1592_v9, %v18012_v24  ;;  %v18974_v54 = vrot.slane %v265_v35, %v18012_v24 }
 0x25e   : > { %11877 = vmatprep.mubr.bf16.mxu0 %v3398_v33  ;;  %11917 = vmatprep.mubr.bf16.mxu1 %v3400_v37  ;;  %v17312_v33 = vcombine.high %v3787_v18, %v4043_v12 }
 0x25f   : > { %v9719_v46 = vpop.f32.mrb[148].mxu0  ;;  %v9759_v47 = vpop.f32.mrb[148].mxu1  ;;  %11925 = vmatprep.subr.bf16.mxu0 %v17304_v40  ;;  %11965 = vmatprep.subr.bf16.mxu1 %v17306_v41  ;;  %v1607_v36 = vcombine.high %v18955_v31, %v18955_v31  ;;  %v1608_v37 = vcombine.high %v18958_v32, %v18958_v32  ;;  %v4045_v41 = vld [vmem:[%s17991_s19 + $0xc40] sm:$0x11]  ;;  %v3409_v9 = vpack.c.bf16 %v18955_v31, %v18955_v31 }
 0x260   : > { %v9720_v49 = vadd.f32 %v9719_v46, %v9680_v34  ;;  %v9721_v50 = vpop.f32.mrb[149].mxu0  ;;  %v9761_v51 = vpop.f32.mrb[149].mxu1  ;;  %v17314_v34 = vcombine.high %v3788_v19, %v4044_v20  ;;  %v3407_v46 = vpack.c.bf16 %v18939_v3, %v18939_v3 }
 0x261   : > { %v9722_v57 = vpop.f32.mrb[150].mxu0  ;;  %v9762_v58 = vpop.f32.mrb[150].mxu1 }
 0x262   : > { %v9760_v62 = vadd.f32 %v9759_v47, %v9720_v49  ;;  %v9723_v63 = vpop.f32.mrb[151].mxu0  ;;  %v9763_v0 = vpop.f32.mrb[151].mxu1  ;;  %v3789_v47 = vld [vmem:[%s17991_s19 + $0x440] sm:$0xff]  ;;  %v4046_v49 = vld [vmem:[%s17991_s19 + $0xc48] sm:$0x11]  ;;  %v3410_v58 = vpack.c.bf16 %v1607_v36, %v1607_v36 }
 0x263   : > { %v17316_v61 = vcombine.high %v3789_v47, %v4045_v41  ;;  %v266_v63 = vld [vmem:[%s17985_s28 + $0x228] sm:$0xff]  ;;  %v1624_v0 = vcombine.high %v18974_v54, %v18974_v54 }
 0x264   : > { %11878 = vmatmul.mubr.bf16.vlgmr.msra.gmra.mrb[0].mxu0 %v3397_v52  ;;  %11918 = vmatmul.mubr.bf16.vlgmr.msra.gmra.mrb[0].mxu1 %v3399_v53  ;;  %v17311_v52 = vcombine.low %v3787_v18, %v4043_v12  ;;  %v17313_v53 = vcombine.low %v3788_v19, %v4044_v20  ;;  %v3792_v12 = vld [vmem:[%s17991_s19 + $0x458] sm:$0xff] }
 0x265   : > { %11926 = vmatpush1.bf16.xpose.msra.mxu0 %v17303_v59  ;;  %11966 = vmatpush1.bf16.xpose.msra.mxu1 %v17305_v60  ;;  %v3412_v59 = vpack.c.bf16 %v1608_v37, %v1608_v37  ;;  %v18977_v60 = vrot.slane %v1609_v38, %v18012_v24  ;;  %v3414_v18 = vpack.c.bf16 %v1624_v0, %v1624_v0 }
 0x266   : > { %11957 = vmatprep.mubr.bf16.mxu0 %v3402_v1  ;;  %11997 = vmatprep.mubr.bf16.mxu1 %v3404_v2  ;;  %v1626_v2 = vcombine.high %v266_v63, %v266_v63  ;;  %v3413_v38 = vpack.c.bf16 %v18974_v54, %v18974_v54 }
 0x267   : > { %v9799_v10 = vpop.f32.mrb[152].mxu0  ;;  %v9839_v11 = vpop.f32.mrb[152].mxu1  ;;  %12005 = vmatprep.subr.bf16.mxu0 %v17308_v4  ;;  %12045 = vmatprep.subr.bf16.mxu1 %v17310_v5  ;;  %v1625_v1 = vcombine.high %v18977_v60, %v18977_v60  ;;  %v4047_v5 = vld [vmem:[%s17991_s19 + $0xc50] sm:$0x11] }
 0x268   : > { %v9800_v13 = vadd.f32 %v9799_v10, %v9760_v62  ;;  %v9801_v14 = vpop.f32.mrb[153].mxu0  ;;  %v9841_v15 = vpop.f32.mrb[153].mxu1  ;;  %v17318_v62 = vcombine.high %v3790_v48, %v4046_v49  ;;  %v3411_v10 = vpack.c.bf16 %v18958_v32, %v18958_v32 }
 0x269   : > { %v9802_v21 = vpop.f32.mrb[154].mxu0  ;;  %v9842_v22 = vpop.f32.mrb[154].mxu1 }
 0x26a   : > { %v9840_v27 = vadd.f32 %v9839_v11, %v9800_v13  ;;  %v9803_v28 = vpop.f32.mrb[155].mxu0  ;;  %v9843_v29 = vpop.f32.mrb[155].mxu1  ;;  %v3791_v11 = vld [vmem:[%s17991_s19 + $0x450] sm:$0xff]  ;;  %v4048_v13 = vld [vmem:[%s17991_s19 + $0xc58] sm:$0x11]  ;;  %v3416_v22 = vpack.c.bf16 %v1625_v1, %v1625_v1 }
 0x26b   : > { %v267_v28 = vld [vmem:[%s17985_s28 + $0x230] sm:$0xff] }
 0x26c   : > { %11958 = vmatmul.mubr.bf16.vlgmr.msra.gmra.mrb[4].mxu0 %v3401_v16  ;;  %11998 = vmatmul.mubr.bf16.vlgmr.msra.gmra.mrb[4].mxu1 %v3403_v17  ;;  %v17315_v16 = vcombine.low %v3789_v47, %v4045_v41  ;;  %v17317_v17 = vcombine.low %v3790_v48, %v4046_v49  ;;  %v1643_v31 = vcombine.high %v267_v28, %v267_v28  ;;  %v3794_v41 = vld [vmem:[%s17991_s19 + $0x468] sm:$0xff] }
 0x26d   : > { %12006 = vmatpush1.bf16.xpose.msra.mxu0 %v17307_v23  ;;  %12046 = vmatpush1.bf16.xpose.msra.mxu1 %v17309_v25  ;;  %v18993_v23 = vrot.slane %v266_v63, %v18012_v24  ;;  %v18996_v25 = vrot.slane %v1626_v2, %v18012_v24  ;;  %v19012_v47 = vrot.slane %v267_v28, %v18012_v24 }
 0x26e   : > { %12037 = vmatprep.mubr.bf16.mxu0 %v3406_v26  ;;  %12077 = vmatprep.mubr.bf16.mxu1 %v3408_v30  ;;  %v17320_v26 = vcombine.high %v3791_v11, %v4047_v5 }
 0x26f   : > { %v9879_v39 = vpop.f32.mrb[156].mxu0  ;;  %v9919_v40 = vpop.f32.mrb[156].mxu1  ;;  %12085 = vmatprep.subr.bf16.mxu0 %v17312_v33  ;;  %12125 = vmatprep.subr.bf16.mxu1 %v17314_v34  ;;  %v1641_v29 = vcombine.high %v18993_v23, %v18993_v23  ;;  %v1642_v30 = vcombine.high %v18996_v25, %v18996_v25  ;;  %v4049_v34 = vld [vmem:[%s17991_s19 + $0xc60] sm:$0x11]  ;;  %v3417_v2 = vpack.c.bf16 %v18993_v23, %v18993_v23 }
 0x270   : > { %v9880_v42 = vadd.f32 %v9879_v39, %v9840_v27  ;;  %v9881_v43 = vpop.f32.mrb[157].mxu0  ;;  %v9921_v44 = vpop.f32.mrb[157].mxu1  ;;  %v17322_v27 = vcombine.high %v3792_v12, %v4048_v13  ;;  %v3415_v39 = vpack.c.bf16 %v18977_v60, %v18977_v60 }
 0x271   : > { %v9882_v50 = vpop.f32.mrb[158].mxu0  ;;  %v9922_v51 = vpop.f32.mrb[158].mxu1 }
 0x272   : > { %v9920_v55 = vadd.f32 %v9919_v40, %v9880_v42  ;;  %v9883_v56 = vpop.f32.mrb[159].mxu0  ;;  %v9923_v57 = vpop.f32.mrb[159].mxu1  ;;  %v3793_v40 = vld [vmem:[%s17991_s19 + $0x460] sm:$0xff]  ;;  %v4050_v42 = vld [vmem:[%s17991_s19 + $0xc68] sm:$0x11]  ;;  %v3418_v51 = vpack.c.bf16 %v1641_v29, %v1641_v29 }
 0x273   : > { %v17324_v54 = vcombine.high %v3793_v40, %v4049_v34  ;;  %v268_v56 = vld [vmem:[%s17985_s28 + $0x238] sm:$0xff]  ;;  %v1658_v57 = vcombine.high %v19012_v47, %v19012_v47 }
 0x274   : > { %12038 = vmatmul.mubr.bf16.vlgmr.msra.gmra.mrb[8].mxu0 %v3405_v45  ;;  %12078 = vmatmul.mubr.bf16.vlgmr.msra.gmra.mrb[8].mxu1 %v3407_v46  ;;  %v17319_v45 = vcombine.low %v3791_v11, %v4047_v5  ;;  %v17321_v46 = vcombine.low %v3792_v12, %v4048_v13  ;;  %v3796_v5 = vld [vmem:[%s17991_s19 + $0x478] sm:$0xff] }
 0x275   : > { %12086 = vmatpush1.bf16.xpose.msra.mxu0 %v17311_v52  ;;  %12126 = vmatpush1.bf16.xpose.msra.mxu1 %v17313_v53  ;;  %v3420_v52 = vpack.c.bf16 %v1642_v30, %v1642_v30  ;;  %v19015_v53 = vrot.slane %v1643_v31, %v18012_v24  ;;  %v3422_v11 = vpack.c.bf16 %v1658_v57, %v1658_v57 }
 0x276   : > { %12117 = vmatprep.mubr.bf16.mxu0 %v3410_v58  ;;  %12157 = vmatprep.mubr.bf16.mxu1 %v3412_v59  ;;  %v1660_v59 = vcombine.high %v268_v56, %v268_v56  ;;  %v3421_v31 = vpack.c.bf16 %v19012_v47, %v19012_v47 }
 0x277   : > { %v9959_v3 = vpop.f32.mrb[160].mxu0  ;;  %v9999_v4 = vpop.f32.mrb[160].mxu1  ;;  %12165 = vmatprep.subr.bf16.mxu0 %v17316_v61  ;;  %12205 = vmatprep.subr.bf16.mxu1 %v17318_v62  ;;  %v1659_v58 = vcombine.high %v19015_v53, %v19015_v53  ;;  %v4051_v62 = vld [vmem:[%s17991_s19 + $0xc70] sm:$0x11] }
 0x278   : > { %v9960_v6 = vadd.f32 %v9959_v3, %v9920_v55  ;;  %v9961_v7 = vpop.f32.mrb[161].mxu0  ;;  %v10001_v8 = vpop.f32.mrb[161].mxu1  ;;  %v17326_v55 = vcombine.high %v3794_v41, %v4050_v42  ;;  %v3419_v3 = vpack.c.bf16 %v18996_v25, %v18996_v25 }
 0x279   : > { %v9962_v14 = vpop.f32.mrb[162].mxu0  ;;  %v10002_v15 = vpop.f32.mrb[162].mxu1 }
 0x27a   : > { %v10000_v19 = vadd.f32 %v9999_v4, %v9960_v6  ;;  %v9963_v20 = vpop.f32.mrb[163].mxu0  ;;  %v10003_v21 = vpop.f32.mrb[163].mxu1  ;;  %v3795_v4 = vld [vmem:[%s17991_s19 + $0x470] sm:$0xff]  ;;  %v4052_v6 = vld [vmem:[%s17991_s19 + $0xc78] sm:$0x11]  ;;  %v3424_v15 = vpack.c.bf16 %v1659_v58, %v1659_v58 }
 0x27b   : > { %v269_v20 = vld [vmem:[%s17985_s28 + $0x240] sm:$0xff] }
 0x27c   : > { %12118 = vmatmul.mubr.bf16.vlgmr.msra.gmra.mrb[12].mxu0 %v3409_v9  ;;  %12158 = vmatmul.mubr.bf16.vlgmr.msra.gmra.mrb[12].mxu1 %v3411_v10  ;;  %v17323_v9 = vcombine.low %v3793_v40, %v4049_v34  ;;  %v17325_v10 = vcombine.low %v3794_v41, %v4050_v42  ;;  %v1677_v23 = vcombine.high %v269_v20, %v269_v20  ;;  %v3798_v34 = vld [vmem:[%s17991_s19 + $0x488] sm:$0xff] }
 0x27d   : > { %12166 = vmatpush1.bf16.xpose.msra.mxu0 %v17315_v16  ;;  %12206 = vmatpush1.bf16.xpose.msra.mxu1 %v17317_v17  ;;  %v19031_v16 = vrot.slane %v268_v56, %v18012_v24  ;;  %v19034_v17 = vrot.slane %v1660_v59, %v18012_v24  ;;  %v19050_v40 = vrot.slane %v269_v20, %v18012_v24 }
 0x27e   : > { %12197 = vmatprep.mubr.bf16.mxu0 %v3414_v18  ;;  %12237 = vmatprep.mubr.bf16.mxu1 %v3416_v22  ;;  %v17328_v18 = vcombine.high %v3795_v4, %v4051_v62 }
 0x27f   : > { %v10039_v32 = vpop.f32.mrb[164].mxu0  ;;  %v10079_v33 = vpop.f32.mrb[164].mxu1  ;;  %12245 = vmatprep.subr.bf16.mxu0 %v17320_v26  ;;  %12285 = vmatprep.subr.bf16.mxu1 %v17322_v27  ;;  %v1675_v21 = vcombine.high %v19031_v16, %v19031_v16  ;;  %v1676_v22 = vcombine.high %v19034_v17, %v19034_v17  ;;  %v4053_v27 = vld [vmem:[%s17991_s19 + $0xc80] sm:$0x11]  ;;  %v3425_v59 = vpack.c.bf16 %v19031_v16, %v19031_v16 }
 0x280   : > { %v10040_v35 = vadd.f32 %v10039_v32, %v10000_v19  ;;  %v10041_v36 = vpop.f32.mrb[165].mxu0  ;;  %v10081_v37 = vpop.f32.mrb[165].mxu1  ;;  %v17330_v19 = vcombine.high %v3796_v5, %v4052_v6  ;;  %v3423_v32 = vpack.c.bf16 %v19015_v53, %v19015_v53 }
 0x281   : > { %v10042_v43 = vpop.f32.mrb[166].mxu0  ;;  %v10082_v44 = vpop.f32.mrb[166].mxu1 }
 0x282   : > { %v10080_v48 = vadd.f32 %v10079_v33, %v10040_v35  ;;  %v10043_v49 = vpop.f32.mrb[167].mxu0  ;;  %v10083_v50 = vpop.f32.mrb[167].mxu1  ;;  %v3797_v33 = vld [vmem:[%s17991_s19 + $0x480] sm:$0xff]  ;;  %v4054_v35 = vld [vmem:[%s17991_s19 + $0xc88] sm:$0x11]  ;;  %v3426_v44 = vpack.c.bf16 %v1675_v21, %v1675_v21 }
 0x283   : > { %v17332_v47 = vcombine.high %v3797_v33, %v4053_v27  ;;  %v270_v49 = vld [vmem:[%s17985_s28 + $0x248] sm:$0xff]  ;;  %v1692_v50 = vcombine.high %v19050_v40, %v19050_v40 }
 0x284   : > { %12198 = vmatmul.mubr.bf16.vlgmr.msra.gmra.mrb[16].mxu0 %v3413_v38  ;;  %12238 = vmatmul.mubr.bf16.vlgmr.msra.gmra.mrb[16].mxu1 %v3415_v39  ;;  %v17327_v38 = vcombine.low %v3795_v4, %v4051_v62  ;;  %v17329_v39 = vcombine.low %v3796_v5, %v4052_v6  ;;  %v3800_v62 = vld [vmem:[%s17991_s19 + $0x498] sm:$0xff] }
 0x285   : > { %12246 = vmatpush1.bf16.xpose.msra.mxu0 %v17319_v45  ;;  %12286 = vmatpush1.bf16.xpose.msra.mxu1 %v17321_v46  ;;  %v3428_v45 = vpack.c.bf16 %v1676_v22, %v1676_v22  ;;  %v19053_v46 = vrot.slane %v1677_v23, %v18012_v24  ;;  %v3430_v4 = vpack.c.bf16 %v1692_v50, %v1692_v50 }
 0x286   : > { %12277 = vmatprep.mubr.bf16.mxu0 %v3418_v51  ;;  %12317 = vmatprep.mubr.bf16.mxu1 %v3420_v52  ;;  %v1694_v52 = vcombine.high %v270_v49, %v270_v49  ;;  %v3429_v23 = vpack.c.bf16 %v19050_v40, %v19050_v40 }
 0x287   : > { %v10119_v60 = vpop.f32.mrb[168].mxu0  ;;  %v10159_v61 = vpop.f32.mrb[168].mxu1  ;;  %12325 = vmatprep.subr.bf16.mxu0 %v17324_v54  ;;  %12365 = vmatprep.subr.bf16.mxu1 %v17326_v55  ;;  %v1693_v51 = vcombine.high %v19053_v46, %v19053_v46  ;;  %v4055_v55 = vld [vmem:[%s17991_s19 + $0xc90] sm:$0x11] }
 0x288   : > { %v10120_v63 = vadd.f32 %v10119_v60, %v10080_v48  ;;  %v10121_v0 = vpop.f32.mrb[169].mxu0  ;;  %v10161_v1 = vpop.f32.mrb[169].mxu1  ;;  %v17334_v48 = vcombine.high %v3798_v34, %v4054_v35  ;;  %v3427_v60 = vpack.c.bf16 %v19034_v17, %v19034_v17 }
 0x289   : > { %v10122_v7 = vpop.f32.mrb[170].mxu0  ;;  %v10162_v8 = vpop.f32.mrb[170].mxu1 }
 0x28a   : > { %v10160_v12 = vadd.f32 %v10159_v61, %v10120_v63  ;;  %v10123_v13 = vpop.f32.mrb[171].mxu0  ;;  %v10163_v14 = vpop.f32.mrb[171].mxu1  ;;  %v3799_v61 = vld [vmem:[%s17991_s19 + $0x490] sm:$0xff]  ;;  %v4056_v63 = vld [vmem:[%s17991_s19 + $0xc98] sm:$0x11]  ;;  %v3432_v8 = vpack.c.bf16 %v1693_v51, %v1693_v51 }
 0x28b   : > { %v271_v13 = vld [vmem:[%s17985_s28 + $0x250] sm:$0xff] }
 0x28c   : > { %12278 = vmatmul.mubr.bf16.vlgmr.msra.gmra.mrb[20].mxu0 %v3417_v2  ;;  %12318 = vmatmul.mubr.bf16.vlgmr.msra.gmra.mrb[20].mxu1 %v3419_v3  ;;  %v17331_v2 = vcombine.low %v3797_v33, %v4053_v27  ;;  %v17333_v3 = vcombine.low %v3798_v34, %v4054_v35  ;;  %v1711_v16 = vcombine.high %v271_v13, %v271_v13  ;;  %v3802_v27 = vld [vmem:[%s17991_s19 + $0x4a8] sm:$0xff] }
 0x28d   : > { %12326 = vmatpush1.bf16.xpose.msra.mxu0 %v17323_v9  ;;  %12366 = vmatpush1.bf16.xpose.msra.mxu1 %v17325_v10  ;;  %v19069_v9 = vrot.slane %v270_v49, %v18012_v24  ;;  %v19072_v10 = vrot.slane %v1694_v52, %v18012_v24  ;;  %v19088_v33 = vrot.slane %v271_v13, %v18012_v24 }
 0x28e   : > { %12357 = vmatprep.mubr.bf16.mxu0 %v3422_v11  ;;  %12397 = vmatprep.mubr.bf16.mxu1 %v3424_v15  ;;  %v17336_v11 = vcombine.high %v3799_v61, %v4055_v55 }
 0x28f   : > { %v10199_v25 = vpop.f32.mrb[172].mxu0  ;;  %v10239_v26 = vpop.f32.mrb[172].mxu1  ;;  %12405 = vmatprep.subr.bf16.mxu0 %v17328_v18  ;;  %12445 = vmatprep.subr.bf16.mxu1 %v17330_v19  ;;  %v1709_v14 = vcombine.high %v19069_v9, %v19069_v9  ;;  %v1710_v15 = vcombine.high %v19072_v10, %v19072_v10  ;;  %v4057_v19 = vld [vmem:[%s17991_s19 + $0xca0] sm:$0x11]  ;;  %v3433_v52 = vpack.c.bf16 %v19069_v9, %v19069_v9 }
 0x290   : > { %v10200_v28 = vadd.f32 %v10199_v25, %v10160_v12  ;;  %v10201_v29 = vpop.f32.mrb[173].mxu0  ;;  %v10241_v30 = vpop.f32.mrb[173].mxu1  ;;  %v17338_v12 = vcombine.high %v3800_v62, %v4056_v63  ;;  %v3431_v25 = vpack.c.bf16 %v19053_v46, %v19053_v46 }
 0x291   : > { %v10202_v36 = vpop.f32.mrb[174].mxu0  ;;  %v10242_v37 = vpop.f32.mrb[174].mxu1 }
 0x292   : > { %v10240_v41 = vadd.f32 %v10239_v26, %v10200_v28  ;;  %v10203_v42 = vpop.f32.mrb[175].mxu0  ;;  %v10243_v43 = vpop.f32.mrb[175].mxu1  ;;  %v3801_v26 = vld [vmem:[%s17991_s19 + $0x4a0] sm:$0xff]  ;;  %v4058_v28 = vld [vmem:[%s17991_s19 + $0xca8] sm:$0x11]  ;;  %v3434_v37 = vpack.c.bf16 %v1709_v14, %v1709_v14 }
 0x293   : > { %v17340_v40 = vcombine.high %v3801_v26, %v4057_v19  ;;  %v272_v42 = vld [vmem:[%s17985_s28 + $0x258] sm:$0xff]  ;;  %v1726_v43 = vcombine.high %v19088_v33, %v19088_v33 }
 0x294   : > { %12358 = vmatmul.mubr.bf16.vlgmr.msra.gmra.mrb[24].mxu0 %v3421_v31  ;;  %12398 = vmatmul.mubr.bf16.vlgmr.msra.gmra.mrb[24].mxu1 %v3423_v32  ;;  %v17335_v31 = vcombine.low %v3799_v61, %v4055_v55  ;;  %v17337_v32 = vcombine.low %v3800_v62, %v4056_v63  ;;  %v3804_v55 = vld [vmem:[%s17991_s19 + $0x4b8] sm:$0xff] }
 0x295   : > { %12406 = vmatpush1.bf16.xpose.msra.mxu0 %v17327_v38  ;;  %12446 = vmatpush1.bf16.xpose.msra.mxu1 %v17329_v39  ;;  %v3436_v38 = vpack.c.bf16 %v1710_v15, %v1710_v15  ;;  %v19091_v39 = vrot.slane %v1711_v16, %v18012_v24  ;;  %v3438_v61 = vpack.c.bf16 %v1726_v43, %v1726_v43 }
 0x296   : > { %12437 = vmatprep.mubr.bf16.mxu0 %v3426_v44  ;;  %12477 = vmatprep.mubr.bf16.mxu1 %v3428_v45  ;;  %v1728_v45 = vcombine.high %v272_v42, %v272_v42  ;;  %v3437_v16 = vpack.c.bf16 %v19088_v33, %v19088_v33 }
 0x297   : > { %v10279_v53 = vpop.f32.mrb[176].mxu0  ;;  %v10319_v54 = vpop.f32.mrb[176].mxu1  ;;  %12485 = vmatprep.subr.bf16.mxu0 %v17332_v47  ;;  %12525 = vmatprep.subr.bf16.mxu1 %v17334_v48  ;;  %v1727_v44 = vcombine.high %v19091_v39, %v19091_v39  ;;  %v4059_v48 = vld [vmem:[%s17991_s19 + $0xcb0] sm:$0x11] }
 0x298   : > { %v10280_v56 = vadd.f32 %v10279_v53, %v10240_v41  ;;  %v10281_v57 = vpop.f32.mrb[177].mxu0  ;;  %v10321_v58 = vpop.f32.mrb[177].mxu1  ;;  %v17342_v41 = vcombine.high %v3802_v27, %v4058_v28  ;;  %v3435_v53 = vpack.c.bf16 %v19072_v10, %v19072_v10 }
 0x299   : > { %v10282_v0 = vpop.f32.mrb[178].mxu0  ;;  %v10322_v1 = vpop.f32.mrb[178].mxu1 }
 0x29a   : > { %v10320_v5 = vadd.f32 %v10319_v54, %v10280_v56  ;;  %v10283_v6 = vpop.f32.mrb[179].mxu0  ;;  %v10323_v7 = vpop.f32.mrb[179].mxu1  ;;  %v3803_v54 = vld [vmem:[%s17991_s19 + $0x4b0] sm:$0xff]  ;;  %v4060_v56 = vld [vmem:[%s17991_s19 + $0xcb8] sm:$0x11]  ;;  %v3440_v1 = vpack.c.bf16 %v1727_v44, %v1727_v44 }
 0x29b   : > { %v273_v6 = vld [vmem:[%s17985_s28 + $0x260] sm:$0xff] }
 0x29c   : > { %12438 = vmatmul.mubr.bf16.vlgmr.msra.gmra.mrb[28].mxu0 %v3425_v59  ;;  %12478 = vmatmul.mubr.bf16.vlgmr.msra.gmra.mrb[28].mxu1 %v3427_v60  ;;  %v17339_v59 = vcombine.low %v3801_v26, %v4057_v19  ;;  %v17341_v60 = vcombine.low %v3802_v27, %v4058_v28  ;;  %v1745_v9 = vcombine.high %v273_v6, %v273_v6  ;;  %v3806_v19 = vld [vmem:[%s17991_s19 + $0x4c8] sm:$0xff] }
 0x29d   : > { %12486 = vmatpush1.bf16.xpose.msra.mxu0 %v17331_v2  ;;  %12526 = vmatpush1.bf16.xpose.msra.mxu1 %v17333_v3  ;;  %v19107_v2 = vrot.slane %v272_v42, %v18012_v24  ;;  %v19110_v3 = vrot.slane %v1728_v45, %v18012_v24  ;;  %v19126_v26 = vrot.slane %v273_v6, %v18012_v24 }
 0x29e   : > { %12517 = vmatprep.mubr.bf16.mxu0 %v3430_v4  ;;  %12557 = vmatprep.mubr.bf16.mxu1 %v3432_v8  ;;  %v17344_v4 = vcombine.high %v3803_v54, %v4059_v48 }
 0x29f   : > { %v10359_v17 = vpop.f32.mrb[180].mxu0  ;;  %v10399_v18 = vpop.f32.mrb[180].mxu1  ;;  %12565 = vmatprep.subr.bf16.mxu0 %v17336_v11  ;;  %12605 = vmatprep.subr.bf16.mxu1 %v17338_v12  ;;  %v1743_v7 = vcombine.high %v19107_v2, %v19107_v2  ;;  %v1744_v8 = vcombine.high %v19110_v3, %v19110_v3  ;;  %v4061_v12 = vld [vmem:[%s17991_s19 + $0xcc0] sm:$0x11]  ;;  %v3441_v45 = vpack.c.bf16 %v19107_v2, %v19107_v2 }
 0x2a0   : > { %v10360_v20 = vadd.f32 %v10359_v17, %v10320_v5  ;;  %v10361_v21 = vpop.f32.mrb[181].mxu0  ;;  %v10401_v22 = vpop.f32.mrb[181].mxu1  ;;  %v17346_v5 = vcombine.high %v3804_v55, %v4060_v56  ;;  %v3439_v17 = vpack.c.bf16 %v19091_v39, %v19091_v39 }
 0x2a1   : > { %v10362_v29 = vpop.f32.mrb[182].mxu0  ;;  %v10402_v30 = vpop.f32.mrb[182].mxu1 }
 0x2a2   : > { %v10400_v34 = vadd.f32 %v10399_v18, %v10360_v20  ;;  %v10363_v35 = vpop.f32.mrb[183].mxu0  ;;  %v10403_v36 = vpop.f32.mrb[183].mxu1  ;;  %v3805_v18 = vld [vmem:[%s17991_s19 + $0x4c0] sm:$0xff]  ;;  %v4062_v20 = vld [vmem:[%s17991_s19 + $0xcc8] sm:$0x11]  ;;  %v3442_v30 = vpack.c.bf16 %v1743_v7, %v1743_v7 }
 0x2a3   : > { %v17348_v33 = vcombine.high %v3805_v18, %v4061_v12  ;;  %v274_v35 = vld [vmem:[%s17985_s28 + $0x268] sm:$0xff]  ;;  %v1760_v36 = vcombine.high %v19126_v26, %v19126_v26 }
 0x2a4   : > { %12518 = vmatmul.mubr.bf16.vlgmr.msra.gmra.mrb[32].mxu0 %v3429_v23  ;;  %12558 = vmatmul.mubr.bf16.vlgmr.msra.gmra.mrb[32].mxu1 %v3431_v25  ;;  %v17343_v23 = vcombine.low %v3803_v54, %v4059_v48  ;;  %v17345_v25 = vcombine.low %v3804_v55, %v4060_v56  ;;  %v3808_v48 = vld [vmem:[%s17991_s19 + $0x4d8] sm:$0xff] }
 0x2a5   : > { %12566 = vmatpush1.bf16.xpose.msra.mxu0 %v17335_v31  ;;  %12606 = vmatpush1.bf16.xpose.msra.mxu1 %v17337_v32  ;;  %v3444_v31 = vpack.c.bf16 %v1744_v8, %v1744_v8  ;;  %v19129_v32 = vrot.slane %v1745_v9, %v18012_v24  ;;  %v3446_v54 = vpack.c.bf16 %v1760_v36, %v1760_v36 }
 0x2a6   : > { %12597 = vmatprep.mubr.bf16.mxu0 %v3434_v37  ;;  %12637 = vmatprep.mubr.bf16.mxu1 %v3436_v38  ;;  %v1762_v38 = vcombine.high %v274_v35, %v274_v35  ;;  %v3445_v9 = vpack.c.bf16 %v19126_v26, %v19126_v26 }
 0x2a7   : > { %v10439_v46 = vpop.f32.mrb[184].mxu0  ;;  %v10479_v47 = vpop.f32.mrb[184].mxu1  ;;  %12645 = vmatprep.subr.bf16.mxu0 %v17340_v40  ;;  %12685 = vmatprep.subr.bf16.mxu1 %v17342_v41  ;;  %v1761_v37 = vcombine.high %v19129_v32, %v19129_v32  ;;  %v4063_v41 = vld [vmem:[%s17991_s19 + $0xcd0] sm:$0x11] }
 0x2a8   : > { %v10440_v49 = vadd.f32 %v10439_v46, %v10400_v34  ;;  %v10441_v50 = vpop.f32.mrb[185].mxu0  ;;  %v10481_v51 = vpop.f32.mrb[185].mxu1  ;;  %v17350_v34 = vcombine.high %v3806_v19, %v4062_v20  ;;  %v3443_v46 = vpack.c.bf16 %v19110_v3, %v19110_v3 }
 0x2a9   : > { %v10442_v57 = vpop.f32.mrb[186].mxu0  ;;  %v10482_v58 = vpop.f32.mrb[186].mxu1 }
 0x2aa   : > { %v10480_v62 = vadd.f32 %v10479_v47, %v10440_v49  ;;  %v10443_v63 = vpop.f32.mrb[187].mxu0  ;;  %v10483_v0 = vpop.f32.mrb[187].mxu1  ;;  %v3807_v47 = vld [vmem:[%s17991_s19 + $0x4d0] sm:$0xff]  ;;  %v4064_v49 = vld [vmem:[%s17991_s19 + $0xcd8] sm:$0x11]  ;;  %v3448_v58 = vpack.c.bf16 %v1761_v37, %v1761_v37 }
 0x2ab   : > { %v275_v63 = vld [vmem:[%s17985_s28 + $0x270] sm:$0xff] }
 0x2ac   : > { %12598 = vmatmul.mubr.bf16.vlgmr.msra.gmra.mrb[36].mxu0 %v3433_v52  ;;  %12638 = vmatmul.mubr.bf16.vlgmr.msra.gmra.mrb[36].mxu1 %v3435_v53  ;;  %v17347_v52 = vcombine.low %v3805_v18, %v4061_v12  ;;  %v17349_v53 = vcombine.low %v3806_v19, %v4062_v20  ;;  %v1779_v2 = vcombine.high %v275_v63, %v275_v63  ;;  %v3810_v12 = vld [vmem:[%s17991_s19 + $0x4e8] sm:$0xff] }
 0x2ad   : > { %12646 = vmatpush1.bf16.xpose.msra.mxu0 %v17339_v59  ;;  %12686 = vmatpush1.bf16.xpose.msra.mxu1 %v17341_v60  ;;  %v19145_v59 = vrot.slane %v274_v35, %v18012_v24  ;;  %v19148_v60 = vrot.slane %v1762_v38, %v18012_v24  ;;  %v19164_v18 = vrot.slane %v275_v63, %v18012_v24 }
 0x2ae   : > { %12677 = vmatprep.mubr.bf16.mxu0 %v3438_v61  ;;  %12717 = vmatprep.mubr.bf16.mxu1 %v3440_v1  ;;  %v17352_v61 = vcombine.high %v3807_v47, %v4063_v41 }
 0x2af   : > { %v10519_v10 = vpop.f32.mrb[188].mxu0  ;;  %v10559_v11 = vpop.f32.mrb[188].mxu1  ;;  %12725 = vmatprep.subr.bf16.mxu0 %v17344_v4  ;;  %12765 = vmatprep.subr.bf16.mxu1 %v17346_v5  ;;  %v1777_v0 = vcombine.high %v19145_v59, %v19145_v59  ;;  %v1778_v1 = vcombine.high %v19148_v60, %v19148_v60  ;;  %v4065_v5 = vld [vmem:[%s17991_s19 + $0xce0] sm:$0x11]  ;;  %v3449_v38 = vpack.c.bf16 %v19145_v59, %v19145_v59 }
 0x2b0   : > { %v10520_v13 = vadd.f32 %v10519_v10, %v10480_v62  ;;  %v10521_v14 = vpop.f32.mrb[189].mxu0  ;;  %v10561_v15 = vpop.f32.mrb[189].mxu1  ;;  %v17354_v62 = vcombine.high %v3808_v48, %v4064_v49  ;;  %v3447_v10 = vpack.c.bf16 %v19129_v32, %v19129_v32 }
 0x2b1   : > { %v10522_v21 = vpop.f32.mrb[190].mxu0  ;;  %v10562_v22 = vpop.f32.mrb[190].mxu1 }
 0x2b2   : > { %v10560_v27 = vadd.f32 %v10559_v11, %v10520_v13  ;;  %v10523_v28 = vpop.f32.mrb[191].mxu0  ;;  %v10563_v29 = vpop.f32.mrb[191].mxu1  ;;  %v3809_v11 = vld [vmem:[%s17991_s19 + $0x4e0] sm:$0xff]  ;;  %v4066_v13 = vld [vmem:[%s17991_s19 + $0xce8] sm:$0x11]  ;;  %v3450_v22 = vpack.c.bf16 %v1777_v0, %v1777_v0 }
 0x2b3   : > { %v17356_v26 = vcombine.high %v3809_v11, %v4065_v5  ;;  %v276_v28 = vld [vmem:[%s17985_s28 + $0x278] sm:$0xff]  ;;  %v1794_v29 = vcombine.high %v19164_v18, %v19164_v18 }
 0x2b4   : > { %12678 = vmatmul.mubr.bf16.vlgmr.msra.gmra.mrb[40].mxu0 %v3437_v16  ;;  %12718 = vmatmul.mubr.bf16.vlgmr.msra.gmra.mrb[40].mxu1 %v3439_v17  ;;  %v17351_v16 = vcombine.low %v3807_v47, %v4063_v41  ;;  %v17353_v17 = vcombine.low %v3808_v48, %v4064_v49  ;;  %v3812_v41 = vld [vmem:[%s17991_s19 + $0x4f8] sm:$0xff] }
 0x2b5   : > { %12726 = vmatpush1.bf16.xpose.msra.mxu0 %v17343_v23  ;;  %12766 = vmatpush1.bf16.xpose.msra.mxu1 %v17345_v25  ;;  %v3452_v23 = vpack.c.bf16 %v1778_v1, %v1778_v1  ;;  %v19167_v25 = vrot.slane %v1779_v2, %v18012_v24  ;;  %v3454_v47 = vpack.c.bf16 %v1794_v29, %v1794_v29 }
 0x2b6   : > { %12757 = vmatprep.mubr.bf16.mxu0 %v3442_v30  ;;  %12797 = vmatprep.mubr.bf16.mxu1 %v3444_v31  ;;  %v1796_v31 = vcombine.high %v276_v28, %v276_v28  ;;  %v3453_v2 = vpack.c.bf16 %v19164_v18, %v19164_v18 }
 0x2b7   : > { %v10599_v39 = vpop.f32.mrb[192].mxu0  ;;  %v10639_v40 = vpop.f32.mrb[192].mxu1  ;;  %12805 = vmatprep.subr.bf16.mxu0 %v17348_v33  ;;  %12845 = vmatprep.subr.bf16.mxu1 %v17350_v34  ;;  %v1795_v30 = vcombine.high %v19167_v25, %v19167_v25  ;;  %v4067_v34 = vld [vmem:[%s17991_s19 + $0xcf0] sm:$0x11] }
 0x2b8   : > { %v10600_v42 = vadd.f32 %v10599_v39, %v10560_v27  ;;  %v10601_v43 = vpop.f32.mrb[193].mxu0  ;;  %v10641_v44 = vpop.f32.mrb[193].mxu1  ;;  %v17358_v27 = vcombine.high %v3810_v12, %v4066_v13  ;;  %v3451_v39 = vpack.c.bf16 %v19148_v60, %v19148_v60 }
 0x2b9   : > { %v10602_v50 = vpop.f32.mrb[194].mxu0  ;;  %v10642_v51 = vpop.f32.mrb[194].mxu1 }
 0x2ba   : > { %v10640_v55 = vadd.f32 %v10639_v40, %v10600_v42  ;;  %v10603_v56 = vpop.f32.mrb[195].mxu0  ;;  %v10643_v57 = vpop.f32.mrb[195].mxu1  ;;  %v3811_v40 = vld [vmem:[%s17991_s19 + $0x4f0] sm:$0xff]  ;;  %v4068_v42 = vld [vmem:[%s17991_s19 + $0xcf8] sm:$0x11]  ;;  %v3456_v51 = vpack.c.bf16 %v1795_v30, %v1795_v30 }
 0x2bb   : > { %v277_v56 = vld [vmem:[%s17985_s28 + $0x280] sm:$0xff] }
 0x2bc   : > { %12758 = vmatmul.mubr.bf16.vlgmr.msra.gmra.mrb[44].mxu0 %v3441_v45  ;;  %12798 = vmatmul.mubr.bf16.vlgmr.msra.gmra.mrb[44].mxu1 %v3443_v46  ;;  %v17355_v45 = vcombine.low %v3809_v11, %v4065_v5  ;;  %v17357_v46 = vcombine.low %v3810_v12, %v4066_v13  ;;  %v1813_v59 = vcombine.high %v277_v56, %v277_v56  ;;  %v3814_v5 = vld [vmem:[%s17991_s19 + $0x508] sm:$0xff] }
 0x2bd   : > { %12806 = vmatpush1.bf16.xpose.msra.mxu0 %v17347_v52  ;;  %12846 = vmatpush1.bf16.xpose.msra.mxu1 %v17349_v53  ;;  %v19183_v52 = vrot.slane %v276_v28, %v18012_v24  ;;  %v19186_v53 = vrot.slane %v1796_v31, %v18012_v24  ;;  %v19202_v11 = vrot.slane %v277_v56, %v18012_v24 }
 0x2be   : > { %12837 = vmatprep.mubr.bf16.mxu0 %v3446_v54  ;;  %12877 = vmatprep.mubr.bf16.mxu1 %v3448_v58  ;;  %v17360_v54 = vcombine.high %v3811_v40, %v4067_v34 }
 0x2bf   : > { %v10679_v3 = vpop.f32.mrb[196].mxu0  ;;  %v10719_v4 = vpop.f32.mrb[196].mxu1  ;;  %12885 = vmatprep.subr.bf16.mxu0 %v17352_v61  ;;  %12925 = vmatprep.subr.bf16.mxu1 %v17354_v62  ;;  %v1811_v57 = vcombine.high %v19183_v52, %v19183_v52  ;;  %v1812_v58 = vcombine.high %v19186_v53, %v19186_v53  ;;  %v4069_v62 = vld [vmem:[%s17991_s19 + $0xd00] sm:$0x11]  ;;  %v3457_v31 = vpack.c.bf16 %v19183_v52, %v19183_v52 }
 0x2c0   : > { %v10680_v6 = vadd.f32 %v10679_v3, %v10640_v55  ;;  %v10681_v7 = vpop.f32.mrb[197].mxu0  ;;  %v10721_v8 = vpop.f32.mrb[197].mxu1  ;;  %v17362_v55 = vcombine.high %v3812_v41, %v4068_v42  ;;  %v3455_v3 = vpack.c.bf16 %v19167_v25, %v19167_v25 }
 0x2c1   : > { %v10682_v14 = vpop.f32.mrb[198].mxu0  ;;  %v10722_v15 = vpop.f32.mrb[198].mxu1 }
 0x2c2   : > { %v10720_v19 = vadd.f32 %v10719_v4, %v10680_v6  ;;  %v10683_v20 = vpop.f32.mrb[199].mxu0  ;;  %v10723_v21 = vpop.f32.mrb[199].mxu1  ;;  %v3813_v4 = vld [vmem:[%s17991_s19 + $0x500] sm:$0xff]  ;;  %v4070_v6 = vld [vmem:[%s17991_s19 + $0xd08] sm:$0x11]  ;;  %v3458_v15 = vpack.c.bf16 %v1811_v57, %v1811_v57 }
 0x2c3   : > { %v17364_v18 = vcombine.high %v3813_v4, %v4069_v62  ;;  %v278_v20 = vld [vmem:[%s17985_s28 + $0x288] sm:$0xff]  ;;  %v1828_v21 = vcombine.high %v19202_v11, %v19202_v11 }
 0x2c4   : > { %12838 = vmatmul.mubr.bf16.vlgmr.msra.gmra.mrb[48].mxu0 %v3445_v9  ;;  %12878 = vmatmul.mubr.bf16.vlgmr.msra.gmra.mrb[48].mxu1 %v3447_v10  ;;  %v17359_v9 = vcombine.low %v3811_v40, %v4067_v34  ;;  %v17361_v10 = vcombine.low %v3812_v41, %v4068_v42  ;;  %v3816_v34 = vld [vmem:[%s17991_s19 + $0x518] sm:$0xff] }
 0x2c5   : > { %12886 = vmatpush1.bf16.xpose.msra.mxu0 %v17351_v16  ;;  %12926 = vmatpush1.bf16.xpose.msra.mxu1 %v17353_v17  ;;  %v3460_v16 = vpack.c.bf16 %v1812_v58, %v1812_v58  ;;  %v19205_v17 = vrot.slane %v1813_v59, %v18012_v24  ;;  %v3462_v40 = vpack.c.bf16 %v1828_v21, %v1828_v21 }
 0x2c6   : > { %12917 = vmatprep.mubr.bf16.mxu0 %v3450_v22  ;;  %12957 = vmatprep.mubr.bf16.mxu1 %v3452_v23  ;;  %v1830_v23 = vcombine.high %v278_v20, %v278_v20  ;;  %v3461_v59 = vpack.c.bf16 %v19202_v11, %v19202_v11 }
 0x2c7   : > { %v10759_v32 = vpop.f32.mrb[200].mxu0  ;;  %v10799_v33 = vpop.f32.mrb[200].mxu1  ;;  %12965 = vmatprep.subr.bf16.mxu0 %v17356_v26  ;;  %13005 = vmatprep.subr.bf16.mxu1 %v17358_v27  ;;  %v1829_v22 = vcombine.high %v19205_v17, %v19205_v17  ;;  %v4071_v27 = vld [vmem:[%s17991_s19 + $0xd10] sm:$0x11] }
 0x2c8   : > { %v10760_v35 = vadd.f32 %v10759_v32, %v10720_v19  ;;  %v10761_v36 = vpop.f32.mrb[201].mxu0  ;;  %v10801_v37 = vpop.f32.mrb[201].mxu1  ;;  %v17366_v19 = vcombine.high %v3814_v5, %v4070_v6  ;;  %v3459_v32 = vpack.c.bf16 %v19186_v53, %v19186_v53 }
 0x2c9   : > { %v10762_v43 = vpop.f32.mrb[202].mxu0  ;;  %v10802_v44 = vpop.f32.mrb[202].mxu1 }
 0x2ca   : > { %v10800_v48 = vadd.f32 %v10799_v33, %v10760_v35  ;;  %v10763_v49 = vpop.f32.mrb[203].mxu0  ;;  %v10803_v50 = vpop.f32.mrb[203].mxu1  ;;  %v3815_v33 = vld [vmem:[%s17991_s19 + $0x510] sm:$0xff]  ;;  %v4072_v35 = vld [vmem:[%s17991_s19 + $0xd18] sm:$0x11]  ;;  %v3464_v44 = vpack.c.bf16 %v1829_v22, %v1829_v22 }
 0x2cb   : > { %v279_v49 = vld [vmem:[%s17985_s28 + $0x290] sm:$0xff] }
 0x2cc   : > { %12918 = vmatmul.mubr.bf16.vlgmr.msra.gmra.mrb[52].mxu0 %v3449_v38  ;;  %12958 = vmatmul.mubr.bf16.vlgmr.msra.gmra.mrb[52].mxu1 %v3451_v39  ;;  %v17363_v38 = vcombine.low %v3813_v4, %v4069_v62  ;;  %v17365_v39 = vcombine.low %v3814_v5, %v4070_v6  ;;  %v1847_v52 = vcombine.high %v279_v49, %v279_v49  ;;  %v3818_v62 = vld [vmem:[%s17991_s19 + $0x528] sm:$0xff] }
 0x2cd   : > { %12966 = vmatpush1.bf16.xpose.msra.mxu0 %v17355_v45  ;;  %13006 = vmatpush1.bf16.xpose.msra.mxu1 %v17357_v46  ;;  %v19221_v45 = vrot.slane %v278_v20, %v18012_v24  ;;  %v19224_v46 = vrot.slane %v1830_v23, %v18012_v24  ;;  %v19240_v4 = vrot.slane %v279_v49, %v18012_v24 }
 0x2ce   : > { %12997 = vmatprep.mubr.bf16.mxu0 %v3454_v47  ;;  %13037 = vmatprep.mubr.bf16.mxu1 %v3456_v51  ;;  %v17368_v47 = vcombine.high %v3815_v33, %v4071_v27 }
 0x2cf   : > { %v10839_v60 = vpop.f32.mrb[204].mxu0  ;;  %v10879_v61 = vpop.f32.mrb[204].mxu1  ;;  %13045 = vmatprep.subr.bf16.mxu0 %v17360_v54  ;;  %13085 = vmatprep.subr.bf16.mxu1 %v17362_v55  ;;  %v1845_v50 = vcombine.high %v19221_v45, %v19221_v45  ;;  %v1846_v51 = vcombine.high %v19224_v46, %v19224_v46  ;;  %v4073_v55 = vld [vmem:[%s17991_s19 + $0xd20] sm:$0x11]  ;;  %v3465_v23 = vpack.c.bf16 %v19221_v45, %v19221_v45 }
 0x2d0   : > { %v10840_v63 = vadd.f32 %v10839_v60, %v10800_v48  ;;  %v10841_v0 = vpop.f32.mrb[205].mxu0  ;;  %v10881_v1 = vpop.f32.mrb[205].mxu1  ;;  %v17370_v48 = vcombine.high %v3816_v34, %v4072_v35  ;;  %v3463_v60 = vpack.c.bf16 %v19205_v17, %v19205_v17 }
 0x2d1   : > { %v10842_v7 = vpop.f32.mrb[206].mxu0  ;;  %v10882_v8 = vpop.f32.mrb[206].mxu1 }
 0x2d2   : > { %v10880_v12 = vadd.f32 %v10879_v61, %v10840_v63  ;;  %v10843_v13 = vpop.f32.mrb[207].mxu0  ;;  %v10883_v14 = vpop.f32.mrb[207].mxu1  ;;  %v3817_v61 = vld [vmem:[%s17991_s19 + $0x520] sm:$0xff]  ;;  %v4074_v63 = vld [vmem:[%s17991_s19 + $0xd28] sm:$0x11]  ;;  %v3466_v8 = vpack.c.bf16 %v1845_v50, %v1845_v50 }
 0x2d3   : > { %v17372_v11 = vcombine.high %v3817_v61, %v4073_v55  ;;  %v280_v13 = vld [vmem:[%s17985_s28 + $0x298] sm:$0xff]  ;;  %v1862_v14 = vcombine.high %v19240_v4, %v19240_v4 }
 0x2d4   : > { %12998 = vmatmul.mubr.bf16.vlgmr.msra.gmra.mrb[56].mxu0 %v3453_v2  ;;  %13038 = vmatmul.mubr.bf16.vlgmr.msra.gmra.mrb[56].mxu1 %v3455_v3  ;;  %v17367_v2 = vcombine.low %v3815_v33, %v4071_v27  ;;  %v17369_v3 = vcombine.low %v3816_v34, %v4072_v35  ;;  %v3820_v27 = vld [vmem:[%s17991_s19 + $0x538] sm:$0xff] }
 0x2d5   : > { %13046 = vmatpush1.bf16.xpose.msra.mxu0 %v17359_v9  ;;  %13086 = vmatpush1.bf16.xpose.msra.mxu1 %v17361_v10  ;;  %v3468_v9 = vpack.c.bf16 %v1846_v51, %v1846_v51  ;;  %v19243_v10 = vrot.slane %v1847_v52, %v18012_v24  ;;  %v3470_v33 = vpack.c.bf16 %v1862_v14, %v1862_v14 }
 0x2d6   : > { %13077 = vmatprep.mubr.bf16.mxu0 %v3458_v15  ;;  %13117 = vmatprep.mubr.bf16.mxu1 %v3460_v16  ;;  %v1864_v16 = vcombine.high %v280_v13, %v280_v13  ;;  %v3469_v52 = vpack.c.bf16 %v19240_v4, %v19240_v4 }
 0x2d7   : > { %v10919_v25 = vpop.f32.mrb[208].mxu0  ;;  %v10959_v26 = vpop.f32.mrb[208].mxu1  ;;  %13125 = vmatprep.subr.bf16.mxu0 %v17364_v18  ;;  %13165 = vmatprep.subr.bf16.mxu1 %v17366_v19  ;;  %v1863_v15 = vcombine.high %v19243_v10, %v19243_v10  ;;  %v4075_v19 = vld [vmem:[%s17991_s19 + $0xd30] sm:$0x11] }
 0x2d8   : > { %v10920_v28 = vadd.f32 %v10919_v25, %v10880_v12  ;;  %v10921_v29 = vpop.f32.mrb[209].mxu0  ;;  %v10961_v30 = vpop.f32.mrb[209].mxu1  ;;  %v17374_v12 = vcombine.high %v3818_v62, %v4074_v63  ;;  %v3467_v25 = vpack.c.bf16 %v19224_v46, %v19224_v46 }
 0x2d9   : > { %v10922_v36 = vpop.f32.mrb[210].mxu0  ;;  %v10962_v37 = vpop.f32.mrb[210].mxu1 }
 0x2da   : > { %v10960_v41 = vadd.f32 %v10959_v26, %v10920_v28  ;;  %v10923_v42 = vpop.f32.mrb[211].mxu0  ;;  %v10963_v43 = vpop.f32.mrb[211].mxu1  ;;  %v3819_v26 = vld [vmem:[%s17991_s19 + $0x530] sm:$0xff]  ;;  %v4076_v28 = vld [vmem:[%s17991_s19 + $0xd38] sm:$0x11]  ;;  %v3472_v37 = vpack.c.bf16 %v1863_v15, %v1863_v15 }
 0x2db   : > { %v281_v42 = vld [vmem:[%s17985_s28 + $0x2a0] sm:$0xff] }
 0x2dc   : > { %13078 = vmatmul.mubr.bf16.vlgmr.msra.gmra.mrb[60].mxu0 %v3457_v31  ;;  %13118 = vmatmul.mubr.bf16.vlgmr.msra.gmra.mrb[60].mxu1 %v3459_v32  ;;  %v17371_v31 = vcombine.low %v3817_v61, %v4073_v55  ;;  %v17373_v32 = vcombine.low %v3818_v62, %v4074_v63  ;;  %v1881_v45 = vcombine.high %v281_v42, %v281_v42  ;;  %v3822_v55 = vld [vmem:[%s17991_s19 + $0x548] sm:$0xff] }
 0x2dd   : > { %13126 = vmatpush1.bf16.xpose.msra.mxu0 %v17363_v38  ;;  %13166 = vmatpush1.bf16.xpose.msra.mxu1 %v17365_v39  ;;  %v19259_v38 = vrot.slane %v280_v13, %v18012_v24  ;;  %v19262_v39 = vrot.slane %v1864_v16, %v18012_v24  ;;  %v19278_v61 = vrot.slane %v281_v42, %v18012_v24 }
 0x2de   : > { %13157 = vmatprep.mubr.bf16.mxu0 %v3462_v40  ;;  %13197 = vmatprep.mubr.bf16.mxu1 %v3464_v44  ;;  %v17376_v40 = vcombine.high %v3819_v26, %v4075_v19 }
 0x2df   : > { %v10999_v53 = vpop.f32.mrb[212].mxu0  ;;  %v11039_v54 = vpop.f32.mrb[212].mxu1  ;;  %13205 = vmatprep.subr.bf16.mxu0 %v17368_v47  ;;  %13245 = vmatprep.subr.bf16.mxu1 %v17370_v48  ;;  %v1879_v43 = vcombine.high %v19259_v38, %v19259_v38  ;;  %v1880_v44 = vcombine.high %v19262_v39, %v19262_v39  ;;  %v4077_v48 = vld [vmem:[%s17991_s19 + $0xd40] sm:$0x11]  ;;  %v3473_v16 = vpack.c.bf16 %v19259_v38, %v19259_v38 }
 0x2e0   : > { %v11000_v56 = vadd.f32 %v10999_v53, %v10960_v41  ;;  %v11001_v57 = vpop.f32.mrb[213].mxu0  ;;  %v11041_v58 = vpop.f32.mrb[213].mxu1  ;;  %v17378_v41 = vcombine.high %v3820_v27, %v4076_v28  ;;  %v3471_v53 = vpack.c.bf16 %v19243_v10, %v19243_v10 }
 0x2e1   : > { %v11002_v0 = vpop.f32.mrb[214].mxu0  ;;  %v11042_v1 = vpop.f32.mrb[214].mxu1 }
 0x2e2   : > { %v11040_v5 = vadd.f32 %v11039_v54, %v11000_v56  ;;  %v11003_v6 = vpop.f32.mrb[215].mxu0  ;;  %v11043_v7 = vpop.f32.mrb[215].mxu1  ;;  %v3821_v54 = vld [vmem:[%s17991_s19 + $0x540] sm:$0xff]  ;;  %v4078_v56 = vld [vmem:[%s17991_s19 + $0xd48] sm:$0x11]  ;;  %v3474_v1 = vpack.c.bf16 %v1879_v43, %v1879_v43 }
 0x2e3   : > { %v17380_v4 = vcombine.high %v3821_v54, %v4077_v48  ;;  %v282_v6 = vld [vmem:[%s17985_s28 + $0x2a8] sm:$0xff]  ;;  %v1896_v7 = vcombine.high %v19278_v61, %v19278_v61 }
 0x2e4   : > { %13158 = vmatmul.mubr.bf16.vlgmr.msra.gmra.mrb[64].mxu0 %v3461_v59  ;;  %13198 = vmatmul.mubr.bf16.vlgmr.msra.gmra.mrb[64].mxu1 %v3463_v60  ;;  %v17375_v59 = vcombine.low %v3819_v26, %v4075_v19  ;;  %v17377_v60 = vcombine.low %v3820_v27, %v4076_v28  ;;  %v3824_v19 = vld [vmem:[%s17991_s19 + $0x558] sm:$0xff] }
 0x2e5   : > { %13206 = vmatpush1.bf16.xpose.msra.mxu0 %v17367_v2  ;;  %13246 = vmatpush1.bf16.xpose.msra.mxu1 %v17369_v3  ;;  %v3476_v2 = vpack.c.bf16 %v1880_v44, %v1880_v44  ;;  %v19281_v3 = vrot.slane %v1881_v45, %v18012_v24  ;;  %v3478_v26 = vpack.c.bf16 %v1896_v7, %v1896_v7 }
 0x2e6   : > { %13237 = vmatprep.mubr.bf16.mxu0 %v3466_v8  ;;  %13277 = vmatprep.mubr.bf16.mxu1 %v3468_v9  ;;  %v1898_v9 = vcombine.high %v282_v6, %v282_v6  ;;  %v3477_v45 = vpack.c.bf16 %v19278_v61, %v19278_v61 }
 0x2e7   : > { %v11079_v17 = vpop.f32.mrb[216].mxu0  ;;  %v11119_v18 = vpop.f32.mrb[216].mxu1  ;;  %13285 = vmatprep.subr.bf16.mxu0 %v17372_v11  ;;  %13325 = vmatprep.subr.bf16.mxu1 %v17374_v12  ;;  %v1897_v8 = vcombine.high %v19281_v3, %v19281_v3  ;;  %v4079_v12 = vld [vmem:[%s17991_s19 + $0xd50] sm:$0x11] }
 0x2e8   : > { %v11080_v20 = vadd.f32 %v11079_v17, %v11040_v5  ;;  %v11081_v21 = vpop.f32.mrb[217].mxu0  ;;  %v11121_v22 = vpop.f32.mrb[217].mxu1  ;;  %v17382_v5 = vcombine.high %v3822_v55, %v4078_v56  ;;  %v3475_v17 = vpack.c.bf16 %v19262_v39, %v19262_v39 }
 0x2e9   : > { %v11082_v29 = vpop.f32.mrb[218].mxu0  ;;  %v11122_v30 = vpop.f32.mrb[218].mxu1 }
 0x2ea   : > { %v11120_v34 = vadd.f32 %v11119_v18, %v11080_v20  ;;  %v11083_v35 = vpop.f32.mrb[219].mxu0  ;;  %v11123_v36 = vpop.f32.mrb[219].mxu1  ;;  %v3823_v18 = vld [vmem:[%s17991_s19 + $0x550] sm:$0xff]  ;;  %v4080_v20 = vld [vmem:[%s17991_s19 + $0xd58] sm:$0x11]  ;;  %v3480_v30 = vpack.c.bf16 %v1897_v8, %v1897_v8 }
 0x2eb   : > { %v283_v35 = vld [vmem:[%s17985_s28 + $0x2b0] sm:$0xff] }
 0x2ec   : > { %13238 = vmatmul.mubr.bf16.vlgmr.msra.gmra.mrb[68].mxu0 %v3465_v23  ;;  %13278 = vmatmul.mubr.bf16.vlgmr.msra.gmra.mrb[68].mxu1 %v3467_v25  ;;  %v17379_v23 = vcombine.low %v3821_v54, %v4077_v48  ;;  %v17381_v25 = vcombine.low %v3822_v55, %v4078_v56  ;;  %v1915_v38 = vcombine.high %v283_v35, %v283_v35  ;;  %v3826_v48 = vld [vmem:[%s17991_s19 + $0x568] sm:$0xff] }
 0x2ed   : > { %13286 = vmatpush1.bf16.xpose.msra.mxu0 %v17371_v31  ;;  %13326 = vmatpush1.bf16.xpose.msra.mxu1 %v17373_v32  ;;  %v19297_v31 = vrot.slane %v282_v6, %v18012_v24  ;;  %v19300_v32 = vrot.slane %v1898_v9, %v18012_v24  ;;  %v19316_v54 = vrot.slane %v283_v35, %v18012_v24 }
 0x2ee   : > { %13317 = vmatprep.mubr.bf16.mxu0 %v3470_v33  ;;  %13357 = vmatprep.mubr.bf16.mxu1 %v3472_v37  ;;  %v17384_v33 = vcombine.high %v3823_v18, %v4079_v12 }
 0x2ef   : > { %v11159_v46 = vpop.f32.mrb[220].mxu0  ;;  %v11199_v47 = vpop.f32.mrb[220].mxu1  ;;  %13365 = vmatprep.subr.bf16.mxu0 %v17376_v40  ;;  %13405 = vmatprep.subr.bf16.mxu1 %v17378_v41  ;;  %v1913_v36 = vcombine.high %v19297_v31, %v19297_v31  ;;  %v1914_v37 = vcombine.high %v19300_v32, %v19300_v32  ;;  %v4081_v41 = vld [vmem:[%s17991_s19 + $0xd60] sm:$0x11]  ;;  %v3481_v9 = vpack.c.bf16 %v19297_v31, %v19297_v31 }
 0x2f0   : > { %v11160_v49 = vadd.f32 %v11159_v46, %v11120_v34  ;;  %v11161_v50 = vpop.f32.mrb[221].mxu0  ;;  %v11201_v51 = vpop.f32.mrb[221].mxu1  ;;  %v17386_v34 = vcombine.high %v3824_v19, %v4080_v20  ;;  %v3479_v46 = vpack.c.bf16 %v19281_v3, %v19281_v3 }
 0x2f1   : > { %v11162_v57 = vpop.f32.mrb[222].mxu0  ;;  %v11202_v58 = vpop.f32.mrb[222].mxu1 }
 0x2f2   : > { %v11200_v62 = vadd.f32 %v11199_v47, %v11160_v49  ;;  %v11163_v63 = vpop.f32.mrb[223].mxu0  ;;  %v11203_v0 = vpop.f32.mrb[223].mxu1  ;;  %v3825_v47 = vld [vmem:[%s17991_s19 + $0x560] sm:$0xff]  ;;  %v4082_v49 = vld [vmem:[%s17991_s19 + $0xd68] sm:$0x11]  ;;  %v3482_v58 = vpack.c.bf16 %v1913_v36, %v1913_v36 }
 0x2f3   : > { %v17388_v61 = vcombine.high %v3825_v47, %v4081_v41  ;;  %v284_v63 = vld [vmem:[%s17985_s28 + $0x2b8] sm:$0xff]  ;;  %v1930_v0 = vcombine.high %v19316_v54, %v19316_v54 }
 0x2f4   : > { %13318 = vmatmul.mubr.bf16.vlgmr.msra.gmra.mrb[72].mxu0 %v3469_v52  ;;  %13358 = vmatmul.mubr.bf16.vlgmr.msra.gmra.mrb[72].mxu1 %v3471_v53  ;;  %v17383_v52 = vcombine.low %v3823_v18, %v4079_v12  ;;  %v17385_v53 = vcombine.low %v3824_v19, %v4080_v20  ;;  %v3828_v12 = vld [vmem:[%s17991_s19 + $0x578] sm:$0xff] }
 0x2f5   : > { %13366 = vmatpush1.bf16.xpose.msra.mxu0 %v17375_v59  ;;  %13406 = vmatpush1.bf16.xpose.msra.mxu1 %v17377_v60  ;;  %v3484_v59 = vpack.c.bf16 %v1914_v37, %v1914_v37  ;;  %v19319_v60 = vrot.slane %v1915_v38, %v18012_v24  ;;  %v3486_v18 = vpack.c.bf16 %v1930_v0, %v1930_v0 }
 0x2f6   : > { %13397 = vmatprep.mubr.bf16.mxu0 %v3474_v1  ;;  %13437 = vmatprep.mubr.bf16.mxu1 %v3476_v2  ;;  %v1932_v2 = vcombine.high %v284_v63, %v284_v63  ;;  %v3485_v38 = vpack.c.bf16 %v19316_v54, %v19316_v54 }
 0x2f7   : > { %v11239_v10 = vpop.f32.mrb[224].mxu0  ;;  %v11279_v11 = vpop.f32.mrb[224].mxu1  ;;  %13445 = vmatprep.subr.bf16.mxu0 %v17380_v4  ;;  %13485 = vmatprep.subr.bf16.mxu1 %v17382_v5  ;;  %v1931_v1 = vcombine.high %v19319_v60, %v19319_v60  ;;  %v4083_v5 = vld [vmem:[%s17991_s19 + $0xd70] sm:$0x11] }
 0x2f8   : > { %v11240_v13 = vadd.f32 %v11239_v10, %v11200_v62  ;;  %v11241_v14 = vpop.f32.mrb[225].mxu0  ;;  %v11281_v15 = vpop.f32.mrb[225].mxu1  ;;  %v17390_v62 = vcombine.high %v3826_v48, %v4082_v49  ;;  %v3483_v10 = vpack.c.bf16 %v19300_v32, %v19300_v32 }
 0x2f9   : > { %v11242_v21 = vpop.f32.mrb[226].mxu0  ;;  %v11282_v22 = vpop.f32.mrb[226].mxu1 }
 0x2fa   : > { %v11280_v27 = vadd.f32 %v11279_v11, %v11240_v13  ;;  %v11243_v28 = vpop.f32.mrb[227].mxu0  ;;  %v11283_v29 = vpop.f32.mrb[227].mxu1  ;;  %v3827_v11 = vld [vmem:[%s17991_s19 + $0x570] sm:$0xff]  ;;  %v4084_v13 = vld [vmem:[%s17991_s19 + $0xd78] sm:$0x11]  ;;  %v3488_v22 = vpack.c.bf16 %v1931_v1, %v1931_v1 }
 0x2fb   : > { %v285_v28 = vld [vmem:[%s17985_s28 + $0x2c0] sm:$0xff] }
 0x2fc   : > { %13398 = vmatmul.mubr.bf16.vlgmr.msra.gmra.mrb[76].mxu0 %v3473_v16  ;;  %13438 = vmatmul.mubr.bf16.vlgmr.msra.gmra.mrb[76].mxu1 %v3475_v17  ;;  %v17387_v16 = vcombine.low %v3825_v47, %v4081_v41  ;;  %v17389_v17 = vcombine.low %v3826_v48, %v4082_v49  ;;  %v1949_v31 = vcombine.high %v285_v28, %v285_v28  ;;  %v3830_v41 = vld [vmem:[%s17991_s19 + $0x588] sm:$0xff] }
 0x2fd   : > { %13446 = vmatpush1.bf16.xpose.msra.mxu0 %v17379_v23  ;;  %13486 = vmatpush1.bf16.xpose.msra.mxu1 %v17381_v25  ;;  %v19335_v23 = vrot.slane %v284_v63, %v18012_v24  ;;  %v19338_v25 = vrot.slane %v1932_v2, %v18012_v24  ;;  %v19354_v47 = vrot.slane %v285_v28, %v18012_v24 }
 0x2fe   : > { %13477 = vmatprep.mubr.bf16.mxu0 %v3478_v26  ;;  %13517 = vmatprep.mubr.bf16.mxu1 %v3480_v30  ;;  %v17392_v26 = vcombine.high %v3827_v11, %v4083_v5 }
 0x2ff   : > { %v11319_v39 = vpop.f32.mrb[228].mxu0  ;;  %v11359_v40 = vpop.f32.mrb[228].mxu1  ;;  %13525 = vmatprep.subr.bf16.mxu0 %v17384_v33  ;;  %13565 = vmatprep.subr.bf16.mxu1 %v17386_v34  ;;  %v1947_v29 = vcombine.high %v19335_v23, %v19335_v23  ;;  %v1948_v30 = vcombine.high %v19338_v25, %v19338_v25  ;;  %v4085_v34 = vld [vmem:[%s17991_s19 + $0xd80] sm:$0x11]  ;;  %v3489_v2 = vpack.c.bf16 %v19335_v23, %v19335_v23 }
 0x300   : > { %v11320_v42 = vadd.f32 %v11319_v39, %v11280_v27  ;;  %v11321_v43 = vpop.f32.mrb[229].mxu0  ;;  %v11361_v44 = vpop.f32.mrb[229].mxu1  ;;  %v17394_v27 = vcombine.high %v3828_v12, %v4084_v13  ;;  %v3487_v39 = vpack.c.bf16 %v19319_v60, %v19319_v60 }
 0x301   : > { %v11322_v50 = vpop.f32.mrb[230].mxu0  ;;  %v11362_v51 = vpop.f32.mrb[230].mxu1 }
 0x302   : > { %v11360_v55 = vadd.f32 %v11359_v40, %v11320_v42  ;;  %v11323_v56 = vpop.f32.mrb[231].mxu0  ;;  %v11363_v57 = vpop.f32.mrb[231].mxu1  ;;  %v3829_v40 = vld [vmem:[%s17991_s19 + $0x580] sm:$0xff]  ;;  %v4086_v42 = vld [vmem:[%s17991_s19 + $0xd88] sm:$0x11]  ;;  %v3490_v51 = vpack.c.bf16 %v1947_v29, %v1947_v29 }
 0x303   : > { %v17396_v54 = vcombine.high %v3829_v40, %v4085_v34  ;;  %v286_v56 = vld [vmem:[%s17985_s28 + $0x2c8] sm:$0xff]  ;;  %v1964_v57 = vcombine.high %v19354_v47, %v19354_v47 }
 0x304   : > { %13478 = vmatmul.mubr.bf16.vlgmr.msra.gmra.mrb[80].mxu0 %v3477_v45  ;;  %13518 = vmatmul.mubr.bf16.vlgmr.msra.gmra.mrb[80].mxu1 %v3479_v46  ;;  %v17391_v45 = vcombine.low %v3827_v11, %v4083_v5  ;;  %v17393_v46 = vcombine.low %v3828_v12, %v4084_v13  ;;  %v3832_v5 = vld [vmem:[%s17991_s19 + $0x598] sm:$0xff] }
 0x305   : > { %13526 = vmatpush1.bf16.xpose.msra.mxu0 %v17383_v52  ;;  %13566 = vmatpush1.bf16.xpose.msra.mxu1 %v17385_v53  ;;  %v3492_v52 = vpack.c.bf16 %v1948_v30, %v1948_v30  ;;  %v19357_v53 = vrot.slane %v1949_v31, %v18012_v24  ;;  %v3494_v11 = vpack.c.bf16 %v1964_v57, %v1964_v57 }
 0x306   : > { %13557 = vmatprep.mubr.bf16.mxu0 %v3482_v58  ;;  %13597 = vmatprep.mubr.bf16.mxu1 %v3484_v59  ;;  %v1966_v59 = vcombine.high %v286_v56, %v286_v56  ;;  %v3493_v31 = vpack.c.bf16 %v19354_v47, %v19354_v47 }
 0x307   : > { %v11399_v3 = vpop.f32.mrb[232].mxu0  ;;  %v11439_v4 = vpop.f32.mrb[232].mxu1  ;;  %13605 = vmatprep.subr.bf16.mxu0 %v17388_v61  ;;  %13645 = vmatprep.subr.bf16.mxu1 %v17390_v62  ;;  %v1965_v58 = vcombine.high %v19357_v53, %v19357_v53  ;;  %v4087_v62 = vld [vmem:[%s17991_s19 + $0xd90] sm:$0x11] }
 0x308   : > { %v11400_v6 = vadd.f32 %v11399_v3, %v11360_v55  ;;  %v11401_v7 = vpop.f32.mrb[233].mxu0  ;;  %v11441_v8 = vpop.f32.mrb[233].mxu1  ;;  %v17398_v55 = vcombine.high %v3830_v41, %v4086_v42  ;;  %v3491_v3 = vpack.c.bf16 %v19338_v25, %v19338_v25 }
 0x309   : > { %v11402_v14 = vpop.f32.mrb[234].mxu0  ;;  %v11442_v15 = vpop.f32.mrb[234].mxu1 }
 0x30a   : > { %v11440_v19 = vadd.f32 %v11439_v4, %v11400_v6  ;;  %v11403_v20 = vpop.f32.mrb[235].mxu0  ;;  %v11443_v21 = vpop.f32.mrb[235].mxu1  ;;  %v3831_v4 = vld [vmem:[%s17991_s19 + $0x590] sm:$0xff]  ;;  %v4088_v6 = vld [vmem:[%s17991_s19 + $0xd98] sm:$0x11]  ;;  %v3496_v15 = vpack.c.bf16 %v1965_v58, %v1965_v58 }
 0x30b   : > { %v287_v20 = vld [vmem:[%s17985_s28 + $0x2d0] sm:$0xff] }
 0x30c   : > { %13558 = vmatmul.mubr.bf16.vlgmr.msra.gmra.mrb[84].mxu0 %v3481_v9  ;;  %13598 = vmatmul.mubr.bf16.vlgmr.msra.gmra.mrb[84].mxu1 %v3483_v10  ;;  %v17395_v9 = vcombine.low %v3829_v40, %v4085_v34  ;;  %v17397_v10 = vcombine.low %v3830_v41, %v4086_v42  ;;  %v1983_v23 = vcombine.high %v287_v20, %v287_v20  ;;  %v3834_v34 = vld [vmem:[%s17991_s19 + $0x5a8] sm:$0xff] }
 0x30d   : > { %13606 = vmatpush1.bf16.xpose.msra.mxu0 %v17387_v16  ;;  %13646 = vmatpush1.bf16.xpose.msra.mxu1 %v17389_v17  ;;  %v19373_v16 = vrot.slane %v286_v56, %v18012_v24  ;;  %v19376_v17 = vrot.slane %v1966_v59, %v18012_v24  ;;  %v19392_v40 = vrot.slane %v287_v20, %v18012_v24 }
 0x30e   : > { %13637 = vmatprep.mubr.bf16.mxu0 %v3486_v18  ;;  %13677 = vmatprep.mubr.bf16.mxu1 %v3488_v22  ;;  %v17400_v18 = vcombine.high %v3831_v4, %v4087_v62 }
 0x30f   : > { %v11479_v32 = vpop.f32.mrb[236].mxu0  ;;  %v11519_v33 = vpop.f32.mrb[236].mxu1  ;;  %13685 = vmatprep.subr.bf16.mxu0 %v17392_v26  ;;  %13725 = vmatprep.subr.bf16.mxu1 %v17394_v27  ;;  %v1981_v21 = vcombine.high %v19373_v16, %v19373_v16  ;;  %v1982_v22 = vcombine.high %v19376_v17, %v19376_v17  ;;  %v4089_v27 = vld [vmem:[%s17991_s19 + $0xda0] sm:$0x11]  ;;  %v3497_v59 = vpack.c.bf16 %v19373_v16, %v19373_v16 }
 0x310   : > { %v11480_v35 = vadd.f32 %v11479_v32, %v11440_v19  ;;  %v11481_v36 = vpop.f32.mrb[237].mxu0  ;;  %v11521_v37 = vpop.f32.mrb[237].mxu1  ;;  %v17402_v19 = vcombine.high %v3832_v5, %v4088_v6  ;;  %v3495_v32 = vpack.c.bf16 %v19357_v53, %v19357_v53 }
 0x311   : > { %v11482_v43 = vpop.f32.mrb[238].mxu0  ;;  %v11522_v44 = vpop.f32.mrb[238].mxu1 }
 0x312   : > { %v11520_v48 = vadd.f32 %v11519_v33, %v11480_v35  ;;  %v11483_v49 = vpop.f32.mrb[239].mxu0  ;;  %v11523_v50 = vpop.f32.mrb[239].mxu1  ;;  %v3833_v33 = vld [vmem:[%s17991_s19 + $0x5a0] sm:$0xff]  ;;  %v4090_v35 = vld [vmem:[%s17991_s19 + $0xda8] sm:$0x11]  ;;  %v3498_v44 = vpack.c.bf16 %v1981_v21, %v1981_v21 }
 0x313   : > { %v17404_v47 = vcombine.high %v3833_v33, %v4089_v27  ;;  %v288_v49 = vld [vmem:[%s17985_s28 + $0x2d8] sm:$0xff]  ;;  %v1998_v50 = vcombine.high %v19392_v40, %v19392_v40 }
 0x314   : > { %13638 = vmatmul.mubr.bf16.vlgmr.msra.gmra.mrb[88].mxu0 %v3485_v38  ;;  %13678 = vmatmul.mubr.bf16.vlgmr.msra.gmra.mrb[88].mxu1 %v3487_v39  ;;  %v17399_v38 = vcombine.low %v3831_v4, %v4087_v62  ;;  %v17401_v39 = vcombine.low %v3832_v5, %v4088_v6  ;;  %v3836_v62 = vld [vmem:[%s17991_s19 + $0x5b8] sm:$0xff] }
 0x315   : > { %13686 = vmatpush1.bf16.xpose.msra.mxu0 %v17391_v45  ;;  %13726 = vmatpush1.bf16.xpose.msra.mxu1 %v17393_v46  ;;  %v3500_v45 = vpack.c.bf16 %v1982_v22, %v1982_v22  ;;  %v19395_v46 = vrot.slane %v1983_v23, %v18012_v24  ;;  %v3502_v4 = vpack.c.bf16 %v1998_v50, %v1998_v50 }
 0x316   : > { %13717 = vmatprep.mubr.bf16.mxu0 %v3490_v51  ;;  %13757 = vmatprep.mubr.bf16.mxu1 %v3492_v52  ;;  %v2000_v52 = vcombine.high %v288_v49, %v288_v49  ;;  %v3501_v23 = vpack.c.bf16 %v19392_v40, %v19392_v40 }
 0x317   : > { %v11559_v60 = vpop.f32.mrb[240].mxu0  ;;  %v11599_v61 = vpop.f32.mrb[240].mxu1  ;;  %13765 = vmatprep.subr.bf16.mxu0 %v17396_v54  ;;  %13805 = vmatprep.subr.bf16.mxu1 %v17398_v55  ;;  %v1999_v51 = vcombine.high %v19395_v46, %v19395_v46  ;;  %v4091_v55 = vld [vmem:[%s17991_s19 + $0xdb0] sm:$0x11] }
 0x318   : > { %v11560_v63 = vadd.f32 %v11559_v60, %v11520_v48  ;;  %v11561_v0 = vpop.f32.mrb[241].mxu0  ;;  %v11601_v1 = vpop.f32.mrb[241].mxu1  ;;  %v17406_v48 = vcombine.high %v3834_v34, %v4090_v35  ;;  %v3499_v60 = vpack.c.bf16 %v19376_v17, %v19376_v17 }
 0x319   : > { %v11562_v7 = vpop.f32.mrb[242].mxu0  ;;  %v11602_v8 = vpop.f32.mrb[242].mxu1 }
 0x31a   : > { %v11600_v12 = vadd.f32 %v11599_v61, %v11560_v63  ;;  %v11563_v13 = vpop.f32.mrb[243].mxu0  ;;  %v11603_v14 = vpop.f32.mrb[243].mxu1  ;;  %v3835_v61 = vld [vmem:[%s17991_s19 + $0x5b0] sm:$0xff]  ;;  %v4092_v63 = vld [vmem:[%s17991_s19 + $0xdb8] sm:$0x11]  ;;  %v3504_v8 = vpack.c.bf16 %v1999_v51, %v1999_v51 }
 0x31b   : > { %v289_v13 = vld [vmem:[%s17985_s28 + $0x2e0] sm:$0xff] }
 0x31c   : > { %13718 = vmatmul.mubr.bf16.vlgmr.msra.gmra.mrb[92].mxu0 %v3489_v2  ;;  %13758 = vmatmul.mubr.bf16.vlgmr.msra.gmra.mrb[92].mxu1 %v3491_v3  ;;  %v17403_v2 = vcombine.low %v3833_v33, %v4089_v27  ;;  %v17405_v3 = vcombine.low %v3834_v34, %v4090_v35  ;;  %v2017_v16 = vcombine.high %v289_v13, %v289_v13  ;;  %v3838_v27 = vld [vmem:[%s17991_s19 + $0x5c8] sm:$0xff] }
 0x31d   : > { %13766 = vmatpush1.bf16.xpose.msra.mxu0 %v17395_v9  ;;  %13806 = vmatpush1.bf16.xpose.msra.mxu1 %v17397_v10  ;;  %v19411_v9 = vrot.slane %v288_v49, %v18012_v24  ;;  %v19414_v10 = vrot.slane %v2000_v52, %v18012_v24  ;;  %v19430_v33 = vrot.slane %v289_v13, %v18012_v24 }
 0x31e   : > { %13797 = vmatprep.mubr.bf16.mxu0 %v3494_v11  ;;  %13837 = vmatprep.mubr.bf16.mxu1 %v3496_v15  ;;  %v17408_v11 = vcombine.high %v3835_v61, %v4091_v55 }
 0x31f   : > { %v11639_v25 = vpop.f32.mrb[244].mxu0  ;;  %v11679_v26 = vpop.f32.mrb[244].mxu1  ;;  %13845 = vmatprep.subr.bf16.mxu0 %v17400_v18  ;;  %13885 = vmatprep.subr.bf16.mxu1 %v17402_v19  ;;  %v2015_v14 = vcombine.high %v19411_v9, %v19411_v9  ;;  %v2016_v15 = vcombine.high %v19414_v10, %v19414_v10  ;;  %v4093_v19 = vld [vmem:[%s17991_s19 + $0xdc0] sm:$0x11]  ;;  %v3505_v52 = vpack.c.bf16 %v19411_v9, %v19411_v9 }
 0x320   : > { %v11640_v28 = vadd.f32 %v11639_v25, %v11600_v12  ;;  %v11641_v29 = vpop.f32.mrb[245].mxu0  ;;  %v11681_v30 = vpop.f32.mrb[245].mxu1  ;;  %v17410_v12 = vcombine.high %v3836_v62, %v4092_v63  ;;  %v3503_v25 = vpack.c.bf16 %v19395_v46, %v19395_v46 }
 0x321   : > { %v11642_v36 = vpop.f32.mrb[246].mxu0  ;;  %v11682_v37 = vpop.f32.mrb[246].mxu1 }
 0x322   : > { %v11680_v41 = vadd.f32 %v11679_v26, %v11640_v28  ;;  %v11643_v42 = vpop.f32.mrb[247].mxu0  ;;  %v11683_v43 = vpop.f32.mrb[247].mxu1  ;;  %v3837_v26 = vld [vmem:[%s17991_s19 + $0x5c0] sm:$0xff]  ;;  %v4094_v28 = vld [vmem:[%s17991_s19 + $0xdc8] sm:$0x11]  ;;  %v3506_v37 = vpack.c.bf16 %v2015_v14, %v2015_v14 }
 0x323   : > { %v17412_v40 = vcombine.high %v3837_v26, %v4093_v19  ;;  %v290_v42 = vld [vmem:[%s17985_s28 + $0x2e8] sm:$0xff]  ;;  %v2032_v43 = vcombine.high %v19430_v33, %v19430_v33 }
 0x324   : > { %13798 = vmatmul.mubr.bf16.vlgmr.msra.gmra.mrb[96].mxu0 %v3493_v31  ;;  %13838 = vmatmul.mubr.bf16.vlgmr.msra.gmra.mrb[96].mxu1 %v3495_v32  ;;  %v17407_v31 = vcombine.low %v3835_v61, %v4091_v55  ;;  %v17409_v32 = vcombine.low %v3836_v62, %v4092_v63  ;;  %v3840_v55 = vld [vmem:[%s17991_s19 + $0x5d8] sm:$0xff] }
 0x325   : > { %13846 = vmatpush1.bf16.xpose.msra.mxu0 %v17399_v38  ;;  %13886 = vmatpush1.bf16.xpose.msra.mxu1 %v17401_v39  ;;  %v3508_v38 = vpack.c.bf16 %v2016_v15, %v2016_v15  ;;  %v19433_v39 = vrot.slane %v2017_v16, %v18012_v24  ;;  %v3510_v61 = vpack.c.bf16 %v2032_v43, %v2032_v43 }
 0x326   : > { %13877 = vmatprep.mubr.bf16.mxu0 %v3498_v44  ;;  %13917 = vmatprep.mubr.bf16.mxu1 %v3500_v45  ;;  %v2034_v45 = vcombine.high %v290_v42, %v290_v42  ;;  %v3509_v16 = vpack.c.bf16 %v19430_v33, %v19430_v33 }
 0x327   : > { %v11719_v53 = vpop.f32.mrb[248].mxu0  ;;  %v11759_v54 = vpop.f32.mrb[248].mxu1  ;;  %13925 = vmatprep.subr.bf16.mxu0 %v17404_v47  ;;  %13965 = vmatprep.subr.bf16.mxu1 %v17406_v48  ;;  %v2033_v44 = vcombine.high %v19433_v39, %v19433_v39  ;;  %v4095_v48 = vld [vmem:[%s17991_s19 + $0xdd0] sm:$0x11] }
 0x328   : > { %v11720_v56 = vadd.f32 %v11719_v53, %v11680_v41  ;;  %v11721_v57 = vpop.f32.mrb[249].mxu0  ;;  %v11761_v58 = vpop.f32.mrb[249].mxu1  ;;  %v17414_v41 = vcombine.high %v3838_v27, %v4094_v28  ;;  %v3507_v53 = vpack.c.bf16 %v19414_v10, %v19414_v10 }
 0x329   : > { %v11722_v0 = vpop.f32.mrb[250].mxu0  ;;  %v11762_v1 = vpop.f32.mrb[250].mxu1 }
 0x32a   : > { %v11760_v5 = vadd.f32 %v11759_v54, %v11720_v56  ;;  %v11723_v6 = vpop.f32.mrb[251].mxu0  ;;  %v11763_v7 = vpop.f32.mrb[251].mxu1  ;;  %v3839_v54 = vld [vmem:[%s17991_s19 + $0x5d0] sm:$0xff]  ;;  %v4096_v56 = vld [vmem:[%s17991_s19 + $0xdd8] sm:$0x11]  ;;  %v3512_v1 = vpack.c.bf16 %v2033_v44, %v2033_v44 }
 0x32b   : > { %v291_v6 = vld [vmem:[%s17985_s28 + $0x2f0] sm:$0xff] }
 0x32c   : > { %13878 = vmatmul.mubr.bf16.vlgmr.msra.gmra.mrb[100].mxu0 %v3497_v59  ;;  %13918 = vmatmul.mubr.bf16.vlgmr.msra.gmra.mrb[100].mxu1 %v3499_v60  ;;  %v17411_v59 = vcombine.low %v3837_v26, %v4093_v19  ;;  %v17413_v60 = vcombine.low %v3838_v27, %v4094_v28  ;;  %v2051_v9 = vcombine.high %v291_v6, %v291_v6  ;;  %v3842_v19 = vld [vmem:[%s17991_s19 + $0x5e8] sm:$0xff] }
 0x32d   : > { %13926 = vmatpush1.bf16.xpose.msra.mxu0 %v17403_v2  ;;  %13966 = vmatpush1.bf16.xpose.msra.mxu1 %v17405_v3  ;;  %v19449_v2 = vrot.slane %v290_v42, %v18012_v24  ;;  %v19452_v3 = vrot.slane %v2034_v45, %v18012_v24  ;;  %v19468_v26 = vrot.slane %v291_v6, %v18012_v24 }
 0x32e   : > { %13957 = vmatprep.mubr.bf16.mxu0 %v3502_v4  ;;  %13997 = vmatprep.mubr.bf16.mxu1 %v3504_v8  ;;  %v17416_v4 = vcombine.high %v3839_v54, %v4095_v48 }
 0x32f   : > { %v11799_v17 = vpop.f32.mrb[252].mxu0  ;;  %v11839_v18 = vpop.f32.mrb[252].mxu1  ;;  %14005 = vmatprep.subr.bf16.mxu0 %v17408_v11  ;;  %14045 = vmatprep.subr.bf16.mxu1 %v17410_v12  ;;  %v2049_v7 = vcombine.high %v19449_v2, %v19449_v2  ;;  %v2050_v8 = vcombine.high %v19452_v3, %v19452_v3  ;;  %v4097_v12 = vld [vmem:[%s17991_s19 + $0xde0] sm:$0x11]  ;;  %v3513_v45 = vpack.c.bf16 %v19449_v2, %v19449_v2 }
 0x330   : > { %v11800_v20 = vadd.f32 %v11799_v17, %v11760_v5  ;;  %v11801_v21 = vpop.f32.mrb[253].mxu0  ;;  %v11841_v22 = vpop.f32.mrb[253].mxu1  ;;  %v17418_v5 = vcombine.high %v3840_v55, %v4096_v56  ;;  %v3511_v17 = vpack.c.bf16 %v19433_v39, %v19433_v39 }
 0x331   : > { %v11802_v29 = vpop.f32.mrb[254].mxu0  ;;  %v11842_v30 = vpop.f32.mrb[254].mxu1 }
 0x332   : > { %v11840_v34 = vadd.f32 %v11839_v18, %v11800_v20  ;;  %v11803_v35 = vpop.f32.mrb[255].mxu0  ;;  %v11843_v36 = vpop.f32.mrb[255].mxu1  ;;  %v3841_v18 = vld [vmem:[%s17991_s19 + $0x5e0] sm:$0xff]  ;;  %v4098_v20 = vld [vmem:[%s17991_s19 + $0xde8] sm:$0x11]  ;;  %v3514_v30 = vpack.c.bf16 %v2049_v7, %v2049_v7 }
 0x333   : > { %v17420_v33 = vcombine.high %v3841_v18, %v4097_v12  ;;  %v292_v35 = vld [vmem:[%s17985_s28 + $0x2f8] sm:$0xff]  ;;  %v2066_v36 = vcombine.high %v19468_v26, %v19468_v26 }
 0x334   : > { %13958 = vmatmul.mubr.bf16.vlgmr.msra.gmra.mrb[104].mxu0 %v3501_v23  ;;  %13998 = vmatmul.mubr.bf16.vlgmr.msra.gmra.mrb[104].mxu1 %v3503_v25  ;;  %v17415_v23 = vcombine.low %v3839_v54, %v4095_v48  ;;  %v17417_v25 = vcombine.low %v3840_v55, %v4096_v56  ;;  %v3844_v48 = vld [vmem:[%s17991_s19 + $0x5f8] sm:$0xff] }
 0x335   : > { %14006 = vmatpush1.bf16.xpose.msra.mxu0 %v17407_v31  ;;  %14046 = vmatpush1.bf16.xpose.msra.mxu1 %v17409_v32  ;;  %v3516_v31 = vpack.c.bf16 %v2050_v8, %v2050_v8  ;;  %v19471_v32 = vrot.slane %v2051_v9, %v18012_v24  ;;  %v3518_v54 = vpack.c.bf16 %v2066_v36, %v2066_v36 }
 0x336   : > { %14037 = vmatprep.mubr.bf16.mxu0 %v3506_v37  ;;  %14077 = vmatprep.mubr.bf16.mxu1 %v3508_v38  ;;  %v2068_v38 = vcombine.high %v292_v35, %v292_v35  ;;  %v3517_v9 = vpack.c.bf16 %v19468_v26, %v19468_v26 }
 0x337   : > { %v11879_v46 = vpop.f32.mrb[0].mxu0  ;;  %v11919_v47 = vpop.f32.mrb[0].mxu1  ;;  %14085 = vmatprep.subr.bf16.mxu0 %v17412_v40  ;;  %14125 = vmatprep.subr.bf16.mxu1 %v17414_v41  ;;  %v2067_v37 = vcombine.high %v19471_v32, %v19471_v32  ;;  %v4099_v41 = vld [vmem:[%s17991_s19 + $0xdf0] sm:$0x11] }
 0x338   : > { %v11880_v49 = vadd.f32 %v11879_v46, %v11840_v34  ;;  %v11881_v50 = vpop.f32.mrb[1].mxu0  ;;  %v11921_v51 = vpop.f32.mrb[1].mxu1  ;;  %v17422_v34 = vcombine.high %v3842_v19, %v4098_v20  ;;  %v3515_v46 = vpack.c.bf16 %v19452_v3, %v19452_v3 }
 0x339   : > { %v11882_v57 = vpop.f32.mrb[2].mxu0  ;;  %v11922_v58 = vpop.f32.mrb[2].mxu1 }
 0x33a   : > { %v11920_v62 = vadd.f32 %v11919_v47, %v11880_v49  ;;  %v11883_v63 = vpop.f32.mrb[3].mxu0  ;;  %v11923_v0 = vpop.f32.mrb[3].mxu1  ;;  %v3843_v47 = vld [vmem:[%s17991_s19 + $0x5f0] sm:$0xff]  ;;  %v4100_v49 = vld [vmem:[%s17991_s19 + $0xdf8] sm:$0x11]  ;;  %v3520_v58 = vpack.c.bf16 %v2067_v37, %v2067_v37 }
 0x33b   : > { %v293_v63 = vld [vmem:[%s17985_s28 + $0x300] sm:$0xff] }
 0x33c   : > { %14038 = vmatmul.mubr.bf16.vlgmr.msra.gmra.mrb[108].mxu0 %v3505_v52  ;;  %14078 = vmatmul.mubr.bf16.vlgmr.msra.gmra.mrb[108].mxu1 %v3507_v53  ;;  %v17419_v52 = vcombine.low %v3841_v18, %v4097_v12  ;;  %v17421_v53 = vcombine.low %v3842_v19, %v4098_v20  ;;  %v2085_v2 = vcombine.high %v293_v63, %v293_v63  ;;  %v3846_v12 = vld [vmem:[%s17991_s19 + $0x608] sm:$0xff] }
 0x33d   : > { %14086 = vmatpush1.bf16.xpose.msra.mxu0 %v17411_v59  ;;  %14126 = vmatpush1.bf16.xpose.msra.mxu1 %v17413_v60  ;;  %v19487_v59 = vrot.slane %v292_v35, %v18012_v24  ;;  %v19490_v60 = vrot.slane %v2068_v38, %v18012_v24  ;;  %v19506_v18 = vrot.slane %v293_v63, %v18012_v24 }
 0x33e   : > { %14117 = vmatprep.mubr.bf16.mxu0 %v3510_v61  ;;  %14157 = vmatprep.mubr.bf16.mxu1 %v3512_v1  ;;  %v17424_v61 = vcombine.high %v3843_v47, %v4099_v41 }
 0x33f   : > { %v11959_v10 = vpop.f32.mrb[4].mxu0  ;;  %v11999_v11 = vpop.f32.mrb[4].mxu1  ;;  %14165 = vmatprep.subr.bf16.mxu0 %v17416_v4  ;;  %14205 = vmatprep.subr.bf16.mxu1 %v17418_v5  ;;  %v2083_v0 = vcombine.high %v19487_v59, %v19487_v59  ;;  %v2084_v1 = vcombine.high %v19490_v60, %v19490_v60  ;;  %v4101_v5 = vld [vmem:[%s17991_s19 + $0xe00] sm:$0x11]  ;;  %v3521_v38 = vpack.c.bf16 %v19487_v59, %v19487_v59 }
 0x340   : > { %v11960_v13 = vadd.f32 %v11959_v10, %v11920_v62  ;;  %v11961_v14 = vpop.f32.mrb[5].mxu0  ;;  %v12001_v15 = vpop.f32.mrb[5].mxu1  ;;  %v17426_v62 = vcombine.high %v3844_v48, %v4100_v49  ;;  %v3519_v10 = vpack.c.bf16 %v19471_v32, %v19471_v32 }
 0x341   : > { %v11962_v21 = vpop.f32.mrb[6].mxu0  ;;  %v12002_v22 = vpop.f32.mrb[6].mxu1 }
 0x342   : > { %v12000_v27 = vadd.f32 %v11999_v11, %v11960_v13  ;;  %v11963_v28 = vpop.f32.mrb[7].mxu0  ;;  %v12003_v29 = vpop.f32.mrb[7].mxu1  ;;  %v3845_v11 = vld [vmem:[%s17991_s19 + $0x600] sm:$0xff]  ;;  %v4102_v13 = vld [vmem:[%s17991_s19 + $0xe08] sm:$0x11]  ;;  %v3522_v22 = vpack.c.bf16 %v2083_v0, %v2083_v0 }
 0x343   : > { %v17428_v26 = vcombine.high %v3845_v11, %v4101_v5  ;;  %v294_v28 = vld [vmem:[%s17985_s28 + $0x308] sm:$0xff]  ;;  %v2100_v29 = vcombine.high %v19506_v18, %v19506_v18 }
 0x344   : > { %14118 = vmatmul.mubr.bf16.vlgmr.msra.gmra.mrb[112].mxu0 %v3509_v16  ;;  %14158 = vmatmul.mubr.bf16.vlgmr.msra.gmra.mrb[112].mxu1 %v3511_v17  ;;  %v17423_v16 = vcombine.low %v3843_v47, %v4099_v41  ;;  %v17425_v17 = vcombine.low %v3844_v48, %v4100_v49  ;;  %v3848_v41 = vld [vmem:[%s17991_s19 + $0x618] sm:$0xff] }
 0x345   : > { %14166 = vmatpush1.bf16.xpose.msra.mxu0 %v17415_v23  ;;  %14206 = vmatpush1.bf16.xpose.msra.mxu1 %v17417_v25  ;;  %v3524_v23 = vpack.c.bf16 %v2084_v1, %v2084_v1  ;;  %v19509_v25 = vrot.slane %v2085_v2, %v18012_v24  ;;  %v3526_v47 = vpack.c.bf16 %v2100_v29, %v2100_v29 }
 0x346   : > { %14197 = vmatprep.mubr.bf16.mxu0 %v3514_v30  ;;  %14237 = vmatprep.mubr.bf16.mxu1 %v3516_v31  ;;  %v2102_v31 = vcombine.high %v294_v28, %v294_v28  ;;  %v3525_v2 = vpack.c.bf16 %v19506_v18, %v19506_v18 }
 0x347   : > { %v12039_v39 = vpop.f32.mrb[8].mxu0  ;;  %v12079_v40 = vpop.f32.mrb[8].mxu1  ;;  %14245 = vmatprep.subr.bf16.mxu0 %v17420_v33  ;;  %14285 = vmatprep.subr.bf16.mxu1 %v17422_v34  ;;  %v2101_v30 = vcombine.high %v19509_v25, %v19509_v25  ;;  %v4103_v34 = vld [vmem:[%s17991_s19 + $0xe10] sm:$0x11] }
 0x348   : > { %v12040_v42 = vadd.f32 %v12039_v39, %v12000_v27  ;;  %v12041_v43 = vpop.f32.mrb[9].mxu0  ;;  %v12081_v44 = vpop.f32.mrb[9].mxu1  ;;  %v17430_v27 = vcombine.high %v3846_v12, %v4102_v13  ;;  %v3523_v39 = vpack.c.bf16 %v19490_v60, %v19490_v60 }
 0x349   : > { %v12042_v50 = vpop.f32.mrb[10].mxu0  ;;  %v12082_v51 = vpop.f32.mrb[10].mxu1 }
 0x34a   : > { %v12080_v55 = vadd.f32 %v12079_v40, %v12040_v42  ;;  %v12043_v56 = vpop.f32.mrb[11].mxu0  ;;  %v12083_v57 = vpop.f32.mrb[11].mxu1  ;;  %v3847_v40 = vld [vmem:[%s17991_s19 + $0x610] sm:$0xff]  ;;  %v4104_v42 = vld [vmem:[%s17991_s19 + $0xe18] sm:$0x11]  ;;  %v3528_v51 = vpack.c.bf16 %v2101_v30, %v2101_v30 }
 0x34b   : > { %v295_v56 = vld [vmem:[%s17985_s28 + $0x310] sm:$0xff] }
 0x34c   : > { %14198 = vmatmul.mubr.bf16.vlgmr.msra.gmra.mrb[116].mxu0 %v3513_v45  ;;  %14238 = vmatmul.mubr.bf16.vlgmr.msra.gmra.mrb[116].mxu1 %v3515_v46  ;;  %v17427_v45 = vcombine.low %v3845_v11, %v4101_v5  ;;  %v17429_v46 = vcombine.low %v3846_v12, %v4102_v13  ;;  %v2119_v59 = vcombine.high %v295_v56, %v295_v56  ;;  %v3850_v5 = vld [vmem:[%s17991_s19 + $0x628] sm:$0xff] }
 0x34d   : > { %14246 = vmatpush1.bf16.xpose.msra.mxu0 %v17419_v52  ;;  %14286 = vmatpush1.bf16.xpose.msra.mxu1 %v17421_v53  ;;  %v19525_v52 = vrot.slane %v294_v28, %v18012_v24  ;;  %v19528_v53 = vrot.slane %v2102_v31, %v18012_v24  ;;  %v19544_v11 = vrot.slane %v295_v56, %v18012_v24 }
 0x34e   : > { %14277 = vmatprep.mubr.bf16.mxu0 %v3518_v54  ;;  %14317 = vmatprep.mubr.bf16.mxu1 %v3520_v58  ;;  %v17432_v54 = vcombine.high %v3847_v40, %v4103_v34 }
 0x34f   : > { %v12119_v3 = vpop.f32.mrb[12].mxu0  ;;  %v12159_v4 = vpop.f32.mrb[12].mxu1  ;;  %14325 = vmatprep.subr.bf16.mxu0 %v17424_v61  ;;  %14365 = vmatprep.subr.bf16.mxu1 %v17426_v62  ;;  %v2117_v57 = vcombine.high %v19525_v52, %v19525_v52  ;;  %v2118_v58 = vcombine.high %v19528_v53, %v19528_v53  ;;  %v4105_v62 = vld [vmem:[%s17991_s19 + $0xe20] sm:$0x11]  ;;  %v3529_v31 = vpack.c.bf16 %v19525_v52, %v19525_v52 }
 0x350   : > { %v12120_v6 = vadd.f32 %v12119_v3, %v12080_v55  ;;  %v12121_v7 = vpop.f32.mrb[13].mxu0  ;;  %v12161_v8 = vpop.f32.mrb[13].mxu1  ;;  %v17434_v55 = vcombine.high %v3848_v41, %v4104_v42  ;;  %v3527_v3 = vpack.c.bf16 %v19509_v25, %v19509_v25 }
 0x351   : > { %v12122_v14 = vpop.f32.mrb[14].mxu0  ;;  %v12162_v15 = vpop.f32.mrb[14].mxu1 }
 0x352   : > { %v12160_v19 = vadd.f32 %v12159_v4, %v12120_v6  ;;  %v12123_v20 = vpop.f32.mrb[15].mxu0  ;;  %v12163_v21 = vpop.f32.mrb[15].mxu1  ;;  %v3849_v4 = vld [vmem:[%s17991_s19 + $0x620] sm:$0xff]  ;;  %v4106_v6 = vld [vmem:[%s17991_s19 + $0xe28] sm:$0x11]  ;;  %v3530_v15 = vpack.c.bf16 %v2117_v57, %v2117_v57 }
 0x353   : > { %v17436_v18 = vcombine.high %v3849_v4, %v4105_v62  ;;  %v296_v20 = vld [vmem:[%s17985_s28 + $0x318] sm:$0xff]  ;;  %v2134_v21 = vcombine.high %v19544_v11, %v19544_v11 }
 0x354   : > { %14278 = vmatmul.mubr.bf16.vlgmr.msra.gmra.mrb[120].mxu0 %v3517_v9  ;;  %14318 = vmatmul.mubr.bf16.vlgmr.msra.gmra.mrb[120].mxu1 %v3519_v10  ;;  %v17431_v9 = vcombine.low %v3847_v40, %v4103_v34  ;;  %v17433_v10 = vcombine.low %v3848_v41, %v4104_v42  ;;  %v3852_v34 = vld [vmem:[%s17991_s19 + $0x638] sm:$0xff] }
 0x355   : > { %14326 = vmatpush1.bf16.xpose.msra.mxu0 %v17423_v16  ;;  %14366 = vmatpush1.bf16.xpose.msra.mxu1 %v17425_v17  ;;  %v3532_v16 = vpack.c.bf16 %v2118_v58, %v2118_v58  ;;  %v19547_v17 = vrot.slane %v2119_v59, %v18012_v24  ;;  %v3534_v40 = vpack.c.bf16 %v2134_v21, %v2134_v21 }
 0x356   : > { %14357 = vmatprep.mubr.bf16.mxu0 %v3522_v22  ;;  %14397 = vmatprep.mubr.bf16.mxu1 %v3524_v23  ;;  %v2136_v23 = vcombine.high %v296_v20, %v296_v20  ;;  %v3533_v59 = vpack.c.bf16 %v19544_v11, %v19544_v11 }
 0x357   : > { %v12199_v32 = vpop.f32.mrb[16].mxu0  ;;  %v12239_v33 = vpop.f32.mrb[16].mxu1  ;;  %14405 = vmatprep.subr.bf16.mxu0 %v17428_v26  ;;  %14445 = vmatprep.subr.bf16.mxu1 %v17430_v27  ;;  %v2135_v22 = vcombine.high %v19547_v17, %v19547_v17  ;;  %v4107_v27 = vld [vmem:[%s17991_s19 + $0xe30] sm:$0x11] }
 0x358   : > { %v12200_v35 = vadd.f32 %v12199_v32, %v12160_v19  ;;  %v12201_v36 = vpop.f32.mrb[17].mxu0  ;;  %v12241_v37 = vpop.f32.mrb[17].mxu1  ;;  %v17438_v19 = vcombine.high %v3850_v5, %v4106_v6  ;;  %v3531_v32 = vpack.c.bf16 %v19528_v53, %v19528_v53 }
 0x359   : > { %v12202_v43 = vpop.f32.mrb[18].mxu0  ;;  %v12242_v44 = vpop.f32.mrb[18].mxu1 }
 0x35a   : > { %v12240_v48 = vadd.f32 %v12239_v33, %v12200_v35  ;;  %v12203_v49 = vpop.f32.mrb[19].mxu0  ;;  %v12243_v50 = vpop.f32.mrb[19].mxu1  ;;  %v3851_v33 = vld [vmem:[%s17991_s19 + $0x630] sm:$0xff]  ;;  %v4108_v35 = vld [vmem:[%s17991_s19 + $0xe38] sm:$0x11]  ;;  %v3536_v44 = vpack.c.bf16 %v2135_v22, %v2135_v22 }
 0x35b   : > { %v297_v49 = vld [vmem:[%s17985_s28 + $0x320] sm:$0xff] }
 0x35c   : > { %14358 = vmatmul.mubr.bf16.vlgmr.msra.gmra.mrb[124].mxu0 %v3521_v38  ;;  %14398 = vmatmul.mubr.bf16.vlgmr.msra.gmra.mrb[124].mxu1 %v3523_v39  ;;  %v17435_v38 = vcombine.low %v3849_v4, %v4105_v62  ;;  %v17437_v39 = vcombine.low %v3850_v5, %v4106_v6  ;;  %v2153_v52 = vcombine.high %v297_v49, %v297_v49  ;;  %v3854_v62 = vld [vmem:[%s17991_s19 + $0x648] sm:$0xff] }
 0x35d   : > { %14406 = vmatpush1.bf16.xpose.msra.mxu0 %v17427_v45  ;;  %14446 = vmatpush1.bf16.xpose.msra.mxu1 %v17429_v46  ;;  %v19563_v45 = vrot.slane %v296_v20, %v18012_v24  ;;  %v19566_v46 = vrot.slane %v2136_v23, %v18012_v24  ;;  %v19582_v4 = vrot.slane %v297_v49, %v18012_v24 }
 0x35e   : > { %14437 = vmatprep.mubr.bf16.mxu0 %v3526_v47  ;;  %14477 = vmatprep.mubr.bf16.mxu1 %v3528_v51  ;;  %v17440_v47 = vcombine.high %v3851_v33, %v4107_v27 }
 0x35f   : > { %v12279_v60 = vpop.f32.mrb[20].mxu0  ;;  %v12319_v61 = vpop.f32.mrb[20].mxu1  ;;  %14485 = vmatprep.subr.bf16.mxu0 %v17432_v54  ;;  %14525 = vmatprep.subr.bf16.mxu1 %v17434_v55  ;;  %v2151_v50 = vcombine.high %v19563_v45, %v19563_v45  ;;  %v2152_v51 = vcombine.high %v19566_v46, %v19566_v46  ;;  %v4109_v55 = vld [vmem:[%s17991_s19 + $0xe40] sm:$0x11]  ;;  %v3537_v23 = vpack.c.bf16 %v19563_v45, %v19563_v45 }
 0x360   : > { %v12280_v63 = vadd.f32 %v12279_v60, %v12240_v48  ;;  %v12281_v0 = vpop.f32.mrb[21].mxu0  ;;  %v12321_v1 = vpop.f32.mrb[21].mxu1  ;;  %v17442_v48 = vcombine.high %v3852_v34, %v4108_v35  ;;  %v3535_v60 = vpack.c.bf16 %v19547_v17, %v19547_v17 }
 0x361   : > { %v12282_v7 = vpop.f32.mrb[22].mxu0  ;;  %v12322_v8 = vpop.f32.mrb[22].mxu1 }
 0x362   : > { %v12320_v12 = vadd.f32 %v12319_v61, %v12280_v63  ;;  %v12283_v13 = vpop.f32.mrb[23].mxu0  ;;  %v12323_v14 = vpop.f32.mrb[23].mxu1  ;;  %v3853_v61 = vld [vmem:[%s17991_s19 + $0x640] sm:$0xff]  ;;  %v4110_v63 = vld [vmem:[%s17991_s19 + $0xe48] sm:$0x11]  ;;  %v3538_v8 = vpack.c.bf16 %v2151_v50, %v2151_v50 }
 0x363   : > { %v17444_v11 = vcombine.high %v3853_v61, %v4109_v55  ;;  %v298_v13 = vld [vmem:[%s17985_s28 + $0x328] sm:$0xff]  ;;  %v2168_v14 = vcombine.high %v19582_v4, %v19582_v4 }
 0x364   : > { %14438 = vmatmul.mubr.bf16.vlgmr.msra.gmra.mrb[128].mxu0 %v3525_v2  ;;  %14478 = vmatmul.mubr.bf16.vlgmr.msra.gmra.mrb[128].mxu1 %v3527_v3  ;;  %v17439_v2 = vcombine.low %v3851_v33, %v4107_v27  ;;  %v17441_v3 = vcombine.low %v3852_v34, %v4108_v35  ;;  %v3856_v27 = vld [vmem:[%s17991_s19 + $0x658] sm:$0xff] }
 0x365   : > { %14486 = vmatpush1.bf16.xpose.msra.mxu0 %v17431_v9  ;;  %14526 = vmatpush1.bf16.xpose.msra.mxu1 %v17433_v10  ;;  %v3540_v9 = vpack.c.bf16 %v2152_v51, %v2152_v51  ;;  %v19585_v10 = vrot.slane %v2153_v52, %v18012_v24  ;;  %v3542_v33 = vpack.c.bf16 %v2168_v14, %v2168_v14 }
 0x366   : > { %14517 = vmatprep.mubr.bf16.mxu0 %v3530_v15  ;;  %14557 = vmatprep.mubr.bf16.mxu1 %v3532_v16  ;;  %v2170_v16 = vcombine.high %v298_v13, %v298_v13  ;;  %v3541_v52 = vpack.c.bf16 %v19582_v4, %v19582_v4 }
 0x367   : > { %v12359_v25 = vpop.f32.mrb[24].mxu0  ;;  %v12399_v26 = vpop.f32.mrb[24].mxu1  ;;  %14565 = vmatprep.subr.bf16.mxu0 %v17436_v18  ;;  %14605 = vmatprep.subr.bf16.mxu1 %v17438_v19  ;;  %v2169_v15 = vcombine.high %v19585_v10, %v19585_v10  ;;  %v4111_v19 = vld [vmem:[%s17991_s19 + $0xe50] sm:$0x11] }
 0x368   : > { %v12360_v28 = vadd.f32 %v12359_v25, %v12320_v12  ;;  %v12361_v29 = vpop.f32.mrb[25].mxu0  ;;  %v12401_v30 = vpop.f32.mrb[25].mxu1  ;;  %v17446_v12 = vcombine.high %v3854_v62, %v4110_v63  ;;  %v3539_v25 = vpack.c.bf16 %v19566_v46, %v19566_v46 }
 0x369   : > { %v12362_v36 = vpop.f32.mrb[26].mxu0  ;;  %v12402_v37 = vpop.f32.mrb[26].mxu1 }
 0x36a   : > { %v12400_v41 = vadd.f32 %v12399_v26, %v12360_v28  ;;  %v12363_v42 = vpop.f32.mrb[27].mxu0  ;;  %v12403_v43 = vpop.f32.mrb[27].mxu1  ;;  %v3855_v26 = vld [vmem:[%s17991_s19 + $0x650] sm:$0xff]  ;;  %v4112_v28 = vld [vmem:[%s17991_s19 + $0xe58] sm:$0x11]  ;;  %v3544_v37 = vpack.c.bf16 %v2169_v15, %v2169_v15 }
 0x36b   : > { %v299_v42 = vld [vmem:[%s17985_s28 + $0x330] sm:$0xff] }
 0x36c   : > { %14518 = vmatmul.mubr.bf16.vlgmr.msra.gmra.mrb[132].mxu0 %v3529_v31  ;;  %14558 = vmatmul.mubr.bf16.vlgmr.msra.gmra.mrb[132].mxu1 %v3531_v32  ;;  %v17443_v31 = vcombine.low %v3853_v61, %v4109_v55  ;;  %v17445_v32 = vcombine.low %v3854_v62, %v4110_v63  ;;  %v2187_v45 = vcombine.high %v299_v42, %v299_v42  ;;  %v3858_v55 = vld [vmem:[%s17991_s19 + $0x668] sm:$0xff] }
 0x36d   : > { %14566 = vmatpush1.bf16.xpose.msra.mxu0 %v17435_v38  ;;  %14606 = vmatpush1.bf16.xpose.msra.mxu1 %v17437_v39  ;;  %v19601_v38 = vrot.slane %v298_v13, %v18012_v24  ;;  %v19604_v39 = vrot.slane %v2170_v16, %v18012_v24  ;;  %v19620_v61 = vrot.slane %v299_v42, %v18012_v24 }
 0x36e   : > { %14597 = vmatprep.mubr.bf16.mxu0 %v3534_v40  ;;  %14637 = vmatprep.mubr.bf16.mxu1 %v3536_v44  ;;  %v17448_v40 = vcombine.high %v3855_v26, %v4111_v19 }
 0x36f   : > { %v12439_v53 = vpop.f32.mrb[28].mxu0  ;;  %v12479_v54 = vpop.f32.mrb[28].mxu1  ;;  %14645 = vmatprep.subr.bf16.mxu0 %v17440_v47  ;;  %14685 = vmatprep.subr.bf16.mxu1 %v17442_v48  ;;  %v2185_v43 = vcombine.high %v19601_v38, %v19601_v38  ;;  %v2186_v44 = vcombine.high %v19604_v39, %v19604_v39  ;;  %v4113_v48 = vld [vmem:[%s17991_s19 + $0xe60] sm:$0x11]  ;;  %v3545_v16 = vpack.c.bf16 %v19601_v38, %v19601_v38 }
 0x370   : > { %v12440_v56 = vadd.f32 %v12439_v53, %v12400_v41  ;;  %v12441_v57 = vpop.f32.mrb[29].mxu0  ;;  %v12481_v58 = vpop.f32.mrb[29].mxu1  ;;  %v17450_v41 = vcombine.high %v3856_v27, %v4112_v28  ;;  %v3543_v53 = vpack.c.bf16 %v19585_v10, %v19585_v10 }
 0x371   : > { %v12442_v0 = vpop.f32.mrb[30].mxu0  ;;  %v12482_v1 = vpop.f32.mrb[30].mxu1 }
 0x372   : > { %v12480_v5 = vadd.f32 %v12479_v54, %v12440_v56  ;;  %v12443_v6 = vpop.f32.mrb[31].mxu0  ;;  %v12483_v7 = vpop.f32.mrb[31].mxu1  ;;  %v3857_v54 = vld [vmem:[%s17991_s19 + $0x660] sm:$0xff]  ;;  %v4114_v56 = vld [vmem:[%s17991_s19 + $0xe68] sm:$0x11]  ;;  %v3546_v1 = vpack.c.bf16 %v2185_v43, %v2185_v43 }
 0x373   : > { %v17452_v4 = vcombine.high %v3857_v54, %v4113_v48  ;;  %v300_v6 = vld [vmem:[%s17985_s28 + $0x338] sm:$0xff]  ;;  %v2202_v7 = vcombine.high %v19620_v61, %v19620_v61 }
 0x374   : > { %14598 = vmatmul.mubr.bf16.vlgmr.msra.gmra.mrb[136].mxu0 %v3533_v59  ;;  %14638 = vmatmul.mubr.bf16.vlgmr.msra.gmra.mrb[136].mxu1 %v3535_v60  ;;  %v17447_v59 = vcombine.low %v3855_v26, %v4111_v19  ;;  %v17449_v60 = vcombine.low %v3856_v27, %v4112_v28  ;;  %v3860_v19 = vld [vmem:[%s17991_s19 + $0x678] sm:$0xff] }
 0x375   : > { %14646 = vmatpush1.bf16.xpose.msra.mxu0 %v17439_v2  ;;  %14686 = vmatpush1.bf16.xpose.msra.mxu1 %v17441_v3  ;;  %v3548_v2 = vpack.c.bf16 %v2186_v44, %v2186_v44  ;;  %v19623_v3 = vrot.slane %v2187_v45, %v18012_v24  ;;  %v3550_v26 = vpack.c.bf16 %v2202_v7, %v2202_v7 }
 0x376   : > { %14677 = vmatprep.mubr.bf16.mxu0 %v3538_v8  ;;  %14717 = vmatprep.mubr.bf16.mxu1 %v3540_v9  ;;  %v2204_v9 = vcombine.high %v300_v6, %v300_v6  ;;  %v3549_v45 = vpack.c.bf16 %v19620_v61, %v19620_v61 }
 0x377   : > { %v12519_v17 = vpop.f32.mrb[32].mxu0  ;;  %v12559_v18 = vpop.f32.mrb[32].mxu1  ;;  %14725 = vmatprep.subr.bf16.mxu0 %v17444_v11  ;;  %14765 = vmatprep.subr.bf16.mxu1 %v17446_v12  ;;  %v2203_v8 = vcombine.high %v19623_v3, %v19623_v3  ;;  %v4115_v12 = vld [vmem:[%s17991_s19 + $0xe70] sm:$0x11] }
 0x378   : > { %v12520_v20 = vadd.f32 %v12519_v17, %v12480_v5  ;;  %v12521_v21 = vpop.f32.mrb[33].mxu0  ;;  %v12561_v22 = vpop.f32.mrb[33].mxu1  ;;  %v17454_v5 = vcombine.high %v3858_v55, %v4114_v56  ;;  %v3547_v17 = vpack.c.bf16 %v19604_v39, %v19604_v39 }
 0x379   : > { %v12522_v29 = vpop.f32.mrb[34].mxu0  ;;  %v12562_v30 = vpop.f32.mrb[34].mxu1 }
 0x37a   : > { %v12560_v34 = vadd.f32 %v12559_v18, %v12520_v20  ;;  %v12523_v35 = vpop.f32.mrb[35].mxu0  ;;  %v12563_v36 = vpop.f32.mrb[35].mxu1  ;;  %v3859_v18 = vld [vmem:[%s17991_s19 + $0x670] sm:$0xff]  ;;  %v4116_v20 = vld [vmem:[%s17991_s19 + $0xe78] sm:$0x11]  ;;  %v3552_v30 = vpack.c.bf16 %v2203_v8, %v2203_v8 }
 0x37b   : > { %v301_v35 = vld [vmem:[%s17985_s28 + $0x340] sm:$0xff] }
 0x37c   : > { %14678 = vmatmul.mubr.bf16.vlgmr.msra.gmra.mrb[140].mxu0 %v3537_v23  ;;  %14718 = vmatmul.mubr.bf16.vlgmr.msra.gmra.mrb[140].mxu1 %v3539_v25  ;;  %v17451_v23 = vcombine.low %v3857_v54, %v4113_v48  ;;  %v17453_v25 = vcombine.low %v3858_v55, %v4114_v56  ;;  %v2221_v38 = vcombine.high %v301_v35, %v301_v35  ;;  %v3862_v48 = vld [vmem:[%s17991_s19 + $0x688] sm:$0xff] }
 0x37d   : > { %14726 = vmatpush1.bf16.xpose.msra.mxu0 %v17443_v31  ;;  %14766 = vmatpush1.bf16.xpose.msra.mxu1 %v17445_v32  ;;  %v19639_v31 = vrot.slane %v300_v6, %v18012_v24  ;;  %v19642_v32 = vrot.slane %v2204_v9, %v18012_v24  ;;  %v19658_v54 = vrot.slane %v301_v35, %v18012_v24 }
 0x37e   : > { %14757 = vmatprep.mubr.bf16.mxu0 %v3542_v33  ;;  %14797 = vmatprep.mubr.bf16.mxu1 %v3544_v37  ;;  %v17456_v33 = vcombine.high %v3859_v18, %v4115_v12 }
 0x37f   : > { %v12599_v46 = vpop.f32.mrb[36].mxu0  ;;  %v12639_v47 = vpop.f32.mrb[36].mxu1  ;;  %14805 = vmatprep.subr.bf16.mxu0 %v17448_v40  ;;  %14845 = vmatprep.subr.bf16.mxu1 %v17450_v41  ;;  %v2219_v36 = vcombine.high %v19639_v31, %v19639_v31  ;;  %v2220_v37 = vcombine.high %v19642_v32, %v19642_v32  ;;  %v4117_v41 = vld [vmem:[%s17991_s19 + $0xe80] sm:$0x11]  ;;  %v3553_v9 = vpack.c.bf16 %v19639_v31, %v19639_v31 }
 0x380   : > { %v12600_v49 = vadd.f32 %v12599_v46, %v12560_v34  ;;  %v12601_v50 = vpop.f32.mrb[37].mxu0  ;;  %v12641_v51 = vpop.f32.mrb[37].mxu1  ;;  %v17458_v34 = vcombine.high %v3860_v19, %v4116_v20  ;;  %v3551_v46 = vpack.c.bf16 %v19623_v3, %v19623_v3 }
 0x381   : > { %v12602_v57 = vpop.f32.mrb[38].mxu0  ;;  %v12642_v58 = vpop.f32.mrb[38].mxu1 }
 0x382   : > { %v12640_v62 = vadd.f32 %v12639_v47, %v12600_v49  ;;  %v12603_v63 = vpop.f32.mrb[39].mxu0  ;;  %v12643_v0 = vpop.f32.mrb[39].mxu1  ;;  %v3861_v47 = vld [vmem:[%s17991_s19 + $0x680] sm:$0xff]  ;;  %v4118_v49 = vld [vmem:[%s17991_s19 + $0xe88] sm:$0x11]  ;;  %v3554_v58 = vpack.c.bf16 %v2219_v36, %v2219_v36 }
 0x383   : > { %v17460_v61 = vcombine.high %v3861_v47, %v4117_v41  ;;  %v302_v63 = vld [vmem:[%s17985_s28 + $0x348] sm:$0xff]  ;;  %v2236_v0 = vcombine.high %v19658_v54, %v19658_v54 }
 0x384   : > { %14758 = vmatmul.mubr.bf16.vlgmr.msra.gmra.mrb[144].mxu0 %v3541_v52  ;;  %14798 = vmatmul.mubr.bf16.vlgmr.msra.gmra.mrb[144].mxu1 %v3543_v53  ;;  %v17455_v52 = vcombine.low %v3859_v18, %v4115_v12  ;;  %v17457_v53 = vcombine.low %v3860_v19, %v4116_v20  ;;  %v3864_v12 = vld [vmem:[%s17991_s19 + $0x698] sm:$0xff] }
 0x385   : > { %14806 = vmatpush1.bf16.xpose.msra.mxu0 %v17447_v59  ;;  %14846 = vmatpush1.bf16.xpose.msra.mxu1 %v17449_v60  ;;  %v3556_v59 = vpack.c.bf16 %v2220_v37, %v2220_v37  ;;  %v19661_v60 = vrot.slane %v2221_v38, %v18012_v24  ;;  %v3558_v18 = vpack.c.bf16 %v2236_v0, %v2236_v0 }
 0x386   : > { %14837 = vmatprep.mubr.bf16.mxu0 %v3546_v1  ;;  %14877 = vmatprep.mubr.bf16.mxu1 %v3548_v2  ;;  %v2238_v2 = vcombine.high %v302_v63, %v302_v63  ;;  %v3557_v38 = vpack.c.bf16 %v19658_v54, %v19658_v54 }
 0x387   : > { %v12679_v10 = vpop.f32.mrb[40].mxu0  ;;  %v12719_v11 = vpop.f32.mrb[40].mxu1  ;;  %14885 = vmatprep.subr.bf16.mxu0 %v17452_v4  ;;  %14925 = vmatprep.subr.bf16.mxu1 %v17454_v5  ;;  %v2237_v1 = vcombine.high %v19661_v60, %v19661_v60  ;;  %v4119_v5 = vld [vmem:[%s17991_s19 + $0xe90] sm:$0x11] }
 0x388   : > { %v12680_v13 = vadd.f32 %v12679_v10, %v12640_v62  ;;  %v12681_v14 = vpop.f32.mrb[41].mxu0  ;;  %v12721_v15 = vpop.f32.mrb[41].mxu1  ;;  %v17462_v62 = vcombine.high %v3862_v48, %v4118_v49  ;;  %v3555_v10 = vpack.c.bf16 %v19642_v32, %v19642_v32 }
 0x389   : > { %v12682_v21 = vpop.f32.mrb[42].mxu0  ;;  %v12722_v22 = vpop.f32.mrb[42].mxu1 }
 0x38a   : > { %v12720_v27 = vadd.f32 %v12719_v11, %v12680_v13  ;;  %v12683_v28 = vpop.f32.mrb[43].mxu0  ;;  %v12723_v29 = vpop.f32.mrb[43].mxu1  ;;  %v3863_v11 = vld [vmem:[%s17991_s19 + $0x690] sm:$0xff]  ;;  %v4120_v13 = vld [vmem:[%s17991_s19 + $0xe98] sm:$0x11]  ;;  %v3560_v22 = vpack.c.bf16 %v2237_v1, %v2237_v1 }
 0x38b   : > { %v303_v28 = vld [vmem:[%s17985_s28 + $0x350] sm:$0xff] }
 0x38c   : > { %14838 = vmatmul.mubr.bf16.vlgmr.msra.gmra.mrb[148].mxu0 %v3545_v16  ;;  %14878 = vmatmul.mubr.bf16.vlgmr.msra.gmra.mrb[148].mxu1 %v3547_v17  ;;  %v17459_v16 = vcombine.low %v3861_v47, %v4117_v41  ;;  %v17461_v17 = vcombine.low %v3862_v48, %v4118_v49  ;;  %v2255_v31 = vcombine.high %v303_v28, %v303_v28  ;;  %v3866_v41 = vld [vmem:[%s17991_s19 + $0x6a8] sm:$0xff] }
 0x38d   : > { %14886 = vmatpush1.bf16.xpose.msra.mxu0 %v17451_v23  ;;  %14926 = vmatpush1.bf16.xpose.msra.mxu1 %v17453_v25  ;;  %v19677_v23 = vrot.slane %v302_v63, %v18012_v24  ;;  %v19680_v25 = vrot.slane %v2238_v2, %v18012_v24  ;;  %v19696_v47 = vrot.slane %v303_v28, %v18012_v24 }
 0x38e   : > { %14917 = vmatprep.mubr.bf16.mxu0 %v3550_v26  ;;  %14957 = vmatprep.mubr.bf16.mxu1 %v3552_v30  ;;  %v17464_v26 = vcombine.high %v3863_v11, %v4119_v5 }
 0x38f   : > { %v12759_v39 = vpop.f32.mrb[44].mxu0  ;;  %v12799_v40 = vpop.f32.mrb[44].mxu1  ;;  %14965 = vmatprep.subr.bf16.mxu0 %v17456_v33  ;;  %15005 = vmatprep.subr.bf16.mxu1 %v17458_v34  ;;  %v2253_v29 = vcombine.high %v19677_v23, %v19677_v23  ;;  %v2254_v30 = vcombine.high %v19680_v25, %v19680_v25  ;;  %v4121_v34 = vld [vmem:[%s17991_s19 + $0xea0] sm:$0x11]  ;;  %v3561_v2 = vpack.c.bf16 %v19677_v23, %v19677_v23 }
 0x390   : > { %v12760_v42 = vadd.f32 %v12759_v39, %v12720_v27  ;;  %v12761_v43 = vpop.f32.mrb[45].mxu0  ;;  %v12801_v44 = vpop.f32.mrb[45].mxu1  ;;  %v17466_v27 = vcombine.high %v3864_v12, %v4120_v13  ;;  %v3559_v39 = vpack.c.bf16 %v19661_v60, %v19661_v60 }
 0x391   : > { %v12762_v50 = vpop.f32.mrb[46].mxu0  ;;  %v12802_v51 = vpop.f32.mrb[46].mxu1 }
 0x392   : > { %v12800_v55 = vadd.f32 %v12799_v40, %v12760_v42  ;;  %v12763_v56 = vpop.f32.mrb[47].mxu0  ;;  %v12803_v57 = vpop.f32.mrb[47].mxu1  ;;  %v3865_v40 = vld [vmem:[%s17991_s19 + $0x6a0] sm:$0xff]  ;;  %v4122_v42 = vld [vmem:[%s17991_s19 + $0xea8] sm:$0x11]  ;;  %v3562_v51 = vpack.c.bf16 %v2253_v29, %v2253_v29 }
 0x393   : > { %v17468_v54 = vcombine.high %v3865_v40, %v4121_v34  ;;  %v304_v56 = vld [vmem:[%s17985_s28 + $0x358] sm:$0xff]  ;;  %v2270_v57 = vcombine.high %v19696_v47, %v19696_v47 }
 0x394   : > { %14918 = vmatmul.mubr.bf16.vlgmr.msra.gmra.mrb[152].mxu0 %v3549_v45  ;;  %14958 = vmatmul.mubr.bf16.vlgmr.msra.gmra.mrb[152].mxu1 %v3551_v46  ;;  %v17463_v45 = vcombine.low %v3863_v11, %v4119_v5  ;;  %v17465_v46 = vcombine.low %v3864_v12, %v4120_v13  ;;  %v3868_v5 = vld [vmem:[%s17991_s19 + $0x6b8] sm:$0xff] }
 0x395   : > { %14966 = vmatpush1.bf16.xpose.msra.mxu0 %v17455_v52  ;;  %15006 = vmatpush1.bf16.xpose.msra.mxu1 %v17457_v53  ;;  %v3564_v52 = vpack.c.bf16 %v2254_v30, %v2254_v30  ;;  %v19699_v53 = vrot.slane %v2255_v31, %v18012_v24  ;;  %v3566_v11 = vpack.c.bf16 %v2270_v57, %v2270_v57 }
 0x396   : > { %14997 = vmatprep.mubr.bf16.mxu0 %v3554_v58  ;;  %15037 = vmatprep.mubr.bf16.mxu1 %v3556_v59  ;;  %v2272_v59 = vcombine.high %v304_v56, %v304_v56  ;;  %v3565_v31 = vpack.c.bf16 %v19696_v47, %v19696_v47 }
 0x397   : > { %v12839_v3 = vpop.f32.mrb[48].mxu0  ;;  %v12879_v4 = vpop.f32.mrb[48].mxu1  ;;  %15045 = vmatprep.subr.bf16.mxu0 %v17460_v61  ;;  %15085 = vmatprep.subr.bf16.mxu1 %v17462_v62  ;;  %v2271_v58 = vcombine.high %v19699_v53, %v19699_v53  ;;  %v4123_v62 = vld [vmem:[%s17991_s19 + $0xeb0] sm:$0x11] }
 0x398   : > { %v12840_v6 = vadd.f32 %v12839_v3, %v12800_v55  ;;  %v12841_v7 = vpop.f32.mrb[49].mxu0  ;;  %v12881_v8 = vpop.f32.mrb[49].mxu1  ;;  %v17470_v55 = vcombine.high %v3866_v41, %v4122_v42  ;;  %v3563_v3 = vpack.c.bf16 %v19680_v25, %v19680_v25 }
 0x399   : > { %v12842_v14 = vpop.f32.mrb[50].mxu0  ;;  %v12882_v15 = vpop.f32.mrb[50].mxu1 }
 0x39a   : > { %v12880_v19 = vadd.f32 %v12879_v4, %v12840_v6  ;;  %v12843_v20 = vpop.f32.mrb[51].mxu0  ;;  %v12883_v21 = vpop.f32.mrb[51].mxu1  ;;  %v3867_v4 = vld [vmem:[%s17991_s19 + $0x6b0] sm:$0xff]  ;;  %v4124_v6 = vld [vmem:[%s17991_s19 + $0xeb8] sm:$0x11]  ;;  %v3568_v15 = vpack.c.bf16 %v2271_v58, %v2271_v58 }
 0x39b   : > { %v305_v20 = vld [vmem:[%s17985_s28 + $0x360] sm:$0xff] }
 0x39c   : > { %14998 = vmatmul.mubr.bf16.vlgmr.msra.gmra.mrb[156].mxu0 %v3553_v9  ;;  %15038 = vmatmul.mubr.bf16.vlgmr.msra.gmra.mrb[156].mxu1 %v3555_v10  ;;  %v17467_v9 = vcombine.low %v3865_v40, %v4121_v34  ;;  %v17469_v10 = vcombine.low %v3866_v41, %v4122_v42  ;;  %v2289_v23 = vcombine.high %v305_v20, %v305_v20  ;;  %v3870_v34 = vld [vmem:[%s17991_s19 + $0x6c8] sm:$0xff] }
 0x39d   : > { %15046 = vmatpush1.bf16.xpose.msra.mxu0 %v17459_v16  ;;  %15086 = vmatpush1.bf16.xpose.msra.mxu1 %v17461_v17  ;;  %v19715_v16 = vrot.slane %v304_v56, %v18012_v24  ;;  %v19718_v17 = vrot.slane %v2272_v59, %v18012_v24  ;;  %v19734_v40 = vrot.slane %v305_v20, %v18012_v24 }
 0x39e   : > { %15077 = vmatprep.mubr.bf16.mxu0 %v3558_v18  ;;  %15117 = vmatprep.mubr.bf16.mxu1 %v3560_v22  ;;  %v17472_v18 = vcombine.high %v3867_v4, %v4123_v62 }
 0x39f   : > { %v12919_v32 = vpop.f32.mrb[52].mxu0  ;;  %v12959_v33 = vpop.f32.mrb[52].mxu1  ;;  %15125 = vmatprep.subr.bf16.mxu0 %v17464_v26  ;;  %15165 = vmatprep.subr.bf16.mxu1 %v17466_v27  ;;  %v2287_v21 = vcombine.high %v19715_v16, %v19715_v16  ;;  %v2288_v22 = vcombine.high %v19718_v17, %v19718_v17  ;;  %v4125_v27 = vld [vmem:[%s17991_s19 + $0xec0] sm:$0x11]  ;;  %v3569_v59 = vpack.c.bf16 %v19715_v16, %v19715_v16 }
 0x3a0   : > { %v12920_v35 = vadd.f32 %v12919_v32, %v12880_v19  ;;  %v12921_v36 = vpop.f32.mrb[53].mxu0  ;;  %v12961_v37 = vpop.f32.mrb[53].mxu1  ;;  %v17474_v19 = vcombine.high %v3868_v5, %v4124_v6  ;;  %v3567_v32 = vpack.c.bf16 %v19699_v53, %v19699_v53 }
 0x3a1   : > { %v12922_v43 = vpop.f32.mrb[54].mxu0  ;;  %v12962_v44 = vpop.f32.mrb[54].mxu1 }
 0x3a2   : > { %v12960_v48 = vadd.f32 %v12959_v33, %v12920_v35  ;;  %v12923_v49 = vpop.f32.mrb[55].mxu0  ;;  %v12963_v50 = vpop.f32.mrb[55].mxu1  ;;  %v3869_v33 = vld [vmem:[%s17991_s19 + $0x6c0] sm:$0xff]  ;;  %v4126_v35 = vld [vmem:[%s17991_s19 + $0xec8] sm:$0x11]  ;;  %v3570_v44 = vpack.c.bf16 %v2287_v21, %v2287_v21 }
 0x3a3   : > { %v17476_v47 = vcombine.high %v3869_v33, %v4125_v27  ;;  %v306_v49 = vld [vmem:[%s17985_s28 + $0x368] sm:$0xff]  ;;  %v2304_v50 = vcombine.high %v19734_v40, %v19734_v40 }
 0x3a4   : > { %15078 = vmatmul.mubr.bf16.vlgmr.msra.gmra.mrb[160].mxu0 %v3557_v38  ;;  %15118 = vmatmul.mubr.bf16.vlgmr.msra.gmra.mrb[160].mxu1 %v3559_v39  ;;  %v17471_v38 = vcombine.low %v3867_v4, %v4123_v62  ;;  %v17473_v39 = vcombine.low %v3868_v5, %v4124_v6  ;;  %v3872_v62 = vld [vmem:[%s17991_s19 + $0x6d8] sm:$0xff] }
 0x3a5   : > { %15126 = vmatpush1.bf16.xpose.msra.mxu0 %v17463_v45  ;;  %15166 = vmatpush1.bf16.xpose.msra.mxu1 %v17465_v46  ;;  %v3572_v45 = vpack.c.bf16 %v2288_v22, %v2288_v22  ;;  %v19737_v46 = vrot.slane %v2289_v23, %v18012_v24  ;;  %v3574_v4 = vpack.c.bf16 %v2304_v50, %v2304_v50 }
 0x3a6   : > { %15157 = vmatprep.mubr.bf16.mxu0 %v3562_v51  ;;  %15197 = vmatprep.mubr.bf16.mxu1 %v3564_v52  ;;  %v2306_v52 = vcombine.high %v306_v49, %v306_v49  ;;  %v3573_v23 = vpack.c.bf16 %v19734_v40, %v19734_v40 }
 0x3a7   : > { %v12999_v60 = vpop.f32.mrb[56].mxu0  ;;  %v13039_v61 = vpop.f32.mrb[56].mxu1  ;;  %15205 = vmatprep.subr.bf16.mxu0 %v17468_v54  ;;  %15245 = vmatprep.subr.bf16.mxu1 %v17470_v55  ;;  %v2305_v51 = vcombine.high %v19737_v46, %v19737_v46  ;;  %v4127_v55 = vld [vmem:[%s17991_s19 + $0xed0] sm:$0x11] }
 0x3a8   : > { %v13000_v63 = vadd.f32 %v12999_v60, %v12960_v48  ;;  %v13001_v0 = vpop.f32.mrb[57].mxu0  ;;  %v13041_v1 = vpop.f32.mrb[57].mxu1  ;;  %v17478_v48 = vcombine.high %v3870_v34, %v4126_v35  ;;  %v3571_v60 = vpack.c.bf16 %v19718_v17, %v19718_v17 }
 0x3a9   : > { %v13002_v7 = vpop.f32.mrb[58].mxu0  ;;  %v13042_v8 = vpop.f32.mrb[58].mxu1 }
 0x3aa   : > { %v13040_v12 = vadd.f32 %v13039_v61, %v13000_v63  ;;  %v13003_v13 = vpop.f32.mrb[59].mxu0  ;;  %v13043_v14 = vpop.f32.mrb[59].mxu1  ;;  %v3871_v61 = vld [vmem:[%s17991_s19 + $0x6d0] sm:$0xff]  ;;  %v4128_v63 = vld [vmem:[%s17991_s19 + $0xed8] sm:$0x11]  ;;  %v3576_v8 = vpack.c.bf16 %v2305_v51, %v2305_v51 }
 0x3ab   : > { %v307_v13 = vld [vmem:[%s17985_s28 + $0x370] sm:$0xff] }
 0x3ac   : > { %15158 = vmatmul.mubr.bf16.vlgmr.msra.gmra.mrb[164].mxu0 %v3561_v2  ;;  %15198 = vmatmul.mubr.bf16.vlgmr.msra.gmra.mrb[164].mxu1 %v3563_v3  ;;  %v17475_v2 = vcombine.low %v3869_v33, %v4125_v27  ;;  %v17477_v3 = vcombine.low %v3870_v34, %v4126_v35  ;;  %v2323_v16 = vcombine.high %v307_v13, %v307_v13  ;;  %v3874_v27 = vld [vmem:[%s17991_s19 + $0x6e8] sm:$0xff] }
 0x3ad   : > { %15206 = vmatpush1.bf16.xpose.msra.mxu0 %v17467_v9  ;;  %15246 = vmatpush1.bf16.xpose.msra.mxu1 %v17469_v10  ;;  %v19753_v9 = vrot.slane %v306_v49, %v18012_v24  ;;  %v19756_v10 = vrot.slane %v2306_v52, %v18012_v24  ;;  %v19772_v33 = vrot.slane %v307_v13, %v18012_v24 }
 0x3ae   : > { %15237 = vmatprep.mubr.bf16.mxu0 %v3566_v11  ;;  %15277 = vmatprep.mubr.bf16.mxu1 %v3568_v15  ;;  %v17480_v11 = vcombine.high %v3871_v61, %v4127_v55 }
 0x3af   : > { %v13079_v25 = vpop.f32.mrb[60].mxu0  ;;  %v13119_v26 = vpop.f32.mrb[60].mxu1  ;;  %15285 = vmatprep.subr.bf16.mxu0 %v17472_v18  ;;  %15325 = vmatprep.subr.bf16.mxu1 %v17474_v19  ;;  %v2321_v14 = vcombine.high %v19753_v9, %v19753_v9  ;;  %v2322_v15 = vcombine.high %v19756_v10, %v19756_v10  ;;  %v4129_v19 = vld [vmem:[%s17991_s19 + $0xee0] sm:$0x11]  ;;  %v3577_v52 = vpack.c.bf16 %v19753_v9, %v19753_v9 }
 0x3b0   : > { %v13080_v28 = vadd.f32 %v13079_v25, %v13040_v12  ;;  %v13081_v29 = vpop.f32.mrb[61].mxu0  ;;  %v13121_v30 = vpop.f32.mrb[61].mxu1  ;;  %v17482_v12 = vcombine.high %v3872_v62, %v4128_v63  ;;  %v3575_v25 = vpack.c.bf16 %v19737_v46, %v19737_v46 }
 0x3b1   : > { %v13082_v36 = vpop.f32.mrb[62].mxu0  ;;  %v13122_v37 = vpop.f32.mrb[62].mxu1 }
 0x3b2   : > { %v13120_v41 = vadd.f32 %v13119_v26, %v13080_v28  ;;  %v13083_v42 = vpop.f32.mrb[63].mxu0  ;;  %v13123_v43 = vpop.f32.mrb[63].mxu1  ;;  %v3873_v26 = vld [vmem:[%s17991_s19 + $0x6e0] sm:$0xff]  ;;  %v4130_v28 = vld [vmem:[%s17991_s19 + $0xee8] sm:$0x11]  ;;  %v3578_v37 = vpack.c.bf16 %v2321_v14, %v2321_v14 }
 0x3b3   : > { %v17484_v40 = vcombine.high %v3873_v26, %v4129_v19  ;;  %v308_v42 = vld [vmem:[%s17985_s28 + $0x378] sm:$0xff]  ;;  %v2338_v43 = vcombine.high %v19772_v33, %v19772_v33 }
 0x3b4   : > { %15238 = vmatmul.mubr.bf16.vlgmr.msra.gmra.mrb[168].mxu0 %v3565_v31  ;;  %15278 = vmatmul.mubr.bf16.vlgmr.msra.gmra.mrb[168].mxu1 %v3567_v32  ;;  %v17479_v31 = vcombine.low %v3871_v61, %v4127_v55  ;;  %v17481_v32 = vcombine.low %v3872_v62, %v4128_v63  ;;  %v3876_v55 = vld [vmem:[%s17991_s19 + $0x6f8] sm:$0xff] }
 0x3b5   : > { %15286 = vmatpush1.bf16.xpose.msra.mxu0 %v17471_v38  ;;  %15326 = vmatpush1.bf16.xpose.msra.mxu1 %v17473_v39  ;;  %v3580_v38 = vpack.c.bf16 %v2322_v15, %v2322_v15  ;;  %v19775_v39 = vrot.slane %v2323_v16, %v18012_v24  ;;  %v3582_v61 = vpack.c.bf16 %v2338_v43, %v2338_v43 }
 0x3b6   : > { %15317 = vmatprep.mubr.bf16.mxu0 %v3570_v44  ;;  %15357 = vmatprep.mubr.bf16.mxu1 %v3572_v45  ;;  %v2340_v45 = vcombine.high %v308_v42, %v308_v42  ;;  %v3581_v16 = vpack.c.bf16 %v19772_v33, %v19772_v33 }
 0x3b7   : > { %v13159_v53 = vpop.f32.mrb[64].mxu0  ;;  %v13199_v54 = vpop.f32.mrb[64].mxu1  ;;  %15365 = vmatprep.subr.bf16.mxu0 %v17476_v47  ;;  %15405 = vmatprep.subr.bf16.mxu1 %v17478_v48  ;;  %v2339_v44 = vcombine.high %v19775_v39, %v19775_v39  ;;  %v4131_v48 = vld [vmem:[%s17991_s19 + $0xef0] sm:$0x11] }
 0x3b8   : > { %v13160_v56 = vadd.f32 %v13159_v53, %v13120_v41  ;;  %v13161_v57 = vpop.f32.mrb[65].mxu0  ;;  %v13201_v58 = vpop.f32.mrb[65].mxu1  ;;  %v17486_v41 = vcombine.high %v3874_v27, %v4130_v28  ;;  %v3579_v53 = vpack.c.bf16 %v19756_v10, %v19756_v10 }
 0x3b9   : > { %v13162_v0 = vpop.f32.mrb[66].mxu0  ;;  %v13202_v1 = vpop.f32.mrb[66].mxu1 }
 0x3ba   : > { %v13200_v5 = vadd.f32 %v13199_v54, %v13160_v56  ;;  %v13163_v6 = vpop.f32.mrb[67].mxu0  ;;  %v13203_v7 = vpop.f32.mrb[67].mxu1  ;;  %v3875_v54 = vld [vmem:[%s17991_s19 + $0x6f0] sm:$0xff]  ;;  %v4132_v56 = vld [vmem:[%s17991_s19 + $0xef8] sm:$0x11]  ;;  %v3584_v1 = vpack.c.bf16 %v2339_v44, %v2339_v44 }
 0x3bb   : > { %v309_v6 = vld [vmem:[%s17985_s28 + $0x380] sm:$0xff] }
 0x3bc   : > { %15318 = vmatmul.mubr.bf16.vlgmr.msra.gmra.mrb[172].mxu0 %v3569_v59  ;;  %15358 = vmatmul.mubr.bf16.vlgmr.msra.gmra.mrb[172].mxu1 %v3571_v60  ;;  %v17483_v59 = vcombine.low %v3873_v26, %v4129_v19  ;;  %v17485_v60 = vcombine.low %v3874_v27, %v4130_v28  ;;  %v2357_v9 = vcombine.high %v309_v6, %v309_v6  ;;  %v3878_v19 = vld [vmem:[%s17991_s19 + $0x708] sm:$0xff] }
 0x3bd   : > { %15366 = vmatpush1.bf16.xpose.msra.mxu0 %v17475_v2  ;;  %15406 = vmatpush1.bf16.xpose.msra.mxu1 %v17477_v3  ;;  %v19791_v2 = vrot.slane %v308_v42, %v18012_v24  ;;  %v19794_v3 = vrot.slane %v2340_v45, %v18012_v24  ;;  %v19810_v26 = vrot.slane %v309_v6, %v18012_v24 }
 0x3be   : > { %15397 = vmatprep.mubr.bf16.mxu0 %v3574_v4  ;;  %15437 = vmatprep.mubr.bf16.mxu1 %v3576_v8  ;;  %v17488_v4 = vcombine.high %v3875_v54, %v4131_v48 }
 0x3bf   : > { %v13239_v17 = vpop.f32.mrb[68].mxu0  ;;  %v13279_v18 = vpop.f32.mrb[68].mxu1  ;;  %15445 = vmatprep.subr.bf16.mxu0 %v17480_v11  ;;  %15485 = vmatprep.subr.bf16.mxu1 %v17482_v12  ;;  %v2355_v7 = vcombine.high %v19791_v2, %v19791_v2  ;;  %v2356_v8 = vcombine.high %v19794_v3, %v19794_v3  ;;  %v4133_v12 = vld [vmem:[%s17991_s19 + $0xf00] sm:$0x11]  ;;  %v3585_v45 = vpack.c.bf16 %v19791_v2, %v19791_v2 }
 0x3c0   : > { %v13240_v20 = vadd.f32 %v13239_v17, %v13200_v5  ;;  %v13241_v21 = vpop.f32.mrb[69].mxu0  ;;  %v13281_v22 = vpop.f32.mrb[69].mxu1  ;;  %v17490_v5 = vcombine.high %v3876_v55, %v4132_v56  ;;  %v3583_v17 = vpack.c.bf16 %v19775_v39, %v19775_v39 }
 0x3c1   : > { %v13242_v29 = vpop.f32.mrb[70].mxu0  ;;  %v13282_v30 = vpop.f32.mrb[70].mxu1 }
 0x3c2   : > { %v13280_v34 = vadd.f32 %v13279_v18, %v13240_v20  ;;  %v13243_v35 = vpop.f32.mrb[71].mxu0  ;;  %v13283_v36 = vpop.f32.mrb[71].mxu1  ;;  %v3877_v18 = vld [vmem:[%s17991_s19 + $0x700] sm:$0xff]  ;;  %v4134_v20 = vld [vmem:[%s17991_s19 + $0xf08] sm:$0x11]  ;;  %v3586_v30 = vpack.c.bf16 %v2355_v7, %v2355_v7 }
 0x3c3   : > { %v17492_v33 = vcombine.high %v3877_v18, %v4133_v12  ;;  %v310_v35 = vld [vmem:[%s17985_s28 + $0x388] sm:$0xff]  ;;  %v2372_v36 = vcombine.high %v19810_v26, %v19810_v26 }
 0x3c4   : > { %15398 = vmatmul.mubr.bf16.vlgmr.msra.gmra.mrb[176].mxu0 %v3573_v23  ;;  %15438 = vmatmul.mubr.bf16.vlgmr.msra.gmra.mrb[176].mxu1 %v3575_v25  ;;  %v17487_v23 = vcombine.low %v3875_v54, %v4131_v48  ;;  %v17489_v25 = vcombine.low %v3876_v55, %v4132_v56  ;;  %v3880_v48 = vld [vmem:[%s17991_s19 + $0x718] sm:$0xff] }
 0x3c5   : > { %15446 = vmatpush1.bf16.xpose.msra.mxu0 %v17479_v31  ;;  %15486 = vmatpush1.bf16.xpose.msra.mxu1 %v17481_v32  ;;  %v3588_v31 = vpack.c.bf16 %v2356_v8, %v2356_v8  ;;  %v19813_v32 = vrot.slane %v2357_v9, %v18012_v24  ;;  %v3590_v54 = vpack.c.bf16 %v2372_v36, %v2372_v36 }
 0x3c6   : > { %15477 = vmatprep.mubr.bf16.mxu0 %v3578_v37  ;;  %15517 = vmatprep.mubr.bf16.mxu1 %v3580_v38  ;;  %v2374_v38 = vcombine.high %v310_v35, %v310_v35  ;;  %v3589_v9 = vpack.c.bf16 %v19810_v26, %v19810_v26 }
 0x3c7   : > { %v13319_v46 = vpop.f32.mrb[72].mxu0  ;;  %v13359_v47 = vpop.f32.mrb[72].mxu1  ;;  %15525 = vmatprep.subr.bf16.mxu0 %v17484_v40  ;;  %15565 = vmatprep.subr.bf16.mxu1 %v17486_v41  ;;  %v2373_v37 = vcombine.high %v19813_v32, %v19813_v32  ;;  %v4135_v41 = vld [vmem:[%s17991_s19 + $0xf10] sm:$0x11] }
 0x3c8   : > { %v13320_v49 = vadd.f32 %v13319_v46, %v13280_v34  ;;  %v13321_v50 = vpop.f32.mrb[73].mxu0  ;;  %v13361_v51 = vpop.f32.mrb[73].mxu1  ;;  %v17494_v34 = vcombine.high %v3878_v19, %v4134_v20  ;;  %v3587_v46 = vpack.c.bf16 %v19794_v3, %v19794_v3 }
 0x3c9   : > { %v13322_v57 = vpop.f32.mrb[74].mxu0  ;;  %v13362_v58 = vpop.f32.mrb[74].mxu1 }
 0x3ca   : > { %v13360_v62 = vadd.f32 %v13359_v47, %v13320_v49  ;;  %v13323_v63 = vpop.f32.mrb[75].mxu0  ;;  %v13363_v0 = vpop.f32.mrb[75].mxu1  ;;  %v3879_v47 = vld [vmem:[%s17991_s19 + $0x710] sm:$0xff]  ;;  %v4136_v49 = vld [vmem:[%s17991_s19 + $0xf18] sm:$0x11]  ;;  %v3592_v58 = vpack.c.bf16 %v2373_v37, %v2373_v37 }
 0x3cb   : > { %v311_v63 = vld [vmem:[%s17985_s28 + $0x390] sm:$0xff] }
 0x3cc   : > { %15478 = vmatmul.mubr.bf16.vlgmr.msra.gmra.mrb[180].mxu0 %v3577_v52  ;;  %15518 = vmatmul.mubr.bf16.vlgmr.msra.gmra.mrb[180].mxu1 %v3579_v53  ;;  %v17491_v52 = vcombine.low %v3877_v18, %v4133_v12  ;;  %v17493_v53 = vcombine.low %v3878_v19, %v4134_v20  ;;  %v2391_v2 = vcombine.high %v311_v63, %v311_v63  ;;  %v3882_v12 = vld [vmem:[%s17991_s19 + $0x728] sm:$0xff] }
 0x3cd   : > { %15526 = vmatpush1.bf16.xpose.msra.mxu0 %v17483_v59  ;;  %15566 = vmatpush1.bf16.xpose.msra.mxu1 %v17485_v60  ;;  %v19829_v59 = vrot.slane %v310_v35, %v18012_v24  ;;  %v19832_v60 = vrot.slane %v2374_v38, %v18012_v24  ;;  %v19848_v18 = vrot.slane %v311_v63, %v18012_v24 }
 0x3ce   : > { %15557 = vmatprep.mubr.bf16.mxu0 %v3582_v61  ;;  %15597 = vmatprep.mubr.bf16.mxu1 %v3584_v1  ;;  %v17496_v61 = vcombine.high %v3879_v47, %v4135_v41 }
 0x3cf   : > { %v13399_v10 = vpop.f32.mrb[76].mxu0  ;;  %v13439_v11 = vpop.f32.mrb[76].mxu1  ;;  %15605 = vmatprep.subr.bf16.mxu0 %v17488_v4  ;;  %15645 = vmatprep.subr.bf16.mxu1 %v17490_v5  ;;  %v2389_v0 = vcombine.high %v19829_v59, %v19829_v59  ;;  %v2390_v1 = vcombine.high %v19832_v60, %v19832_v60  ;;  %v4137_v5 = vld [vmem:[%s17991_s19 + $0xf20] sm:$0x11]  ;;  %v3593_v38 = vpack.c.bf16 %v19829_v59, %v19829_v59 }
 0x3d0   : > { %v13400_v13 = vadd.f32 %v13399_v10, %v13360_v62  ;;  %v13401_v14 = vpop.f32.mrb[77].mxu0  ;;  %v13441_v15 = vpop.f32.mrb[77].mxu1  ;;  %v17498_v62 = vcombine.high %v3880_v48, %v4136_v49  ;;  %v3591_v10 = vpack.c.bf16 %v19813_v32, %v19813_v32 }
 0x3d1   : > { %v13402_v21 = vpop.f32.mrb[78].mxu0  ;;  %v13442_v22 = vpop.f32.mrb[78].mxu1 }
 0x3d2   : > { %v13440_v27 = vadd.f32 %v13439_v11, %v13400_v13  ;;  %v13403_v28 = vpop.f32.mrb[79].mxu0  ;;  %v13443_v29 = vpop.f32.mrb[79].mxu1  ;;  %v3881_v11 = vld [vmem:[%s17991_s19 + $0x720] sm:$0xff]  ;;  %v4138_v13 = vld [vmem:[%s17991_s19 + $0xf28] sm:$0x11]  ;;  %v3594_v22 = vpack.c.bf16 %v2389_v0, %v2389_v0 }
 0x3d3   : > { %v17500_v26 = vcombine.high %v3881_v11, %v4137_v5  ;;  %v312_v28 = vld [vmem:[%s17985_s28 + $0x398] sm:$0xff]  ;;  %v2406_v29 = vcombine.high %v19848_v18, %v19848_v18 }
 0x3d4   : > { %15558 = vmatmul.mubr.bf16.vlgmr.msra.gmra.mrb[184].mxu0 %v3581_v16  ;;  %15598 = vmatmul.mubr.bf16.vlgmr.msra.gmra.mrb[184].mxu1 %v3583_v17  ;;  %v17495_v16 = vcombine.low %v3879_v47, %v4135_v41  ;;  %v17497_v17 = vcombine.low %v3880_v48, %v4136_v49  ;;  %v3884_v41 = vld [vmem:[%s17991_s19 + $0x738] sm:$0xff] }
 0x3d5   : > { %15606 = vmatpush1.bf16.xpose.msra.mxu0 %v17487_v23  ;;  %15646 = vmatpush1.bf16.xpose.msra.mxu1 %v17489_v25  ;;  %v3596_v23 = vpack.c.bf16 %v2390_v1, %v2390_v1  ;;  %v19851_v25 = vrot.slane %v2391_v2, %v18012_v24  ;;  %v3598_v47 = vpack.c.bf16 %v2406_v29, %v2406_v29 }
 0x3d6   : > { %15637 = vmatprep.mubr.bf16.mxu0 %v3586_v30  ;;  %15677 = vmatprep.mubr.bf16.mxu1 %v3588_v31  ;;  %v2408_v31 = vcombine.high %v312_v28, %v312_v28  ;;  %v3597_v2 = vpack.c.bf16 %v19848_v18, %v19848_v18 }
 0x3d7   : > { %v13479_v39 = vpop.f32.mrb[80].mxu0  ;;  %v13519_v40 = vpop.f32.mrb[80].mxu1  ;;  %15685 = vmatprep.subr.bf16.mxu0 %v17492_v33  ;;  %15725 = vmatprep.subr.bf16.mxu1 %v17494_v34  ;;  %v2407_v30 = vcombine.high %v19851_v25, %v19851_v25  ;;  %v4139_v34 = vld [vmem:[%s17991_s19 + $0xf30] sm:$0x11] }
 0x3d8   : > { %v13480_v42 = vadd.f32 %v13479_v39, %v13440_v27  ;;  %v13481_v43 = vpop.f32.mrb[81].mxu0  ;;  %v13521_v44 = vpop.f32.mrb[81].mxu1  ;;  %v17502_v27 = vcombine.high %v3882_v12, %v4138_v13  ;;  %v3595_v39 = vpack.c.bf16 %v19832_v60, %v19832_v60 }
 0x3d9   : > { %v13482_v50 = vpop.f32.mrb[82].mxu0  ;;  %v13522_v51 = vpop.f32.mrb[82].mxu1 }
 0x3da   : > { %v13520_v55 = vadd.f32 %v13519_v40, %v13480_v42  ;;  %v13483_v56 = vpop.f32.mrb[83].mxu0  ;;  %v13523_v57 = vpop.f32.mrb[83].mxu1  ;;  %v3883_v40 = vld [vmem:[%s17991_s19 + $0x730] sm:$0xff]  ;;  %v4140_v42 = vld [vmem:[%s17991_s19 + $0xf38] sm:$0x11]  ;;  %v3600_v51 = vpack.c.bf16 %v2407_v30, %v2407_v30 }
 0x3db   : > { %v313_v56 = vld [vmem:[%s17985_s28 + $0x3a0] sm:$0xff] }
 0x3dc   : > { %15638 = vmatmul.mubr.bf16.vlgmr.msra.gmra.mrb[188].mxu0 %v3585_v45  ;;  %15678 = vmatmul.mubr.bf16.vlgmr.msra.gmra.mrb[188].mxu1 %v3587_v46  ;;  %v17499_v45 = vcombine.low %v3881_v11, %v4137_v5  ;;  %v17501_v46 = vcombine.low %v3882_v12, %v4138_v13  ;;  %v2425_v59 = vcombine.high %v313_v56, %v313_v56  ;;  %v3886_v5 = vld [vmem:[%s17991_s19 + $0x748] sm:$0xff] }
 0x3dd   : > { %15686 = vmatpush1.bf16.xpose.msra.mxu0 %v17491_v52  ;;  %15726 = vmatpush1.bf16.xpose.msra.mxu1 %v17493_v53  ;;  %v19867_v52 = vrot.slane %v312_v28, %v18012_v24  ;;  %v19870_v53 = vrot.slane %v2408_v31, %v18012_v24  ;;  %v19886_v11 = vrot.slane %v313_v56, %v18012_v24 }
 0x3de   : > { %15717 = vmatprep.mubr.bf16.mxu0 %v3590_v54  ;;  %15757 = vmatprep.mubr.bf16.mxu1 %v3592_v58  ;;  %v17504_v54 = vcombine.high %v3883_v40, %v4139_v34 }
 0x3df   : > { %v13559_v3 = vpop.f32.mrb[84].mxu0  ;;  %v13599_v4 = vpop.f32.mrb[84].mxu1  ;;  %15765 = vmatprep.subr.bf16.mxu0 %v17496_v61  ;;  %15805 = vmatprep.subr.bf16.mxu1 %v17498_v62  ;;  %v2423_v57 = vcombine.high %v19867_v52, %v19867_v52  ;;  %v2424_v58 = vcombine.high %v19870_v53, %v19870_v53  ;;  %v4141_v62 = vld [vmem:[%s17991_s19 + $0xf40] sm:$0x11]  ;;  %v3601_v31 = vpack.c.bf16 %v19867_v52, %v19867_v52 }
 0x3e0   : > { %v13560_v6 = vadd.f32 %v13559_v3, %v13520_v55  ;;  %v13561_v7 = vpop.f32.mrb[85].mxu0  ;;  %v13601_v8 = vpop.f32.mrb[85].mxu1  ;;  %v17506_v55 = vcombine.high %v3884_v41, %v4140_v42  ;;  %v3599_v3 = vpack.c.bf16 %v19851_v25, %v19851_v25 }
 0x3e1   : > { %v13562_v14 = vpop.f32.mrb[86].mxu0  ;;  %v13602_v15 = vpop.f32.mrb[86].mxu1 }
 0x3e2   : > { %v13600_v19 = vadd.f32 %v13599_v4, %v13560_v6  ;;  %v13563_v20 = vpop.f32.mrb[87].mxu0  ;;  %v13603_v21 = vpop.f32.mrb[87].mxu1  ;;  %v3885_v4 = vld [vmem:[%s17991_s19 + $0x740] sm:$0xff]  ;;  %v4142_v6 = vld [vmem:[%s17991_s19 + $0xf48] sm:$0x11]  ;;  %v3602_v15 = vpack.c.bf16 %v2423_v57, %v2423_v57 }
 0x3e3   : > { %v17508_v18 = vcombine.high %v3885_v4, %v4141_v62  ;;  %v314_v20 = vld [vmem:[%s17985_s28 + $0x3a8] sm:$0xff]  ;;  %v2440_v21 = vcombine.high %v19886_v11, %v19886_v11 }
 0x3e4   : > { %15718 = vmatmul.mubr.bf16.vlgmr.msra.gmra.mrb[192].mxu0 %v3589_v9  ;;  %15758 = vmatmul.mubr.bf16.vlgmr.msra.gmra.mrb[192].mxu1 %v3591_v10  ;;  %v17503_v9 = vcombine.low %v3883_v40, %v4139_v34  ;;  %v17505_v10 = vcombine.low %v3884_v41, %v4140_v42  ;;  %v3888_v34 = vld [vmem:[%s17991_s19 + $0x758] sm:$0xff] }
 0x3e5   : > { %15766 = vmatpush1.bf16.xpose.msra.mxu0 %v17495_v16  ;;  %15806 = vmatpush1.bf16.xpose.msra.mxu1 %v17497_v17  ;;  %v3604_v16 = vpack.c.bf16 %v2424_v58, %v2424_v58  ;;  %v19889_v17 = vrot.slane %v2425_v59, %v18012_v24  ;;  %v3606_v40 = vpack.c.bf16 %v2440_v21, %v2440_v21 }
 0x3e6   : > { %15797 = vmatprep.mubr.bf16.mxu0 %v3594_v22  ;;  %15837 = vmatprep.mubr.bf16.mxu1 %v3596_v23  ;;  %v2442_v23 = vcombine.high %v314_v20, %v314_v20  ;;  %v3605_v59 = vpack.c.bf16 %v19886_v11, %v19886_v11 }
 0x3e7   : > { %v13639_v32 = vpop.f32.mrb[88].mxu0  ;;  %v13679_v33 = vpop.f32.mrb[88].mxu1  ;;  %15845 = vmatprep.subr.bf16.mxu0 %v17500_v26  ;;  %15885 = vmatprep.subr.bf16.mxu1 %v17502_v27  ;;  %v2441_v22 = vcombine.high %v19889_v17, %v19889_v17  ;;  %v4143_v27 = vld [vmem:[%s17991_s19 + $0xf50] sm:$0x11] }
 0x3e8   : > { %v13640_v35 = vadd.f32 %v13639_v32, %v13600_v19  ;;  %v13641_v36 = vpop.f32.mrb[89].mxu0  ;;  %v13681_v37 = vpop.f32.mrb[89].mxu1  ;;  %v17510_v19 = vcombine.high %v3886_v5, %v4142_v6  ;;  %v3603_v32 = vpack.c.bf16 %v19870_v53, %v19870_v53 }
 0x3e9   : > { %v13642_v43 = vpop.f32.mrb[90].mxu0  ;;  %v13682_v44 = vpop.f32.mrb[90].mxu1 }
 0x3ea   : > { %v13680_v48 = vadd.f32 %v13679_v33, %v13640_v35  ;;  %v13643_v49 = vpop.f32.mrb[91].mxu0  ;;  %v13683_v50 = vpop.f32.mrb[91].mxu1  ;;  %v3887_v33 = vld [vmem:[%s17991_s19 + $0x750] sm:$0xff]  ;;  %v4144_v35 = vld [vmem:[%s17991_s19 + $0xf58] sm:$0x11]  ;;  %v3608_v44 = vpack.c.bf16 %v2441_v22, %v2441_v22 }
 0x3eb   : > { %v315_v49 = vld [vmem:[%s17985_s28 + $0x3b0] sm:$0xff] }
 0x3ec   : > { %15798 = vmatmul.mubr.bf16.vlgmr.msra.gmra.mrb[196].mxu0 %v3593_v38  ;;  %15838 = vmatmul.mubr.bf16.vlgmr.msra.gmra.mrb[196].mxu1 %v3595_v39  ;;  %v17507_v38 = vcombine.low %v3885_v4, %v4141_v62  ;;  %v17509_v39 = vcombine.low %v3886_v5, %v4142_v6  ;;  %v2459_v52 = vcombine.high %v315_v49, %v315_v49  ;;  %v3890_v62 = vld [vmem:[%s17991_s19 + $0x768] sm:$0xff] }
 0x3ed   : > { %15846 = vmatpush1.bf16.xpose.msra.mxu0 %v17499_v45  ;;  %15886 = vmatpush1.bf16.xpose.msra.mxu1 %v17501_v46  ;;  %v19905_v45 = vrot.slane %v314_v20, %v18012_v24  ;;  %v19908_v46 = vrot.slane %v2442_v23, %v18012_v24  ;;  %v19924_v4 = vrot.slane %v315_v49, %v18012_v24 }
 0x3ee   : > { %15877 = vmatprep.mubr.bf16.mxu0 %v3598_v47  ;;  %15917 = vmatprep.mubr.bf16.mxu1 %v3600_v51  ;;  %v17512_v47 = vcombine.high %v3887_v33, %v4143_v27 }
 0x3ef   : > { %v13719_v60 = vpop.f32.mrb[92].mxu0  ;;  %v13759_v61 = vpop.f32.mrb[92].mxu1  ;;  %15925 = vmatprep.subr.bf16.mxu0 %v17504_v54  ;;  %15965 = vmatprep.subr.bf16.mxu1 %v17506_v55  ;;  %v2457_v50 = vcombine.high %v19905_v45, %v19905_v45  ;;  %v2458_v51 = vcombine.high %v19908_v46, %v19908_v46  ;;  %v4145_v55 = vld [vmem:[%s17991_s19 + $0xf60] sm:$0x11]  ;;  %v3609_v23 = vpack.c.bf16 %v19905_v45, %v19905_v45 }
 0x3f0   : > { %v13720_v63 = vadd.f32 %v13719_v60, %v13680_v48  ;;  %v13721_v0 = vpop.f32.mrb[93].mxu0  ;;  %v13761_v1 = vpop.f32.mrb[93].mxu1  ;;  %v17514_v48 = vcombine.high %v3888_v34, %v4144_v35  ;;  %v3607_v60 = vpack.c.bf16 %v19889_v17, %v19889_v17 }
 0x3f1   : > { %v13722_v7 = vpop.f32.mrb[94].mxu0  ;;  %v13762_v8 = vpop.f32.mrb[94].mxu1 }
 0x3f2   : > { %v13760_v12 = vadd.f32 %v13759_v61, %v13720_v63  ;;  %v13723_v13 = vpop.f32.mrb[95].mxu0  ;;  %v13763_v14 = vpop.f32.mrb[95].mxu1  ;;  %v3889_v61 = vld [vmem:[%s17991_s19 + $0x760] sm:$0xff]  ;;  %v4146_v63 = vld [vmem:[%s17991_s19 + $0xf68] sm:$0x11]  ;;  %v3610_v8 = vpack.c.bf16 %v2457_v50, %v2457_v50 }
 0x3f3   : > { %v17516_v11 = vcombine.high %v3889_v61, %v4145_v55  ;;  %v316_v13 = vld [vmem:[%s17985_s28 + $0x3b8] sm:$0xff]  ;;  %v2474_v14 = vcombine.high %v19924_v4, %v19924_v4 }
 0x3f4   : > { %15878 = vmatmul.mubr.bf16.vlgmr.msra.gmra.mrb[200].mxu0 %v3597_v2  ;;  %15918 = vmatmul.mubr.bf16.vlgmr.msra.gmra.mrb[200].mxu1 %v3599_v3  ;;  %v17511_v2 = vcombine.low %v3887_v33, %v4143_v27  ;;  %v17513_v3 = vcombine.low %v3888_v34, %v4144_v35  ;;  %v3892_v27 = vld [vmem:[%s17991_s19 + $0x778] sm:$0xff] }
 0x3f5   : > { %15926 = vmatpush1.bf16.xpose.msra.mxu0 %v17503_v9  ;;  %15966 = vmatpush1.bf16.xpose.msra.mxu1 %v17505_v10  ;;  %v3612_v9 = vpack.c.bf16 %v2458_v51, %v2458_v51  ;;  %v19927_v10 = vrot.slane %v2459_v52, %v18012_v24  ;;  %v3614_v33 = vpack.c.bf16 %v2474_v14, %v2474_v14 }
 0x3f6   : > { %15957 = vmatprep.mubr.bf16.mxu0 %v3602_v15  ;;  %15997 = vmatprep.mubr.bf16.mxu1 %v3604_v16  ;;  %v2476_v16 = vcombine.high %v316_v13, %v316_v13  ;;  %v3613_v52 = vpack.c.bf16 %v19924_v4, %v19924_v4 }
 0x3f7   : > { %v13799_v25 = vpop.f32.mrb[96].mxu0  ;;  %v13839_v26 = vpop.f32.mrb[96].mxu1  ;;  %16005 = vmatprep.subr.bf16.mxu0 %v17508_v18  ;;  %16045 = vmatprep.subr.bf16.mxu1 %v17510_v19  ;;  %v2475_v15 = vcombine.high %v19927_v10, %v19927_v10  ;;  %v4147_v19 = vld [vmem:[%s17991_s19 + $0xf70] sm:$0x11] }
 0x3f8   : > { %v13800_v28 = vadd.f32 %v13799_v25, %v13760_v12  ;;  %v13801_v29 = vpop.f32.mrb[97].mxu0  ;;  %v13841_v30 = vpop.f32.mrb[97].mxu1  ;;  %v17518_v12 = vcombine.high %v3890_v62, %v4146_v63  ;;  %v3611_v25 = vpack.c.bf16 %v19908_v46, %v19908_v46 }
 0x3f9   : > { %v13802_v36 = vpop.f32.mrb[98].mxu0  ;;  %v13842_v37 = vpop.f32.mrb[98].mxu1 }
 0x3fa   : > { %v13840_v41 = vadd.f32 %v13839_v26, %v13800_v28  ;;  %v13803_v42 = vpop.f32.mrb[99].mxu0  ;;  %v13843_v43 = vpop.f32.mrb[99].mxu1  ;;  %v3891_v26 = vld [vmem:[%s17991_s19 + $0x770] sm:$0xff]  ;;  %v4148_v28 = vld [vmem:[%s17991_s19 + $0xf78] sm:$0x11]  ;;  %v3616_v37 = vpack.c.bf16 %v2475_v15, %v2475_v15 }
 0x3fb   : > { %v317_v42 = vld [vmem:[%s17985_s28 + $0x3c0] sm:$0xff] }
 0x3fc   : > { %15958 = vmatmul.mubr.bf16.vlgmr.msra.gmra.mrb[204].mxu0 %v3601_v31  ;;  %15998 = vmatmul.mubr.bf16.vlgmr.msra.gmra.mrb[204].mxu1 %v3603_v32  ;;  %v17515_v31 = vcombine.low %v3889_v61, %v4145_v55  ;;  %v17517_v32 = vcombine.low %v3890_v62, %v4146_v63  ;;  %v2493_v45 = vcombine.high %v317_v42, %v317_v42  ;;  %v3894_v55 = vld [vmem:[%s17991_s19 + $0x788] sm:$0xff] }
 0x3fd   : > { %16006 = vmatpush1.bf16.xpose.msra.mxu0 %v17507_v38  ;;  %16046 = vmatpush1.bf16.xpose.msra.mxu1 %v17509_v39  ;;  %v19943_v38 = vrot.slane %v316_v13, %v18012_v24  ;;  %v19946_v39 = vrot.slane %v2476_v16, %v18012_v24  ;;  %v19962_v61 = vrot.slane %v317_v42, %v18012_v24 }
 0x3fe   : > { %16037 = vmatprep.mubr.bf16.mxu0 %v3606_v40  ;;  %16077 = vmatprep.mubr.bf16.mxu1 %v3608_v44  ;;  %v17520_v40 = vcombine.high %v3891_v26, %v4147_v19 }
 0x3ff   : > { %v13879_v53 = vpop.f32.mrb[100].mxu0  ;;  %v13919_v54 = vpop.f32.mrb[100].mxu1  ;;  %16085 = vmatprep.subr.bf16.mxu0 %v17512_v47  ;;  %16125 = vmatprep.subr.bf16.mxu1 %v17514_v48  ;;  %v2491_v43 = vcombine.high %v19943_v38, %v19943_v38  ;;  %v2492_v44 = vcombine.high %v19946_v39, %v19946_v39  ;;  %v4149_v48 = vld [vmem:[%s17991_s19 + $0xf80] sm:$0x11]  ;;  %v3617_v16 = vpack.c.bf16 %v19943_v38, %v19943_v38 }
 0x400   : > { %v13880_v56 = vadd.f32 %v13879_v53, %v13840_v41  ;;  %v13881_v57 = vpop.f32.mrb[101].mxu0  ;;  %v13921_v58 = vpop.f32.mrb[101].mxu1  ;;  %v17522_v41 = vcombine.high %v3892_v27, %v4148_v28  ;;  %v3615_v53 = vpack.c.bf16 %v19927_v10, %v19927_v10 }
 0x401   : > { %v13882_v0 = vpop.f32.mrb[102].mxu0  ;;  %v13922_v1 = vpop.f32.mrb[102].mxu1 }
 0x402   : > { %v13920_v5 = vadd.f32 %v13919_v54, %v13880_v56  ;;  %v13883_v6 = vpop.f32.mrb[103].mxu0  ;;  %v13923_v7 = vpop.f32.mrb[103].mxu1  ;;  %v3893_v54 = vld [vmem:[%s17991_s19 + $0x780] sm:$0xff]  ;;  %v4150_v56 = vld [vmem:[%s17991_s19 + $0xf88] sm:$0x11]  ;;  %v3618_v1 = vpack.c.bf16 %v2491_v43, %v2491_v43 }
 0x403   : > { %v17524_v4 = vcombine.high %v3893_v54, %v4149_v48  ;;  %v318_v6 = vld [vmem:[%s17985_s28 + $0x3c8] sm:$0xff]  ;;  %v2508_v7 = vcombine.high %v19962_v61, %v19962_v61 }
 0x404   : > { %16038 = vmatmul.mubr.bf16.vlgmr.msra.gmra.mrb[208].mxu0 %v3605_v59  ;;  %16078 = vmatmul.mubr.bf16.vlgmr.msra.gmra.mrb[208].mxu1 %v3607_v60  ;;  %v17519_v59 = vcombine.low %v3891_v26, %v4147_v19  ;;  %v17521_v60 = vcombine.low %v3892_v27, %v4148_v28  ;;  %v3896_v19 = vld [vmem:[%s17991_s19 + $0x798] sm:$0xff] }
 0x405   : > { %16086 = vmatpush1.bf16.xpose.msra.mxu0 %v17511_v2  ;;  %16126 = vmatpush1.bf16.xpose.msra.mxu1 %v17513_v3  ;;  %v3620_v2 = vpack.c.bf16 %v2492_v44, %v2492_v44  ;;  %v19965_v3 = vrot.slane %v2493_v45, %v18012_v24  ;;  %v3622_v26 = vpack.c.bf16 %v2508_v7, %v2508_v7 }
 0x406   : > { %16117 = vmatprep.mubr.bf16.mxu0 %v3610_v8  ;;  %16157 = vmatprep.mubr.bf16.mxu1 %v3612_v9  ;;  %v2510_v9 = vcombine.high %v318_v6, %v318_v6  ;;  %v3621_v45 = vpack.c.bf16 %v19962_v61, %v19962_v61 }
 0x407   : > { %v13959_v17 = vpop.f32.mrb[104].mxu0  ;;  %v13999_v18 = vpop.f32.mrb[104].mxu1  ;;  %16165 = vmatprep.subr.bf16.mxu0 %v17516_v11  ;;  %16205 = vmatprep.subr.bf16.mxu1 %v17518_v12  ;;  %v2509_v8 = vcombine.high %v19965_v3, %v19965_v3  ;;  %v4151_v12 = vld [vmem:[%s17991_s19 + $0xf90] sm:$0x11] }
 0x408   : > { %v13960_v20 = vadd.f32 %v13959_v17, %v13920_v5  ;;  %v13961_v21 = vpop.f32.mrb[105].mxu0  ;;  %v14001_v22 = vpop.f32.mrb[105].mxu1  ;;  %v17526_v5 = vcombine.high %v3894_v55, %v4150_v56  ;;  %v3619_v17 = vpack.c.bf16 %v19946_v39, %v19946_v39 }
 0x409   : > { %v13962_v29 = vpop.f32.mrb[106].mxu0  ;;  %v14002_v30 = vpop.f32.mrb[106].mxu1 }
 0x40a   : > { %v14000_v34 = vadd.f32 %v13999_v18, %v13960_v20  ;;  %v13963_v35 = vpop.f32.mrb[107].mxu0  ;;  %v14003_v36 = vpop.f32.mrb[107].mxu1  ;;  %v3895_v18 = vld [vmem:[%s17991_s19 + $0x790] sm:$0xff]  ;;  %v4152_v20 = vld [vmem:[%s17991_s19 + $0xf98] sm:$0x11]  ;;  %v3624_v30 = vpack.c.bf16 %v2509_v8, %v2509_v8 }
 0x40b   : > { %v319_v35 = vld [vmem:[%s17985_s28 + $0x3d0] sm:$0xff] }
 0x40c   : > { %16118 = vmatmul.mubr.bf16.vlgmr.msra.gmra.mrb[212].mxu0 %v3609_v23  ;;  %16158 = vmatmul.mubr.bf16.vlgmr.msra.gmra.mrb[212].mxu1 %v3611_v25  ;;  %v17523_v23 = vcombine.low %v3893_v54, %v4149_v48  ;;  %v17525_v25 = vcombine.low %v3894_v55, %v4150_v56  ;;  %v2527_v38 = vcombine.high %v319_v35, %v319_v35  ;;  %v3898_v48 = vld [vmem:[%s17991_s19 + $0x7a8] sm:$0xff] }
 0x40d   : > { %16166 = vmatpush1.bf16.xpose.msra.mxu0 %v17515_v31  ;;  %16206 = vmatpush1.bf16.xpose.msra.mxu1 %v17517_v32  ;;  %v19981_v31 = vrot.slane %v318_v6, %v18012_v24  ;;  %v19984_v32 = vrot.slane %v2510_v9, %v18012_v24  ;;  %v20000_v54 = vrot.slane %v319_v35, %v18012_v24 }
 0x40e   : > { %16197 = vmatprep.mubr.bf16.mxu0 %v3614_v33  ;;  %16237 = vmatprep.mubr.bf16.mxu1 %v3616_v37  ;;  %v17528_v33 = vcombine.high %v3895_v18, %v4151_v12 }
 0x40f   : > { %v14039_v46 = vpop.f32.mrb[108].mxu0  ;;  %v14079_v47 = vpop.f32.mrb[108].mxu1  ;;  %16245 = vmatprep.subr.bf16.mxu0 %v17520_v40  ;;  %16285 = vmatprep.subr.bf16.mxu1 %v17522_v41  ;;  %v2525_v36 = vcombine.high %v19981_v31, %v19981_v31  ;;  %v2526_v37 = vcombine.high %v19984_v32, %v19984_v32  ;;  %v4153_v41 = vld [vmem:[%s17991_s19 + $0xfa0] sm:$0x11]  ;;  %v3625_v9 = vpack.c.bf16 %v19981_v31, %v19981_v31 }
 0x410   : > { %v14040_v49 = vadd.f32 %v14039_v46, %v14000_v34  ;;  %v14041_v50 = vpop.f32.mrb[109].mxu0  ;;  %v14081_v51 = vpop.f32.mrb[109].mxu1  ;;  %v17530_v34 = vcombine.high %v3896_v19, %v4152_v20  ;;  %v3623_v46 = vpack.c.bf16 %v19965_v3, %v19965_v3 }
 0x411   : > { %v14042_v57 = vpop.f32.mrb[110].mxu0  ;;  %v14082_v58 = vpop.f32.mrb[110].mxu1 }
 0x412   : > { %v14080_v62 = vadd.f32 %v14079_v47, %v14040_v49  ;;  %v14043_v63 = vpop.f32.mrb[111].mxu0  ;;  %v14083_v0 = vpop.f32.mrb[111].mxu1  ;;  %v3897_v47 = vld [vmem:[%s17991_s19 + $0x7a0] sm:$0xff]  ;;  %v4154_v49 = vld [vmem:[%s17991_s19 + $0xfa8] sm:$0x11]  ;;  %v3626_v58 = vpack.c.bf16 %v2525_v36, %v2525_v36 }
 0x413   : > { %v17532_v61 = vcombine.high %v3897_v47, %v4153_v41  ;;  %v320_v63 = vld [vmem:[%s17985_s28 + $0x3d8] sm:$0xff]  ;;  %v2542_v0 = vcombine.high %v20000_v54, %v20000_v54 }
 0x414   : > { %16198 = vmatmul.mubr.bf16.vlgmr.msra.gmra.mrb[216].mxu0 %v3613_v52  ;;  %16238 = vmatmul.mubr.bf16.vlgmr.msra.gmra.mrb[216].mxu1 %v3615_v53  ;;  %v17527_v52 = vcombine.low %v3895_v18, %v4151_v12  ;;  %v17529_v53 = vcombine.low %v3896_v19, %v4152_v20  ;;  %v3900_v12 = vld [vmem:[%s17991_s19 + $0x7b8] sm:$0xff] }
 0x415   : > { %16246 = vmatpush1.bf16.xpose.msra.mxu0 %v17519_v59  ;;  %16286 = vmatpush1.bf16.xpose.msra.mxu1 %v17521_v60  ;;  %v3628_v59 = vpack.c.bf16 %v2526_v37, %v2526_v37  ;;  %v20003_v60 = vrot.slane %v2527_v38, %v18012_v24  ;;  %v3630_v18 = vpack.c.bf16 %v2542_v0, %v2542_v0 }
 0x416   : > { %16277 = vmatprep.mubr.bf16.mxu0 %v3618_v1  ;;  %16317 = vmatprep.mubr.bf16.mxu1 %v3620_v2  ;;  %v2544_v2 = vcombine.high %v320_v63, %v320_v63  ;;  %v3629_v38 = vpack.c.bf16 %v20000_v54, %v20000_v54 }
 0x417   : > { %v14119_v10 = vpop.f32.mrb[112].mxu0  ;;  %v14159_v11 = vpop.f32.mrb[112].mxu1  ;;  %16325 = vmatprep.subr.bf16.mxu0 %v17524_v4  ;;  %16365 = vmatprep.subr.bf16.mxu1 %v17526_v5  ;;  %v2543_v1 = vcombine.high %v20003_v60, %v20003_v60  ;;  %v4155_v5 = vld [vmem:[%s17991_s19 + $0xfb0] sm:$0x11] }
 0x418   : > { %v14120_v13 = vadd.f32 %v14119_v10, %v14080_v62  ;;  %v14121_v14 = vpop.f32.mrb[113].mxu0  ;;  %v14161_v15 = vpop.f32.mrb[113].mxu1  ;;  %v17534_v62 = vcombine.high %v3898_v48, %v4154_v49  ;;  %v3627_v10 = vpack.c.bf16 %v19984_v32, %v19984_v32 }
 0x419   : > { %v14122_v21 = vpop.f32.mrb[114].mxu0  ;;  %v14162_v22 = vpop.f32.mrb[114].mxu1 }
 0x41a   : > { %v14160_v27 = vadd.f32 %v14159_v11, %v14120_v13  ;;  %v14123_v28 = vpop.f32.mrb[115].mxu0  ;;  %v14163_v29 = vpop.f32.mrb[115].mxu1  ;;  %v3899_v11 = vld [vmem:[%s17991_s19 + $0x7b0] sm:$0xff]  ;;  %v4156_v13 = vld [vmem:[%s17991_s19 + $0xfb8] sm:$0x11]  ;;  %v3632_v22 = vpack.c.bf16 %v2543_v1, %v2543_v1 }
 0x41b   : > { %v321_v28 = vld [vmem:[%s17985_s28 + $0x3e0] sm:$0xff] }
 0x41c   : > { %16278 = vmatmul.mubr.bf16.vlgmr.msra.gmra.mrb[220].mxu0 %v3617_v16  ;;  %16318 = vmatmul.mubr.bf16.vlgmr.msra.gmra.mrb[220].mxu1 %v3619_v17  ;;  %v17531_v16 = vcombine.low %v3897_v47, %v4153_v41  ;;  %v17533_v17 = vcombine.low %v3898_v48, %v4154_v49  ;;  %v2561_v31 = vcombine.high %v321_v28, %v321_v28  ;;  %v3902_v41 = vld [vmem:[%s17991_s19 + $0x7c8] sm:$0xff] }
 0x41d   : > { %16326 = vmatpush1.bf16.xpose.msra.mxu0 %v17523_v23  ;;  %16366 = vmatpush1.bf16.xpose.msra.mxu1 %v17525_v25  ;;  %v20019_v23 = vrot.slane %v320_v63, %v18012_v24  ;;  %v20022_v25 = vrot.slane %v2544_v2, %v18012_v24  ;;  %v20038_v47 = vrot.slane %v321_v28, %v18012_v24 }
 0x41e   : > { %16357 = vmatprep.mubr.bf16.mxu0 %v3622_v26  ;;  %16397 = vmatprep.mubr.bf16.mxu1 %v3624_v30  ;;  %v17536_v26 = vcombine.high %v3899_v11, %v4155_v5 }
 0x41f   : > { %v14199_v39 = vpop.f32.mrb[116].mxu0  ;;  %v14239_v40 = vpop.f32.mrb[116].mxu1  ;;  %16405 = vmatprep.subr.bf16.mxu0 %v17528_v33  ;;  %16445 = vmatprep.subr.bf16.mxu1 %v17530_v34  ;;  %v2559_v29 = vcombine.high %v20019_v23, %v20019_v23  ;;  %v2560_v30 = vcombine.high %v20022_v25, %v20022_v25  ;;  %v4157_v34 = vld [vmem:[%s17991_s19 + $0xfc0] sm:$0x11]  ;;  %v3633_v2 = vpack.c.bf16 %v20019_v23, %v20019_v23 }
 0x420   : > { %v14200_v42 = vadd.f32 %v14199_v39, %v14160_v27  ;;  %v14201_v43 = vpop.f32.mrb[117].mxu0  ;;  %v14241_v44 = vpop.f32.mrb[117].mxu1  ;;  %v17538_v27 = vcombine.high %v3900_v12, %v4156_v13  ;;  %v3631_v39 = vpack.c.bf16 %v20003_v60, %v20003_v60 }
 0x421   : > { %v14202_v50 = vpop.f32.mrb[118].mxu0  ;;  %v14242_v51 = vpop.f32.mrb[118].mxu1 }
 0x422   : > { %v14240_v55 = vadd.f32 %v14239_v40, %v14200_v42  ;;  %v14203_v56 = vpop.f32.mrb[119].mxu0  ;;  %v14243_v57 = vpop.f32.mrb[119].mxu1  ;;  %v3901_v40 = vld [vmem:[%s17991_s19 + $0x7c0] sm:$0xff]  ;;  %v4158_v42 = vld [vmem:[%s17991_s19 + $0xfc8] sm:$0x11]  ;;  %v3634_v51 = vpack.c.bf16 %v2559_v29, %v2559_v29 }
 0x423   : > { %v17540_v54 = vcombine.high %v3901_v40, %v4157_v34  ;;  %v322_v56 = vld [vmem:[%s17985_s28 + $0x3e8] sm:$0xff]  ;;  %v2576_v57 = vcombine.high %v20038_v47, %v20038_v47 }
 0x424   : > { %16358 = vmatmul.mubr.bf16.vlgmr.msra.gmra.mrb[224].mxu0 %v3621_v45  ;;  %16398 = vmatmul.mubr.bf16.vlgmr.msra.gmra.mrb[224].mxu1 %v3623_v46  ;;  %v17535_v45 = vcombine.low %v3899_v11, %v4155_v5  ;;  %v17537_v46 = vcombine.low %v3900_v12, %v4156_v13  ;;  %v3904_v5 = vld [vmem:[%s17991_s19 + $0x7d8] sm:$0xff] }
 0x425   : > { %16406 = vmatpush1.bf16.xpose.msra.mxu0 %v17527_v52  ;;  %16446 = vmatpush1.bf16.xpose.msra.mxu1 %v17529_v53  ;;  %v3636_v52 = vpack.c.bf16 %v2560_v30, %v2560_v30  ;;  %v20041_v53 = vrot.slane %v2561_v31, %v18012_v24  ;;  %v3638_v11 = vpack.c.bf16 %v2576_v57, %v2576_v57 }
 0x426   : > { %16437 = vmatprep.mubr.bf16.mxu0 %v3626_v58  ;;  %16477 = vmatprep.mubr.bf16.mxu1 %v3628_v59  ;;  %v2578_v59 = vcombine.high %v322_v56, %v322_v56  ;;  %v3637_v31 = vpack.c.bf16 %v20038_v47, %v20038_v47 }
 0x427   : > { %v14279_v3 = vpop.f32.mrb[120].mxu0  ;;  %v14319_v4 = vpop.f32.mrb[120].mxu1  ;;  %16485 = vmatprep.subr.bf16.mxu0 %v17532_v61  ;;  %16525 = vmatprep.subr.bf16.mxu1 %v17534_v62  ;;  %v2577_v58 = vcombine.high %v20041_v53, %v20041_v53  ;;  %v4159_v62 = vld [vmem:[%s17991_s19 + $0xfd0] sm:$0x11] }
 0x428   : > { %v14280_v6 = vadd.f32 %v14279_v3, %v14240_v55  ;;  %v14281_v7 = vpop.f32.mrb[121].mxu0  ;;  %v14321_v8 = vpop.f32.mrb[121].mxu1  ;;  %v17542_v55 = vcombine.high %v3902_v41, %v4158_v42  ;;  %v3635_v3 = vpack.c.bf16 %v20022_v25, %v20022_v25 }
 0x429   : > { %v14282_v14 = vpop.f32.mrb[122].mxu0  ;;  %v14322_v15 = vpop.f32.mrb[122].mxu1 }
 0x42a   : > { %v14320_v19 = vadd.f32 %v14319_v4, %v14280_v6  ;;  %v14283_v20 = vpop.f32.mrb[123].mxu0  ;;  %v14323_v21 = vpop.f32.mrb[123].mxu1  ;;  %v3903_v4 = vld [vmem:[%s17991_s19 + $0x7d0] sm:$0xff]  ;;  %v4160_v6 = vld [vmem:[%s17991_s19 + $0xfd8] sm:$0x11]  ;;  %v3640_v15 = vpack.c.bf16 %v2577_v58, %v2577_v58 }
 0x42b   : > { %v323_v20 = vld [vmem:[%s17985_s28 + $0x3f0] sm:$0xff] }
 0x42c   : > { %16438 = vmatmul.mubr.bf16.vlgmr.msra.gmra.mrb[228].mxu0 %v3625_v9  ;;  %16478 = vmatmul.mubr.bf16.vlgmr.msra.gmra.mrb[228].mxu1 %v3627_v10  ;;  %v17539_v9 = vcombine.low %v3901_v40, %v4157_v34  ;;  %v17541_v10 = vcombine.low %v3902_v41, %v4158_v42  ;;  %v2595_v23 = vcombine.high %v323_v20, %v323_v20  ;;  %v3906_v34 = vld [vmem:[%s17991_s19 + $0x7e8] sm:$0xff] }
 0x42d   : > { %16486 = vmatpush1.bf16.xpose.msra.mxu0 %v17531_v16  ;;  %16526 = vmatpush1.bf16.xpose.msra.mxu1 %v17533_v17  ;;  %v20057_v16 = vrot.slane %v322_v56, %v18012_v24  ;;  %v20060_v17 = vrot.slane %v2578_v59, %v18012_v24  ;;  %v20076_v40 = vrot.slane %v323_v20, %v18012_v24 }
 0x42e   : > { %16517 = vmatprep.mubr.bf16.mxu0 %v3630_v18  ;;  %16557 = vmatprep.mubr.bf16.mxu1 %v3632_v22  ;;  %v17544_v18 = vcombine.high %v3903_v4, %v4159_v62 }
 0x42f   : > { %v14359_v32 = vpop.f32.mrb[124].mxu0  ;;  %v14399_v33 = vpop.f32.mrb[124].mxu1  ;;  %16565 = vmatprep.subr.bf16.mxu0 %v17536_v26  ;;  %16605 = vmatprep.subr.bf16.mxu1 %v17538_v27  ;;  %v2593_v21 = vcombine.high %v20057_v16, %v20057_v16  ;;  %v2594_v22 = vcombine.high %v20060_v17, %v20060_v17  ;;  %v4161_v27 = vld [vmem:[%s17991_s19 + $0xfe0] sm:$0x11]  ;;  %v3641_v59 = vpack.c.bf16 %v20057_v16, %v20057_v16 }
 0x430   : > { %v14360_v35 = vadd.f32 %v14359_v32, %v14320_v19  ;;  %v14361_v36 = vpop.f32.mrb[125].mxu0  ;;  %v14401_v37 = vpop.f32.mrb[125].mxu1  ;;  %v17546_v19 = vcombine.high %v3904_v5, %v4160_v6  ;;  %v3639_v32 = vpack.c.bf16 %v20041_v53, %v20041_v53 }
 0x431   : > { %v14362_v43 = vpop.f32.mrb[126].mxu0  ;;  %v14402_v44 = vpop.f32.mrb[126].mxu1 }
 0x432   : > { %v14400_v48 = vadd.f32 %v14399_v33, %v14360_v35  ;;  %v14363_v49 = vpop.f32.mrb[127].mxu0  ;;  %v14403_v50 = vpop.f32.mrb[127].mxu1  ;;  %v3905_v33 = vld [vmem:[%s17991_s19 + $0x7e0] sm:$0xff]  ;;  %v4162_v35 = vld [vmem:[%s17991_s19 + $0xfe8] sm:$0x11]  ;;  %v3642_v44 = vpack.c.bf16 %v2593_v21, %v2593_v21 }
 0x433   : > { %v17548_v47 = vcombine.high %v3905_v33, %v4161_v27  ;;  %v324_v49 = vld [vmem:[%s17985_s28 + $0x3f8] sm:$0xff]  ;;  %v2610_v50 = vcombine.high %v20076_v40, %v20076_v40 }
 0x434   : > { %16518 = vmatmul.mubr.bf16.vlgmr.msra.gmra.mrb[232].mxu0 %v3629_v38  ;;  %16558 = vmatmul.mubr.bf16.vlgmr.msra.gmra.mrb[232].mxu1 %v3631_v39  ;;  %v17543_v38 = vcombine.low %v3903_v4, %v4159_v62  ;;  %v17545_v39 = vcombine.low %v3904_v5, %v4160_v6  ;;  %v3908_v62 = vld [vmem:[%s17991_s19 + $0x7f8] sm:$0xff] }
 0x435   : > { %16566 = vmatpush1.bf16.xpose.msra.mxu0 %v17535_v45  ;;  %16606 = vmatpush1.bf16.xpose.msra.mxu1 %v17537_v46  ;;  %v3644_v45 = vpack.c.bf16 %v2594_v22, %v2594_v22  ;;  %v20079_v46 = vrot.slane %v2595_v23, %v18012_v24  ;;  %v3646_v4 = vpack.c.bf16 %v2610_v50, %v2610_v50 }
 0x436   : > { %16597 = vmatprep.mubr.bf16.mxu0 %v3634_v51  ;;  %16637 = vmatprep.mubr.bf16.mxu1 %v3636_v52  ;;  %v2612_v52 = vcombine.high %v324_v49, %v324_v49 }
 0x437   : > { %v14439_v60 = vpop.f32.mrb[128].mxu0  ;;  %v14479_v61 = vpop.f32.mrb[128].mxu1  ;;  %16645 = vmatprep.subr.bf16.mxu0 %v17540_v54  ;;  %16685 = vmatprep.subr.bf16.mxu1 %v17542_v55  ;;  %v2611_v51 = vcombine.high %v20079_v46, %v20079_v46  ;;  %v4163_v55 = vld [vmem:[%s17991_s19 + $0xff0] sm:$0x11]  ;;  %v3647_v20 = vpack.c.bf16 %v20079_v46, %v20079_v46 }
 0x438   : > { %v14440_v63 = vadd.f32 %v14439_v60, %v14400_v48  ;;  %v14441_v0 = vpop.f32.mrb[129].mxu0  ;;  %v14481_v1 = vpop.f32.mrb[129].mxu1  ;;  %v17550_v48 = vcombine.high %v3906_v34, %v4162_v35  ;;  %v3643_v60 = vpack.c.bf16 %v20060_v17, %v20060_v17 }
 0x439   : > { %v14442_v7 = vpop.f32.mrb[130].mxu0  ;;  %v14482_v8 = vpop.f32.mrb[130].mxu1 }
 0x43a   : > { %v14480_v12 = vadd.f32 %v14479_v61, %v14440_v63  ;;  %v14443_v13 = vpop.f32.mrb[131].mxu0  ;;  %v14483_v14 = vpop.f32.mrb[131].mxu1  ;;  %v3907_v61 = vld [vmem:[%s17991_s19 + $0x7f0] sm:$0xff]  ;;  %v4164_v63 = vld [vmem:[%s17991_s19 + $0xff8] sm:$0x11]  ;;  %v3648_v8 = vpack.c.bf16 %v2611_v51, %v2611_v51 }
 0x43b   : > { %v17551_v23 = vcombine.low %v3907_v61, %v4163_v55 }
 0x43c   : > { %16598 = vmatmul.mubr.bf16.vlgmr.msra.gmra.mrb[236].mxu0 %v3633_v2  ;;  %16638 = vmatmul.mubr.bf16.vlgmr.msra.gmra.mrb[236].mxu1 %v3635_v3  ;;  %v17547_v2 = vcombine.low %v3905_v33, %v4161_v27  ;;  %v17549_v3 = vcombine.low %v3906_v34, %v4162_v35 }
 0x43d   : > { %16646 = vmatpush1.bf16.xpose.msra.mxu0 %v17539_v9  ;;  %16686 = vmatpush1.bf16.xpose.msra.mxu1 %v17541_v10  ;;  %v2619_v9 = vrot.slane %v324_v49, %v18012_v24  ;;  %v2626_v10 = vrot.slane %v2612_v52, %v18012_v24  ;;  %v3645_v24 = vpack.c.bf16 %v20076_v40, %v20076_v40 }
 0x43e   : > { %16677 = vmatprep.mubr.bf16.mxu0 %v3638_v11  ;;  %16717 = vmatprep.mubr.bf16.mxu1 %v3640_v15  ;;  %v17552_v11 = vcombine.high %v3907_v61, %v4163_v55 }
 0x43f   : > { %v14519_v25 = vpop.f32.mrb[132].mxu0  ;;  %v14559_v26 = vpop.f32.mrb[132].mxu1  ;;  %16725 = vmatprep.subr.bf16.mxu0 %v17544_v18  ;;  %16765 = vmatprep.subr.bf16.mxu1 %v17546_v19  ;;  %v2627_v13 = vcombine.high %v2619_v9, %v2619_v9  ;;  %v2628_v14 = vcombine.high %v2626_v10, %v2626_v10 }
 0x440   : > { %v14520_v28 = vadd.f32 %v14519_v25, %v14480_v12  ;;  %v14521_v29 = vpop.f32.mrb[133].mxu0  ;;  %v14561_v30 = vpop.f32.mrb[133].mxu1  ;;  %v17554_v12 = vcombine.high %v3908_v62, %v4164_v63  ;;  %v17553_v25 = vcombine.low %v3908_v62, %v4164_v63 }
 0x441   : > { %v14522_v36 = vpop.f32.mrb[134].mxu0  ;;  %v14562_v37 = vpop.f32.mrb[134].mxu1  ;;  %v3650_v29 = vpack.c.bf16 %v2627_v13, %v2627_v13  ;;  %v3652_v30 = vpack.c.bf16 %v2628_v14, %v2628_v14 }
 0x442   : > { %v14560_v41 = vadd.f32 %v14559_v26, %v14520_v28  ;;  %v14523_v42 = vpop.f32.mrb[135].mxu0  ;;  %v14563_v43 = vpop.f32.mrb[135].mxu1  ;;  %v3649_v36 = vpack.c.bf16 %v2619_v9, %v2619_v9  ;;  %v3651_v37 = vpack.c.bf16 %v2626_v10, %v2626_v10 }
 0x444   : > { %16678 = vmatmul.mubr.bf16.vlgmr.msra.gmra.mrb[240].mxu0 %v3637_v31  ;;  %16718 = vmatmul.mubr.bf16.vlgmr.msra.gmra.mrb[240].mxu1 %v3639_v32 }
 0x445   : > { %16726 = vmatpush1.bf16.xpose.msra.mxu0 %v17543_v38  ;;  %16766 = vmatpush1.bf16.xpose.msra.mxu1 %v17545_v39 }
 0x446   : > { %16757 = vmatprep.mubr.bf16.mxu0 %v3642_v44  ;;  %16797 = vmatprep.mubr.bf16.mxu1 %v3644_v45 }
 0x447   : > { %v14599_v53 = vpop.f32.mrb[136].mxu0  ;;  %v14639_v54 = vpop.f32.mrb[136].mxu1  ;;  %16805 = vmatprep.subr.bf16.mxu0 %v17548_v47  ;;  %16845 = vmatprep.subr.bf16.mxu1 %v17550_v48 }
 0x448   : > { %v14600_v56 = vadd.f32 %v14599_v53, %v14560_v41  ;;  %v14601_v57 = vpop.f32.mrb[137].mxu0  ;;  %v14641_v58 = vpop.f32.mrb[137].mxu1 }
 0x449   : > { %v14602_v0 = vpop.f32.mrb[138].mxu0  ;;  %v14642_v1 = vpop.f32.mrb[138].mxu1 }
 0x44a   : > { %v14640_v5 = vadd.f32 %v14639_v54, %v14600_v56  ;;  %v14603_v6 = vpop.f32.mrb[139].mxu0  ;;  %v14643_v7 = vpop.f32.mrb[139].mxu1 }
 0x44c   : > { %16758 = vmatmul.mubr.bf16.vlgmr.msra.gmra.mrb[244].mxu0 %v3641_v59  ;;  %16798 = vmatmul.mubr.bf16.vlgmr.msra.gmra.mrb[244].mxu1 %v3643_v60 }
 0x44d   : > { %16806 = vmatpush1.bf16.xpose.msra.mxu0 %v17547_v2  ;;  %16846 = vmatpush1.bf16.xpose.msra.mxu1 %v17549_v3 }
 0x44e   : > { %16837 = vmatprep.mubr.bf16.mxu0 %v3646_v4  ;;  %16877 = vmatprep.mubr.bf16.mxu1 %v3648_v8 }
 0x44f   : > { %v14679_v15 = vpop.f32.mrb[140].mxu0  ;;  %v14719_v16 = vpop.f32.mrb[140].mxu1  ;;  %16885 = vmatprep.subr.bf16.mxu0 %v17552_v11  ;;  %16925 = vmatprep.subr.bf16.mxu1 %v17554_v12 }
 0x450   : > { %v14680_v17 = vadd.f32 %v14679_v15, %v14640_v5  ;;  %v14681_v18 = vpop.f32.mrb[141].mxu0  ;;  %v14721_v19 = vpop.f32.mrb[141].mxu1 }
 0x451   : > { %v14682_v21 = vpop.f32.mrb[142].mxu0  ;;  %v14722_v22 = vpop.f32.mrb[142].mxu1 }
 0x452   : > { %v14720_v26 = vadd.f32 %v14719_v16, %v14680_v17  ;;  %v14683_v27 = vpop.f32.mrb[143].mxu0  ;;  %v14723_v28 = vpop.f32.mrb[143].mxu1 }
 0x454   : > { %16838 = vmatmul.mubr.bf16.vlgmr.msra.gmra.mrb[248].mxu0 %v3645_v24  ;;  %16878 = vmatmul.mubr.bf16.vlgmr.msra.gmra.mrb[248].mxu1 %v3647_v20 }
 0x455   : > { %16886 = vmatpush1.bf16.xpose.msra.mxu0 %v17551_v23  ;;  %16926 = vmatpush1.bf16.xpose.msra.mxu1 %v17553_v25 }
 0x456   : > { %16917 = vmatprep.mubr.bf16.mxu0 %v3650_v29  ;;  %16957 = vmatprep.mubr.bf16.mxu1 %v3652_v30 }
 0x457   : > { %v14759_v31 = vpop.f32.mrb[144].mxu0  ;;  %v14799_v32 = vpop.f32.mrb[144].mxu1 }
 0x458   : > { %v14760_v33 = vadd.f32 %v14759_v31, %v14720_v26  ;;  %v14761_v34 = vpop.f32.mrb[145].mxu0  ;;  %v14801_v35 = vpop.f32.mrb[145].mxu1 }
 0x459   : > { %v14762_v38 = vpop.f32.mrb[146].mxu0  ;;  %v14802_v39 = vpop.f32.mrb[146].mxu1 }
 0x45a   : > { %v14800_v40 = vadd.f32 %v14799_v32, %v14760_v33  ;;  %v14763_v41 = vpop.f32.mrb[147].mxu0  ;;  %v14803_v42 = vpop.f32.mrb[147].mxu1 }
 0x45c   : > { %16918 = vmatmul.mubr.bf16.vlgmr.msra.gmra.mrb[252].mxu0 %v3649_v36  ;;  %16958 = vmatmul.mubr.bf16.vlgmr.msra.gmra.mrb[252].mxu1 %v3651_v37 }
 0x45f   : > { %v14839_v43 = vpop.f32.mrb[148].mxu0  ;;  %v14879_v44 = vpop.f32.mrb[148].mxu1 }
 0x460   : > { %v14840_v45 = vadd.f32 %v14839_v43, %v14800_v40  ;;  %v14841_v46 = vpop.f32.mrb[149].mxu0  ;;  %v14881_v47 = vpop.f32.mrb[149].mxu1 }
 0x461   : > { %v14842_v48 = vpop.f32.mrb[150].mxu0  ;;  %v14882_v49 = vpop.f32.mrb[150].mxu1 }
 0x462   : > { %v14880_v50 = vadd.f32 %v14879_v44, %v14840_v45  ;;  %v14843_v51 = vpop.f32.mrb[151].mxu0  ;;  %v14883_v52 = vpop.f32.mrb[151].mxu1 }
 0x467   : > { %v14919_v53 = vpop.f32.mrb[152].mxu0  ;;  %v14959_v54 = vpop.f32.mrb[152].mxu1 }
 0x468   : > { %v14920_v55 = vadd.f32 %v14919_v53, %v14880_v50  ;;  %v14921_v56 = vpop.f32.mrb[153].mxu0  ;;  %v14961_v57 = vpop.f32.mrb[153].mxu1 }
 0x469   : > { %v14922_v58 = vpop.f32.mrb[154].mxu0  ;;  %v14962_v59 = vpop.f32.mrb[154].mxu1 }
 0x46a   : > { %v14960_v60 = vadd.f32 %v14959_v54, %v14920_v55  ;;  %v14923_v61 = vpop.f32.mrb[155].mxu0  ;;  %v14963_v62 = vpop.f32.mrb[155].mxu1 }
 0x46f   : > { %v14999_v63 = vpop.f32.mrb[156].mxu0  ;;  %v15039_v0 = vpop.f32.mrb[156].mxu1 }
 0x470   : > { %v15000_v1 = vadd.f32 %v14999_v63, %v14960_v60  ;;  %v15001_v2 = vpop.f32.mrb[157].mxu0  ;;  %v15041_v3 = vpop.f32.mrb[157].mxu1 }
 0x471   : > { %v15002_v4 = vpop.f32.mrb[158].mxu0  ;;  %v15042_v5 = vpop.f32.mrb[158].mxu1 }
 0x472   : > { %v15040_v6 = vadd.f32 %v15039_v0, %v15000_v1  ;;  %v15003_v7 = vpop.f32.mrb[159].mxu0  ;;  %v15043_v8 = vpop.f32.mrb[159].mxu1 }
 0x477   : > { %v15079_v9 = vpop.f32.mrb[160].mxu0  ;;  %v15119_v10 = vpop.f32.mrb[160].mxu1 }
 0x478   : > { %v15080_v11 = vadd.f32 %v15079_v9, %v15040_v6  ;;  %v15081_v12 = vpop.f32.mrb[161].mxu0  ;;  %v15121_v13 = vpop.f32.mrb[161].mxu1 }
 0x479   : > { %v15082_v14 = vpop.f32.mrb[162].mxu0  ;;  %v15122_v15 = vpop.f32.mrb[162].mxu1 }
 0x47a   : > { %v15120_v16 = vadd.f32 %v15119_v10, %v15080_v11  ;;  %v15083_v17 = vpop.f32.mrb[163].mxu0  ;;  %v15123_v18 = vpop.f32.mrb[163].mxu1 }
 0x47f   : > { %v15159_v19 = vpop.f32.mrb[164].mxu0  ;;  %v15199_v24 = vpop.f32.mrb[164].mxu1 }
 0x480   : > { %v15160_v20 = vadd.f32 %v15159_v19, %v15120_v16  ;;  %v15161_v21 = vpop.f32.mrb[165].mxu0  ;;  %v15201_v22 = vpop.f32.mrb[165].mxu1 }
 0x481   : > { %v15162_v23 = vpop.f32.mrb[166].mxu0  ;;  %v15202_v25 = vpop.f32.mrb[166].mxu1 }
 0x482   : > { %v15200_v26 = vadd.f32 %v15199_v24, %v15160_v20  ;;  %v15163_v27 = vpop.f32.mrb[167].mxu0  ;;  %v15203_v28 = vpop.f32.mrb[167].mxu1 }
 0x487   : > { %v15239_v29 = vpop.f32.mrb[168].mxu0  ;;  %v15279_v30 = vpop.f32.mrb[168].mxu1 }
 0x488   : > { %v15240_v31 = vadd.f32 %v15239_v29, %v15200_v26  ;;  %v15241_v32 = vpop.f32.mrb[169].mxu0  ;;  %v15281_v33 = vpop.f32.mrb[169].mxu1 }
 0x489   : > { %v15242_v34 = vpop.f32.mrb[170].mxu0  ;;  %v15282_v35 = vpop.f32.mrb[170].mxu1 }
 0x48a   : > { %v15280_v36 = vadd.f32 %v15279_v30, %v15240_v31  ;;  %v15243_v37 = vpop.f32.mrb[171].mxu0  ;;  %v15283_v38 = vpop.f32.mrb[171].mxu1 }
 0x48f   : > { %v15319_v39 = vpop.f32.mrb[172].mxu0  ;;  %v15359_v40 = vpop.f32.mrb[172].mxu1 }
 0x490   : > { %v15320_v41 = vadd.f32 %v15319_v39, %v15280_v36  ;;  %v15321_v42 = vpop.f32.mrb[173].mxu0  ;;  %v15361_v43 = vpop.f32.mrb[173].mxu1 }
 0x491   : > { %v15322_v44 = vpop.f32.mrb[174].mxu0  ;;  %v15362_v45 = vpop.f32.mrb[174].mxu1 }
 0x492   : > { %v15360_v46 = vadd.f32 %v15359_v40, %v15320_v41  ;;  %v15323_v47 = vpop.f32.mrb[175].mxu0  ;;  %v15363_v48 = vpop.f32.mrb[175].mxu1 }
 0x497   : > { %v15399_v49 = vpop.f32.mrb[176].mxu0  ;;  %v15439_v50 = vpop.f32.mrb[176].mxu1 }
 0x498   : > { %v15400_v51 = vadd.f32 %v15399_v49, %v15360_v46  ;;  %v15401_v52 = vpop.f32.mrb[177].mxu0  ;;  %v15441_v53 = vpop.f32.mrb[177].mxu1 }
 0x499   : > { %v15402_v54 = vpop.f32.mrb[178].mxu0  ;;  %v15442_v55 = vpop.f32.mrb[178].mxu1 }
 0x49a   : > { %v15440_v56 = vadd.f32 %v15439_v50, %v15400_v51  ;;  %v15403_v57 = vpop.f32.mrb[179].mxu0  ;;  %v15443_v58 = vpop.f32.mrb[179].mxu1 }
 0x49f   : > { %v15479_v59 = vpop.f32.mrb[180].mxu0  ;;  %v15519_v60 = vpop.f32.mrb[180].mxu1 }
 0x4a0   : > { %v15480_v61 = vadd.f32 %v15479_v59, %v15440_v56  ;;  %v15481_v62 = vpop.f32.mrb[181].mxu0  ;;  %v15521_v63 = vpop.f32.mrb[181].mxu1 }
 0x4a1   : > { %v15482_v0 = vpop.f32.mrb[182].mxu0  ;;  %v15522_v1 = vpop.f32.mrb[182].mxu1 }
 0x4a2   : > { %v15520_v2 = vadd.f32 %v15519_v60, %v15480_v61  ;;  %v15483_v3 = vpop.f32.mrb[183].mxu0  ;;  %v15523_v4 = vpop.f32.mrb[183].mxu1 }
 0x4a7   : > { %v15559_v5 = vpop.f32.mrb[184].mxu0  ;;  %v15599_v6 = vpop.f32.mrb[184].mxu1 }
 0x4a8   : > { %v15560_v7 = vadd.f32 %v15559_v5, %v15520_v2  ;;  %v15561_v8 = vpop.f32.mrb[185].mxu0  ;;  %v15601_v9 = vpop.f32.mrb[185].mxu1 }
 0x4a9   : > { %v15562_v10 = vpop.f32.mrb[186].mxu0  ;;  %v15602_v11 = vpop.f32.mrb[186].mxu1 }
 0x4aa   : > { %v15600_v12 = vadd.f32 %v15599_v6, %v15560_v7  ;;  %v15563_v13 = vpop.f32.mrb[187].mxu0  ;;  %v15603_v14 = vpop.f32.mrb[187].mxu1 }
 0x4af   : > { %v15639_v15 = vpop.f32.mrb[188].mxu0  ;;  %v15679_v16 = vpop.f32.mrb[188].mxu1 }
 0x4b0   : > { %v15640_v17 = vadd.f32 %v15639_v15, %v15600_v12  ;;  %v15641_v18 = vpop.f32.mrb[189].mxu0  ;;  %v15681_v19 = vpop.f32.mrb[189].mxu1 }
 0x4b1   : > { %v15642_v24 = vpop.f32.mrb[190].mxu0  ;;  %v15682_v20 = vpop.f32.mrb[190].mxu1 }
 0x4b2   : > { %v15680_v21 = vadd.f32 %v15679_v16, %v15640_v17  ;;  %v15643_v22 = vpop.f32.mrb[191].mxu0  ;;  %v15683_v23 = vpop.f32.mrb[191].mxu1 }
 0x4b7   : > { %v15719_v25 = vpop.f32.mrb[192].mxu0  ;;  %v15759_v26 = vpop.f32.mrb[192].mxu1 }
 0x4b8   : > { %v15720_v27 = vadd.f32 %v15719_v25, %v15680_v21  ;;  %v15721_v28 = vpop.f32.mrb[193].mxu0  ;;  %v15761_v29 = vpop.f32.mrb[193].mxu1 }
 0x4b9   : > { %v15722_v30 = vpop.f32.mrb[194].mxu0  ;;  %v15762_v31 = vpop.f32.mrb[194].mxu1 }
 0x4ba   : > { %v15760_v32 = vadd.f32 %v15759_v26, %v15720_v27  ;;  %v15723_v33 = vpop.f32.mrb[195].mxu0  ;;  %v15763_v34 = vpop.f32.mrb[195].mxu1 }
 0x4bf   : > { %v15799_v35 = vpop.f32.mrb[196].mxu0  ;;  %v15839_v36 = vpop.f32.mrb[196].mxu1 }
 0x4c0   : > { %v15800_v37 = vadd.f32 %v15799_v35, %v15760_v32  ;;  %v15801_v38 = vpop.f32.mrb[197].mxu0  ;;  %v15841_v39 = vpop.f32.mrb[197].mxu1 }
 0x4c1   : > { %v15802_v40 = vpop.f32.mrb[198].mxu0  ;;  %v15842_v41 = vpop.f32.mrb[198].mxu1 }
 0x4c2   : > { %v15840_v42 = vadd.f32 %v15839_v36, %v15800_v37  ;;  %v15803_v43 = vpop.f32.mrb[199].mxu0  ;;  %v15843_v44 = vpop.f32.mrb[199].mxu1 }
 0x4c7   : > { %v15879_v45 = vpop.f32.mrb[200].mxu0  ;;  %v15919_v46 = vpop.f32.mrb[200].mxu1 }
 0x4c8   : > { %v15880_v47 = vadd.f32 %v15879_v45, %v15840_v42  ;;  %v15881_v48 = vpop.f32.mrb[201].mxu0  ;;  %v15921_v49 = vpop.f32.mrb[201].mxu1 }
 0x4c9   : > { %v15882_v50 = vpop.f32.mrb[202].mxu0  ;;  %v15922_v51 = vpop.f32.mrb[202].mxu1 }
 0x4ca   : > { %v15920_v52 = vadd.f32 %v15919_v46, %v15880_v47  ;;  %v15883_v53 = vpop.f32.mrb[203].mxu0  ;;  %v15923_v54 = vpop.f32.mrb[203].mxu1 }
 0x4cf   : > { %v15959_v55 = vpop.f32.mrb[204].mxu0  ;;  %v15999_v56 = vpop.f32.mrb[204].mxu1 }
 0x4d0   : > { %v15960_v57 = vadd.f32 %v15959_v55, %v15920_v52  ;;  %v15961_v58 = vpop.f32.mrb[205].mxu0  ;;  %v16001_v59 = vpop.f32.mrb[205].mxu1 }
 0x4d1   : > { %v15962_v60 = vpop.f32.mrb[206].mxu0  ;;  %v16002_v61 = vpop.f32.mrb[206].mxu1 }
 0x4d2   : > { %v16000_v62 = vadd.f32 %v15999_v56, %v15960_v57  ;;  %v15963_v63 = vpop.f32.mrb[207].mxu0  ;;  %v16003_v0 = vpop.f32.mrb[207].mxu1 }
 0x4d7   : > { %v16039_v1 = vpop.f32.mrb[208].mxu0  ;;  %v16079_v2 = vpop.f32.mrb[208].mxu1 }
 0x4d8   : > { %v16040_v3 = vadd.f32 %v16039_v1, %v16000_v62  ;;  %v16041_v4 = vpop.f32.mrb[209].mxu0  ;;  %v16081_v5 = vpop.f32.mrb[209].mxu1 }
 0x4d9   : > { %v16042_v6 = vpop.f32.mrb[210].mxu0  ;;  %v16082_v7 = vpop.f32.mrb[210].mxu1 }
 0x4da   : > { %v16080_v8 = vadd.f32 %v16079_v2, %v16040_v3  ;;  %v16043_v9 = vpop.f32.mrb[211].mxu0  ;;  %v16083_v10 = vpop.f32.mrb[211].mxu1 }
 0x4df   : > { %v16119_v11 = vpop.f32.mrb[212].mxu0  ;;  %v16159_v12 = vpop.f32.mrb[212].mxu1 }
 0x4e0   : > { %v16120_v13 = vadd.f32 %v16119_v11, %v16080_v8  ;;  %v16121_v14 = vpop.f32.mrb[213].mxu0  ;;  %v16161_v15 = vpop.f32.mrb[213].mxu1 }
 0x4e1   : > { %v16122_v16 = vpop.f32.mrb[214].mxu0  ;;  %v16162_v17 = vpop.f32.mrb[214].mxu1 }
 0x4e2   : > { %v16160_v18 = vadd.f32 %v16159_v12, %v16120_v13  ;;  %v16123_v19 = vpop.f32.mrb[215].mxu0  ;;  %v16163_v24 = vpop.f32.mrb[215].mxu1 }
 0x4e7   : > { %v16199_v20 = vpop.f32.mrb[216].mxu0  ;;  %v16239_v21 = vpop.f32.mrb[216].mxu1 }
 0x4e8   : > { %v16200_v22 = vadd.f32 %v16199_v20, %v16160_v18  ;;  %v16201_v23 = vpop.f32.mrb[217].mxu0  ;;  %v16241_v25 = vpop.f32.mrb[217].mxu1 }
 0x4e9   : > { %v16202_v26 = vpop.f32.mrb[218].mxu0  ;;  %v16242_v27 = vpop.f32.mrb[218].mxu1 }
 0x4ea   : > { %v16240_v28 = vadd.f32 %v16239_v21, %v16200_v22  ;;  %v16203_v29 = vpop.f32.mrb[219].mxu0  ;;  %v16243_v30 = vpop.f32.mrb[219].mxu1 }
 0x4ef   : > { %v16279_v31 = vpop.f32.mrb[220].mxu0  ;;  %v16319_v32 = vpop.f32.mrb[220].mxu1 }
 0x4f0   : > { %v16280_v33 = vadd.f32 %v16279_v31, %v16240_v28  ;;  %v16281_v34 = vpop.f32.mrb[221].mxu0  ;;  %v16321_v35 = vpop.f32.mrb[221].mxu1 }
 0x4f1   : > { %v16282_v36 = vpop.f32.mrb[222].mxu0  ;;  %v16322_v37 = vpop.f32.mrb[222].mxu1 }
 0x4f2   : > { %v16320_v38 = vadd.f32 %v16319_v32, %v16280_v33  ;;  %v16283_v39 = vpop.f32.mrb[223].mxu0  ;;  %v16323_v40 = vpop.f32.mrb[223].mxu1 }
 0x4f7   : > { %v16359_v41 = vpop.f32.mrb[224].mxu0  ;;  %v16399_v42 = vpop.f32.mrb[224].mxu1 }
 0x4f8   : > { %v16360_v43 = vadd.f32 %v16359_v41, %v16320_v38  ;;  %v16361_v44 = vpop.f32.mrb[225].mxu0  ;;  %v16401_v45 = vpop.f32.mrb[225].mxu1 }
 0x4f9   : > { %v16362_v46 = vpop.f32.mrb[226].mxu0  ;;  %v16402_v47 = vpop.f32.mrb[226].mxu1 }
 0x4fa   : > { %v16400_v48 = vadd.f32 %v16399_v42, %v16360_v43  ;;  %v16363_v49 = vpop.f32.mrb[227].mxu0  ;;  %v16403_v50 = vpop.f32.mrb[227].mxu1 }
 0x4ff   : > { %v16439_v51 = vpop.f32.mrb[228].mxu0  ;;  %v16479_v52 = vpop.f32.mrb[228].mxu1 }
 0x500   : > { %v16440_v53 = vadd.f32 %v16439_v51, %v16400_v48  ;;  %v16441_v54 = vpop.f32.mrb[229].mxu0  ;;  %v16481_v55 = vpop.f32.mrb[229].mxu1 }
 0x501   : > { %v16442_v56 = vpop.f32.mrb[230].mxu0  ;;  %v16482_v57 = vpop.f32.mrb[230].mxu1 }
 0x502   : > { %v16480_v58 = vadd.f32 %v16479_v52, %v16440_v53  ;;  %v16443_v59 = vpop.f32.mrb[231].mxu0  ;;  %v16483_v60 = vpop.f32.mrb[231].mxu1  ;;  %v196_v52 = vld [vmem:[%s20121_s2] sm:$0x3] }
 0x507   : > { %v16519_v61 = vpop.f32.mrb[232].mxu0  ;;  %v16559_v62 = vpop.f32.mrb[232].mxu1 }
 0x508   : > { %v16520_v63 = vadd.f32 %v16519_v61, %v16480_v58  ;;  %v16521_v0 = vpop.f32.mrb[233].mxu0  ;;  %v16561_v1 = vpop.f32.mrb[233].mxu1 }
 0x509   : > { %v16522_v2 = vpop.f32.mrb[234].mxu0  ;;  %v16562_v3 = vpop.f32.mrb[234].mxu1 }
 0x50a   : > { %v16560_v4 = vadd.f32 %v16559_v62, %v16520_v63  ;;  %v16523_v5 = vpop.f32.mrb[235].mxu0  ;;  %v16563_v6 = vpop.f32.mrb[235].mxu1 }
 0x50f   : > { %v16599_v7 = vpop.f32.mrb[236].mxu0  ;;  %v16639_v8 = vpop.f32.mrb[236].mxu1 }
 0x510   : > { %v16600_v9 = vadd.f32 %v16599_v7, %v16560_v4  ;;  %v16601_v10 = vpop.f32.mrb[237].mxu0  ;;  %v16641_v11 = vpop.f32.mrb[237].mxu1 }
 0x511   : > { %v16602_v12 = vpop.f32.mrb[238].mxu0  ;;  %v16642_v13 = vpop.f32.mrb[238].mxu1 }
 0x512   : > { %v16640_v14 = vadd.f32 %v16639_v8, %v16600_v9  ;;  %v16603_v15 = vpop.f32.mrb[239].mxu0  ;;  %v16643_v16 = vpop.f32.mrb[239].mxu1 }
 0x517   : > { %v16679_v17 = vpop.f32.mrb[240].mxu0  ;;  %v16719_v18 = vpop.f32.mrb[240].mxu1 }
 0x518   : > { %v16680_v19 = vadd.f32 %v16679_v17, %v16640_v14  ;;  %v16681_v24 = vpop.f32.mrb[241].mxu0  ;;  %v16721_v20 = vpop.f32.mrb[241].mxu1 }
 0x519   : > { %v16682_v21 = vpop.f32.mrb[242].mxu0  ;;  %v16722_v22 = vpop.f32.mrb[242].mxu1 }
 0x51a   : > { %v16720_v23 = vadd.f32 %v16719_v18, %v16680_v19  ;;  %v16683_v25 = vpop.f32.mrb[243].mxu0  ;;  %v16723_v26 = vpop.f32.mrb[243].mxu1 }
 0x51f   : > { %v16759_v27 = vpop.f32.mrb[244].mxu0  ;;  %v16799_v28 = vpop.f32.mrb[244].mxu1 }
 0x520   : > { %v16760_v29 = vadd.f32 %v16759_v27, %v16720_v23  ;;  %v16761_v30 = vpop.f32.mrb[245].mxu0  ;;  %v16801_v31 = vpop.f32.mrb[245].mxu1 }
 0x521   : > { %v16762_v32 = vpop.f32.mrb[246].mxu0  ;;  %v16802_v33 = vpop.f32.mrb[246].mxu1 }
 0x522   : > { %v16800_v34 = vadd.f32 %v16799_v28, %v16760_v29  ;;  %v16763_v35 = vpop.f32.mrb[247].mxu0  ;;  %v16803_v36 = vpop.f32.mrb[247].mxu1 }
 0x527   : > { %v16839_v37 = vpop.f32.mrb[248].mxu0  ;;  %v16879_v38 = vpop.f32.mrb[248].mxu1 }
 0x528   : > { %v16840_v39 = vadd.f32 %v16839_v37, %v16800_v34  ;;  %v16841_v40 = vpop.f32.mrb[249].mxu0  ;;  %v16881_v41 = vpop.f32.mrb[249].mxu1 }
 0x529   : > { %v16842_v42 = vpop.f32.mrb[250].mxu0  ;;  %v16882_v43 = vpop.f32.mrb[250].mxu1 }
 0x52a   : > { %v16880_v44 = vadd.f32 %v16879_v38, %v16840_v39  ;;  %v16843_v45 = vpop.f32.mrb[251].mxu0  ;;  %v16883_v46 = vpop.f32.mrb[251].mxu1 }
 0x52f   : > { %v16919_v47 = vpop.f32.mrb[252].mxu0  ;;  %v16959_v48 = vpop.f32.mrb[252].mxu1 }
 0x530   : > { %v16920_v49 = vadd.f32 %v16919_v47, %v16880_v44  ;;  %v16921_v50 = vpop.f32.mrb[253].mxu0  ;;  %v16961_v51 = vpop.f32.mrb[253].mxu1 }
 0x531   : > { %v16922_v53 = vpop.f32.mrb[254].mxu0  ;;  %v16962_v54 = vpop.f32.mrb[254].mxu1 }
 0x532   : > { %v16960_v55 = vadd.f32 %v16959_v48, %v16920_v49  ;;  %v16923_v56 = vpop.f32.mrb[255].mxu0  ;;  %v16963_v57 = vpop.f32.mrb[255].mxu1 }
 0x534   : > { %v16965_v58 = vadd.f32 %v16960_v55, %v196_v52 }
 0x536   : > { %16967 = vst.msk [vmem:[%s20121_s2] sm:$0x3] %vm16966_vm1, %v16965_v58 }
 0x537 PF: > { %p15_p10 = scmp.ge.s32.totalorder %s17878_s14, 5   ;;  %s20127_s9 = smov %s17826_s10 }
 0x538   : > { %s20128_s10 = smov %s17830_s11  ;;  %s20129_s11 = smov %s17888_s17 }
 0x539   : > { %s20130_s12 = smov %s17878_s14  ;;  %17 = sbr.rel (!%p15_p10) target bundleno = 5 (0x5), region = 81 }
 0x540   :  { %16979 = vsyncpa [#allocation3], 1 }
 0x541   :  { %16981 = vsyncpa [#allocation3 + $0x1], 1 }
 0x542   :  { %16982 = vsyncpa [#allocation5], 1 }
 0x543   :  { %16984 = vsyncpa [#allocation5 + $0x1], 1 }

</bundles_post_ra>
